<compile_context>
chip_gen: v7x
topology: tpu7x:2x2x1
jax: 0.10.0
libtpu: 0.0.40
codegen_flags: <defaults>
</compile_context>

<pallas_src>
import functools

import jax
import jax.numpy as jnp
from jax.experimental import pallas as pl
from jax.experimental.pallas import tpu as pltpu

EPS = 1e-5
NEG_SLOPE = 0.2  # discAct() = LeakyReLU(0.2)


def _pick_tile(n, candidates):
    for c in candidates:
        if n % c == 0:
            return c
    return n


def _conv_bn_lrelu_kernel(x_ref, w_ref, o_ref, acc_ref, *, use_norm, negative_slope):
    """One (tm, tk) x (tk, Cout) partial matmul per grid step; BN+LeakyReLU epilogue."""
    k = pl.program_id(1)

    @pl.when(k == 0)
    def _():
        acc_ref[...] = jnp.zeros_like(acc_ref)

    acc_ref[...] += jnp.dot(x_ref[...], w_ref[...],
                            preferred_element_type=jnp.float32)

    @pl.when(k == pl.num_programs(1) - 1)
    def _():
        y = acc_ref[...]
        if use_norm:
            # BatchNorm2d, train-mode batch stats over all rows (N*Ho*Wo), gamma=1, beta=0.
            m_rows = jnp.float32(y.shape[0])
            mean = jnp.sum(y, axis=0, keepdims=True) / m_rows
            d = y - mean
            var = jnp.sum(d * d, axis=0, keepdims=True) / m_rows
            y = d * jax.lax.rsqrt(var + jnp.float32(EPS))
        y = jnp.where(y > 0, y, jnp.float32(negative_slope) * y)
        o_ref[...] = y.astype(o_ref.dtype)


def _extract_patches_s2(x_nhwc):
    """im2col for a 3x3 / stride-2 / zero-pad-1 conv.  Returns (N*Ho*Wo, 9*C)."""
    N, H, W, C = x_nhwc.shape
    Ho, Wo = H // 2, W // 2
    xp = jnp.pad(x_nhwc, ((0, 0), (1, 1), (1, 1), (0, 0)))
    taps = []
    for kh in range(3):
        for kw in range(3):
            taps.append(xp[:, kh:kh + 2 * Ho:2, kw:kw + 2 * Wo:2, :])
    patches = jnp.concatenate(taps, axis=-1)          # (N, Ho, Wo, 9*C), tap-major/channel-minor
    return patches.reshape(N * Ho * Wo, 9 * C), Ho, Wo


def conv3x3_s2_norm_act(x_nhwc, w_hwio, *, use_norm, out_dtype=jnp.bfloat16):
    """conv3x3(stride=2, pad=1, no bias) -> [BatchNorm] -> LeakyReLU(0.2), NHWC in/out."""
    N, H, W, Cin = x_nhwc.shape
    Cout = w_hwio.shape[-1]
    patches, Ho, Wo = _extract_patches_s2(x_nhwc.astype(jnp.bfloat16))
    M, K = patches.shape
    w_mat = w_hwio.reshape(9 * Cin, Cout).astype(jnp.bfloat16)  # (kh,kw,cin) order matches patches

    # Norm layers need global batch stats -> single M block (fits VMEM at these sizes).
    tm = M if use_norm else _pick_tile(M, (1024, 512, 256, 128, 64, 32, 16, 8))
    tk = _pick_tile(K, (384, 256, 128))
    grid = (M // tm, K // tk)

    kernel = functools.partial(_conv_bn_lrelu_kernel,
                               use_norm=use_norm, negative_slope=NEG_SLOPE)
    out = pl.pallas_call(
        kernel,
        out_shape=jax.ShapeDtypeStruct((M, Cout), out_dtype),
        grid_spec=pltpu.PrefetchScalarGridSpec(
            num_scalar_prefetch=0,
            grid=grid,
            in_specs=[pl.BlockSpec((tm, tk), lambda i, k: (i, k)),
                      pl.BlockSpec((tk, Cout), lambda i, k: (k, 0))],
            out_specs=pl.BlockSpec((tm, Cout), lambda i, k: (i, 0)),
            scratch_shapes=[pltpu.VMEM((tm, Cout), jnp.float32)]),
        compiler_params=pltpu.CompilerParams(
            dimension_semantics=("parallel", "arbitrary")),
    )(patches, w_mat)
    return out.reshape(N, Ho, Wo, Cout)


def init_params(key, input_size, num_chan, out_dim):
    """Deterministic synthetic weights matching the module's conv shapes (no bias)."""
    assert input_size in (64, 128, 256)
    if input_size == 64:
        dims = [num_chan, 128, 256, 512, out_dim]
    elif input_size == 128:
        dims = [num_chan, 64, 128, 256, 512, out_dim]
    else:
        dims = [num_chan, 32, 64, 128, 256, 512, out_dim]
    weights = []
    for cin, cout in zip(dims[:-1], dims[1:]):
        key, sub = jax.random.split(key)
        w = jax.random.normal(sub, (3, 3, cin, cout), jnp.float32) / jnp.sqrt(
            jnp.float32(9 * cin))
        weights.append(w)
    return {"weights": weights}


def image_down_forward(x_nchw, params):
    """ImageDown.forward: stack of stride-2 conv_norm blocks; NCHW in, NCHW out."""
    x = jnp.transpose(x_nchw, (0, 2, 3, 1))  # NHWC inside
    n_layers = len(params["weights"])
    for i, w in enumerate(params["weights"]):
        last = (i == n_layers - 1)
        x = conv3x3_s2_norm_act(
            x, w,
            use_norm=(i != 0),                      # first conv_norm has use_norm=False
            out_dtype=jnp.float32 if last else jnp.bfloat16)
    return jnp.transpose(x, (0, 3, 1, 2))


if __name__ == "__main__":
    key = jax.random.PRNGKey(0)
    k_x, k_p = jax.random.split(key)

    N, num_chan, input_size, out_dim = 2, 3, 64, 128
    x = jax.random.normal(k_x, (N, num_chan, input_size, input_size), jnp.float32)
    params = init_params(k_p, input_size, num_chan, out_dim)

    fwd = jax.jit(image_down_forward)
    out = fwd(x, params)
    jax.block_until_ready(out)

    assert out.shape == (N, out_dim, input_size // 16, input_size // 16), out.shape
    assert bool(jnp.all(jnp.isfinite(out)))
    print("KERNEL_OK")
</pallas_src>

<mosaic_0001>
module attributes {stable_mosaic.version = 11 : i64} {
  func.func @_conv_bn_lrelu_kernel(%arg0: i32, %arg1: i32, %arg2: memref<1024x27xbf16, #tpu.memory_space<vmem>>, %arg3: memref<27x128xbf16, #tpu.memory_space<vmem>>, %arg4: memref<1024x128xbf16, #tpu.memory_space<vmem>>, %arg5: memref<1024x128xf32, #tpu.memory_space<vmem>>) attributes {dimension_semantics = [#tpu.dimension_semantics<parallel>, #tpu.dimension_semantics<arbitrary>], iteration_bounds = array<i64: 2, 1>, scalar_prefetch = 0 : i64, scratch_operands = 1 : i64, tpu.core_type = #tpu.core_type<tc>, window_params = [{transform_indices = @transform_0, window_bounds = array<i64: 1024, 27>}, {transform_indices = @transform_1, window_bounds = array<i64: 27, 128>}, {transform_indices = @transform_2, window_bounds = array<i64: 1024, 128>}]} {
    %c0_i32 = arith.constant 0 : i32
    %0 = arith.cmpi eq, %arg1, %c0_i32 : i32
    %1 = arith.extui %0 : i1 to i32
    %c0_i32_0 = arith.constant 0 : i32
    %2 = arith.cmpi ne, %1, %c0_i32_0 : i32
    scf.if %2 {
      %cst_10 = arith.constant 0.000000e+00 : f32
      %12 = vector.broadcast %cst_10 : f32 to vector<1024x128xf32>
      %c0_11 = arith.constant 0 : index
      %c0_12 = arith.constant 0 : index
      %13 = vector.load %arg5[%c0_11, %c0_12] : memref<1024x128xf32, #tpu.memory_space<vmem>>, vector<1024x128xf32>
      tpu.vector_store %arg5[%c0_11, %c0_12], %12 {strides = array<i32>} : memref<1024x128xf32, #tpu.memory_space<vmem>>, vector<1024x128xf32>,
    } else {
    }
    %c0 = arith.constant 0 : index
    %c0_1 = arith.constant 0 : index
    %3 = vector.load %arg5[%c0, %c0_1] : memref<1024x128xf32, #tpu.memory_space<vmem>>, vector<1024x128xf32>
    %c0_2 = arith.constant 0 : index
    %c0_3 = arith.constant 0 : index
    %4 = vector.load %arg2[%c0_2, %c0_3] : memref<1024x27xbf16, #tpu.memory_space<vmem>>, vector<1024x27xbf16>
    %c0_4 = arith.constant 0 : index
    %c0_5 = arith.constant 0 : index
    %5 = vector.load %arg3[%c0_4, %c0_5] : memref<27x128xbf16, #tpu.memory_space<vmem>>, vector<27x128xbf16>
    %cst = arith.constant dense<0.000000e+00> : vector<1024x128xf32>
    %6 = tpu.matmul %4, %5, %cst {dimension_numbers = #tpu.dot_dimension_numbers<[1], [0], [0], [1], [0, 0, 1, 1], [], []>} : vector<1024x27xbf16>, vector<27x128xbf16>, vector<1024x128xf32> -> vector<1024x128xf32>
    %7 = arith.addf %3, %6 : vector<1024x128xf32>
    %c0_6 = arith.constant 0 : index
    %c0_7 = arith.constant 0 : index
    %8 = vector.load %arg5[%c0_6, %c0_7] : memref<1024x128xf32, #tpu.memory_space<vmem>>, vector<1024x128xf32>
    tpu.vector_store %arg5[%c0_6, %c0_7], %7 {strides = array<i32>} : memref<1024x128xf32, #tpu.memory_space<vmem>>, vector<1024x128xf32>,
    %c0_i32_8 = arith.constant 0 : i32
    %9 = arith.cmpi eq, %arg1, %c0_i32_8 : i32
    %10 = arith.extui %9 : i1 to i32
    %c0_i32_9 = arith.constant 0 : i32
    %11 = arith.cmpi ne, %10, %c0_i32_9 : i32
    scf.if %11 {
      %c0_10 = arith.constant 0 : index
      %c0_11 = arith.constant 0 : index
      %12 = vector.load %arg5[%c0_10, %c0_11] : memref<1024x128xf32, #tpu.memory_space<vmem>>, vector<1024x128xf32>
      %cst_12 = arith.constant 0.000000e+00 : f32
      %13 = vector.broadcast %cst_12 : f32 to vector<1024x128xf32>
      %14 = arith.cmpf ogt, %12, %13 : vector<1024x128xf32>
      %cst_13 = arith.constant 2.000000e-01 : f32
      %15 = vector.broadcast %cst_13 : f32 to vector<1024x128xf32>
      %16 = arith.mulf %15, %12 : vector<1024x128xf32>
      %17 = arith.select %14, %12, %16 : vector<1024x128xi1>, vector<1024x128xf32>
      %18 = arith.truncf %17 : vector<1024x128xf32> to vector<1024x128xbf16>
      %c0_14 = arith.constant 0 : index
      %c0_15 = arith.constant 0 : index
      %19 = vector.load %arg4[%c0_14, %c0_15] : memref<1024x128xbf16, #tpu.memory_space<vmem>>, vector<1024x128xbf16>
      tpu.vector_store %arg4[%c0_14, %c0_15], %18 {strides = array<i32>} : memref<1024x128xbf16, #tpu.memory_space<vmem>>, vector<1024x128xbf16>,
    } else {
    }
    return
  }
  func.func @transform_0(%arg0: i32, %arg1: i32) -> (i32, i32) {
    %c0_i32 = arith.constant 0 : i32
    return %arg0, %arg1 : i32, i32
  }
  func.func @transform_1(%arg0: i32, %arg1: i32) -> (i32, i32) {
    %c0_i32 = arith.constant 0 : i32
    %c0_i32_0 = arith.constant 0 : i32
    return %arg1, %c0_i32 : i32, i32
  }
  func.func @transform_2(%arg0: i32, %arg1: i32) -> (i32, i32) {
    %c0_i32 = arith.constant 0 : i32
    %c0_i32_0 = arith.constant 0 : i32
    return %arg0, %c0_i32 : i32, i32
  }
}

module attributes {stable_mosaic.version = 11 : i64} {
  func.func @_conv_bn_lrelu_kernel(%arg0: i32, %arg1: i32, %arg2: memref<512x384xbf16, #tpu.memory_space<vmem>>, %arg3: memref<384x256xbf16, #tpu.memory_space<vmem>>, %arg4: memref<512x256xbf16, #tpu.memory_space<vmem>>, %arg5: memref<512x256xf32, #tpu.memory_space<vmem>>) attributes {dimension_semantics = [#tpu.dimension_semantics<parallel>, #tpu.dimension_semantics<arbitrary>], iteration_bounds = array<i64: 1, 3>, scalar_prefetch = 0 : i64, scratch_operands = 1 : i64, tpu.core_type = #tpu.core_type<tc>, window_params = [{transform_indices = @transform_0, window_bounds = array<i64: 512, 384>}, {transform_indices = @transform_1, window_bounds = array<i64: 384, 256>}, {transform_indices = @transform_2, window_bounds = array<i64: 512, 256>}]} {
    %c0_i32 = arith.constant 0 : i32
    %0 = arith.cmpi eq, %arg1, %c0_i32 : i32
    %1 = arith.extui %0 : i1 to i32
    %c0_i32_0 = arith.constant 0 : i32
    %2 = arith.cmpi ne, %1, %c0_i32_0 : i32
    scf.if %2 {
      %cst_9 = arith.constant 0.000000e+00 : f32
      %12 = vector.broadcast %cst_9 : f32 to vector<512x256xf32>
      %c0_10 = arith.constant 0 : index
      %c0_11 = arith.constant 0 : index
      %13 = vector.load %arg5[%c0_10, %c0_11] : memref<512x256xf32, #tpu.memory_space<vmem>>, vector<512x256xf32>
      tpu.vector_store %arg5[%c0_10, %c0_11], %12 {strides = array<i32>} : memref<512x256xf32, #tpu.memory_space<vmem>>, vector<512x256xf32>,
    } else {
    }
    %c0 = arith.constant 0 : index
    %c0_1 = arith.constant 0 : index
    %3 = vector.load %arg5[%c0, %c0_1] : memref<512x256xf32, #tpu.memory_space<vmem>>, vector<512x256xf32>
    %c0_2 = arith.constant 0 : index
    %c0_3 = arith.constant 0 : index
    %4 = vector.load %arg2[%c0_2, %c0_3] : memref<512x384xbf16, #tpu.memory_space<vmem>>, vector<512x384xbf16>
    %c0_4 = arith.constant 0 : index
    %c0_5 = arith.constant 0 : index
    %5 = vector.load %arg3[%c0_4, %c0_5] : memref<384x256xbf16, #tpu.memory_space<vmem>>, vector<384x256xbf16>
    %cst = arith.constant dense<0.000000e+00> : vector<512x256xf32>
    %6 = tpu.matmul %4, %5, %cst {dimension_numbers = #tpu.dot_dimension_numbers<[1], [0], [0], [1], [0, 0, 1, 1], [], []>} : vector<512x384xbf16>, vector<384x256xbf16>, vector<512x256xf32> -> vector<512x256xf32>
    %7 = arith.addf %3, %6 : vector<512x256xf32>
    %c0_6 = arith.constant 0 : index
    %c0_7 = arith.constant 0 : index
    %8 = vector.load %arg5[%c0_6, %c0_7] : memref<512x256xf32, #tpu.memory_space<vmem>>, vector<512x256xf32>
    tpu.vector_store %arg5[%c0_6, %c0_7], %7 {strides = array<i32>} : memref<512x256xf32, #tpu.memory_space<vmem>>, vector<512x256xf32>,
    %c2_i32 = arith.constant 2 : i32
    %9 = arith.cmpi eq, %arg1, %c2_i32 : i32
    %10 = arith.extui %9 : i1 to i32
    %c0_i32_8 = arith.constant 0 : i32
    %11 = arith.cmpi ne, %10, %c0_i32_8 : i32
    scf.if %11 {
      %c0_9 = arith.constant 0 : index
      %c0_10 = arith.constant 0 : index
      %12 = vector.load %arg5[%c0_9, %c0_10] : memref<512x256xf32, #tpu.memory_space<vmem>>, vector<512x256xf32>
      %cst_11 = arith.constant dense<0.000000e+00> : vector<256xf32>
      %13 = vector.multi_reduction <add>, %12, %cst_11 [0] : vector<512x256xf32> to vector<256xf32>
      %14 = vector.shape_cast %13 : vector<256xf32> to vector<1x256xf32>
      %cst_12 = arith.constant 5.120000e+02 : f32
      %15 = vector.broadcast %cst_12 : f32 to vector<1x256xf32>
      %16 = arith.divf %14, %15 : vector<1x256xf32>
      %17 = vector.broadcast %16 : vector<1x256xf32> to vector<512x256xf32>
      %18 = arith.subf %12, %17 : vector<512x256xf32>
      %19 = arith.mulf %18, %18 : vector<512x256xf32>
      %cst_13 = arith.constant dense<0.000000e+00> : vector<256xf32>
      %20 = vector.multi_reduction <add>, %19, %cst_13 [0] : vector<512x256xf32> to vector<256xf32>
      %21 = vector.shape_cast %20 : vector<256xf32> to vector<1x256xf32>
      %cst_14 = arith.constant 5.120000e+02 : f32
      %22 = vector.broadcast %cst_14 : f32 to vector<1x256xf32>
      %23 = arith.divf %21, %22 : vector<1x256xf32>
      %cst_15 = arith.constant 9.99999974E-6 : f32
      %24 = vector.broadcast %cst_15 : f32 to vector<1x256xf32>
      %25 = arith.addf %23, %24 : vector<1x256xf32>
      %26 = math.rsqrt %25 : vector<1x256xf32>
      %27 = vector.broadcast %26 : vector<1x256xf32> to vector<512x256xf32>
      %28 = arith.mulf %18, %27 : vector<512x256xf32>
      %cst_16 = arith.constant 0.000000e+00 : f32
      %29 = vector.broadcast %cst_16 : f32 to vector<512x256xf32>
      %30 = arith.cmpf ogt, %28, %29 : vector<512x256xf32>
      %cst_17 = arith.constant 2.000000e-01 : f32
      %31 = vector.broadcast %cst_17 : f32 to vector<512x256xf32>
      %32 = arith.mulf %31, %28 : vector<512x256xf32>
      %33 = arith.select %30, %28, %32 : vector<512x256xi1>, vector<512x256xf32>
      %34 = arith.truncf %33 : vector<512x256xf32> to vector<512x256xbf16>
      %c0_18 = arith.constant 0 : index
      %c0_19 = arith.constant 0 : index
      %35 = vector.load %arg4[%c0_18, %c0_19] : memref<512x256xbf16, #tpu.memory_space<vmem>>, vector<512x256xbf16>
      tpu.vector_store %arg4[%c0_18, %c0_19], %34 {strides = array<i32>} : memref<512x256xbf16, #tpu.memory_space<vmem>>, vector<512x256xbf16>,
    } else {
    }
    return
  }
  func.func @transform_0(%arg0: i32, %arg1: i32) -> (i32, i32) {
    %c0_i32 = arith.constant 0 : i32
    return %arg0, %arg1 : i32, i32
  }
  func.func @transform_1(%arg0: i32, %arg1: i32) -> (i32, i32) {
    %c0_i32 = arith.constant 0 : i32
    %c0_i32_0 = arith.constant 0 : i32
    return %arg1, %c0_i32 : i32, i32
  }
  func.func @transform_2(%arg0: i32, %arg1: i32) -> (i32, i32) {
    %c0_i32 = arith.constant 0 : i32
    %c0_i32_0 = arith.constant 0 : i32
    return %arg0, %c0_i32 : i32, i32
  }
}

module attributes {stable_mosaic.version = 11 : i64} {
  func.func @_conv_bn_lrelu_kernel(%arg0: i32, %arg1: i32, %arg2: memref<128x384xbf16, #tpu.memory_space<vmem>>, %arg3: memref<384x512xbf16, #tpu.memory_space<vmem>>, %arg4: memref<128x512xbf16, #tpu.memory_space<vmem>>, %arg5: memref<128x512xf32, #tpu.memory_space<vmem>>) attributes {dimension_semantics = [#tpu.dimension_semantics<parallel>, #tpu.dimension_semantics<arbitrary>], iteration_bounds = array<i64: 1, 6>, scalar_prefetch = 0 : i64, scratch_operands = 1 : i64, tpu.core_type = #tpu.core_type<tc>, window_params = [{transform_indices = @transform_0, window_bounds = array<i64: 128, 384>}, {transform_indices = @transform_1, window_bounds = array<i64: 384, 512>}, {transform_indices = @transform_2, window_bounds = array<i64: 128, 512>}]} {
    %c0_i32 = arith.constant 0 : i32
    %0 = arith.cmpi eq, %arg1, %c0_i32 : i32
    %1 = arith.extui %0 : i1 to i32
    %c0_i32_0 = arith.constant 0 : i32
    %2 = arith.cmpi ne, %1, %c0_i32_0 : i32
    scf.if %2 {
      %cst_9 = arith.constant 0.000000e+00 : f32
      %12 = vector.broadcast %cst_9 : f32 to vector<128x512xf32>
      %c0_10 = arith.constant 0 : index
      %c0_11 = arith.constant 0 : index
      %13 = vector.load %arg5[%c0_10, %c0_11] : memref<128x512xf32, #tpu.memory_space<vmem>>, vector<128x512xf32>
      tpu.vector_store %arg5[%c0_10, %c0_11], %12 {strides = array<i32>} : memref<128x512xf32, #tpu.memory_space<vmem>>, vector<128x512xf32>,
    } else {
    }
    %c0 = arith.constant 0 : index
    %c0_1 = arith.constant 0 : index
    %3 = vector.load %arg5[%c0, %c0_1] : memref<128x512xf32, #tpu.memory_space<vmem>>, vector<128x512xf32>
    %c0_2 = arith.constant 0 : index
    %c0_3 = arith.constant 0 : index
    %4 = vector.load %arg2[%c0_2, %c0_3] : memref<128x384xbf16, #tpu.memory_space<vmem>>, vector<128x384xbf16>
    %c0_4 = arith.constant 0 : index
    %c0_5 = arith.constant 0 : index
    %5 = vector.load %arg3[%c0_4, %c0_5] : memref<384x512xbf16, #tpu.memory_space<vmem>>, vector<384x512xbf16>
    %cst = arith.constant dense<0.000000e+00> : vector<128x512xf32>
    %6 = tpu.matmul %4, %5, %cst {dimension_numbers = #tpu.dot_dimension_numbers<[1], [0], [0], [1], [0, 0, 1, 1], [], []>} : vector<128x384xbf16>, vector<384x512xbf16>, vector<128x512xf32> -> vector<128x512xf32>
    %7 = arith.addf %3, %6 : vector<128x512xf32>
    %c0_6 = arith.constant 0 : index
    %c0_7 = arith.constant 0 : index
    %8 = vector.load %arg5[%c0_6, %c0_7] : memref<128x512xf32, #tpu.memory_space<vmem>>, vector<128x512xf32>
    tpu.vector_store %arg5[%c0_6, %c0_7], %7 {strides = array<i32>} : memref<128x512xf32, #tpu.memory_space<vmem>>, vector<128x512xf32>,
    %c5_i32 = arith.constant 5 : i32
    %9 = arith.cmpi eq, %arg1, %c5_i32 : i32
    %10 = arith.extui %9 : i1 to i32
    %c0_i32_8 = arith.constant 0 : i32
    %11 = arith.cmpi ne, %10, %c0_i32_8 : i32
    scf.if %11 {
      %c0_9 = arith.constant 0 : index
      %c0_10 = arith.constant 0 : index
      %12 = vector.load %arg5[%c0_9, %c0_10] : memref<128x512xf32, #tpu.memory_space<vmem>>, vector<128x512xf32>
      %cst_11 = arith.constant dense<0.000000e+00> : vector<512xf32>
      %13 = vector.multi_reduction <add>, %12, %cst_11 [0] : vector<128x512xf32> to vector<512xf32>
      %14 = vector.shape_cast %13 : vector<512xf32> to vector<1x512xf32>
      %cst_12 = arith.constant 1.280000e+02 : f32
      %15 = vector.broadcast %cst_12 : f32 to vector<1x512xf32>
      %16 = arith.divf %14, %15 : vector<1x512xf32>
      %17 = vector.broadcast %16 : vector<1x512xf32> to vector<128x512xf32>
      %18 = arith.subf %12, %17 : vector<128x512xf32>
      %19 = arith.mulf %18, %18 : vector<128x512xf32>
      %cst_13 = arith.constant dense<0.000000e+00> : vector<512xf32>
      %20 = vector.multi_reduction <add>, %19, %cst_13 [0] : vector<128x512xf32> to vector<512xf32>
      %21 = vector.shape_cast %20 : vector<512xf32> to vector<1x512xf32>
      %cst_14 = arith.constant 1.280000e+02 : f32
      %22 = vector.broadcast %cst_14 : f32 to vector<1x512xf32>
      %23 = arith.divf %21, %22 : vector<1x512xf32>
      %cst_15 = arith.constant 9.99999974E-6 : f32
      %24 = vector.broadcast %cst_15 : f32 to vector<1x512xf32>
      %25 = arith.addf %23, %24 : vector<1x512xf32>
      %26 = math.rsqrt %25 : vector<1x512xf32>
      %27 = vector.broadcast %26 : vector<1x512xf32> to vector<128x512xf32>
      %28 = arith.mulf %18, %27 : vector<128x512xf32>
      %cst_16 = arith.constant 0.000000e+00 : f32
      %29 = vector.broadcast %cst_16 : f32 to vector<128x512xf32>
      %30 = arith.cmpf ogt, %28, %29 : vector<128x512xf32>
      %cst_17 = arith.constant 2.000000e-01 : f32
      %31 = vector.broadcast %cst_17 : f32 to vector<128x512xf32>
      %32 = arith.mulf %31, %28 : vector<128x512xf32>
      %33 = arith.select %30, %28, %32 : vector<128x512xi1>, vector<128x512xf32>
      %34 = arith.truncf %33 : vector<128x512xf32> to vector<128x512xbf16>
      %c0_18 = arith.constant 0 : index
      %c0_19 = arith.constant 0 : index
      %35 = vector.load %arg4[%c0_18, %c0_19] : memref<128x512xbf16, #tpu.memory_space<vmem>>, vector<128x512xbf16>
      tpu.vector_store %arg4[%c0_18, %c0_19], %34 {strides = array<i32>} : memref<128x512xbf16, #tpu.memory_space<vmem>>, vector<128x512xbf16>,
    } else {
    }
    return
  }
  func.func @transform_0(%arg0: i32, %arg1: i32) -> (i32, i32) {
    %c0_i32 = arith.constant 0 : i32
    return %arg0, %arg1 : i32, i32
  }
  func.func @transform_1(%arg0: i32, %arg1: i32) -> (i32, i32) {
    %c0_i32 = arith.constant 0 : i32
    %c0_i32_0 = arith.constant 0 : i32
    return %arg1, %c0_i32 : i32, i32
  }
  func.func @transform_2(%arg0: i32, %arg1: i32) -> (i32, i32) {
    %c0_i32 = arith.constant 0 : i32
    %c0_i32_0 = arith.constant 0 : i32
    return %arg0, %c0_i32 : i32, i32
  }
}

module attributes {stable_mosaic.version = 11 : i64} {
  func.func @_conv_bn_lrelu_kernel(%arg0: i32, %arg1: i32, %arg2: memref<32x384xbf16, #tpu.memory_space<vmem>>, %arg3: memref<384x128xbf16, #tpu.memory_space<vmem>>, %arg4: memref<32x128xf32, #tpu.memory_space<vmem>>, %arg5: memref<32x128xf32, #tpu.memory_space<vmem>>) attributes {dimension_semantics = [#tpu.dimension_semantics<parallel>, #tpu.dimension_semantics<arbitrary>], iteration_bounds = array<i64: 1, 12>, scalar_prefetch = 0 : i64, scratch_operands = 1 : i64, tpu.core_type = #tpu.core_type<tc>, window_params = [{transform_indices = @transform_0, window_bounds = array<i64: 32, 384>}, {transform_indices = @transform_1, window_bounds = array<i64: 384, 128>}, {transform_indices = @transform_2, window_bounds = array<i64: 32, 128>}]} {
    %c0_i32 = arith.constant 0 : i32
    %0 = arith.cmpi eq, %arg1, %c0_i32 : i32
    %1 = arith.extui %0 : i1 to i32
    %c0_i32_0 = arith.constant 0 : i32
    %2 = arith.cmpi ne, %1, %c0_i32_0 : i32
    scf.if %2 {
      %cst_9 = arith.constant 0.000000e+00 : f32
      %12 = vector.broadcast %cst_9 : f32 to vector<32x128xf32>
      %c0_10 = arith.constant 0 : index
      %c0_11 = arith.constant 0 : index
      %13 = vector.load %arg5[%c0_10, %c0_11] : memref<32x128xf32, #tpu.memory_space<vmem>>, vector<32x128xf32>
      tpu.vector_store %arg5[%c0_10, %c0_11], %12 {strides = array<i32>} : memref<32x128xf32, #tpu.memory_space<vmem>>, vector<32x128xf32>,
    } else {
    }
    %c0 = arith.constant 0 : index
    %c0_1 = arith.constant 0 : index
    %3 = vector.load %arg5[%c0, %c0_1] : memref<32x128xf32, #tpu.memory_space<vmem>>, vector<32x128xf32>
    %c0_2 = arith.constant 0 : index
    %c0_3 = arith.constant 0 : index
    %4 = vector.load %arg2[%c0_2, %c0_3] : memref<32x384xbf16, #tpu.memory_space<vmem>>, vector<32x384xbf16>
    %c0_4 = arith.constant 0 : index
    %c0_5 = arith.constant 0 : index
    %5 = vector.load %arg3[%c0_4, %c0_5] : memref<384x128xbf16, #tpu.memory_space<vmem>>, vector<384x128xbf16>
    %cst = arith.constant dense<0.000000e+00> : vector<32x128xf32>
    %6 = tpu.matmul %4, %5, %cst {dimension_numbers = #tpu.dot_dimension_numbers<[1], [0], [0], [1], [0, 0, 1, 1], [], []>} : vector<32x384xbf16>, vector<384x128xbf16>, vector<32x128xf32> -> vector<32x128xf32>
    %7 = arith.addf %3, %6 : vector<32x128xf32>
    %c0_6 = arith.constant 0 : index
    %c0_7 = arith.constant 0 : index
    %8 = vector.load %arg5[%c0_6, %c0_7] : memref<32x128xf32, #tpu.memory_space<vmem>>, vector<32x128xf32>
    tpu.vector_store %arg5[%c0_6, %c0_7], %7 {strides = array<i32>} : memref<32x128xf32, #tpu.memory_space<vmem>>, vector<32x128xf32>,
    %c11_i32 = arith.constant 11 : i32
    %9 = arith.cmpi eq, %arg1, %c11_i32 : i32
    %10 = arith.extui %9 : i1 to i32
    %c0_i32_8 = arith.constant 0 : i32
    %11 = arith.cmpi ne, %10, %c0_i32_8 : i32
    scf.if %11 {
      %c0_9 = arith.constant 0 : index
      %c0_10 = arith.constant 0 : index
      %12 = vector.load %arg5[%c0_9, %c0_10] : memref<32x128xf32, #tpu.memory_space<vmem>>, vector<32x128xf32>
      %cst_11 = arith.constant dense<0.000000e+00> : vector<128xf32>
      %13 = vector.multi_reduction <add>, %12, %cst_11 [0] : vector<32x128xf32> to vector<128xf32>
      %14 = vector.shape_cast %13 : vector<128xf32> to vector<1x128xf32>
      %cst_12 = arith.constant 3.200000e+01 : f32
      %15 = vector.broadcast %cst_12 : f32 to vector<1x128xf32>
      %16 = arith.divf %14, %15 : vector<1x128xf32>
      %17 = vector.broadcast %16 : vector<1x128xf32> to vector<32x128xf32>
      %18 = arith.subf %12, %17 : vector<32x128xf32>
      %19 = arith.mulf %18, %18 : vector<32x128xf32>
      %cst_13 = arith.constant dense<0.000000e+00> : vector<128xf32>
      %20 = vector.multi_reduction <add>, %19, %cst_13 [0] : vector<32x128xf32> to vector<128xf32>
      %21 = vector.shape_cast %20 : vector<128xf32> to vector<1x128xf32>
      %cst_14 = arith.constant 3.200000e+01 : f32
      %22 = vector.broadcast %cst_14 : f32 to vector<1x128xf32>
      %23 = arith.divf %21, %22 : vector<1x128xf32>
      %cst_15 = arith.constant 9.99999974E-6 : f32
      %24 = vector.broadcast %cst_15 : f32 to vector<1x128xf32>
      %25 = arith.addf %23, %24 : vector<1x128xf32>
      %26 = math.rsqrt %25 : vector<1x128xf32>
      %27 = vector.broadcast %26 : vector<1x128xf32> to vector<32x128xf32>
      %28 = arith.mulf %18, %27 : vector<32x128xf32>
      %cst_16 = arith.constant 0.000000e+00 : f32
      %29 = vector.broadcast %cst_16 : f32 to vector<32x128xf32>
      %30 = arith.cmpf ogt, %28, %29 : vector<32x128xf32>
      %cst_17 = arith.constant 2.000000e-01 : f32
      %31 = vector.broadcast %cst_17 : f32 to vector<32x128xf32>
      %32 = arith.mulf %31, %28 : vector<32x128xf32>
      %33 = arith.select %30, %28, %32 : vector<32x128xi1>, vector<32x128xf32>
      %c0_18 = arith.constant 0 : index
      %c0_19 = arith.constant 0 : index
      %34 = vector.load %arg4[%c0_18, %c0_19] : memref<32x128xf32, #tpu.memory_space<vmem>>, vector<32x128xf32>
      tpu.vector_store %arg4[%c0_18, %c0_19], %33 {strides = array<i32>} : memref<32x128xf32, #tpu.memory_space<vmem>>, vector<32x128xf32>,
    } else {
    }
    return
  }
  func.func @transform_0(%arg0: i32, %arg1: i32) -> (i32, i32) {
    %c0_i32 = arith.constant 0 : i32
    return %arg0, %arg1 : i32, i32
  }
  func.func @transform_1(%arg0: i32, %arg1: i32) -> (i32, i32) {
    %c0_i32 = arith.constant 0 : i32
    %c0_i32_0 = arith.constant 0 : i32
    return %arg1, %c0_i32 : i32, i32
  }
  func.func @transform_2(%arg0: i32, %arg1: i32) -> (i32, i32) {
    %c0_i32 = arith.constant 0 : i32
    %c0_i32_0 = arith.constant 0 : i32
    return %arg0, %c0_i32 : i32, i32
  }
}

</mosaic_0001>

<bundles_post_ra>
// kernel: image_down_forward.4
= control target key start
LH: loop header
LB: loop body
LE: loop exit
PB: predicated region body
PF: predicated region fallthrough
CT: control target
= control target key end

     0   :  { %s4269_s9 = smov 0   ;;  %s4271_s10 = smov 0   ;;  %s4543_s0 = inlined_call_operand.vmem [shape: bf16[2048,27], index: 0, kind: input, shape index: {}]   ;;  %s4544_s1 = inlined_call_operand.vmem [shape: bf16[27,128], index: 1, kind: input, shape index: {}]   ;;  %s4545_s2 = inlined_call_operand.vmem [shape: bf16[2048,128], index: 2, kind: output, shape index: {}]  }
   0x1   :  { %s4273_s11 = smov 0  }
   0x2 LB: > { %s24_s12 = sadd.s32 1, %s4247_s10  ;;  %p3160_p0 = scmp.ge.s32.totalorder %s4251_s11, 1  ;;  %s4251_s11 = sphi %s4273_s11, %s12_s11   ;;  %s4247_s10 = sphi %s4271_s10, %s4547_s10   ;;  %s4243_s9 = sphi %s4269_s9, %s4546_s9  }
   0x3   : > { %p26_p1 = scmp.ge.s32.totalorder %s24_s12, 2  ;;  %p141_p2 = scmp.lt.s32.totalorder %s4251_s11, 3 }
   0x5   : > { %s4549_s12 = smov (%p26_p1, %s24_s12), 0  ;;  %p142_p3 = pnand %p3160_p0, %p141_p2 }
   0x6   : > { %v4163_v0 = vld [vmem:[%s4544_s1] sm:$0xff] (!%p142_p3)   ;;  %vm1109_vm0 = vcmask (!%p142_p3), 1044480   ;;  %v4164_v1 = vld [vmem:[%s4544_s1 + $0x8] sm:$0x3f] (!%p142_p3)   ;;  %vm1110_vm1 = vcmask (!%p142_p3), 1045504   ;;  %s3161_s17 = sshll.u32 (!%p142_p3), %s4243_s9, 7 }
   0x7   : > { %145 = sbr.rel (%p142_p3) target bundleno = 362 (0x16a), region = 28  ;;  %4002 = vmatprep.subr.bf16.mxu0 (!%p142_p3), %v4163_v0  ;;  %4134 = vmatprep.subr.bf16.mxu1 (!%p142_p3), %v4163_v0  ;;  %v4253_v2 = vmov (!%p142_p3), 65535   ;;  %p172_p4 = scmp.lt.s32.totalorder (!%p142_p3), %s3161_s17, 255  ;;  %vm916_vm2 = vcmask (!%p142_p3), 220160  }
   0x8   : > { %4003 = vmatpush3.bf16.msra.mxu0 (!%p142_p3), %v4163_v0  ;;  %4136 = vmatpush3.bf16.msra.mxu1 (!%p142_p3), %v4163_v0  ;;  %v1111_v3 = vsel (!%p142_p3), %vm1109_vm0, 4294967295, %v4253_v2 }
   0x9   : > { %v1112_v4 = vsel (!%p142_p3), %vm1110_vm1, %v1111_v3, 0 }
   0xa   : > { %v1114_v5 = vand.u32 (!%p142_p3), %v4164_v1, %v1112_v4 }
   0xc   : > { %4004 = vmatprep.subr.bf16.mxu0 (!%p142_p3), %v1114_v5  ;;  %4135 = vmatprep.subr.bf16.mxu1 (!%p142_p3), %v1114_v5 }
   0xd   : > { %4005 = vmatpush3.bf16.msra.mxu0 (!%p142_p3), %v1114_v5  ;;  %4137 = vmatpush3.bf16.msra.mxu1 (!%p142_p3), %v1114_v5 }
   0xe   : > { %s4551_s17 = smov (!%p172_p4, %s3161_s17), 255 }
   0xf   : > { %s3162_s18 = sshll.u32 %s4551_s17, 2 }
  0x10   : > { %s4301_s21 = scalar_lea.vmem %s4543_s0, %s3162_s18  ;;  %s4436_s24 = scalar_lea.vmem %s4545_s2, %s3162_s18 }
  0x11   : > { %v4165_v6 = vld [vmem:[%s4301_s21] sm:$0xff]   ;;  %v4167_v8 = vld [vmem:[%s4301_s21 + $0x8] sm:$0xff]   ;;  %v4169_v10 = vld [vmem:[%s4301_s21 + $0x10] sm:$0xff]  }
  0x12   : > { %v4166_v7 = vld [vmem:[%s4301_s21 + $0x100] sm:$0xff]   ;;  %4006 = vmatprep.mubr.msk.bf16.mxu0 %vm916_vm2, %v4165_v6  ;;  %v4168_v9 = vld [vmem:[%s4301_s21 + $0x108] sm:$0xff]   ;;  %v4170_v11 = vld [vmem:[%s4301_s21 + $0x110] sm:$0xff]  }
  0x13   : > { %4070 = vmatprep.mubr.msk.bf16.mxu1 %vm916_vm2, %v4166_v7  ;;  %4007 = vmatmul.mubr.msk.bf16.vlgmr.msra.gmra.mrb[0].mxu0 %vm916_vm2, %v4167_v8  ;;  %v4171_v12 = vld [vmem:[%s4301_s21 + $0x18] sm:$0xff]   ;;  %v4173_v14 = vld [vmem:[%s4301_s21 + $0x20] sm:$0xff]   ;;  %v4175_v16 = vld [vmem:[%s4301_s21 + $0x28] sm:$0xff]  }
  0x14   : > { %4071 = vmatmul.mubr.msk.bf16.vlgmr.msra.gmra.mrb[0].mxu1 %vm916_vm2, %v4168_v9  ;;  %4010 = vmatprep.mubr.msk.bf16.mxu0 %vm916_vm2, %v4169_v10  ;;  %v4172_v13 = vld [vmem:[%s4301_s21 + $0x118] sm:$0xff]   ;;  %v4174_v15 = vld [vmem:[%s4301_s21 + $0x120] sm:$0xff]   ;;  %v4176_v17 = vld [vmem:[%s4301_s21 + $0x128] sm:$0xff]  }
  0x15   : > { %4074 = vmatprep.mubr.msk.bf16.mxu1 %vm916_vm2, %v4170_v11  ;;  %v4177_v18 = vld [vmem:[%s4301_s21 + $0x30] sm:$0xff]   ;;  %v4179_v20 = vld [vmem:[%s4301_s21 + $0x38] sm:$0xff]   ;;  %v4181_v22 = vld [vmem:[%s4301_s21 + $0x40] sm:$0xff]  }
  0x16   : > { %v4178_v19 = vld [vmem:[%s4301_s21 + $0x130] sm:$0xff]   ;;  %v4180_v21 = vld [vmem:[%s4301_s21 + $0x138] sm:$0xff]   ;;  %v4182_v23 = vld [vmem:[%s4301_s21 + $0x140] sm:$0xff]  }
  0x17   : > { %v4183_v24 = vld [vmem:[%s4301_s21 + $0x48] sm:$0xff]   ;;  %v4185_v26 = vld [vmem:[%s4301_s21 + $0x50] sm:$0xff]   ;;  %v4187_v28 = vld [vmem:[%s4301_s21 + $0x58] sm:$0xff]  }
  0x18   : > { %v4184_v25 = vld [vmem:[%s4301_s21 + $0x148] sm:$0xff]   ;;  %v4186_v27 = vld [vmem:[%s4301_s21 + $0x150] sm:$0xff]   ;;  %v4188_v29 = vld [vmem:[%s4301_s21 + $0x158] sm:$0xff]  }
  0x19   : > { %v4189_v30 = vld [vmem:[%s4301_s21 + $0x60] sm:$0xff]   ;;  %v4191_v32 = vld [vmem:[%s4301_s21 + $0x68] sm:$0xff]   ;;  %v4193_v34 = vld [vmem:[%s4301_s21 + $0x70] sm:$0xff]  }
  0x1a   : > { %v4190_v31 = vld [vmem:[%s4301_s21 + $0x160] sm:$0xff]   ;;  %v4192_v33 = vld [vmem:[%s4301_s21 + $0x168] sm:$0xff]   ;;  %v4194_v35 = vld [vmem:[%s4301_s21 + $0x170] sm:$0xff]  }
  0x1b   : > { %4011 = vmatmul.mubr.msk.bf16.gmra.mrb[4].mxu0 %vm916_vm2, %v4171_v12  ;;  %v4195_v36 = vld [vmem:[%s4301_s21 + $0x78] sm:$0xff]   ;;  %v4197_v38 = vld [vmem:[%s4301_s21 + $0x80] sm:$0xff]   ;;  %v4199_v40 = vld [vmem:[%s4301_s21 + $0x88] sm:$0xff]  }
  0x1c   : > { %4075 = vmatmul.mubr.msk.bf16.gmra.mrb[4].mxu1 %vm916_vm2, %v4172_v13  ;;  %4014 = vmatprep.mubr.msk.bf16.mxu0 %vm916_vm2, %v4173_v14  ;;  %v4196_v37 = vld [vmem:[%s4301_s21 + $0x178] sm:$0xff]   ;;  %v4198_v39 = vld [vmem:[%s4301_s21 + $0x180] sm:$0xff]   ;;  %v4200_v41 = vld [vmem:[%s4301_s21 + $0x188] sm:$0xff]  }
  0x1d   : > { %4078 = vmatprep.mubr.msk.bf16.mxu1 %vm916_vm2, %v4174_v15  ;;  %v4201_v42 = vld [vmem:[%s4301_s21 + $0x90] sm:$0xff]   ;;  %v4203_v44 = vld [vmem:[%s4301_s21 + $0x98] sm:$0xff]   ;;  %v4205_v46 = vld [vmem:[%s4301_s21 + $0xa0] sm:$0xff]  }
  0x1e   : > { %v4202_v43 = vld [vmem:[%s4301_s21 + $0x190] sm:$0xff]   ;;  %v4204_v45 = vld [vmem:[%s4301_s21 + $0x198] sm:$0xff]   ;;  %v4206_v47 = vld [vmem:[%s4301_s21 + $0x1a0] sm:$0xff]  }
  0x1f   : > { %v4207_v48 = vld [vmem:[%s4301_s21 + $0xa8] sm:$0xff]   ;;  %v4209_v50 = vld [vmem:[%s4301_s21 + $0xb0] sm:$0xff]   ;;  %v4211_v52 = vld [vmem:[%s4301_s21 + $0xb8] sm:$0xff]  }
  0x20   : > { %v4208_v49 = vld [vmem:[%s4301_s21 + $0x1a8] sm:$0xff]   ;;  %v4210_v51 = vld [vmem:[%s4301_s21 + $0x1b0] sm:$0xff]   ;;  %v4212_v53 = vld [vmem:[%s4301_s21 + $0x1b8] sm:$0xff]  }
  0x21   : > { %v4213_v54 = vld [vmem:[%s4301_s21 + $0xc0] sm:$0xff]   ;;  %v4215_v56 = vld [vmem:[%s4301_s21 + $0xc8] sm:$0xff]   ;;  %v4217_v58 = vld [vmem:[%s4301_s21 + $0xd0] sm:$0xff]  }
  0x22   : > { %v4214_v55 = vld [vmem:[%s4301_s21 + $0x1c0] sm:$0xff]   ;;  %v4216_v57 = vld [vmem:[%s4301_s21 + $0x1c8] sm:$0xff]   ;;  %v4218_v59 = vld [vmem:[%s4301_s21 + $0x1d0] sm:$0xff]  }
  0x23   : > { %4015 = vmatmul.mubr.msk.bf16.gmra.mrb[8].mxu0 %vm916_vm2, %v4175_v16  ;;  %v4219_v60 = vld [vmem:[%s4301_s21 + $0xd8] sm:$0xff]   ;;  %v4221_v62 = vld [vmem:[%s4301_s21 + $0xe0] sm:$0xff]   ;;  %v4223_v0 = vld [vmem:[%s4301_s21 + $0xe8] sm:$0xff]  }
  0x24   : > { %4079 = vmatmul.mubr.msk.bf16.gmra.mrb[8].mxu1 %vm916_vm2, %v4176_v17  ;;  %4018 = vmatprep.mubr.msk.bf16.mxu0 %vm916_vm2, %v4177_v18  ;;  %v4220_v61 = vld [vmem:[%s4301_s21 + $0x1d8] sm:$0xff]   ;;  %v4222_v63 = vld [vmem:[%s4301_s21 + $0x1e0] sm:$0xff]   ;;  %v4224_v1 = vld [vmem:[%s4301_s21 + $0x1e8] sm:$0xff]  }
  0x25   : > { %4082 = vmatprep.mubr.msk.bf16.mxu1 %vm916_vm2, %v4178_v19  ;;  %v4225_v2 = vld [vmem:[%s4301_s21 + $0xf0] sm:$0xff]   ;;  %v4227_v4 = vld [vmem:[%s4301_s21 + $0xf8] sm:$0xff]  }
  0x26   : > { %v4226_v3 = vld [vmem:[%s4301_s21 + $0x1f0] sm:$0xff]   ;;  %v4228_v5 = vld [vmem:[%s4301_s21 + $0x1f8] sm:$0xff]  }
  0x2b   : > { %4019 = vmatmul.mubr.msk.bf16.gmra.mrb[12].mxu0 %vm916_vm2, %v4179_v20 }
  0x2c   : > { %4083 = vmatmul.mubr.msk.bf16.gmra.mrb[12].mxu1 %vm916_vm2, %v4180_v21  ;;  %4022 = vmatprep.mubr.msk.bf16.mxu0 %vm916_vm2, %v4181_v22 }
  0x2d   : > { %4086 = vmatprep.mubr.msk.bf16.mxu1 %vm916_vm2, %v4182_v23 }
  0x33   : > { %4023 = vmatmul.mubr.msk.bf16.gmra.mrb[16].mxu0 %vm916_vm2, %v4183_v24 }
  0x34   : > { %4087 = vmatmul.mubr.msk.bf16.gmra.mrb[16].mxu1 %vm916_vm2, %v4184_v25  ;;  %4026 = vmatprep.mubr.msk.bf16.mxu0 %vm916_vm2, %v4185_v26 }
  0x35   : > { %4090 = vmatprep.mubr.msk.bf16.mxu1 %vm916_vm2, %v4186_v27 }
  0x3b   : > { %4027 = vmatmul.mubr.msk.bf16.gmra.mrb[20].mxu0 %vm916_vm2, %v4187_v28 }
  0x3c   : > { %4091 = vmatmul.mubr.msk.bf16.gmra.mrb[20].mxu1 %vm916_vm2, %v4188_v29  ;;  %4030 = vmatprep.mubr.msk.bf16.mxu0 %vm916_vm2, %v4189_v30 }
  0x3d   : > { %4094 = vmatprep.mubr.msk.bf16.mxu1 %vm916_vm2, %v4190_v31 }
  0x43   : > { %4031 = vmatmul.mubr.msk.bf16.gmra.mrb[24].mxu0 %vm916_vm2, %v4191_v32 }
  0x44   : > { %4095 = vmatmul.mubr.msk.bf16.gmra.mrb[24].mxu1 %vm916_vm2, %v4192_v33  ;;  %4034 = vmatprep.mubr.msk.bf16.mxu0 %vm916_vm2, %v4193_v34 }
  0x45   : > { %4098 = vmatprep.mubr.msk.bf16.mxu1 %vm916_vm2, %v4194_v35 }
  0x4b   : > { %4035 = vmatmul.mubr.msk.bf16.gmra.mrb[28].mxu0 %vm916_vm2, %v4195_v36 }
  0x4c   : > { %4099 = vmatmul.mubr.msk.bf16.gmra.mrb[28].mxu1 %vm916_vm2, %v4196_v37  ;;  %4038 = vmatprep.mubr.msk.bf16.mxu0 %vm916_vm2, %v4197_v38 }
  0x4d   : > { %4102 = vmatprep.mubr.msk.bf16.mxu1 %vm916_vm2, %v4198_v39 }
  0x53   : > { %4039 = vmatmul.mubr.msk.bf16.gmra.mrb[32].mxu0 %vm916_vm2, %v4199_v40 }
  0x54   : > { %4103 = vmatmul.mubr.msk.bf16.gmra.mrb[32].mxu1 %vm916_vm2, %v4200_v41  ;;  %4042 = vmatprep.mubr.msk.bf16.mxu0 %vm916_vm2, %v4201_v42 }
  0x55   : > { %4106 = vmatprep.mubr.msk.bf16.mxu1 %vm916_vm2, %v4202_v43 }
  0x5b   : > { %4043 = vmatmul.mubr.msk.bf16.gmra.mrb[36].mxu0 %vm916_vm2, %v4203_v44 }
  0x5c   : > { %4107 = vmatmul.mubr.msk.bf16.gmra.mrb[36].mxu1 %vm916_vm2, %v4204_v45  ;;  %4046 = vmatprep.mubr.msk.bf16.mxu0 %vm916_vm2, %v4205_v46 }
  0x5d   : > { %4110 = vmatprep.mubr.msk.bf16.mxu1 %vm916_vm2, %v4206_v47 }
  0x63   : > { %4047 = vmatmul.mubr.msk.bf16.gmra.mrb[40].mxu0 %vm916_vm2, %v4207_v48 }
  0x64   : > { %4111 = vmatmul.mubr.msk.bf16.gmra.mrb[40].mxu1 %vm916_vm2, %v4208_v49  ;;  %4050 = vmatprep.mubr.msk.bf16.mxu0 %vm916_vm2, %v4209_v50 }
  0x65   : > { %4114 = vmatprep.mubr.msk.bf16.mxu1 %vm916_vm2, %v4210_v51 }
  0x6b   : > { %4051 = vmatmul.mubr.msk.bf16.gmra.mrb[44].mxu0 %vm916_vm2, %v4211_v52 }
  0x6c   : > { %4115 = vmatmul.mubr.msk.bf16.gmra.mrb[44].mxu1 %vm916_vm2, %v4212_v53  ;;  %4054 = vmatprep.mubr.msk.bf16.mxu0 %vm916_vm2, %v4213_v54 }
  0x6d   : > { %4118 = vmatprep.mubr.msk.bf16.mxu1 %vm916_vm2, %v4214_v55 }
  0x73   : > { %4055 = vmatmul.mubr.msk.bf16.gmra.mrb[48].mxu0 %vm916_vm2, %v4215_v56 }
  0x74   : > { %4119 = vmatmul.mubr.msk.bf16.gmra.mrb[48].mxu1 %vm916_vm2, %v4216_v57  ;;  %4058 = vmatprep.mubr.msk.bf16.mxu0 %vm916_vm2, %v4217_v58 }
  0x75   : > { %4122 = vmatprep.mubr.msk.bf16.mxu1 %vm916_vm2, %v4218_v59 }
  0x7b   : > { %4059 = vmatmul.mubr.msk.bf16.gmra.mrb[52].mxu0 %vm916_vm2, %v4219_v60 }
  0x7c   : > { %4123 = vmatmul.mubr.msk.bf16.gmra.mrb[52].mxu1 %vm916_vm2, %v4220_v61  ;;  %4062 = vmatprep.mubr.msk.bf16.mxu0 %vm916_vm2, %v4221_v62 }
  0x7d   : > { %4126 = vmatprep.mubr.msk.bf16.mxu1 %vm916_vm2, %v4222_v63 }
  0x83   : > { %4063 = vmatmul.mubr.msk.bf16.gmra.mrb[56].mxu0 %vm916_vm2, %v4223_v0 }
  0x84   : > { %4127 = vmatmul.mubr.msk.bf16.gmra.mrb[56].mxu1 %vm916_vm2, %v4224_v1  ;;  %4066 = vmatprep.mubr.msk.bf16.mxu0 %vm916_vm2, %v4225_v2 }
  0x85   : > { %4130 = vmatprep.mubr.msk.bf16.mxu1 %vm916_vm2, %v4226_v3 }
  0x8b   : > { %4067 = vmatmul.mubr.msk.bf16.gmra.mrb[60].mxu0 %vm916_vm2, %v4227_v4 }
  0x8c   : > { %4131 = vmatmul.mubr.msk.bf16.gmra.mrb[60].mxu1 %vm916_vm2, %v4228_v5 }
  0xe6   : > { %v4008_v6 = vpop.f32.mrb[0].mxu0 }
  0xe7   : > { %vm2050_vm3 = vcmp.gt.f32.partialorder %v4008_v6, 0.0  ;;  %v2178_v7 = vmul.f32 0.2, %v4008_v6  ;;  %v4072_v8 = vpop.f32.mrb[0].mxu1  ;;  %v1150_v9 = vpop.f32.mrb[1].mxu0 }
  0xe8   : > { %v2242_v10 = vmul.f32 0.2, %v4072_v8  ;;  %vm2114_vm4 = vcmp.gt.f32.partialorder %v4072_v8, 0.0  ;;  %vm2048_vm5 = vcmp.gt.f32.partialorder %v1150_v9, 0.0  ;;  %v1406_v11 = vpop.f32.mrb[1].mxu1  ;;  %v4009_v12 = vpop.f32.mrb[2].mxu0 }
  0xe9   : > { %v2306_v13 = vsel %vm2050_vm3, %v4008_v6, %v2178_v7  ;;  %v2176_v14 = vmul.f32 0.2, %v1150_v9  ;;  %v2240_v15 = vmul.f32 0.2, %v1406_v11  ;;  %v4073_v16 = vpop.f32.mrb[2].mxu1  ;;  %v1153_v17 = vpop.f32.mrb[3].mxu0 }
  0xea   : > { %vm2051_vm6 = vcmp.gt.f32.partialorder %v4009_v12, 0.0  ;;  %v2179_v18 = vmul.f32 0.2, %v4009_v12  ;;  %vm2115_vm7 = vcmp.gt.f32.partialorder %v4073_v16, 0.0  ;;  %v2243_v19 = vmul.f32 0.2, %v4073_v16 }
  0xeb   : > { %v2370_v20 = vsel %vm2114_vm4, %v4072_v8, %v2242_v10  ;;  %vm2112_vm8 = vcmp.gt.f32.partialorder %v1406_v11, 0.0  ;;  %vm2049_vm9 = vcmp.gt.f32.partialorder %v1153_v17, 0.0  ;;  %v2177_v21 = vmul.f32 0.2, %v1153_v17  ;;  %v1409_v22 = vpop.f32.mrb[3].mxu1 }
  0xec   : > { %v2307_v23 = vsel %vm2051_vm6, %v4009_v12, %v2179_v18  ;;  %v2371_v24 = vsel %vm2115_vm7, %v4073_v16, %v2243_v19  ;;  %vm2113_vm10 = vcmp.gt.f32.partialorder %v1409_v22, 0.0  ;;  %v2241_v25 = vmul.f32 0.2, %v1409_v22 }
  0xed   : > { %v2304_v26 = vsel %vm2048_vm5, %v1150_v9, %v2176_v14  ;;  %v3561_v27 = vpack.c.bf16 %v2307_v23, %v2306_v13  ;;  %v3721_v28 = vpack.c.bf16 %v2371_v24, %v2370_v20  ;;  %v2305_v29 = vsel %vm2049_vm9, %v1153_v17, %v2177_v21 }
  0xee   : > { %v4012_v30 = vpop.f32.mrb[4].mxu0  ;;  %v2368_v31 = vsel %vm2112_vm8, %v1406_v11, %v2240_v15  ;;  %v3556_v32 = vpack.c.bf16 %v2305_v29, %v2304_v26  ;;  %v2369_v33 = vsel %vm2113_vm10, %v1409_v22, %v2241_v25 }
  0xef   : > { %v2182_v34 = vmul.f32 0.2, %v4012_v30  ;;  %v4076_v35 = vpop.f32.mrb[4].mxu1  ;;  %v1166_v36 = vpop.f32.mrb[5].mxu0  ;;  %3873 = vst [vmem:[%s4436_s24 + $0x8] sm:$0xff] %v3561_v27   ;;  %3905 = vst [vmem:[%s4436_s24 + $0x108] sm:$0xff] %v3721_v28   ;;  %v3716_v37 = vpack.c.bf16 %v2369_v33, %v2368_v31 }
  0xf0   : > { %vm2054_vm11 = vcmp.gt.f32.partialorder %v4012_v30, 0.0  ;;  %vm2118_vm12 = vcmp.gt.f32.partialorder %v4076_v35, 0.0  ;;  %v2246_v38 = vmul.f32 0.2, %v4076_v35  ;;  %v1422_v39 = vpop.f32.mrb[5].mxu1  ;;  %v4013_v40 = vpop.f32.mrb[6].mxu0  ;;  %3557 = vst [vmem:[%s4436_s24] sm:$0xff] %v3556_v32  }
  0xf1   : > { %vm2052_vm13 = vcmp.gt.f32.partialorder %v1166_v36, 0.0  ;;  %v2180_v41 = vmul.f32 0.2, %v1166_v36  ;;  %v2244_v42 = vmul.f32 0.2, %v1422_v39  ;;  %v4077_v43 = vpop.f32.mrb[6].mxu1  ;;  %v2310_v47 = vsel %vm2054_vm11, %v4012_v30, %v2182_v34 }
  0xf2   : > { %3904 = vst [vmem:[%s4436_s24 + $0x100] sm:$0xff] %v3716_v37   ;;  %vm2055_vm14 = vcmp.gt.f32.partialorder %v4013_v40, 0.0  ;;  %v2183_v44 = vmul.f32 0.2, %v4013_v40  ;;  %vm2119_vm15 = vcmp.gt.f32.partialorder %v4077_v43, 0.0  ;;  %v1169_v45 = vpop.f32.mrb[7].mxu0  ;;  %v2374_v52 = vsel %vm2118_vm12, %v4076_v35, %v2246_v38 }
  0xf3   : > { %v1425_v46 = vpop.f32.mrb[7].mxu1  ;;  %vm2116_vm0 = vcmp.gt.f32.partialorder %v1422_v39, 0.0  ;;  %v2247_v48 = vmul.f32 0.2, %v4077_v43  ;;  %vm2053_vm1 = vcmp.gt.f32.partialorder %v1169_v45, 0.0  ;;  %v2308_v53 = vsel %vm2052_vm13, %v1166_v36, %v2180_v41 }
  0xf4   : > { %v2311_v49 = vsel %vm2055_vm14, %v4013_v40, %v2183_v44  ;;  %v2181_v50 = vmul.f32 0.2, %v1169_v45  ;;  %vm2117_vm2 = vcmp.gt.f32.partialorder %v1425_v46, 0.0  ;;  %v2245_v51 = vmul.f32 0.2, %v1425_v46 }
  0xf5   : > { %v3571_v54 = vpack.c.bf16 %v2311_v49, %v2310_v47  ;;  %v2375_v55 = vsel %vm2119_vm15, %v4077_v43, %v2247_v48  ;;  %v2372_v56 = vsel %vm2116_vm0, %v1422_v39, %v2244_v42 }
  0xf6   : > { %v3731_v57 = vpack.c.bf16 %v2375_v55, %v2374_v52  ;;  %v2309_v58 = vsel %vm2053_vm1, %v1169_v45, %v2181_v50  ;;  %v2373_v59 = vsel %vm2117_vm2, %v1425_v46, %v2245_v51  ;;  %v4016_v60 = vpop.f32.mrb[8].mxu0 }
  0xf7   : > { %3875 = vst [vmem:[%s4436_s24 + $0x18] sm:$0xff] %v3571_v54   ;;  %v3566_v61 = vpack.c.bf16 %v2309_v58, %v2308_v53  ;;  %v3726_v62 = vpack.c.bf16 %v2373_v59, %v2372_v56  ;;  %vm2058_vm3 = vcmp.gt.f32.partialorder %v4016_v60, 0.0  ;;  %v2186_v63 = vmul.f32 0.2, %v4016_v60  ;;  %v4080_v0 = vpop.f32.mrb[8].mxu1  ;;  %v1182_v1 = vpop.f32.mrb[9].mxu0 }
  0xf8   : > { %3907 = vst [vmem:[%s4436_s24 + $0x118] sm:$0xff] %v3731_v57   ;;  %v2250_v2 = vmul.f32 0.2, %v4080_v0  ;;  %vm2122_vm4 = vcmp.gt.f32.partialorder %v4080_v0, 0.0  ;;  %vm2056_vm5 = vcmp.gt.f32.partialorder %v1182_v1, 0.0  ;;  %v1438_v3 = vpop.f32.mrb[9].mxu1 }
  0xf9   : > { %3874 = vst [vmem:[%s4436_s24 + $0x10] sm:$0xff] %v3566_v61   ;;  %3906 = vst [vmem:[%s4436_s24 + $0x110] sm:$0xff] %v3726_v62   ;;  %v4017_v4 = vpop.f32.mrb[10].mxu0  ;;  %v2314_v5 = vsel %vm2058_vm3, %v4016_v60, %v2186_v63  ;;  %v2184_v6 = vmul.f32 0.2, %v1182_v1  ;;  %v4081_v8 = vpop.f32.mrb[10].mxu1 }
  0xfa   : > { %v2248_v7 = vmul.f32 0.2, %v1438_v3  ;;  %v1185_v9 = vpop.f32.mrb[11].mxu0  ;;  %vm2059_vm6 = vcmp.gt.f32.partialorder %v4017_v4, 0.0  ;;  %v2187_v10 = vmul.f32 0.2, %v4017_v4  ;;  %v2378_v12 = vsel %vm2122_vm4, %v4080_v0, %v2250_v2 }
  0xfb   : > { %vm2123_vm7 = vcmp.gt.f32.partialorder %v4081_v8, 0.0  ;;  %v2251_v11 = vmul.f32 0.2, %v4081_v8  ;;  %vm2120_vm8 = vcmp.gt.f32.partialorder %v1438_v3, 0.0  ;;  %vm2057_vm9 = vcmp.gt.f32.partialorder %v1185_v9, 0.0  ;;  %v1441_v14 = vpop.f32.mrb[11].mxu1 }
  0xfc   : > { %v2185_v13 = vmul.f32 0.2, %v1185_v9  ;;  %v2315_v15 = vsel %vm2059_vm6, %v4017_v4, %v2187_v10  ;;  %vm2121_vm10 = vcmp.gt.f32.partialorder %v1441_v14, 0.0  ;;  %v2249_v17 = vmul.f32 0.2, %v1441_v14 }
  0xfd   : > { %v2379_v16 = vsel %vm2123_vm7, %v4081_v8, %v2251_v11  ;;  %v2312_v18 = vsel %vm2056_vm5, %v1182_v1, %v2184_v6  ;;  %v3581_v19 = vpack.c.bf16 %v2315_v15, %v2314_v5  ;;  %v2376_v23 = vsel %vm2120_vm8, %v1438_v3, %v2248_v7 }
  0xfe   : > { %v3741_v20 = vpack.c.bf16 %v2379_v16, %v2378_v12  ;;  %v2313_v21 = vsel %vm2057_vm9, %v1185_v9, %v2185_v13  ;;  %v4020_v22 = vpop.f32.mrb[12].mxu0  ;;  %v2377_v25 = vsel %vm2121_vm10, %v1441_v14, %v2249_v17 }
  0xff   : > { %v3576_v24 = vpack.c.bf16 %v2313_v21, %v2312_v18  ;;  %v2190_v26 = vmul.f32 0.2, %v4020_v22  ;;  %v4084_v27 = vpop.f32.mrb[12].mxu1  ;;  %v1198_v28 = vpop.f32.mrb[13].mxu0  ;;  %3877 = vst [vmem:[%s4436_s24 + $0x28] sm:$0xff] %v3581_v19   ;;  %v3736_v29 = vpack.c.bf16 %v2377_v25, %v2376_v23  ;;  %vm2062_vm11 = vcmp.gt.f32.partialorder %v4020_v22, 0.0 }
 0x100   : > { %3909 = vst [vmem:[%s4436_s24 + $0x128] sm:$0xff] %v3741_v20   ;;  %vm2126_vm12 = vcmp.gt.f32.partialorder %v4084_v27, 0.0  ;;  %v2254_v30 = vmul.f32 0.2, %v4084_v27  ;;  %v1454_v31 = vpop.f32.mrb[13].mxu1  ;;  %v4021_v32 = vpop.f32.mrb[14].mxu0 }
 0x101   : > { %3876 = vst [vmem:[%s4436_s24 + $0x20] sm:$0xff] %v3576_v24   ;;  %vm2060_vm13 = vcmp.gt.f32.partialorder %v1198_v28, 0.0  ;;  %v2188_v33 = vmul.f32 0.2, %v1198_v28  ;;  %v2252_v34 = vmul.f32 0.2, %v1454_v31  ;;  %v2318_v39 = vsel %vm2062_vm11, %v4020_v22, %v2190_v26 }
 0x102   : > { %v4085_v35 = vpop.f32.mrb[14].mxu1  ;;  %3908 = vst [vmem:[%s4436_s24 + $0x120] sm:$0xff] %v3736_v29   ;;  %vm2063_vm14 = vcmp.gt.f32.partialorder %v4021_v32, 0.0  ;;  %v2191_v36 = vmul.f32 0.2, %v4021_v32  ;;  %v1201_v37 = vpop.f32.mrb[15].mxu0  ;;  %v2382_v44 = vsel %vm2126_vm12, %v4084_v27, %v2254_v30 }
 0x103   : > { %vm2127_vm15 = vcmp.gt.f32.partialorder %v4085_v35, 0.0  ;;  %v1457_v38 = vpop.f32.mrb[15].mxu1  ;;  %vm2124_vm0 = vcmp.gt.f32.partialorder %v1454_v31, 0.0  ;;  %v2255_v40 = vmul.f32 0.2, %v4085_v35  ;;  %vm2061_vm1 = vcmp.gt.f32.partialorder %v1201_v37, 0.0 }
 0x104   : > { %v2319_v41 = vsel %vm2063_vm14, %v4021_v32, %v2191_v36  ;;  %v2189_v42 = vmul.f32 0.2, %v1201_v37  ;;  %vm2125_vm2 = vcmp.gt.f32.partialorder %v1457_v38, 0.0  ;;  %v2253_v43 = vmul.f32 0.2, %v1457_v38 }
 0x105   : > { %v2316_v45 = vsel %vm2060_vm13, %v1198_v28, %v2188_v33  ;;  %v3591_v46 = vpack.c.bf16 %v2319_v41, %v2318_v39  ;;  %v2383_v47 = vsel %vm2127_vm15, %v4085_v35, %v2255_v40  ;;  %v2380_v48 = vsel %vm2124_vm0, %v1454_v31, %v2252_v34 }
 0x106   : > { %v3751_v49 = vpack.c.bf16 %v2383_v47, %v2382_v44  ;;  %v2317_v50 = vsel %vm2061_vm1, %v1201_v37, %v2189_v42  ;;  %v2381_v51 = vsel %vm2125_vm2, %v1457_v38, %v2253_v43  ;;  %v4024_v52 = vpop.f32.mrb[16].mxu0 }
 0x107   : > { %3879 = vst [vmem:[%s4436_s24 + $0x38] sm:$0xff] %v3591_v46   ;;  %v3586_v53 = vpack.c.bf16 %v2317_v50, %v2316_v45  ;;  %v3746_v54 = vpack.c.bf16 %v2381_v51, %v2380_v48  ;;  %vm2066_vm3 = vcmp.gt.f32.partialorder %v4024_v52, 0.0  ;;  %v2194_v55 = vmul.f32 0.2, %v4024_v52  ;;  %v4088_v56 = vpop.f32.mrb[16].mxu1  ;;  %v1214_v57 = vpop.f32.mrb[17].mxu0 }
 0x108   : > { %3911 = vst [vmem:[%s4436_s24 + $0x138] sm:$0xff] %v3751_v49   ;;  %v2258_v58 = vmul.f32 0.2, %v4088_v56  ;;  %vm2130_vm4 = vcmp.gt.f32.partialorder %v4088_v56, 0.0  ;;  %vm2064_vm5 = vcmp.gt.f32.partialorder %v1214_v57, 0.0  ;;  %v1470_v59 = vpop.f32.mrb[17].mxu1 }
 0x109   : > { %3878 = vst [vmem:[%s4436_s24 + $0x30] sm:$0xff] %v3586_v53   ;;  %3910 = vst [vmem:[%s4436_s24 + $0x130] sm:$0xff] %v3746_v54   ;;  %v4025_v60 = vpop.f32.mrb[18].mxu0  ;;  %v2322_v61 = vsel %vm2066_vm3, %v4024_v52, %v2194_v55  ;;  %v2192_v62 = vmul.f32 0.2, %v1214_v57  ;;  %v4089_v0 = vpop.f32.mrb[18].mxu1 }
 0x10a   : > { %v2256_v63 = vmul.f32 0.2, %v1470_v59  ;;  %v1217_v1 = vpop.f32.mrb[19].mxu0  ;;  %vm2067_vm6 = vcmp.gt.f32.partialorder %v4025_v60, 0.0  ;;  %v2195_v2 = vmul.f32 0.2, %v4025_v60  ;;  %v2386_v4 = vsel %vm2130_vm4, %v4088_v56, %v2258_v58 }
 0x10b   : > { %vm2131_vm7 = vcmp.gt.f32.partialorder %v4089_v0, 0.0  ;;  %v2259_v3 = vmul.f32 0.2, %v4089_v0  ;;  %vm2128_vm8 = vcmp.gt.f32.partialorder %v1470_v59, 0.0  ;;  %vm2065_vm9 = vcmp.gt.f32.partialorder %v1217_v1, 0.0  ;;  %v1473_v6 = vpop.f32.mrb[19].mxu1 }
 0x10c   : > { %v2193_v5 = vmul.f32 0.2, %v1217_v1  ;;  %v2323_v7 = vsel %vm2067_vm6, %v4025_v60, %v2195_v2  ;;  %vm2129_vm10 = vcmp.gt.f32.partialorder %v1473_v6, 0.0  ;;  %v2257_v9 = vmul.f32 0.2, %v1473_v6 }
 0x10d   : > { %v2387_v8 = vsel %vm2131_vm7, %v4089_v0, %v2259_v3  ;;  %v2320_v10 = vsel %vm2064_vm5, %v1214_v57, %v2192_v62  ;;  %v3601_v11 = vpack.c.bf16 %v2323_v7, %v2322_v61  ;;  %v2384_v15 = vsel %vm2128_vm8, %v1470_v59, %v2256_v63 }
 0x10e   : > { %v3761_v12 = vpack.c.bf16 %v2387_v8, %v2386_v4  ;;  %v2321_v13 = vsel %vm2065_vm9, %v1217_v1, %v2193_v5  ;;  %v4028_v14 = vpop.f32.mrb[20].mxu0  ;;  %v2385_v17 = vsel %vm2129_vm10, %v1473_v6, %v2257_v9 }
 0x10f   : > { %v3596_v16 = vpack.c.bf16 %v2321_v13, %v2320_v10  ;;  %v2198_v18 = vmul.f32 0.2, %v4028_v14  ;;  %v4092_v19 = vpop.f32.mrb[20].mxu1  ;;  %v1230_v20 = vpop.f32.mrb[21].mxu0  ;;  %3881 = vst [vmem:[%s4436_s24 + $0x48] sm:$0xff] %v3601_v11   ;;  %v3756_v21 = vpack.c.bf16 %v2385_v17, %v2384_v15  ;;  %vm2070_vm11 = vcmp.gt.f32.partialorder %v4028_v14, 0.0 }
 0x110   : > { %3913 = vst [vmem:[%s4436_s24 + $0x148] sm:$0xff] %v3761_v12   ;;  %vm2134_vm12 = vcmp.gt.f32.partialorder %v4092_v19, 0.0  ;;  %v2262_v22 = vmul.f32 0.2, %v4092_v19  ;;  %v1486_v23 = vpop.f32.mrb[21].mxu1  ;;  %v4029_v24 = vpop.f32.mrb[22].mxu0 }
 0x111   : > { %3880 = vst [vmem:[%s4436_s24 + $0x40] sm:$0xff] %v3596_v16   ;;  %vm2068_vm13 = vcmp.gt.f32.partialorder %v1230_v20, 0.0  ;;  %v2196_v25 = vmul.f32 0.2, %v1230_v20  ;;  %v2260_v26 = vmul.f32 0.2, %v1486_v23  ;;  %v2326_v31 = vsel %vm2070_vm11, %v4028_v14, %v2198_v18 }
 0x112   : > { %v4093_v27 = vpop.f32.mrb[22].mxu1  ;;  %3912 = vst [vmem:[%s4436_s24 + $0x140] sm:$0xff] %v3756_v21   ;;  %vm2071_vm14 = vcmp.gt.f32.partialorder %v4029_v24, 0.0  ;;  %v2199_v28 = vmul.f32 0.2, %v4029_v24  ;;  %v1233_v29 = vpop.f32.mrb[23].mxu0  ;;  %v2390_v36 = vsel %vm2134_vm12, %v4092_v19, %v2262_v22 }
 0x113   : > { %vm2135_vm15 = vcmp.gt.f32.partialorder %v4093_v27, 0.0  ;;  %v1489_v30 = vpop.f32.mrb[23].mxu1  ;;  %vm2132_vm0 = vcmp.gt.f32.partialorder %v1486_v23, 0.0  ;;  %v2263_v32 = vmul.f32 0.2, %v4093_v27  ;;  %vm2069_vm1 = vcmp.gt.f32.partialorder %v1233_v29, 0.0 }
 0x114   : > { %v2327_v33 = vsel %vm2071_vm14, %v4029_v24, %v2199_v28  ;;  %v2197_v34 = vmul.f32 0.2, %v1233_v29  ;;  %vm2133_vm2 = vcmp.gt.f32.partialorder %v1489_v30, 0.0  ;;  %v2261_v35 = vmul.f32 0.2, %v1489_v30 }
 0x115   : > { %v2324_v37 = vsel %vm2068_vm13, %v1230_v20, %v2196_v25  ;;  %v3611_v38 = vpack.c.bf16 %v2327_v33, %v2326_v31  ;;  %v2391_v39 = vsel %vm2135_vm15, %v4093_v27, %v2263_v32  ;;  %v2388_v40 = vsel %vm2132_vm0, %v1486_v23, %v2260_v26 }
 0x116   : > { %v3771_v41 = vpack.c.bf16 %v2391_v39, %v2390_v36  ;;  %v2325_v42 = vsel %vm2069_vm1, %v1233_v29, %v2197_v34  ;;  %v2389_v43 = vsel %vm2133_vm2, %v1489_v30, %v2261_v35  ;;  %v4032_v44 = vpop.f32.mrb[24].mxu0 }
 0x117   : > { %3883 = vst [vmem:[%s4436_s24 + $0x58] sm:$0xff] %v3611_v38   ;;  %v3606_v45 = vpack.c.bf16 %v2325_v42, %v2324_v37  ;;  %v3766_v46 = vpack.c.bf16 %v2389_v43, %v2388_v40  ;;  %vm2074_vm3 = vcmp.gt.f32.partialorder %v4032_v44, 0.0  ;;  %v2202_v47 = vmul.f32 0.2, %v4032_v44  ;;  %v4096_v48 = vpop.f32.mrb[24].mxu1  ;;  %v1246_v49 = vpop.f32.mrb[25].mxu0 }
 0x118   : > { %3915 = vst [vmem:[%s4436_s24 + $0x158] sm:$0xff] %v3771_v41   ;;  %v2266_v50 = vmul.f32 0.2, %v4096_v48  ;;  %vm2138_vm4 = vcmp.gt.f32.partialorder %v4096_v48, 0.0  ;;  %vm2072_vm5 = vcmp.gt.f32.partialorder %v1246_v49, 0.0  ;;  %v1502_v51 = vpop.f32.mrb[25].mxu1 }
 0x119   : > { %3882 = vst [vmem:[%s4436_s24 + $0x50] sm:$0xff] %v3606_v45   ;;  %3914 = vst [vmem:[%s4436_s24 + $0x150] sm:$0xff] %v3766_v46   ;;  %v4033_v52 = vpop.f32.mrb[26].mxu0  ;;  %v2330_v53 = vsel %vm2074_vm3, %v4032_v44, %v2202_v47  ;;  %v2200_v54 = vmul.f32 0.2, %v1246_v49  ;;  %v4097_v56 = vpop.f32.mrb[26].mxu1 }
 0x11a   : > { %v2264_v55 = vmul.f32 0.2, %v1502_v51  ;;  %v1249_v57 = vpop.f32.mrb[27].mxu0  ;;  %vm2075_vm6 = vcmp.gt.f32.partialorder %v4033_v52, 0.0  ;;  %v2203_v58 = vmul.f32 0.2, %v4033_v52  ;;  %v2394_v60 = vsel %vm2138_vm4, %v4096_v48, %v2266_v50 }
 0x11b   : > { %vm2139_vm7 = vcmp.gt.f32.partialorder %v4097_v56, 0.0  ;;  %v2267_v59 = vmul.f32 0.2, %v4097_v56  ;;  %vm2136_vm8 = vcmp.gt.f32.partialorder %v1502_v51, 0.0  ;;  %vm2073_vm9 = vcmp.gt.f32.partialorder %v1249_v57, 0.0  ;;  %v1505_v62 = vpop.f32.mrb[27].mxu1 }
 0x11c   : > { %v2201_v61 = vmul.f32 0.2, %v1249_v57  ;;  %v2331_v63 = vsel %vm2075_vm6, %v4033_v52, %v2203_v58  ;;  %vm2137_vm10 = vcmp.gt.f32.partialorder %v1505_v62, 0.0  ;;  %v2265_v1 = vmul.f32 0.2, %v1505_v62 }
 0x11d   : > { %v2395_v0 = vsel %vm2139_vm7, %v4097_v56, %v2267_v59  ;;  %v2328_v2 = vsel %vm2072_vm5, %v1246_v49, %v2200_v54  ;;  %v3621_v3 = vpack.c.bf16 %v2331_v63, %v2330_v53  ;;  %v2392_v7 = vsel %vm2136_vm8, %v1502_v51, %v2264_v55 }
 0x11e   : > { %v3781_v4 = vpack.c.bf16 %v2395_v0, %v2394_v60  ;;  %v2329_v5 = vsel %vm2073_vm9, %v1249_v57, %v2201_v61  ;;  %v4036_v6 = vpop.f32.mrb[28].mxu0  ;;  %v2393_v9 = vsel %vm2137_vm10, %v1505_v62, %v2265_v1 }
 0x11f   : > { %v3616_v8 = vpack.c.bf16 %v2329_v5, %v2328_v2  ;;  %v2206_v10 = vmul.f32 0.2, %v4036_v6  ;;  %v4100_v11 = vpop.f32.mrb[28].mxu1  ;;  %v1262_v12 = vpop.f32.mrb[29].mxu0  ;;  %3885 = vst [vmem:[%s4436_s24 + $0x68] sm:$0xff] %v3621_v3   ;;  %v3776_v13 = vpack.c.bf16 %v2393_v9, %v2392_v7  ;;  %vm2078_vm11 = vcmp.gt.f32.partialorder %v4036_v6, 0.0 }
 0x120   : > { %3917 = vst [vmem:[%s4436_s24 + $0x168] sm:$0xff] %v3781_v4   ;;  %vm2142_vm12 = vcmp.gt.f32.partialorder %v4100_v11, 0.0  ;;  %v2270_v14 = vmul.f32 0.2, %v4100_v11  ;;  %v1518_v15 = vpop.f32.mrb[29].mxu1  ;;  %v4037_v16 = vpop.f32.mrb[30].mxu0 }
 0x121   : > { %3884 = vst [vmem:[%s4436_s24 + $0x60] sm:$0xff] %v3616_v8   ;;  %vm2076_vm13 = vcmp.gt.f32.partialorder %v1262_v12, 0.0  ;;  %v2204_v17 = vmul.f32 0.2, %v1262_v12  ;;  %v2268_v18 = vmul.f32 0.2, %v1518_v15  ;;  %v2334_v23 = vsel %vm2078_vm11, %v4036_v6, %v2206_v10 }
 0x122   : > { %v4101_v19 = vpop.f32.mrb[30].mxu1  ;;  %3916 = vst [vmem:[%s4436_s24 + $0x160] sm:$0xff] %v3776_v13   ;;  %vm2079_vm14 = vcmp.gt.f32.partialorder %v4037_v16, 0.0  ;;  %v2207_v20 = vmul.f32 0.2, %v4037_v16  ;;  %v1265_v21 = vpop.f32.mrb[31].mxu0  ;;  %v2398_v28 = vsel %vm2142_vm12, %v4100_v11, %v2270_v14 }
 0x123   : > { %vm2143_vm15 = vcmp.gt.f32.partialorder %v4101_v19, 0.0  ;;  %v1521_v22 = vpop.f32.mrb[31].mxu1  ;;  %vm2140_vm0 = vcmp.gt.f32.partialorder %v1518_v15, 0.0  ;;  %v2271_v24 = vmul.f32 0.2, %v4101_v19  ;;  %vm2077_vm1 = vcmp.gt.f32.partialorder %v1265_v21, 0.0 }
 0x124   : > { %v2335_v25 = vsel %vm2079_vm14, %v4037_v16, %v2207_v20  ;;  %v2205_v26 = vmul.f32 0.2, %v1265_v21  ;;  %vm2141_vm2 = vcmp.gt.f32.partialorder %v1521_v22, 0.0  ;;  %v2269_v27 = vmul.f32 0.2, %v1521_v22 }
 0x125   : > { %v2332_v29 = vsel %vm2076_vm13, %v1262_v12, %v2204_v17  ;;  %v3631_v30 = vpack.c.bf16 %v2335_v25, %v2334_v23  ;;  %v2399_v31 = vsel %vm2143_vm15, %v4101_v19, %v2271_v24  ;;  %v2396_v32 = vsel %vm2140_vm0, %v1518_v15, %v2268_v18 }
 0x126   : > { %v3791_v33 = vpack.c.bf16 %v2399_v31, %v2398_v28  ;;  %v2333_v34 = vsel %vm2077_vm1, %v1265_v21, %v2205_v26  ;;  %v2397_v35 = vsel %vm2141_vm2, %v1521_v22, %v2269_v27  ;;  %v4040_v36 = vpop.f32.mrb[32].mxu0 }
 0x127   : > { %3887 = vst [vmem:[%s4436_s24 + $0x78] sm:$0xff] %v3631_v30   ;;  %v3626_v37 = vpack.c.bf16 %v2333_v34, %v2332_v29  ;;  %v3786_v38 = vpack.c.bf16 %v2397_v35, %v2396_v32  ;;  %vm2082_vm3 = vcmp.gt.f32.partialorder %v4040_v36, 0.0  ;;  %v2210_v39 = vmul.f32 0.2, %v4040_v36  ;;  %v4104_v40 = vpop.f32.mrb[32].mxu1  ;;  %v1278_v41 = vpop.f32.mrb[33].mxu0 }
 0x128   : > { %3919 = vst [vmem:[%s4436_s24 + $0x178] sm:$0xff] %v3791_v33   ;;  %v2274_v42 = vmul.f32 0.2, %v4104_v40  ;;  %vm2146_vm4 = vcmp.gt.f32.partialorder %v4104_v40, 0.0  ;;  %vm2080_vm5 = vcmp.gt.f32.partialorder %v1278_v41, 0.0  ;;  %v1534_v43 = vpop.f32.mrb[33].mxu1 }
 0x129   : > { %3886 = vst [vmem:[%s4436_s24 + $0x70] sm:$0xff] %v3626_v37   ;;  %3918 = vst [vmem:[%s4436_s24 + $0x170] sm:$0xff] %v3786_v38   ;;  %v4041_v44 = vpop.f32.mrb[34].mxu0  ;;  %v2338_v45 = vsel %vm2082_vm3, %v4040_v36, %v2210_v39  ;;  %v2208_v46 = vmul.f32 0.2, %v1278_v41  ;;  %v4105_v48 = vpop.f32.mrb[34].mxu1 }
 0x12a   : > { %v2272_v47 = vmul.f32 0.2, %v1534_v43  ;;  %v1281_v49 = vpop.f32.mrb[35].mxu0  ;;  %vm2083_vm6 = vcmp.gt.f32.partialorder %v4041_v44, 0.0  ;;  %v2211_v50 = vmul.f32 0.2, %v4041_v44  ;;  %v2402_v52 = vsel %vm2146_vm4, %v4104_v40, %v2274_v42 }
 0x12b   : > { %vm2147_vm7 = vcmp.gt.f32.partialorder %v4105_v48, 0.0  ;;  %v2275_v51 = vmul.f32 0.2, %v4105_v48  ;;  %vm2144_vm8 = vcmp.gt.f32.partialorder %v1534_v43, 0.0  ;;  %vm2081_vm9 = vcmp.gt.f32.partialorder %v1281_v49, 0.0  ;;  %v1537_v54 = vpop.f32.mrb[35].mxu1 }
 0x12c   : > { %v2209_v53 = vmul.f32 0.2, %v1281_v49  ;;  %v2339_v55 = vsel %vm2083_vm6, %v4041_v44, %v2211_v50  ;;  %vm2145_vm10 = vcmp.gt.f32.partialorder %v1537_v54, 0.0  ;;  %v2273_v57 = vmul.f32 0.2, %v1537_v54 }
 0x12d   : > { %v2403_v56 = vsel %vm2147_vm7, %v4105_v48, %v2275_v51  ;;  %v2336_v58 = vsel %vm2080_vm5, %v1278_v41, %v2208_v46  ;;  %v3641_v59 = vpack.c.bf16 %v2339_v55, %v2338_v45  ;;  %v2400_v63 = vsel %vm2144_vm8, %v1534_v43, %v2272_v47 }
 0x12e   : > { %v3801_v60 = vpack.c.bf16 %v2403_v56, %v2402_v52  ;;  %v2337_v61 = vsel %vm2081_vm9, %v1281_v49, %v2209_v53  ;;  %v4044_v62 = vpop.f32.mrb[36].mxu0  ;;  %v2401_v1 = vsel %vm2145_vm10, %v1537_v54, %v2273_v57 }
 0x12f   : > { %v3636_v0 = vpack.c.bf16 %v2337_v61, %v2336_v58  ;;  %v2214_v2 = vmul.f32 0.2, %v4044_v62  ;;  %v4108_v3 = vpop.f32.mrb[36].mxu1  ;;  %v1294_v4 = vpop.f32.mrb[37].mxu0  ;;  %3889 = vst [vmem:[%s4436_s24 + $0x88] sm:$0xff] %v3641_v59   ;;  %v3796_v5 = vpack.c.bf16 %v2401_v1, %v2400_v63  ;;  %vm2086_vm11 = vcmp.gt.f32.partialorder %v4044_v62, 0.0 }
 0x130   : > { %3921 = vst [vmem:[%s4436_s24 + $0x188] sm:$0xff] %v3801_v60   ;;  %vm2150_vm12 = vcmp.gt.f32.partialorder %v4108_v3, 0.0  ;;  %v2278_v6 = vmul.f32 0.2, %v4108_v3  ;;  %v1550_v7 = vpop.f32.mrb[37].mxu1  ;;  %v4045_v8 = vpop.f32.mrb[38].mxu0 }
 0x131   : > { %3888 = vst [vmem:[%s4436_s24 + $0x80] sm:$0xff] %v3636_v0   ;;  %vm2084_vm13 = vcmp.gt.f32.partialorder %v1294_v4, 0.0  ;;  %v2212_v9 = vmul.f32 0.2, %v1294_v4  ;;  %v2276_v10 = vmul.f32 0.2, %v1550_v7  ;;  %v2342_v15 = vsel %vm2086_vm11, %v4044_v62, %v2214_v2 }
 0x132   : > { %v4109_v11 = vpop.f32.mrb[38].mxu1  ;;  %3920 = vst [vmem:[%s4436_s24 + $0x180] sm:$0xff] %v3796_v5   ;;  %vm2087_vm14 = vcmp.gt.f32.partialorder %v4045_v8, 0.0  ;;  %v2215_v12 = vmul.f32 0.2, %v4045_v8  ;;  %v1297_v13 = vpop.f32.mrb[39].mxu0  ;;  %v2406_v20 = vsel %vm2150_vm12, %v4108_v3, %v2278_v6 }
 0x133   : > { %vm2151_vm15 = vcmp.gt.f32.partialorder %v4109_v11, 0.0  ;;  %v1553_v14 = vpop.f32.mrb[39].mxu1  ;;  %vm2148_vm0 = vcmp.gt.f32.partialorder %v1550_v7, 0.0  ;;  %v2279_v16 = vmul.f32 0.2, %v4109_v11  ;;  %vm2085_vm1 = vcmp.gt.f32.partialorder %v1297_v13, 0.0 }
 0x134   : > { %v2343_v17 = vsel %vm2087_vm14, %v4045_v8, %v2215_v12  ;;  %v2213_v18 = vmul.f32 0.2, %v1297_v13  ;;  %vm2149_vm2 = vcmp.gt.f32.partialorder %v1553_v14, 0.0  ;;  %v2277_v19 = vmul.f32 0.2, %v1553_v14 }
 0x135   : > { %v2340_v21 = vsel %vm2084_vm13, %v1294_v4, %v2212_v9  ;;  %v3651_v22 = vpack.c.bf16 %v2343_v17, %v2342_v15  ;;  %v2407_v23 = vsel %vm2151_vm15, %v4109_v11, %v2279_v16  ;;  %v2404_v24 = vsel %vm2148_vm0, %v1550_v7, %v2276_v10 }
 0x136   : > { %v3811_v25 = vpack.c.bf16 %v2407_v23, %v2406_v20  ;;  %v2341_v26 = vsel %vm2085_vm1, %v1297_v13, %v2213_v18  ;;  %v2405_v27 = vsel %vm2149_vm2, %v1553_v14, %v2277_v19  ;;  %v4048_v28 = vpop.f32.mrb[40].mxu0 }
 0x137   : > { %3891 = vst [vmem:[%s4436_s24 + $0x98] sm:$0xff] %v3651_v22   ;;  %v3646_v29 = vpack.c.bf16 %v2341_v26, %v2340_v21  ;;  %v3806_v30 = vpack.c.bf16 %v2405_v27, %v2404_v24  ;;  %vm2090_vm3 = vcmp.gt.f32.partialorder %v4048_v28, 0.0  ;;  %v2218_v31 = vmul.f32 0.2, %v4048_v28  ;;  %v4112_v32 = vpop.f32.mrb[40].mxu1  ;;  %v1310_v33 = vpop.f32.mrb[41].mxu0 }
 0x138   : > { %3923 = vst [vmem:[%s4436_s24 + $0x198] sm:$0xff] %v3811_v25   ;;  %v2282_v34 = vmul.f32 0.2, %v4112_v32  ;;  %vm2154_vm4 = vcmp.gt.f32.partialorder %v4112_v32, 0.0  ;;  %vm2088_vm5 = vcmp.gt.f32.partialorder %v1310_v33, 0.0  ;;  %v1566_v35 = vpop.f32.mrb[41].mxu1 }
 0x139   : > { %3890 = vst [vmem:[%s4436_s24 + $0x90] sm:$0xff] %v3646_v29   ;;  %3922 = vst [vmem:[%s4436_s24 + $0x190] sm:$0xff] %v3806_v30   ;;  %v4049_v36 = vpop.f32.mrb[42].mxu0  ;;  %v2346_v37 = vsel %vm2090_vm3, %v4048_v28, %v2218_v31  ;;  %v2216_v38 = vmul.f32 0.2, %v1310_v33  ;;  %v4113_v40 = vpop.f32.mrb[42].mxu1 }
 0x13a   : > { %v2280_v39 = vmul.f32 0.2, %v1566_v35  ;;  %v1313_v41 = vpop.f32.mrb[43].mxu0  ;;  %vm2091_vm6 = vcmp.gt.f32.partialorder %v4049_v36, 0.0  ;;  %v2219_v42 = vmul.f32 0.2, %v4049_v36  ;;  %v2410_v44 = vsel %vm2154_vm4, %v4112_v32, %v2282_v34 }
 0x13b   : > { %vm2155_vm7 = vcmp.gt.f32.partialorder %v4113_v40, 0.0  ;;  %v2283_v43 = vmul.f32 0.2, %v4113_v40  ;;  %vm2152_vm8 = vcmp.gt.f32.partialorder %v1566_v35, 0.0  ;;  %vm2089_vm9 = vcmp.gt.f32.partialorder %v1313_v41, 0.0  ;;  %v1569_v46 = vpop.f32.mrb[43].mxu1 }
 0x13c   : > { %v2217_v45 = vmul.f32 0.2, %v1313_v41  ;;  %v2347_v47 = vsel %vm2091_vm6, %v4049_v36, %v2219_v42  ;;  %vm2153_vm10 = vcmp.gt.f32.partialorder %v1569_v46, 0.0  ;;  %v2281_v49 = vmul.f32 0.2, %v1569_v46 }
 0x13d   : > { %v2411_v48 = vsel %vm2155_vm7, %v4113_v40, %v2283_v43  ;;  %v2344_v50 = vsel %vm2088_vm5, %v1310_v33, %v2216_v38  ;;  %v3661_v51 = vpack.c.bf16 %v2347_v47, %v2346_v37  ;;  %v2408_v55 = vsel %vm2152_vm8, %v1566_v35, %v2280_v39 }
 0x13e   : > { %v3821_v52 = vpack.c.bf16 %v2411_v48, %v2410_v44  ;;  %v2345_v53 = vsel %vm2089_vm9, %v1313_v41, %v2217_v45  ;;  %v4052_v54 = vpop.f32.mrb[44].mxu0  ;;  %v2409_v57 = vsel %vm2153_vm10, %v1569_v46, %v2281_v49 }
 0x13f   : > { %v3656_v56 = vpack.c.bf16 %v2345_v53, %v2344_v50  ;;  %v2222_v58 = vmul.f32 0.2, %v4052_v54  ;;  %v4116_v59 = vpop.f32.mrb[44].mxu1  ;;  %v1326_v60 = vpop.f32.mrb[45].mxu0  ;;  %3893 = vst [vmem:[%s4436_s24 + $0xa8] sm:$0xff] %v3661_v51   ;;  %v3816_v61 = vpack.c.bf16 %v2409_v57, %v2408_v55  ;;  %vm2094_vm11 = vcmp.gt.f32.partialorder %v4052_v54, 0.0 }
 0x140   : > { %3925 = vst [vmem:[%s4436_s24 + $0x1a8] sm:$0xff] %v3821_v52   ;;  %vm2158_vm12 = vcmp.gt.f32.partialorder %v4116_v59, 0.0  ;;  %v2286_v62 = vmul.f32 0.2, %v4116_v59  ;;  %v1582_v63 = vpop.f32.mrb[45].mxu1  ;;  %v4053_v0 = vpop.f32.mrb[46].mxu0 }
 0x141   : > { %3892 = vst [vmem:[%s4436_s24 + $0xa0] sm:$0xff] %v3656_v56   ;;  %vm2092_vm13 = vcmp.gt.f32.partialorder %v1326_v60, 0.0  ;;  %v2220_v1 = vmul.f32 0.2, %v1326_v60  ;;  %v2284_v2 = vmul.f32 0.2, %v1582_v63  ;;  %v2350_v7 = vsel %vm2094_vm11, %v4052_v54, %v2222_v58 }
 0x142   : > { %v4117_v3 = vpop.f32.mrb[46].mxu1  ;;  %3924 = vst [vmem:[%s4436_s24 + $0x1a0] sm:$0xff] %v3816_v61   ;;  %vm2095_vm14 = vcmp.gt.f32.partialorder %v4053_v0, 0.0  ;;  %v2223_v4 = vmul.f32 0.2, %v4053_v0  ;;  %v1329_v5 = vpop.f32.mrb[47].mxu0  ;;  %v2414_v12 = vsel %vm2158_vm12, %v4116_v59, %v2286_v62 }
 0x143   : > { %vm2159_vm15 = vcmp.gt.f32.partialorder %v4117_v3, 0.0  ;;  %v1585_v6 = vpop.f32.mrb[47].mxu1  ;;  %vm2156_vm0 = vcmp.gt.f32.partialorder %v1582_v63, 0.0  ;;  %v2287_v8 = vmul.f32 0.2, %v4117_v3  ;;  %vm2093_vm1 = vcmp.gt.f32.partialorder %v1329_v5, 0.0 }
 0x144   : > { %v2351_v9 = vsel %vm2095_vm14, %v4053_v0, %v2223_v4  ;;  %v2221_v10 = vmul.f32 0.2, %v1329_v5  ;;  %vm2157_vm2 = vcmp.gt.f32.partialorder %v1585_v6, 0.0  ;;  %v2285_v11 = vmul.f32 0.2, %v1585_v6 }
 0x145   : > { %v2348_v13 = vsel %vm2092_vm13, %v1326_v60, %v2220_v1  ;;  %v3671_v14 = vpack.c.bf16 %v2351_v9, %v2350_v7  ;;  %v2415_v15 = vsel %vm2159_vm15, %v4117_v3, %v2287_v8  ;;  %v2412_v16 = vsel %vm2156_vm0, %v1582_v63, %v2284_v2 }
 0x146   : > { %v3831_v17 = vpack.c.bf16 %v2415_v15, %v2414_v12  ;;  %v2349_v18 = vsel %vm2093_vm1, %v1329_v5, %v2221_v10  ;;  %v2413_v19 = vsel %vm2157_vm2, %v1585_v6, %v2285_v11  ;;  %v4056_v20 = vpop.f32.mrb[48].mxu0 }
 0x147   : > { %3895 = vst [vmem:[%s4436_s24 + $0xb8] sm:$0xff] %v3671_v14   ;;  %v3666_v21 = vpack.c.bf16 %v2349_v18, %v2348_v13  ;;  %v3826_v22 = vpack.c.bf16 %v2413_v19, %v2412_v16  ;;  %vm2098_vm3 = vcmp.gt.f32.partialorder %v4056_v20, 0.0  ;;  %v2226_v23 = vmul.f32 0.2, %v4056_v20  ;;  %v4120_v24 = vpop.f32.mrb[48].mxu1  ;;  %v1342_v25 = vpop.f32.mrb[49].mxu0 }
 0x148   : > { %3927 = vst [vmem:[%s4436_s24 + $0x1b8] sm:$0xff] %v3831_v17   ;;  %v2290_v26 = vmul.f32 0.2, %v4120_v24  ;;  %vm2162_vm4 = vcmp.gt.f32.partialorder %v4120_v24, 0.0  ;;  %vm2096_vm5 = vcmp.gt.f32.partialorder %v1342_v25, 0.0  ;;  %v1598_v27 = vpop.f32.mrb[49].mxu1 }
 0x149   : > { %3894 = vst [vmem:[%s4436_s24 + $0xb0] sm:$0xff] %v3666_v21   ;;  %3926 = vst [vmem:[%s4436_s24 + $0x1b0] sm:$0xff] %v3826_v22   ;;  %v4057_v28 = vpop.f32.mrb[50].mxu0  ;;  %v2354_v29 = vsel %vm2098_vm3, %v4056_v20, %v2226_v23  ;;  %v2224_v30 = vmul.f32 0.2, %v1342_v25  ;;  %v4121_v32 = vpop.f32.mrb[50].mxu1 }
 0x14a   : > { %v2288_v31 = vmul.f32 0.2, %v1598_v27  ;;  %v1345_v33 = vpop.f32.mrb[51].mxu0  ;;  %vm2099_vm6 = vcmp.gt.f32.partialorder %v4057_v28, 0.0  ;;  %v2227_v34 = vmul.f32 0.2, %v4057_v28  ;;  %v2418_v36 = vsel %vm2162_vm4, %v4120_v24, %v2290_v26 }
 0x14b   : > { %vm2163_vm7 = vcmp.gt.f32.partialorder %v4121_v32, 0.0  ;;  %v2291_v35 = vmul.f32 0.2, %v4121_v32  ;;  %vm2160_vm8 = vcmp.gt.f32.partialorder %v1598_v27, 0.0  ;;  %vm2097_vm9 = vcmp.gt.f32.partialorder %v1345_v33, 0.0  ;;  %v1601_v38 = vpop.f32.mrb[51].mxu1 }
 0x14c   : > { %v2225_v37 = vmul.f32 0.2, %v1345_v33  ;;  %v2355_v39 = vsel %vm2099_vm6, %v4057_v28, %v2227_v34  ;;  %vm2161_vm10 = vcmp.gt.f32.partialorder %v1601_v38, 0.0  ;;  %v2289_v41 = vmul.f32 0.2, %v1601_v38 }
 0x14d   : > { %v2419_v40 = vsel %vm2163_vm7, %v4121_v32, %v2291_v35  ;;  %v2352_v42 = vsel %vm2096_vm5, %v1342_v25, %v2224_v30  ;;  %v3681_v43 = vpack.c.bf16 %v2355_v39, %v2354_v29  ;;  %v2416_v47 = vsel %vm2160_vm8, %v1598_v27, %v2288_v31 }
 0x14e   : > { %v3841_v44 = vpack.c.bf16 %v2419_v40, %v2418_v36  ;;  %v2353_v45 = vsel %vm2097_vm9, %v1345_v33, %v2225_v37  ;;  %v4060_v46 = vpop.f32.mrb[52].mxu0  ;;  %v2417_v49 = vsel %vm2161_vm10, %v1601_v38, %v2289_v41 }
 0x14f   : > { %v3676_v48 = vpack.c.bf16 %v2353_v45, %v2352_v42  ;;  %v2230_v50 = vmul.f32 0.2, %v4060_v46  ;;  %v4124_v51 = vpop.f32.mrb[52].mxu1  ;;  %v1358_v52 = vpop.f32.mrb[53].mxu0  ;;  %3897 = vst [vmem:[%s4436_s24 + $0xc8] sm:$0xff] %v3681_v43   ;;  %v3836_v53 = vpack.c.bf16 %v2417_v49, %v2416_v47  ;;  %vm2102_vm11 = vcmp.gt.f32.partialorder %v4060_v46, 0.0 }
 0x150   : > { %3929 = vst [vmem:[%s4436_s24 + $0x1c8] sm:$0xff] %v3841_v44   ;;  %vm2166_vm12 = vcmp.gt.f32.partialorder %v4124_v51, 0.0  ;;  %v2294_v54 = vmul.f32 0.2, %v4124_v51  ;;  %v1614_v55 = vpop.f32.mrb[53].mxu1  ;;  %v4061_v56 = vpop.f32.mrb[54].mxu0 }
 0x151   : > { %3896 = vst [vmem:[%s4436_s24 + $0xc0] sm:$0xff] %v3676_v48   ;;  %vm2100_vm13 = vcmp.gt.f32.partialorder %v1358_v52, 0.0  ;;  %v2228_v57 = vmul.f32 0.2, %v1358_v52  ;;  %v2292_v58 = vmul.f32 0.2, %v1614_v55  ;;  %v2358_v63 = vsel %vm2102_vm11, %v4060_v46, %v2230_v50 }
 0x152   : > { %v4125_v59 = vpop.f32.mrb[54].mxu1  ;;  %3928 = vst [vmem:[%s4436_s24 + $0x1c0] sm:$0xff] %v3836_v53   ;;  %vm2103_vm14 = vcmp.gt.f32.partialorder %v4061_v56, 0.0  ;;  %v2231_v60 = vmul.f32 0.2, %v4061_v56  ;;  %v1361_v61 = vpop.f32.mrb[55].mxu0  ;;  %v2422_v4 = vsel %vm2166_vm12, %v4124_v51, %v2294_v54 }
 0x153   : > { %vm2167_vm15 = vcmp.gt.f32.partialorder %v4125_v59, 0.0  ;;  %v1617_v62 = vpop.f32.mrb[55].mxu1  ;;  %vm2164_vm0 = vcmp.gt.f32.partialorder %v1614_v55, 0.0  ;;  %v2295_v0 = vmul.f32 0.2, %v4125_v59  ;;  %vm2101_vm1 = vcmp.gt.f32.partialorder %v1361_v61, 0.0 }
 0x154   : > { %v2359_v1 = vsel %vm2103_vm14, %v4061_v56, %v2231_v60  ;;  %v2229_v2 = vmul.f32 0.2, %v1361_v61  ;;  %vm2165_vm2 = vcmp.gt.f32.partialorder %v1617_v62, 0.0  ;;  %v2293_v3 = vmul.f32 0.2, %v1617_v62 }
 0x155   : > { %v2356_v5 = vsel %vm2100_vm13, %v1358_v52, %v2228_v57  ;;  %v3691_v6 = vpack.c.bf16 %v2359_v1, %v2358_v63  ;;  %v2423_v7 = vsel %vm2167_vm15, %v4125_v59, %v2295_v0  ;;  %v2420_v8 = vsel %vm2164_vm0, %v1614_v55, %v2292_v58 }
 0x156   : > { %v3851_v9 = vpack.c.bf16 %v2423_v7, %v2422_v4  ;;  %v2357_v10 = vsel %vm2101_vm1, %v1361_v61, %v2229_v2  ;;  %v2421_v11 = vsel %vm2165_vm2, %v1617_v62, %v2293_v3  ;;  %v4064_v12 = vpop.f32.mrb[56].mxu0 }
 0x157   : > { %3899 = vst [vmem:[%s4436_s24 + $0xd8] sm:$0xff] %v3691_v6   ;;  %v3686_v13 = vpack.c.bf16 %v2357_v10, %v2356_v5  ;;  %v3846_v14 = vpack.c.bf16 %v2421_v11, %v2420_v8  ;;  %vm2106_vm3 = vcmp.gt.f32.partialorder %v4064_v12, 0.0  ;;  %v2234_v15 = vmul.f32 0.2, %v4064_v12  ;;  %v4128_v16 = vpop.f32.mrb[56].mxu1  ;;  %v1374_v17 = vpop.f32.mrb[57].mxu0 }
 0x158   : > { %3931 = vst [vmem:[%s4436_s24 + $0x1d8] sm:$0xff] %v3851_v9   ;;  %v2298_v18 = vmul.f32 0.2, %v4128_v16  ;;  %vm2170_vm4 = vcmp.gt.f32.partialorder %v4128_v16, 0.0  ;;  %vm2104_vm5 = vcmp.gt.f32.partialorder %v1374_v17, 0.0  ;;  %v1630_v19 = vpop.f32.mrb[57].mxu1 }
 0x159   : > { %3898 = vst [vmem:[%s4436_s24 + $0xd0] sm:$0xff] %v3686_v13   ;;  %3930 = vst [vmem:[%s4436_s24 + $0x1d0] sm:$0xff] %v3846_v14   ;;  %v4065_v20 = vpop.f32.mrb[58].mxu0  ;;  %v2362_v21 = vsel %vm2106_vm3, %v4064_v12, %v2234_v15  ;;  %v2232_v22 = vmul.f32 0.2, %v1374_v17  ;;  %v4129_v24 = vpop.f32.mrb[58].mxu1 }
 0x15a   : > { %v2296_v23 = vmul.f32 0.2, %v1630_v19  ;;  %v1377_v25 = vpop.f32.mrb[59].mxu0  ;;  %vm2107_vm6 = vcmp.gt.f32.partialorder %v4065_v20, 0.0  ;;  %v2235_v26 = vmul.f32 0.2, %v4065_v20  ;;  %v2426_v28 = vsel %vm2170_vm4, %v4128_v16, %v2298_v18 }
 0x15b   : > { %vm2171_vm7 = vcmp.gt.f32.partialorder %v4129_v24, 0.0  ;;  %v2299_v27 = vmul.f32 0.2, %v4129_v24  ;;  %vm2168_vm8 = vcmp.gt.f32.partialorder %v1630_v19, 0.0  ;;  %vm2105_vm9 = vcmp.gt.f32.partialorder %v1377_v25, 0.0  ;;  %v1633_v30 = vpop.f32.mrb[59].mxu1 }
 0x15c   : > { %v2233_v29 = vmul.f32 0.2, %v1377_v25  ;;  %v2363_v31 = vsel %vm2107_vm6, %v4065_v20, %v2235_v26  ;;  %vm2169_vm10 = vcmp.gt.f32.partialorder %v1633_v30, 0.0  ;;  %v2297_v33 = vmul.f32 0.2, %v1633_v30 }
 0x15d   : > { %v2427_v32 = vsel %vm2171_vm7, %v4129_v24, %v2299_v27  ;;  %v2360_v34 = vsel %vm2104_vm5, %v1374_v17, %v2232_v22  ;;  %v3701_v35 = vpack.c.bf16 %v2363_v31, %v2362_v21  ;;  %v2424_v39 = vsel %vm2168_vm8, %v1630_v19, %v2296_v23 }
 0x15e   : > { %v3861_v36 = vpack.c.bf16 %v2427_v32, %v2426_v28  ;;  %v2361_v37 = vsel %vm2105_vm9, %v1377_v25, %v2233_v29  ;;  %v4068_v38 = vpop.f32.mrb[60].mxu0  ;;  %v2425_v41 = vsel %vm2169_vm10, %v1633_v30, %v2297_v33 }
 0x15f   : > { %v3696_v40 = vpack.c.bf16 %v2361_v37, %v2360_v34  ;;  %v2238_v42 = vmul.f32 0.2, %v4068_v38  ;;  %v4132_v43 = vpop.f32.mrb[60].mxu1  ;;  %v1390_v44 = vpop.f32.mrb[61].mxu0  ;;  %3901 = vst [vmem:[%s4436_s24 + $0xe8] sm:$0xff] %v3701_v35   ;;  %v3856_v45 = vpack.c.bf16 %v2425_v41, %v2424_v39  ;;  %vm2110_vm11 = vcmp.gt.f32.partialorder %v4068_v38, 0.0 }
 0x160   : > { %3933 = vst [vmem:[%s4436_s24 + $0x1e8] sm:$0xff] %v3861_v36   ;;  %vm2174_vm12 = vcmp.gt.f32.partialorder %v4132_v43, 0.0  ;;  %v2302_v46 = vmul.f32 0.2, %v4132_v43  ;;  %v1646_v47 = vpop.f32.mrb[61].mxu1  ;;  %v4069_v48 = vpop.f32.mrb[62].mxu0 }
 0x161   : > { %3900 = vst [vmem:[%s4436_s24 + $0xe0] sm:$0xff] %v3696_v40   ;;  %vm2108_vm13 = vcmp.gt.f32.partialorder %v1390_v44, 0.0  ;;  %v2236_v49 = vmul.f32 0.2, %v1390_v44  ;;  %v2300_v50 = vmul.f32 0.2, %v1646_v47  ;;  %v2366_v55 = vsel %vm2110_vm11, %v4068_v38, %v2238_v42 }
 0x162   : > { %v4133_v51 = vpop.f32.mrb[62].mxu1  ;;  %3932 = vst [vmem:[%s4436_s24 + $0x1e0] sm:$0xff] %v3856_v45   ;;  %vm2111_vm14 = vcmp.gt.f32.partialorder %v4069_v48, 0.0  ;;  %v2239_v52 = vmul.f32 0.2, %v4069_v48  ;;  %v1393_v53 = vpop.f32.mrb[63].mxu0  ;;  %v2430_v60 = vsel %vm2174_vm12, %v4132_v43, %v2302_v46 }
 0x163   : > { %vm2175_vm15 = vcmp.gt.f32.partialorder %v4133_v51, 0.0  ;;  %v1649_v54 = vpop.f32.mrb[63].mxu1  ;;  %vm2172_vm0 = vcmp.gt.f32.partialorder %v1646_v47, 0.0  ;;  %v2303_v56 = vmul.f32 0.2, %v4133_v51  ;;  %vm2109_vm1 = vcmp.gt.f32.partialorder %v1393_v53, 0.0 }
 0x164   : > { %v2367_v57 = vsel %vm2111_vm14, %v4069_v48, %v2239_v52  ;;  %v2237_v58 = vmul.f32 0.2, %v1393_v53  ;;  %vm2173_vm2 = vcmp.gt.f32.partialorder %v1649_v54, 0.0  ;;  %v2301_v59 = vmul.f32 0.2, %v1649_v54 }
 0x165   : > { %v2364_v61 = vsel %vm2108_vm13, %v1390_v44, %v2236_v49  ;;  %v3711_v62 = vpack.c.bf16 %v2367_v57, %v2366_v55  ;;  %v2431_v63 = vsel %vm2175_vm15, %v4133_v51, %v2303_v56  ;;  %v2428_v0 = vsel %vm2172_vm0, %v1646_v47, %v2300_v50 }
 0x166   : > { %v3871_v1 = vpack.c.bf16 %v2431_v63, %v2430_v60  ;;  %v2365_v2 = vsel %vm2109_vm1, %v1393_v53, %v2237_v58  ;;  %v2429_v3 = vsel %vm2173_vm2, %v1649_v54, %v2301_v59 }
 0x167   : > { %3903 = vst [vmem:[%s4436_s24 + $0xf8] sm:$0xff] %v3711_v62   ;;  %v3706_v4 = vpack.c.bf16 %v2365_v2, %v2364_v61  ;;  %v3866_v5 = vpack.c.bf16 %v2429_v3, %v2428_v0 }
 0x168   : > { %3935 = vst [vmem:[%s4436_s24 + $0x1f8] sm:$0xff] %v3871_v1  }
 0x169   : > { %3902 = vst [vmem:[%s4436_s24 + $0xf0] sm:$0xff] %v3706_v4   ;;  %3934 = vst [vmem:[%s4436_s24 + $0x1f0] sm:$0xff] %v3866_v5  }
 0x16a PF: > { %s12_s11 = sadd.s32 1, %s4251_s11   ;;  %s4546_s9 = smov %s4247_s10 }
 0x16b   : > { %p9_p5 = scmp.ge.s32.totalorder %s12_s11, 4   ;;  %s4547_s10 = smov %s4549_s12 }
 0x16d   :  { %11 = sbr.rel (!%p9_p5) target bundleno = 2 (0x2), region = 69 }

// kernel: image_down_forward.5
= control target key start
LH: loop header
LB: loop body
LE: loop exit
PB: predicated region body
PF: predicated region fallthrough
CT: control target
= control target key end

     0   :  { %s5195_s9 = smov 0   ;;  %s5197_s10 = smov 0   ;;  %s7562_s0 = inlined_call_operand.vmem [shape: bf16[512,1152], index: 0, kind: input, shape index: {}]   ;;  %s7563_s1 = inlined_call_operand.vmem [shape: bf16[1152,256], index: 1, kind: input, shape index: {}]   ;;  %s7564_s2 = inlined_call_operand.vmem [shape: bf16[512,256], index: 2, kind: output, shape index: {}]  }
   0x1   :  { %s5199_s11 = smov 0   ;;  %s5201_s12 = smov 0  }
   0x2   :  { %s5203_s13 = smov 0  }
   0x3 LB: > { %s21_s14 = sadd.s32 1, %s5172_s12  ;;  %p40_p1 = scmp.ne.s32.totalorder %s5164_s10, %s5160_s9  ;;  %s5176_s13 = sphi %s5203_s13, %s12_s13   ;;  %s5172_s12 = sphi %s5201_s12, %s8093_s12   ;;  %s5168_s11 = sphi %s5199_s11, %s8092_s11   ;;  %s5164_s10 = sphi %s5197_s10, %s8091_s10   ;;  %s5160_s9 = sphi %s5195_s9, %s8090_s9  }
   0x4   : > { %p22_p0 = scmp.ge.s32.totalorder %s21_s14, 3  ;;  %p41_p2 = scmp.eq.s32.totalorder %s5176_s13, 0 }
   0x5   : > { %s33_s16 = sadd.s32 1, %s5164_s10  ;;  %p4349_p5 = scmp.ge.s32.totalorder %s5176_s13, 3 }
   0x6   : > { %s8095_s14 = smov (%p22_p0, %s21_s14), 0  ;;  %p42_p3 = por %p41_p2, %p40_p1 }
   0x7   : > { %s29_s15 = ssub.s32 %s5172_s12, %s8095_s14  ;;  %118 = sbr.rel (%p4349_p5) target bundleno = 93 (0x5d), region = 16 }
   0x8   : > { %p31_p4 = scmp.eq.s32.totalorder %s29_s15, 0 }
   0xa   : > { %s5230_s17 = scalar_select %p31_p4, %s5164_s10, %s33_s16  }
   0xe   : > { %121 = sbr.rel (!%p42_p3) target bundleno = 93 (0x5d), region = 20  ;;  %s123_s18 = sand.u32 (%p42_p3), 1, %s5164_s10  }
   0xf   : > { %s4696_s19 = smul.u32 (%p42_p3), 12, %s5172_s12 }
  0x10   : > { %s4890_s20 = smul.u32 (%p42_p3), 768, %s123_s18 }
  0x11   : > { %s5238_s23 = scalar_lea.vmem (%p42_p3), %s7562_s0, %s4696_s19 }
  0x12   : > { %v146_v0 = vld [vmem:[%s5238_s23] sm:$0xff] (%p42_p3)  ;;  %v150_v2 = vld [vmem:[%s5238_s23 + $0x48] sm:$0xff] (%p42_p3)  ;;  %s5243_s24 = scalar_lea.vmem (%p42_p3), [#allocation3], %s4890_s20  ;;  %v154_v4 = vld [vmem:[%s5238_s23 + $0x90] sm:$0xff] (%p42_p3) }
  0x13   : > { %v148_v1 = vld [vmem:[%s5238_s23 + $0x24] sm:$0xff] (%p42_p3)  ;;  %147 = vst [vmem:[%s5243_s24] sm:$0xff] (%p42_p3), %v146_v0  ;;  %151 = vst [vmem:[%s5243_s24 + $0x18] sm:$0xff] (%p42_p3), %v150_v2  ;;  %v152_v3 = vld [vmem:[%s5238_s23 + $0x6c] sm:$0xff] (%p42_p3) }
  0x14   : > { %149 = vst [vmem:[%s5243_s24 + $0xc] sm:$0xff] (%p42_p3), %v148_v1  ;;  %v156_v5 = vld [vmem:[%s5238_s23 + $0xb4] sm:$0xff] (%p42_p3)  ;;  %153 = vst [vmem:[%s5243_s24 + $0x24] sm:$0xff] (%p42_p3), %v152_v3  ;;  %v160_v7 = vld [vmem:[%s5238_s23 + $0xfc] sm:$0xff] (%p42_p3) }
  0x15   : > { %155 = vst [vmem:[%s5243_s24 + $0x30] sm:$0xff] %v154_v4  ;;  %157 = vst [vmem:[%s5243_s24 + $0x3c] sm:$0xff] %v156_v5  ;;  %v158_v6 = vld [vmem:[%s5238_s23 + $0xd8] sm:$0xff]  ;;  %v162_v8 = vld [vmem:[%s5238_s23 + $0x120] sm:$0xff] }
  0x16   : > { %159 = vst [vmem:[%s5243_s24 + $0x48] sm:$0xff] %v158_v6  ;;  %161 = vst [vmem:[%s5243_s24 + $0x54] sm:$0xff] %v160_v7  ;;  %v164_v9 = vld [vmem:[%s5238_s23 + $0x144] sm:$0xff]  ;;  %v168_v11 = vld [vmem:[%s5238_s23 + $0x18c] sm:$0xff] }
  0x17   : > { %163 = vst [vmem:[%s5243_s24 + $0x60] sm:$0xff] %v162_v8  ;;  %v166_v10 = vld [vmem:[%s5238_s23 + $0x168] sm:$0xff]  ;;  %165 = vst [vmem:[%s5243_s24 + $0x6c] sm:$0xff] %v164_v9  ;;  %v170_v12 = vld [vmem:[%s5238_s23 + $0x1b0] sm:$0xff] }
  0x18   : > { %167 = vst [vmem:[%s5243_s24 + $0x78] sm:$0xff] %v166_v10  ;;  %169 = vst [vmem:[%s5243_s24 + $0x84] sm:$0xff] %v168_v11  ;;  %v172_v13 = vld [vmem:[%s5238_s23 + $0x1d4] sm:$0xff]  ;;  %v176_v15 = vld [vmem:[%s5238_s23 + $0x21c] sm:$0xff] }
  0x19   : > { %v174_v14 = vld [vmem:[%s5238_s23 + $0x1f8] sm:$0xff]  ;;  %171 = vst [vmem:[%s5243_s24 + $0x90] sm:$0xff] %v170_v12  ;;  %173 = vst [vmem:[%s5243_s24 + $0x9c] sm:$0xff] %v172_v13  ;;  %v178_v16 = vld [vmem:[%s5238_s23 + $0x240] sm:$0xff] }
  0x1a   : > { %175 = vst [vmem:[%s5243_s24 + $0xa8] sm:$0xff] %v174_v14  ;;  %v180_v17 = vld [vmem:[%s5238_s23 + $0x264] sm:$0xff]  ;;  %177 = vst [vmem:[%s5243_s24 + $0xb4] sm:$0xff] %v176_v15  ;;  %v184_v19 = vld [vmem:[%s5238_s23 + $0x2ac] sm:$0xff] }
  0x1b   : > { %179 = vst [vmem:[%s5243_s24 + $0xc0] sm:$0xff] %v178_v16  ;;  %181 = vst [vmem:[%s5243_s24 + $0xcc] sm:$0xff] %v180_v17  ;;  %v182_v18 = vld [vmem:[%s5238_s23 + $0x288] sm:$0xff]  ;;  %v186_v20 = vld [vmem:[%s5238_s23 + $0x2d0] sm:$0xff] }
  0x1c   : > { %183 = vst [vmem:[%s5243_s24 + $0xd8] sm:$0xff] %v182_v18  ;;  %185 = vst [vmem:[%s5243_s24 + $0xe4] sm:$0xff] %v184_v19  ;;  %v188_v21 = vld [vmem:[%s5238_s23 + $0x2f4] sm:$0xff]  ;;  %v192_v23 = vld [vmem:[%s5238_s23 + $0x33c] sm:$0xff] }
  0x1d   : > { %187 = vst [vmem:[%s5243_s24 + $0xf0] sm:$0xff] %v186_v20  ;;  %v190_v22 = vld [vmem:[%s5238_s23 + $0x318] sm:$0xff]  ;;  %189 = vst [vmem:[%s5243_s24 + $0xfc] sm:$0xff] %v188_v21  ;;  %v194_v24 = vld [vmem:[%s5238_s23 + $0x360] sm:$0xff] }
  0x1e   : > { %191 = vst [vmem:[%s5243_s24 + $0x108] sm:$0xff] %v190_v22  ;;  %193 = vst [vmem:[%s5243_s24 + $0x114] sm:$0xff] %v192_v23  ;;  %v196_v25 = vld [vmem:[%s5238_s23 + $0x384] sm:$0xff]  ;;  %v200_v27 = vld [vmem:[%s5238_s23 + $0x3cc] sm:$0xff] }
  0x1f   : > { %v198_v26 = vld [vmem:[%s5238_s23 + $0x3a8] sm:$0xff]  ;;  %195 = vst [vmem:[%s5243_s24 + $0x120] sm:$0xff] %v194_v24  ;;  %197 = vst [vmem:[%s5243_s24 + $0x12c] sm:$0xff] %v196_v25  ;;  %v202_v28 = vld [vmem:[%s5238_s23 + $0x3f0] sm:$0xff] }
  0x20   : > { %199 = vst [vmem:[%s5243_s24 + $0x138] sm:$0xff] %v198_v26  ;;  %v204_v29 = vld [vmem:[%s5238_s23 + $0x414] sm:$0xff]  ;;  %201 = vst [vmem:[%s5243_s24 + $0x144] sm:$0xff] %v200_v27  ;;  %v208_v31 = vld [vmem:[%s5238_s23 + $0x45c] sm:$0xff] }
  0x21   : > { %203 = vst [vmem:[%s5243_s24 + $0x150] sm:$0xff] %v202_v28  ;;  %205 = vst [vmem:[%s5243_s24 + $0x15c] sm:$0xff] %v204_v29  ;;  %v206_v30 = vld [vmem:[%s5238_s23 + $0x438] sm:$0xff]  ;;  %v210_v32 = vld [vmem:[%s5238_s23 + $0x480] sm:$0xff] }
  0x22   : > { %207 = vst [vmem:[%s5243_s24 + $0x168] sm:$0xff] %v206_v30  ;;  %209 = vst [vmem:[%s5243_s24 + $0x174] sm:$0xff] %v208_v31  ;;  %v212_v33 = vld [vmem:[%s5238_s23 + $0x4a4] sm:$0xff]  ;;  %v216_v35 = vld [vmem:[%s5238_s23 + $0x4ec] sm:$0xff] }
  0x23   : > { %211 = vst [vmem:[%s5243_s24 + $0x180] sm:$0xff] %v210_v32  ;;  %v214_v34 = vld [vmem:[%s5238_s23 + $0x4c8] sm:$0xff]  ;;  %213 = vst [vmem:[%s5243_s24 + $0x18c] sm:$0xff] %v212_v33  ;;  %v218_v36 = vld [vmem:[%s5238_s23 + $0x510] sm:$0xff] }
  0x24   : > { %215 = vst [vmem:[%s5243_s24 + $0x198] sm:$0xff] %v214_v34  ;;  %217 = vst [vmem:[%s5243_s24 + $0x1a4] sm:$0xff] %v216_v35  ;;  %v220_v37 = vld [vmem:[%s5238_s23 + $0x534] sm:$0xff]  ;;  %v224_v39 = vld [vmem:[%s5238_s23 + $0x57c] sm:$0xff] }
  0x25   : > { %v222_v38 = vld [vmem:[%s5238_s23 + $0x558] sm:$0xff]  ;;  %219 = vst [vmem:[%s5243_s24 + $0x1b0] sm:$0xff] %v218_v36  ;;  %221 = vst [vmem:[%s5243_s24 + $0x1bc] sm:$0xff] %v220_v37  ;;  %v226_v40 = vld [vmem:[%s5238_s23 + $0x5a0] sm:$0xff] }
  0x26   : > { %223 = vst [vmem:[%s5243_s24 + $0x1c8] sm:$0xff] %v222_v38  ;;  %v228_v41 = vld [vmem:[%s5238_s23 + $0x5c4] sm:$0xff]  ;;  %225 = vst [vmem:[%s5243_s24 + $0x1d4] sm:$0xff] %v224_v39  ;;  %v232_v43 = vld [vmem:[%s5238_s23 + $0x60c] sm:$0xff] }
  0x27   : > { %227 = vst [vmem:[%s5243_s24 + $0x1e0] sm:$0xff] %v226_v40  ;;  %229 = vst [vmem:[%s5243_s24 + $0x1ec] sm:$0xff] %v228_v41  ;;  %v230_v42 = vld [vmem:[%s5238_s23 + $0x5e8] sm:$0xff]  ;;  %v234_v44 = vld [vmem:[%s5238_s23 + $0x630] sm:$0xff] }
  0x28   : > { %231 = vst [vmem:[%s5243_s24 + $0x1f8] sm:$0xff] %v230_v42  ;;  %233 = vst [vmem:[%s5243_s24 + $0x204] sm:$0xff] %v232_v43  ;;  %v236_v45 = vld [vmem:[%s5238_s23 + $0x654] sm:$0xff]  ;;  %v240_v47 = vld [vmem:[%s5238_s23 + $0x69c] sm:$0xff] }
  0x29   : > { %235 = vst [vmem:[%s5243_s24 + $0x210] sm:$0xff] %v234_v44  ;;  %v238_v46 = vld [vmem:[%s5238_s23 + $0x678] sm:$0xff]  ;;  %237 = vst [vmem:[%s5243_s24 + $0x21c] sm:$0xff] %v236_v45  ;;  %v242_v48 = vld [vmem:[%s5238_s23 + $0x6c0] sm:$0xff] }
  0x2a   : > { %239 = vst [vmem:[%s5243_s24 + $0x228] sm:$0xff] %v238_v46  ;;  %241 = vst [vmem:[%s5243_s24 + $0x234] sm:$0xff] %v240_v47  ;;  %v244_v49 = vld [vmem:[%s5238_s23 + $0x6e4] sm:$0xff]  ;;  %v248_v51 = vld [vmem:[%s5238_s23 + $0x72c] sm:$0xff] }
  0x2b   : > { %v246_v50 = vld [vmem:[%s5238_s23 + $0x708] sm:$0xff]  ;;  %243 = vst [vmem:[%s5243_s24 + $0x240] sm:$0xff] %v242_v48  ;;  %245 = vst [vmem:[%s5243_s24 + $0x24c] sm:$0xff] %v244_v49  ;;  %v250_v52 = vld [vmem:[%s5238_s23 + $0x750] sm:$0xff] }
  0x2c   : > { %247 = vst [vmem:[%s5243_s24 + $0x258] sm:$0xff] %v246_v50  ;;  %v252_v53 = vld [vmem:[%s5238_s23 + $0x774] sm:$0xff]  ;;  %249 = vst [vmem:[%s5243_s24 + $0x264] sm:$0xff] %v248_v51  ;;  %v256_v55 = vld [vmem:[%s5238_s23 + $0x7bc] sm:$0xff] }
  0x2d   : > { %251 = vst [vmem:[%s5243_s24 + $0x270] sm:$0xff] %v250_v52  ;;  %253 = vst [vmem:[%s5243_s24 + $0x27c] sm:$0xff] %v252_v53  ;;  %v254_v54 = vld [vmem:[%s5238_s23 + $0x798] sm:$0xff]  ;;  %v258_v56 = vld [vmem:[%s5238_s23 + $0x7e0] sm:$0xff] }
  0x2e   : > { %255 = vst [vmem:[%s5243_s24 + $0x288] sm:$0xff] %v254_v54  ;;  %257 = vst [vmem:[%s5243_s24 + $0x294] sm:$0xff] %v256_v55  ;;  %v260_v57 = vld [vmem:[%s5238_s23 + $0x804] sm:$0xff]  ;;  %v264_v59 = vld [vmem:[%s5238_s23 + $0x84c] sm:$0xff] }
  0x2f   : > { %259 = vst [vmem:[%s5243_s24 + $0x2a0] sm:$0xff] %v258_v56  ;;  %v262_v58 = vld [vmem:[%s5238_s23 + $0x828] sm:$0xff]  ;;  %261 = vst [vmem:[%s5243_s24 + $0x2ac] sm:$0xff] %v260_v57  ;;  %v266_v60 = vld [vmem:[%s5238_s23 + $0x870] sm:$0xff] }
  0x30   : > { %263 = vst [vmem:[%s5243_s24 + $0x2b8] sm:$0xff] %v262_v58  ;;  %265 = vst [vmem:[%s5243_s24 + $0x2c4] sm:$0xff] %v264_v59  ;;  %v268_v61 = vld [vmem:[%s5238_s23 + $0x894] sm:$0xff]  ;;  %v272_v63 = vld [vmem:[%s5238_s23 + $0x8dc] sm:$0xff] }
  0x31   : > { %v270_v62 = vld [vmem:[%s5238_s23 + $0x8b8] sm:$0xff]  ;;  %267 = vst [vmem:[%s5243_s24 + $0x2d0] sm:$0xff] %v266_v60  ;;  %269 = vst [vmem:[%s5243_s24 + $0x2dc] sm:$0xff] %v268_v61  ;;  %v4351_v0 = vld [vmem:[%s5238_s23 + $0x8] sm:$0xf] }
  0x32   : > { %271 = vst [vmem:[%s5243_s24 + $0x2e8] sm:$0xff] %v270_v62  ;;  %v4353_v1 = vld [vmem:[%s5238_s23 + $0x2c] sm:$0xf]  ;;  %273 = vst [vmem:[%s5243_s24 + $0x2f4] sm:$0xff] %v272_v63  ;;  %v4355_v2 = vld [vmem:[%s5238_s23 + $0x50] sm:$0xf] }
  0x33   : > { %4352 = vst [vmem:[%s5243_s24 + $0x8] sm:$0xf] %v4351_v0  ;;  %4354 = vst [vmem:[%s5243_s24 + $0x14] sm:$0xf] %v4353_v1  ;;  %v4357_v3 = vld [vmem:[%s5238_s23 + $0x74] sm:$0xf] }
  0x34   : > { %v4359_v4 = vld [vmem:[%s5238_s23 + $0x98] sm:$0xf]  ;;  %4356 = vst [vmem:[%s5243_s24 + $0x20] sm:$0xf] %v4355_v2  ;;  %4358 = vst [vmem:[%s5243_s24 + $0x2c] sm:$0xf] %v4357_v3 }
  0x35   : > { %4360 = vst [vmem:[%s5243_s24 + $0x38] sm:$0xf] %v4359_v4  ;;  %v4361_v5 = vld [vmem:[%s5238_s23 + $0xbc] sm:$0xf]  ;;  %v4363_v6 = vld [vmem:[%s5238_s23 + $0xe0] sm:$0xf] }
  0x36   : > { %v4365_v7 = vld [vmem:[%s5238_s23 + $0x104] sm:$0xf]  ;;  %4362 = vst [vmem:[%s5243_s24 + $0x44] sm:$0xf] %v4361_v5  ;;  %4364 = vst [vmem:[%s5243_s24 + $0x50] sm:$0xf] %v4363_v6 }
  0x37   : > { %4366 = vst [vmem:[%s5243_s24 + $0x5c] sm:$0xf] %v4365_v7  ;;  %v4367_v8 = vld [vmem:[%s5238_s23 + $0x128] sm:$0xf]  ;;  %v4369_v9 = vld [vmem:[%s5238_s23 + $0x14c] sm:$0xf] }
  0x38   : > { %v4371_v10 = vld [vmem:[%s5238_s23 + $0x170] sm:$0xf]  ;;  %4368 = vst [vmem:[%s5243_s24 + $0x68] sm:$0xf] %v4367_v8  ;;  %4370 = vst [vmem:[%s5243_s24 + $0x74] sm:$0xf] %v4369_v9 }
  0x39   : > { %4372 = vst [vmem:[%s5243_s24 + $0x80] sm:$0xf] %v4371_v10  ;;  %v4373_v11 = vld [vmem:[%s5238_s23 + $0x194] sm:$0xf]  ;;  %v4375_v12 = vld [vmem:[%s5238_s23 + $0x1b8] sm:$0xf] }
  0x3a   : > { %v4377_v13 = vld [vmem:[%s5238_s23 + $0x1dc] sm:$0xf]  ;;  %4374 = vst [vmem:[%s5243_s24 + $0x8c] sm:$0xf] %v4373_v11  ;;  %4376 = vst [vmem:[%s5243_s24 + $0x98] sm:$0xf] %v4375_v12 }
  0x3b   : > { %4378 = vst [vmem:[%s5243_s24 + $0xa4] sm:$0xf] %v4377_v13  ;;  %v4379_v14 = vld [vmem:[%s5238_s23 + $0x200] sm:$0xf]  ;;  %v4381_v15 = vld [vmem:[%s5238_s23 + $0x224] sm:$0xf] }
  0x3c   : > { %v4383_v16 = vld [vmem:[%s5238_s23 + $0x248] sm:$0xf]  ;;  %4380 = vst [vmem:[%s5243_s24 + $0xb0] sm:$0xf] %v4379_v14  ;;  %4382 = vst [vmem:[%s5243_s24 + $0xbc] sm:$0xf] %v4381_v15 }
  0x3d   : > { %4384 = vst [vmem:[%s5243_s24 + $0xc8] sm:$0xf] %v4383_v16  ;;  %v4385_v17 = vld [vmem:[%s5238_s23 + $0x26c] sm:$0xf]  ;;  %v4387_v18 = vld [vmem:[%s5238_s23 + $0x290] sm:$0xf] }
  0x3e   : > { %v4389_v19 = vld [vmem:[%s5238_s23 + $0x2b4] sm:$0xf]  ;;  %4386 = vst [vmem:[%s5243_s24 + $0xd4] sm:$0xf] %v4385_v17  ;;  %4388 = vst [vmem:[%s5243_s24 + $0xe0] sm:$0xf] %v4387_v18 }
  0x3f   : > { %4390 = vst [vmem:[%s5243_s24 + $0xec] sm:$0xf] %v4389_v19  ;;  %v4391_v20 = vld [vmem:[%s5238_s23 + $0x2d8] sm:$0xf]  ;;  %v4393_v21 = vld [vmem:[%s5238_s23 + $0x2fc] sm:$0xf] }
  0x40   : > { %v4395_v22 = vld [vmem:[%s5238_s23 + $0x320] sm:$0xf]  ;;  %4392 = vst [vmem:[%s5243_s24 + $0xf8] sm:$0xf] %v4391_v20  ;;  %4394 = vst [vmem:[%s5243_s24 + $0x104] sm:$0xf] %v4393_v21 }
  0x41   : > { %4396 = vst [vmem:[%s5243_s24 + $0x110] sm:$0xf] %v4395_v22  ;;  %v4397_v23 = vld [vmem:[%s5238_s23 + $0x344] sm:$0xf]  ;;  %v4399_v24 = vld [vmem:[%s5238_s23 + $0x368] sm:$0xf] }
  0x42   : > { %v4401_v25 = vld [vmem:[%s5238_s23 + $0x38c] sm:$0xf]  ;;  %4398 = vst [vmem:[%s5243_s24 + $0x11c] sm:$0xf] %v4397_v23  ;;  %4400 = vst [vmem:[%s5243_s24 + $0x128] sm:$0xf] %v4399_v24 }
  0x43   : > { %4402 = vst [vmem:[%s5243_s24 + $0x134] sm:$0xf] %v4401_v25  ;;  %v4403_v26 = vld [vmem:[%s5238_s23 + $0x3b0] sm:$0xf]  ;;  %v4405_v27 = vld [vmem:[%s5238_s23 + $0x3d4] sm:$0xf] }
  0x44   : > { %v4407_v28 = vld [vmem:[%s5238_s23 + $0x3f8] sm:$0xf]  ;;  %4404 = vst [vmem:[%s5243_s24 + $0x140] sm:$0xf] %v4403_v26  ;;  %4406 = vst [vmem:[%s5243_s24 + $0x14c] sm:$0xf] %v4405_v27 }
  0x45   : > { %4408 = vst [vmem:[%s5243_s24 + $0x158] sm:$0xf] %v4407_v28  ;;  %v4409_v29 = vld [vmem:[%s5238_s23 + $0x41c] sm:$0xf]  ;;  %v4411_v30 = vld [vmem:[%s5238_s23 + $0x440] sm:$0xf] }
  0x46   : > { %v4413_v31 = vld [vmem:[%s5238_s23 + $0x464] sm:$0xf]  ;;  %4410 = vst [vmem:[%s5243_s24 + $0x164] sm:$0xf] %v4409_v29  ;;  %4412 = vst [vmem:[%s5243_s24 + $0x170] sm:$0xf] %v4411_v30 }
  0x47   : > { %4414 = vst [vmem:[%s5243_s24 + $0x17c] sm:$0xf] %v4413_v31  ;;  %v4415_v32 = vld [vmem:[%s5238_s23 + $0x488] sm:$0xf]  ;;  %v4417_v33 = vld [vmem:[%s5238_s23 + $0x4ac] sm:$0xf] }
  0x48   : > { %v4419_v34 = vld [vmem:[%s5238_s23 + $0x4d0] sm:$0xf]  ;;  %4416 = vst [vmem:[%s5243_s24 + $0x188] sm:$0xf] %v4415_v32  ;;  %4418 = vst [vmem:[%s5243_s24 + $0x194] sm:$0xf] %v4417_v33 }
  0x49   : > { %4420 = vst [vmem:[%s5243_s24 + $0x1a0] sm:$0xf] %v4419_v34  ;;  %v4421_v35 = vld [vmem:[%s5238_s23 + $0x4f4] sm:$0xf]  ;;  %v4423_v36 = vld [vmem:[%s5238_s23 + $0x518] sm:$0xf] }
  0x4a   : > { %v4425_v37 = vld [vmem:[%s5238_s23 + $0x53c] sm:$0xf]  ;;  %4422 = vst [vmem:[%s5243_s24 + $0x1ac] sm:$0xf] %v4421_v35  ;;  %4424 = vst [vmem:[%s5243_s24 + $0x1b8] sm:$0xf] %v4423_v36 }
  0x4b   : > { %4426 = vst [vmem:[%s5243_s24 + $0x1c4] sm:$0xf] %v4425_v37  ;;  %v4427_v38 = vld [vmem:[%s5238_s23 + $0x560] sm:$0xf]  ;;  %v4429_v39 = vld [vmem:[%s5238_s23 + $0x584] sm:$0xf] }
  0x4c   : > { %v4431_v40 = vld [vmem:[%s5238_s23 + $0x5a8] sm:$0xf]  ;;  %4428 = vst [vmem:[%s5243_s24 + $0x1d0] sm:$0xf] %v4427_v38  ;;  %4430 = vst [vmem:[%s5243_s24 + $0x1dc] sm:$0xf] %v4429_v39 }
  0x4d   : > { %4432 = vst [vmem:[%s5243_s24 + $0x1e8] sm:$0xf] %v4431_v40  ;;  %v4433_v41 = vld [vmem:[%s5238_s23 + $0x5cc] sm:$0xf]  ;;  %v4435_v42 = vld [vmem:[%s5238_s23 + $0x5f0] sm:$0xf] }
  0x4e   : > { %v4437_v43 = vld [vmem:[%s5238_s23 + $0x614] sm:$0xf]  ;;  %4434 = vst [vmem:[%s5243_s24 + $0x1f4] sm:$0xf] %v4433_v41  ;;  %4436 = vst [vmem:[%s5243_s24 + $0x200] sm:$0xf] %v4435_v42 }
  0x4f   : > { %4438 = vst [vmem:[%s5243_s24 + $0x20c] sm:$0xf] %v4437_v43  ;;  %v4439_v44 = vld [vmem:[%s5238_s23 + $0x638] sm:$0xf]  ;;  %v4441_v45 = vld [vmem:[%s5238_s23 + $0x65c] sm:$0xf] }
  0x50   : > { %v4443_v46 = vld [vmem:[%s5238_s23 + $0x680] sm:$0xf]  ;;  %4440 = vst [vmem:[%s5243_s24 + $0x218] sm:$0xf] %v4439_v44  ;;  %4442 = vst [vmem:[%s5243_s24 + $0x224] sm:$0xf] %v4441_v45 }
  0x51   : > { %4444 = vst [vmem:[%s5243_s24 + $0x230] sm:$0xf] %v4443_v46  ;;  %v4445_v47 = vld [vmem:[%s5238_s23 + $0x6a4] sm:$0xf]  ;;  %v4447_v48 = vld [vmem:[%s5238_s23 + $0x6c8] sm:$0xf] }
  0x52   : > { %v4449_v49 = vld [vmem:[%s5238_s23 + $0x6ec] sm:$0xf]  ;;  %4446 = vst [vmem:[%s5243_s24 + $0x23c] sm:$0xf] %v4445_v47  ;;  %4448 = vst [vmem:[%s5243_s24 + $0x248] sm:$0xf] %v4447_v48 }
  0x53   : > { %4450 = vst [vmem:[%s5243_s24 + $0x254] sm:$0xf] %v4449_v49  ;;  %v4451_v50 = vld [vmem:[%s5238_s23 + $0x710] sm:$0xf]  ;;  %v4453_v51 = vld [vmem:[%s5238_s23 + $0x734] sm:$0xf] }
  0x54   : > { %v4455_v52 = vld [vmem:[%s5238_s23 + $0x758] sm:$0xf]  ;;  %4452 = vst [vmem:[%s5243_s24 + $0x260] sm:$0xf] %v4451_v50  ;;  %4454 = vst [vmem:[%s5243_s24 + $0x26c] sm:$0xf] %v4453_v51 }
  0x55   : > { %4456 = vst [vmem:[%s5243_s24 + $0x278] sm:$0xf] %v4455_v52  ;;  %v4457_v53 = vld [vmem:[%s5238_s23 + $0x77c] sm:$0xf]  ;;  %v4459_v54 = vld [vmem:[%s5238_s23 + $0x7a0] sm:$0xf] }
  0x56   : > { %v4461_v55 = vld [vmem:[%s5238_s23 + $0x7c4] sm:$0xf]  ;;  %4458 = vst [vmem:[%s5243_s24 + $0x284] sm:$0xf] %v4457_v53  ;;  %4460 = vst [vmem:[%s5243_s24 + $0x290] sm:$0xf] %v4459_v54 }
  0x57   : > { %4462 = vst [vmem:[%s5243_s24 + $0x29c] sm:$0xf] %v4461_v55  ;;  %v4463_v56 = vld [vmem:[%s5238_s23 + $0x7e8] sm:$0xf]  ;;  %v4465_v57 = vld [vmem:[%s5238_s23 + $0x80c] sm:$0xf] }
  0x58   : > { %v4467_v58 = vld [vmem:[%s5238_s23 + $0x830] sm:$0xf]  ;;  %4464 = vst [vmem:[%s5243_s24 + $0x2a8] sm:$0xf] %v4463_v56  ;;  %4466 = vst [vmem:[%s5243_s24 + $0x2b4] sm:$0xf] %v4465_v57 }
  0x59   : > { %4468 = vst [vmem:[%s5243_s24 + $0x2c0] sm:$0xf] %v4467_v58  ;;  %v4469_v59 = vld [vmem:[%s5238_s23 + $0x854] sm:$0xf]  ;;  %v4471_v60 = vld [vmem:[%s5238_s23 + $0x878] sm:$0xf] }
  0x5a   : > { %v4473_v61 = vld [vmem:[%s5238_s23 + $0x89c] sm:$0xf]  ;;  %4470 = vst [vmem:[%s5243_s24 + $0x2cc] sm:$0xf] %v4469_v59  ;;  %4472 = vst [vmem:[%s5243_s24 + $0x2d8] sm:$0xf] %v4471_v60 }
  0x5b   : > { %4474 = vst [vmem:[%s5243_s24 + $0x2e4] sm:$0xf] %v4473_v61  ;;  %v4475_v62 = vld [vmem:[%s5238_s23 + $0x8c0] sm:$0xf]  ;;  %v4477_v63 = vld [vmem:[%s5238_s23 + $0x8e4] sm:$0xf] }
  0x5c   : > { %4476 = vst [vmem:[%s5243_s24 + $0x2f0] sm:$0xf] %v4475_v62  ;;  %4478 = vst [vmem:[%s5243_s24 + $0x2fc] sm:$0xf] %v4477_v63 }
  0x5d PF: > { %p4479_p6 = scmp.ge.s32.totalorder %s5176_s13, 1  ;;  %p423_p7 = scmp.lt.s32.totalorder %s5176_s13, 4 }
  0x5f   : > { %p424_p8 = pnand %p4479_p6, %p423_p7 }
  0x60   : > { %s430_s25 = sand.u32 (!%p424_p8), 1, %s5160_s9   ;;  %s460_s26 = smul.u32 (!%p424_p8), 48, %s5168_s11 }
  0x61   : > { %427 = sbr.rel (%p424_p8) target bundleno = 1157 (0x485), region = 50  ;;  %p4482_p10 = scmp.ne.s32.totalorder (!%p424_p8), %s5168_s11, 0 }
  0x62   : > { %s4891_s27 = smul.u32 (!%p424_p8), 768, %s430_s25  ;;  %p461_p9 = scmp.lt.s32.totalorder (!%p424_p8), %s460_s26, 143 }
  0x64   : > { %s5507_s4 = scalar_lea.vmem (!%p424_p8), [#allocation3], %s4891_s27 }
  0x68   : > { %s8097_s26 = smov (!%p461_p9, %s460_s26), 143  ;;  %478 = sbr.rel (%p4482_p10) target bundleno = 170 (0xaa), region = 58 }
  0x69   : > { %s4697_s28 = sshll.u32 %s8097_s26, 3  ;;  %v5178_v0 = vmov (!%p4482_p10), 0.0  }
  0x6a   : > { %s5505_s3 = scalar_lea.vmem %s7563_s1, %s4697_s28  ;;  %479 = vst [vmem:[#allocation2] sm:$0xff] (!%p4482_p10), %v5178_v0  ;;  %480 = vst [vmem:[#allocation2 + $0x8] sm:$0xff] (!%p4482_p10), %v5178_v0 }
  0x6b   : > { %481 = vst [vmem:[#allocation2 + $0x10] sm:$0xff] (!%p4482_p10), %v5178_v0  ;;  %482 = vst [vmem:[#allocation2 + $0x18] sm:$0xff] (!%p4482_p10), %v5178_v0 }
  0x6c   : > { %483 = vst [vmem:[#allocation2 + $0x20] sm:$0xff] (!%p4482_p10), %v5178_v0  ;;  %484 = vst [vmem:[#allocation2 + $0x28] sm:$0xff] (!%p4482_p10), %v5178_v0 }
  0x6d   : > { %485 = vst [vmem:[#allocation2 + $0x30] sm:$0xff] (!%p4482_p10), %v5178_v0  ;;  %486 = vst [vmem:[#allocation2 + $0x38] sm:$0xff] (!%p4482_p10), %v5178_v0 }
  0x6e   : > { %487 = vst [vmem:[#allocation2 + $0x40] sm:$0xff] (!%p4482_p10), %v5178_v0  ;;  %488 = vst [vmem:[#allocation2 + $0x48] sm:$0xff] (!%p4482_p10), %v5178_v0 }
  0x6f   : > { %489 = vst [vmem:[#allocation2 + $0x50] sm:$0xff] %v5178_v0  ;;  %490 = vst [vmem:[#allocation2 + $0x58] sm:$0xff] %v5178_v0 }
  0x70   : > { %491 = vst [vmem:[#allocation2 + $0x60] sm:$0xff] %v5178_v0  ;;  %492 = vst [vmem:[#allocation2 + $0x68] sm:$0xff] %v5178_v0 }
  0x71   : > { %493 = vst [vmem:[#allocation2 + $0x70] sm:$0xff] %v5178_v0  ;;  %494 = vst [vmem:[#allocation2 + $0x78] sm:$0xff] %v5178_v0 }
  0x72   : > { %495 = vst [vmem:[#allocation2 + $0x80] sm:$0xff] %v5178_v0  ;;  %496 = vst [vmem:[#allocation2 + $0x88] sm:$0xff] %v5178_v0 }
  0x73   : > { %497 = vst [vmem:[#allocation2 + $0x90] sm:$0xff] %v5178_v0  ;;  %498 = vst [vmem:[#allocation2 + $0x98] sm:$0xff] %v5178_v0 }
  0x74   : > { %499 = vst [vmem:[#allocation2 + $0xa0] sm:$0xff] %v5178_v0  ;;  %500 = vst [vmem:[#allocation2 + $0xa8] sm:$0xff] %v5178_v0 }
  0x75   : > { %501 = vst [vmem:[#allocation2 + $0xb0] sm:$0xff] %v5178_v0  ;;  %502 = vst [vmem:[#allocation2 + $0xb8] sm:$0xff] %v5178_v0 }
  0x76   : > { %503 = vst [vmem:[#allocation2 + $0xc0] sm:$0xff] %v5178_v0  ;;  %504 = vst [vmem:[#allocation2 + $0xc8] sm:$0xff] %v5178_v0 }
  0x77   : > { %505 = vst [vmem:[#allocation2 + $0xd0] sm:$0xff] %v5178_v0  ;;  %506 = vst [vmem:[#allocation2 + $0xd8] sm:$0xff] %v5178_v0 }
  0x78   : > { %507 = vst [vmem:[#allocation2 + $0xe0] sm:$0xff] %v5178_v0  ;;  %508 = vst [vmem:[#allocation2 + $0xe8] sm:$0xff] %v5178_v0 }
  0x79   : > { %509 = vst [vmem:[#allocation2 + $0xf0] sm:$0xff] %v5178_v0  ;;  %510 = vst [vmem:[#allocation2 + $0xf8] sm:$0xff] %v5178_v0 }
  0x7a   : > { %511 = vst [vmem:[#allocation2 + $0x100] sm:$0xff] %v5178_v0  ;;  %512 = vst [vmem:[#allocation2 + $0x108] sm:$0xff] %v5178_v0 }
  0x7b   : > { %513 = vst [vmem:[#allocation2 + $0x110] sm:$0xff] %v5178_v0  ;;  %514 = vst [vmem:[#allocation2 + $0x118] sm:$0xff] %v5178_v0 }
  0x7c   : > { %515 = vst [vmem:[#allocation2 + $0x120] sm:$0xff] %v5178_v0  ;;  %516 = vst [vmem:[#allocation2 + $0x128] sm:$0xff] %v5178_v0 }
  0x7d   : > { %517 = vst [vmem:[#allocation2 + $0x130] sm:$0xff] %v5178_v0  ;;  %518 = vst [vmem:[#allocation2 + $0x138] sm:$0xff] %v5178_v0 }
  0x7e   : > { %519 = vst [vmem:[#allocation2 + $0x140] sm:$0xff] %v5178_v0  ;;  %520 = vst [vmem:[#allocation2 + $0x148] sm:$0xff] %v5178_v0 }
  0x7f   : > { %521 = vst [vmem:[#allocation2 + $0x150] sm:$0xff] %v5178_v0  ;;  %522 = vst [vmem:[#allocation2 + $0x158] sm:$0xff] %v5178_v0 }
  0x80   : > { %523 = vst [vmem:[#allocation2 + $0x160] sm:$0xff] %v5178_v0  ;;  %524 = vst [vmem:[#allocation2 + $0x168] sm:$0xff] %v5178_v0 }
  0x81   : > { %525 = vst [vmem:[#allocation2 + $0x170] sm:$0xff] %v5178_v0  ;;  %526 = vst [vmem:[#allocation2 + $0x178] sm:$0xff] %v5178_v0 }
  0x82   : > { %527 = vst [vmem:[#allocation2 + $0x180] sm:$0xff] %v5178_v0  ;;  %528 = vst [vmem:[#allocation2 + $0x188] sm:$0xff] %v5178_v0 }
  0x83   : > { %529 = vst [vmem:[#allocation2 + $0x190] sm:$0xff] %v5178_v0  ;;  %530 = vst [vmem:[#allocation2 + $0x198] sm:$0xff] %v5178_v0 }
  0x84   : > { %531 = vst [vmem:[#allocation2 + $0x1a0] sm:$0xff] %v5178_v0  ;;  %532 = vst [vmem:[#allocation2 + $0x1a8] sm:$0xff] %v5178_v0 }
  0x85   : > { %533 = vst [vmem:[#allocation2 + $0x1b0] sm:$0xff] %v5178_v0  ;;  %534 = vst [vmem:[#allocation2 + $0x1b8] sm:$0xff] %v5178_v0 }
  0x86   : > { %535 = vst [vmem:[#allocation2 + $0x1c0] sm:$0xff] %v5178_v0  ;;  %536 = vst [vmem:[#allocation2 + $0x1c8] sm:$0xff] %v5178_v0 }
  0x87   : > { %537 = vst [vmem:[#allocation2 + $0x1d0] sm:$0xff] %v5178_v0  ;;  %538 = vst [vmem:[#allocation2 + $0x1d8] sm:$0xff] %v5178_v0 }
  0x88   : > { %539 = vst [vmem:[#allocation2 + $0x1e0] sm:$0xff] %v5178_v0  ;;  %540 = vst [vmem:[#allocation2 + $0x1e8] sm:$0xff] %v5178_v0 }
  0x89   : > { %541 = vst [vmem:[#allocation2 + $0x1f0] sm:$0xff] %v5178_v0  ;;  %542 = vst [vmem:[#allocation2 + $0x1f8] sm:$0xff] %v5178_v0 }
  0x8a   : > { %543 = vst [vmem:[#allocation2 + $0x200] sm:$0xff] %v5178_v0  ;;  %544 = vst [vmem:[#allocation2 + $0x208] sm:$0xff] %v5178_v0 }
  0x8b   : > { %545 = vst [vmem:[#allocation2 + $0x210] sm:$0xff] %v5178_v0  ;;  %546 = vst [vmem:[#allocation2 + $0x218] sm:$0xff] %v5178_v0 }
  0x8c   : > { %547 = vst [vmem:[#allocation2 + $0x220] sm:$0xff] %v5178_v0  ;;  %548 = vst [vmem:[#allocation2 + $0x228] sm:$0xff] %v5178_v0 }
  0x8d   : > { %549 = vst [vmem:[#allocation2 + $0x230] sm:$0xff] %v5178_v0  ;;  %550 = vst [vmem:[#allocation2 + $0x238] sm:$0xff] %v5178_v0 }
  0x8e   : > { %551 = vst [vmem:[#allocation2 + $0x240] sm:$0xff] %v5178_v0  ;;  %552 = vst [vmem:[#allocation2 + $0x248] sm:$0xff] %v5178_v0 }
  0x8f   : > { %553 = vst [vmem:[#allocation2 + $0x250] sm:$0xff] %v5178_v0  ;;  %554 = vst [vmem:[#allocation2 + $0x258] sm:$0xff] %v5178_v0 }
  0x90   : > { %555 = vst [vmem:[#allocation2 + $0x260] sm:$0xff] %v5178_v0  ;;  %556 = vst [vmem:[#allocation2 + $0x268] sm:$0xff] %v5178_v0 }
  0x91   : > { %557 = vst [vmem:[#allocation2 + $0x270] sm:$0xff] %v5178_v0  ;;  %558 = vst [vmem:[#allocation2 + $0x278] sm:$0xff] %v5178_v0 }
  0x92   : > { %559 = vst [vmem:[#allocation2 + $0x280] sm:$0xff] %v5178_v0  ;;  %560 = vst [vmem:[#allocation2 + $0x288] sm:$0xff] %v5178_v0 }
  0x93   : > { %561 = vst [vmem:[#allocation2 + $0x290] sm:$0xff] %v5178_v0  ;;  %562 = vst [vmem:[#allocation2 + $0x298] sm:$0xff] %v5178_v0 }
  0x94   : > { %563 = vst [vmem:[#allocation2 + $0x2a0] sm:$0xff] %v5178_v0  ;;  %564 = vst [vmem:[#allocation2 + $0x2a8] sm:$0xff] %v5178_v0 }
  0x95   : > { %565 = vst [vmem:[#allocation2 + $0x2b0] sm:$0xff] %v5178_v0  ;;  %566 = vst [vmem:[#allocation2 + $0x2b8] sm:$0xff] %v5178_v0 }
  0x96   : > { %567 = vst [vmem:[#allocation2 + $0x2c0] sm:$0xff] %v5178_v0  ;;  %568 = vst [vmem:[#allocation2 + $0x2c8] sm:$0xff] %v5178_v0 }
  0x97   : > { %569 = vst [vmem:[#allocation2 + $0x2d0] sm:$0xff] %v5178_v0  ;;  %570 = vst [vmem:[#allocation2 + $0x2d8] sm:$0xff] %v5178_v0 }
  0x98   : > { %571 = vst [vmem:[#allocation2 + $0x2e0] sm:$0xff] %v5178_v0  ;;  %572 = vst [vmem:[#allocation2 + $0x2e8] sm:$0xff] %v5178_v0 }
  0x99   : > { %573 = vst [vmem:[#allocation2 + $0x2f0] sm:$0xff] %v5178_v0  ;;  %574 = vst [vmem:[#allocation2 + $0x2f8] sm:$0xff] %v5178_v0 }
  0x9a   : > { %575 = vst [vmem:[#allocation2 + $0x300] sm:$0xff] %v5178_v0  ;;  %576 = vst [vmem:[#allocation2 + $0x308] sm:$0xff] %v5178_v0 }
  0x9b   : > { %577 = vst [vmem:[#allocation2 + $0x310] sm:$0xff] %v5178_v0  ;;  %578 = vst [vmem:[#allocation2 + $0x318] sm:$0xff] %v5178_v0 }
  0x9c   : > { %579 = vst [vmem:[#allocation2 + $0x320] sm:$0xff] %v5178_v0  ;;  %580 = vst [vmem:[#allocation2 + $0x328] sm:$0xff] %v5178_v0 }
  0x9d   : > { %581 = vst [vmem:[#allocation2 + $0x330] sm:$0xff] %v5178_v0  ;;  %582 = vst [vmem:[#allocation2 + $0x338] sm:$0xff] %v5178_v0 }
  0x9e   : > { %583 = vst [vmem:[#allocation2 + $0x340] sm:$0xff] %v5178_v0  ;;  %584 = vst [vmem:[#allocation2 + $0x348] sm:$0xff] %v5178_v0 }
  0x9f   : > { %585 = vst [vmem:[#allocation2 + $0x350] sm:$0xff] %v5178_v0  ;;  %586 = vst [vmem:[#allocation2 + $0x358] sm:$0xff] %v5178_v0 }
  0xa0   : > { %587 = vst [vmem:[#allocation2 + $0x360] sm:$0xff] %v5178_v0  ;;  %588 = vst [vmem:[#allocation2 + $0x368] sm:$0xff] %v5178_v0 }
  0xa1   : > { %589 = vst [vmem:[#allocation2 + $0x370] sm:$0xff] %v5178_v0  ;;  %590 = vst [vmem:[#allocation2 + $0x378] sm:$0xff] %v5178_v0 }
  0xa2   : > { %591 = vst [vmem:[#allocation2 + $0x380] sm:$0xff] %v5178_v0  ;;  %592 = vst [vmem:[#allocation2 + $0x388] sm:$0xff] %v5178_v0 }
  0xa3   : > { %593 = vst [vmem:[#allocation2 + $0x390] sm:$0xff] %v5178_v0  ;;  %594 = vst [vmem:[#allocation2 + $0x398] sm:$0xff] %v5178_v0 }
  0xa4   : > { %595 = vst [vmem:[#allocation2 + $0x3a0] sm:$0xff] %v5178_v0  ;;  %596 = vst [vmem:[#allocation2 + $0x3a8] sm:$0xff] %v5178_v0 }
  0xa5   : > { %597 = vst [vmem:[#allocation2 + $0x3b0] sm:$0xff] %v5178_v0  ;;  %598 = vst [vmem:[#allocation2 + $0x3b8] sm:$0xff] %v5178_v0 }
  0xa6   : > { %599 = vst [vmem:[#allocation2 + $0x3c0] sm:$0xff] %v5178_v0  ;;  %600 = vst [vmem:[#allocation2 + $0x3c8] sm:$0xff] %v5178_v0 }
  0xa7   : > { %601 = vst [vmem:[#allocation2 + $0x3d0] sm:$0xff] %v5178_v0  ;;  %602 = vst [vmem:[#allocation2 + $0x3d8] sm:$0xff] %v5178_v0 }
  0xa8   : > { %603 = vst [vmem:[#allocation2 + $0x3e0] sm:$0xff] %v5178_v0  ;;  %604 = vst [vmem:[#allocation2 + $0x3e8] sm:$0xff] %v5178_v0 }
  0xa9   : > { %605 = vst [vmem:[#allocation2 + $0x3f0] sm:$0xff] %v5178_v0  ;;  %606 = vst [vmem:[#allocation2 + $0x3f8] sm:$0xff] %v5178_v0 }
  0xaa PF: > { %v4934_v1 = vld [vmem:[%s5505_s3 + $0x4] ss:$8 sps:$4 sm:$0xff]   ;;  %v4936_v2 = vld [vmem:[%s5505_s3] ss:$8 sps:$4 sm:$0xff]   ;;  %v5179_v3 = vmov 0   ;;  %p4627_p11 = scmp.ne.s32.totalorder %s5168_s11, 2 }
  0xab   : > { %2048 = vmatprep.mubr.bf16.mxu0 %v5179_v3  ;;  %1663 = vmatprep.subr.bf16.mxu1 %v4934_v1  ;;  %v4937_v4 = vld [vmem:[%s5505_s3 + $0x14] ss:$8 sps:$4 sm:$0xff]   ;;  %v4939_v5 = vld [vmem:[%s5505_s3 + $0x10] ss:$8 sps:$4 sm:$0xff]   ;;  %v4940_v6 = vld [vmem:[%s5505_s3 + $0x24] ss:$8 sps:$4 sm:$0xff]  }
  0xac   : > { %1664 = vmatpush1.bf16.msra.mxu1 %v4936_v2  ;;  %v4942_v7 = vld [vmem:[%s5505_s3 + $0x20] ss:$8 sps:$4 sm:$0xff]   ;;  %v4943_v8 = vld [vmem:[%s5505_s3 + $0x34] ss:$8 sps:$4 sm:$0xff]   ;;  %v4945_v9 = vld [vmem:[%s5505_s3 + $0x30] ss:$8 sps:$4 sm:$0xff]  }
  0xad   : > { %1665 = vmatprep.subr.bf16.mxu1 %v4937_v4  ;;  %v4958_v10 = vld [vmem:[%s5505_s3 + $0x104] ss:$8 sps:$4 sm:$0xff]   ;;  %v4960_v11 = vld [vmem:[%s5505_s3 + $0x100] ss:$8 sps:$4 sm:$0xff]   ;;  %v4964_v13 = vld [vmem:[%s5505_s3 + $0x114] ss:$8 sps:$4 sm:$0xff]  }
  0xae   : > { %v4946_v12 = vld [vmem:[%s5505_s3 + $0x44] ss:$8 sps:$4 sm:$0xff]   ;;  %2016 = vmatprep.subr.bf16.mxu0 %v4958_v10  ;;  %v4966_v14 = vld [vmem:[%s5505_s3 + $0x110] ss:$8 sps:$4 sm:$0xff]   ;;  %v4948_v15 = vld [vmem:[%s5505_s3 + $0x40] ss:$8 sps:$4 sm:$0xff]  }
  0xaf   : > { %2017 = vmatpush1.bf16.msra.mxu0 %v4960_v11  ;;  %v4949_v16 = vld [vmem:[%s5505_s3 + $0x54] ss:$8 sps:$4 sm:$0xff]   ;;  %v4970_v17 = vld [vmem:[%s5505_s3 + $0x124] ss:$8 sps:$4 sm:$0xff]   ;;  %v4972_v18 = vld [vmem:[%s5505_s3 + $0x120] ss:$8 sps:$4 sm:$0xff]  }
  0xb0   : > { %1666 = vmatpush1.bf16.msra.mxu1 %v4939_v5  ;;  %2018 = vmatprep.subr.bf16.mxu0 %v4964_v13  ;;  %v4951_v19 = vld [vmem:[%s5505_s3 + $0x50] ss:$8 sps:$4 sm:$0xff]   ;;  %v4976_v20 = vld [vmem:[%s5505_s3 + $0x134] ss:$8 sps:$4 sm:$0xff]   ;;  %v4952_v21 = vld [vmem:[%s5505_s3 + $0x64] ss:$8 sps:$4 sm:$0xff]  }
  0xb1   : > { %1667 = vmatprep.subr.bf16.mxu1 %v4940_v6  ;;  %v4978_v22 = vld [vmem:[%s5505_s3 + $0x130] ss:$8 sps:$4 sm:$0xff]   ;;  %v4954_v23 = vld [vmem:[%s5505_s3 + $0x60] ss:$8 sps:$4 sm:$0xff]   ;;  %v4982_v24 = vld [vmem:[%s5505_s3 + $0x144] ss:$8 sps:$4 sm:$0xff]  }
  0xb2   : > { %v4955_v25 = vld [vmem:[%s5505_s3 + $0x74] ss:$8 sps:$4 sm:$0xff]   ;;  %v4984_v26 = vld [vmem:[%s5505_s3 + $0x140] ss:$8 sps:$4 sm:$0xff]   ;;  %v4957_v27 = vld [vmem:[%s5505_s3 + $0x70] ss:$8 sps:$4 sm:$0xff]  }
  0xb3   : > { %2019 = vmatpush1.bf16.msra.mxu0 %v4966_v14  ;;  %v4988_v28 = vld [vmem:[%s5505_s3 + $0x154] ss:$8 sps:$4 sm:$0xff]   ;;  %v4961_v29 = vld [vmem:[%s5505_s3 + $0x84] ss:$8 sps:$4 sm:$0xff]   ;;  %v4990_v30 = vld [vmem:[%s5505_s3 + $0x150] ss:$8 sps:$4 sm:$0xff]  }
  0xb4   : > { %1668 = vmatpush1.bf16.msra.mxu1 %v4942_v7  ;;  %2020 = vmatprep.subr.bf16.mxu0 %v4970_v17  ;;  %v4963_v31 = vld [vmem:[%s5505_s3 + $0x80] ss:$8 sps:$4 sm:$0xff]   ;;  %v4994_v32 = vld [vmem:[%s5505_s3 + $0x164] ss:$8 sps:$4 sm:$0xff]   ;;  %v4967_v33 = vld [vmem:[%s5505_s3 + $0x94] ss:$8 sps:$4 sm:$0xff]  }
  0xb5   : > { %1669 = vmatprep.subr.bf16.mxu1 %v4943_v8  ;;  %v4969_v34 = vld [vmem:[%s5505_s3 + $0x90] ss:$8 sps:$4 sm:$0xff]   ;;  %v4996_v35 = vld [vmem:[%s5505_s3 + $0x160] ss:$8 sps:$4 sm:$0xff]   ;;  %v5000_v37 = vld [vmem:[%s5505_s3 + $0x174] ss:$8 sps:$4 sm:$0xff]  }
  0xb6   : > { %v5009_v36 = vld [vmem:[%s5507_s4 + $0x4] ss:$12 sps:$4 sm:$0xff]   ;;  %v4975_v40 = vld [vmem:[%s5505_s3 + $0xa0] ss:$8 sps:$4 sm:$0xff]   ;;  %v4979_v41 = vld [vmem:[%s5505_s3 + $0xb4] ss:$8 sps:$4 sm:$0xff]  }
  0xb7   : > { %2021 = vmatpush1.bf16.msra.mxu0 %v4972_v18  ;;  %v4973_v38 = vld [vmem:[%s5505_s3 + $0xa4] ss:$8 sps:$4 sm:$0xff]   ;;  %1695 = vmatprep.mubr.bf16.mxu1 %v5009_v36  ;;  %v5002_v39 = vld [vmem:[%s5505_s3 + $0x170] ss:$8 sps:$4 sm:$0xff]   ;;  %v5006_v42 = vld [vmem:[%s5507_s4 + $0x8] ss:$12 sps:$4 sm:$0xff]  }
  0xb8   : > { %1670 = vmatpush1.bf16.msra.mxu1 %v4945_v9  ;;  %2022 = vmatprep.subr.bf16.mxu0 %v4976_v20  ;;  %v4981_v43 = vld [vmem:[%s5505_s3 + $0xb0] ss:$8 sps:$4 sm:$0xff]   ;;  %v4985_v44 = vld [vmem:[%s5505_s3 + $0xc4] ss:$8 sps:$4 sm:$0xff]   ;;  %v4987_v45 = vld [vmem:[%s5505_s3 + $0xc0] ss:$8 sps:$4 sm:$0xff]  }
  0xb9   : > { %1671 = vmatprep.subr.bf16.mxu1 %v4946_v12  ;;  %v4991_v46 = vld [vmem:[%s5505_s3 + $0xd4] ss:$8 sps:$4 sm:$0xff]   ;;  %v5010_v47 = vld [vmem:[%s5507_s4 + $0x20] ss:$12 sps:$4 sm:$0xff]   ;;  %v4993_v48 = vld [vmem:[%s5505_s3 + $0xd0] ss:$8 sps:$4 sm:$0xff]  }
  0xba   : > { %v4997_v49 = vld [vmem:[%s5505_s3 + $0xe4] ss:$8 sps:$4 sm:$0xff]   ;;  %v4999_v50 = vld [vmem:[%s5505_s3 + $0xe0] ss:$8 sps:$4 sm:$0xff]   ;;  %v5003_v51 = vld [vmem:[%s5505_s3 + $0xf4] ss:$8 sps:$4 sm:$0xff]  }
  0xbb   : > { %2023 = vmatpush1.bf16.msra.mxu0 %v4978_v22  ;;  %v5014_v52 = vld [vmem:[%s5507_s4 + $0x38] ss:$12 sps:$4 sm:$0xff]   ;;  %v5007_v54 = vld [vmem:[%s5507_s4] ss:$12 sps:$4 sm:$0xff]   ;;  %v5011_v55 = vld [vmem:[%s5507_s4 + $0x1c] ss:$12 sps:$4 sm:$0xff]  }
  0xbc   : > { %1672 = vmatpush1.bf16.msra.mxu1 %v4948_v15  ;;  %2024 = vmatprep.subr.bf16.mxu0 %v4982_v24  ;;  %v5005_v53 = vld [vmem:[%s5505_s3 + $0xf0] ss:$8 sps:$4 sm:$0xff]   ;;  %v5015_v58 = vld [vmem:[%s5507_s4 + $0x34] ss:$12 sps:$4 sm:$0xff]   ;;  %v5027_v4 = vld [vmem:[%s5507_s4 + $0x7c] ss:$12 sps:$4 sm:$0xff]  }
  0xbd   : > { %1673 = vmatprep.subr.bf16.mxu1 %v4949_v16  ;;  %v5018_v56 = vld [vmem:[%s5507_s4 + $0x50] ss:$12 sps:$4 sm:$0xff]   ;;  %v5013_v57 = vld [vmem:[%s5507_s4 + $0x18] ss:$12 sps:$4 sm:$0xff]   ;;  %v5022_v59 = vld [vmem:[%s5507_s4 + $0x68] ss:$12 sps:$4 sm:$0xff]  }
  0xbe   : > { %v5017_v60 = vld [vmem:[%s5507_s4 + $0x30] ss:$12 sps:$4 sm:$0xff]   ;;  %v5019_v61 = vld [vmem:[%s5507_s4 + $0x4c] ss:$12 sps:$4 sm:$0xff]   ;;  %v5021_v63 = vld [vmem:[%s5507_s4 + $0x48] ss:$12 sps:$4 sm:$0xff]  }
  0xbf   : > { %2025 = vmatpush1.bf16.msra.mxu0 %v4984_v26  ;;  %v5026_v62 = vld [vmem:[%s5507_s4 + $0x80] ss:$12 sps:$4 sm:$0xff]   ;;  %v5023_v0 = vld [vmem:[%s5507_s4 + $0x64] ss:$12 sps:$4 sm:$0xff]   ;;  %v5038_v8 = vld [vmem:[%s5507_s4 + $0xc8] ss:$12 sps:$4 sm:$0xff]  }
  0xc0   : > { %1674 = vmatpush1.bf16.msra.mxu1 %v4951_v19  ;;  %2026 = vmatprep.subr.bf16.mxu0 %v4988_v28  ;;  %v5030_v1 = vld [vmem:[%s5507_s4 + $0x98] ss:$12 sps:$4 sm:$0xff]   ;;  %v5025_v2 = vld [vmem:[%s5507_s4 + $0x60] ss:$12 sps:$4 sm:$0xff]   ;;  %v5034_v5 = vld [vmem:[%s5507_s4 + $0xb0] ss:$12 sps:$4 sm:$0xff]  }
  0xc1   : > { %1675 = vmatprep.subr.bf16.mxu1 %v4952_v21  ;;  %v5029_v6 = vld [vmem:[%s5507_s4 + $0x78] ss:$12 sps:$4 sm:$0xff]   ;;  %v5031_v7 = vld [vmem:[%s5507_s4 + $0x94] ss:$12 sps:$4 sm:$0xff]   ;;  %v5033_v9 = vld [vmem:[%s5507_s4 + $0x90] ss:$12 sps:$4 sm:$0xff]  }
  0xc2   : > { %v5035_v10 = vld [vmem:[%s5507_s4 + $0xac] ss:$12 sps:$4 sm:$0xff]   ;;  %v5037_v12 = vld [vmem:[%s5507_s4 + $0xa8] ss:$12 sps:$4 sm:$0xff]   ;;  %v5039_v13 = vld [vmem:[%s5507_s4 + $0xc4] ss:$12 sps:$4 sm:$0xff]  }
  0xc3   : > { %2027 = vmatpush1.bf16.msra.mxu0 %v4990_v30  ;;  %v5042_v11 = vld [vmem:[%s5507_s4 + $0xe0] ss:$12 sps:$4 sm:$0xff]   ;;  %v5046_v14 = vld [vmem:[%s5507_s4 + $0xf8] ss:$12 sps:$4 sm:$0xff]   ;;  %v5043_v16 = vld [vmem:[%s5507_s4 + $0xdc] ss:$12 sps:$4 sm:$0xff]  }
  0xc4   : > { %1676 = vmatpush1.bf16.msra.mxu1 %v4954_v23  ;;  %2028 = vmatprep.subr.bf16.mxu0 %v4994_v32  ;;  %v5041_v15 = vld [vmem:[%s5507_s4 + $0xc0] ss:$12 sps:$4 sm:$0xff]   ;;  %v5050_v17 = vld [vmem:[%s5507_s4 + $0x110] ss:$12 sps:$4 sm:$0xff]   ;;  %v5045_v18 = vld [vmem:[%s5507_s4 + $0xd8] ss:$12 sps:$4 sm:$0xff]  }
  0xc5   : > { %1677 = vmatprep.subr.bf16.mxu1 %v4955_v25  ;;  %v5047_v19 = vld [vmem:[%s5507_s4 + $0xf4] ss:$12 sps:$4 sm:$0xff]   ;;  %v5049_v21 = vld [vmem:[%s5507_s4 + $0xf0] ss:$12 sps:$4 sm:$0xff]   ;;  %v5051_v22 = vld [vmem:[%s5507_s4 + $0x10c] ss:$12 sps:$4 sm:$0xff]  }
  0xc6   : > { %v5054_v20 = vld [vmem:[%s5507_s4 + $0x128] ss:$12 sps:$4 sm:$0xff]   ;;  %v5058_v23 = vld [vmem:[%s5507_s4 + $0x140] ss:$12 sps:$4 sm:$0xff]   ;;  %v5055_v25 = vld [vmem:[%s5507_s4 + $0x124] ss:$12 sps:$4 sm:$0xff]  }
  0xc7   : > { %2029 = vmatpush1.bf16.msra.mxu0 %v4996_v35  ;;  %v5053_v24 = vld [vmem:[%s5507_s4 + $0x108] ss:$12 sps:$4 sm:$0xff]   ;;  %v5062_v26 = vld [vmem:[%s5507_s4 + $0x158] ss:$12 sps:$4 sm:$0xff]   ;;  %v5074_v35 = vld [vmem:[%s5507_s4 + $0x1a0] ss:$12 sps:$4 sm:$0xff]  }
  0xc8   : > { %1678 = vmatpush1.bf16.msra.mxu1 %v4957_v27  ;;  %2030 = vmatprep.subr.bf16.mxu0 %v5000_v37  ;;  %v5057_v27 = vld [vmem:[%s5507_s4 + $0x120] ss:$12 sps:$4 sm:$0xff]   ;;  %v5059_v28 = vld [vmem:[%s5507_s4 + $0x13c] ss:$12 sps:$4 sm:$0xff]   ;;  %v5061_v30 = vld [vmem:[%s5507_s4 + $0x138] ss:$12 sps:$4 sm:$0xff]  }
  0xc9   : > { %1679 = vmatprep.subr.bf16.mxu1 %v4961_v29  ;;  %v5066_v29 = vld [vmem:[%s5507_s4 + $0x170] ss:$12 sps:$4 sm:$0xff]   ;;  %v5070_v32 = vld [vmem:[%s5507_s4 + $0x188] ss:$12 sps:$4 sm:$0xff]  }
  0xca   : > { %v5069_v36 = vld [vmem:[%s5507_s4 + $0x168] ss:$12 sps:$4 sm:$0xff]   ;;  %v5071_v37 = vld [vmem:[%s5507_s4 + $0x184] ss:$12 sps:$4 sm:$0xff]  }
  0xcb   : > { %2031 = vmatpush1.bf16.msra.mxu0 %v5002_v39  ;;  %v5073_v39 = vld [vmem:[%s5507_s4 + $0x180] ss:$12 sps:$4 sm:$0xff]  }
  0xcc   : > { %1680 = vmatpush1.bf16.msra.mxu1 %v4963_v31  ;;  %v5063_v31 = vld [vmem:[%s5507_s4 + $0x154] ss:$12 sps:$4 sm:$0xff]  }
  0xcd   : > { %1681 = vmatprep.subr.bf16.mxu1 %v4967_v33  ;;  %v5065_v33 = vld [vmem:[%s5507_s4 + $0x150] ss:$12 sps:$4 sm:$0xff]  }
  0xce   : > { %2049 = vmatmul.mubr.bf16.vlgmr.msra.gmra.mrb[0].mxu0 %v5006_v42  ;;  %v5077_v42 = vld [vmem:[%s5507_s4 + $0x198] ss:$12 sps:$4 sm:$0xff]  }
  0xcf   : > { %2058 = vmatprep.mubr.bf16.mxu0 %v5179_v3 }
  0xd0   : > { %1682 = vmatpush1.bf16.msra.mxu1 %v4969_v34  ;;  %v5067_v34 = vld [vmem:[%s5507_s4 + $0x16c] ss:$12 sps:$4 sm:$0xff]  }
  0xd1   : > { %1683 = vmatprep.subr.bf16.mxu1 %v4973_v38  ;;  %v5078_v38 = vld [vmem:[%s5507_s4 + $0x1b8] ss:$12 sps:$4 sm:$0xff]  }
  0xd4   : > { %1684 = vmatpush1.bf16.msra.mxu1 %v4975_v40  ;;  %v5075_v40 = vld [vmem:[%s5507_s4 + $0x19c] ss:$12 sps:$4 sm:$0xff]  }
  0xd5   : > { %1685 = vmatprep.subr.bf16.mxu1 %v4979_v41  ;;  %v5082_v41 = vld [vmem:[%s5507_s4 + $0x1d0] ss:$12 sps:$4 sm:$0xff]  }
  0xd6   : > { %2059 = vmatmul.mubr.bf16.gmra.mrb[4].mxu0 %v5010_v47  ;;  %v5090_v47 = vld [vmem:[%s5507_s4 + $0x200] ss:$12 sps:$4 sm:$0xff]  }
  0xd7   : > { %2068 = vmatprep.mubr.bf16.mxu0 %v5179_v3 }
  0xd8   : > { %1686 = vmatpush1.bf16.msra.mxu1 %v4981_v43  ;;  %v5079_v43 = vld [vmem:[%s5507_s4 + $0x1b4] ss:$12 sps:$4 sm:$0xff]  }
  0xd9   : > { %1687 = vmatprep.subr.bf16.mxu1 %v4985_v44  ;;  %v5086_v44 = vld [vmem:[%s5507_s4 + $0x1e8] ss:$12 sps:$4 sm:$0xff]  }
  0xdc   : > { %1688 = vmatpush1.bf16.msra.mxu1 %v4987_v45  ;;  %v5081_v45 = vld [vmem:[%s5507_s4 + $0x1b0] ss:$12 sps:$4 sm:$0xff]  }
  0xdd   : > { %1689 = vmatprep.subr.bf16.mxu1 %v4991_v46  ;;  %v5083_v46 = vld [vmem:[%s5507_s4 + $0x1cc] ss:$12 sps:$4 sm:$0xff]  }
  0xde   : > { %2069 = vmatmul.mubr.bf16.gmra.mrb[8].mxu0 %v5014_v52  ;;  %v5091_v52 = vld [vmem:[%s5507_s4 + $0x1fc] ss:$12 sps:$4 sm:$0xff]  }
  0xdf   : > { %2078 = vmatprep.mubr.bf16.mxu0 %v5179_v3 }
  0xe0   : > { %1690 = vmatpush1.bf16.msra.mxu1 %v4993_v48  ;;  %v5085_v48 = vld [vmem:[%s5507_s4 + $0x1c8] ss:$12 sps:$4 sm:$0xff]  }
  0xe1   : > { %1691 = vmatprep.subr.bf16.mxu1 %v4997_v49  ;;  %v5087_v49 = vld [vmem:[%s5507_s4 + $0x1e4] ss:$12 sps:$4 sm:$0xff]  }
  0xe4   : > { %1692 = vmatpush1.bf16.msra.mxu1 %v4999_v50  ;;  %v5094_v50 = vld [vmem:[%s5507_s4 + $0x218] ss:$12 sps:$4 sm:$0xff]  }
  0xe5   : > { %1693 = vmatprep.subr.bf16.mxu1 %v5003_v51  ;;  %v5089_v51 = vld [vmem:[%s5507_s4 + $0x1e0] ss:$12 sps:$4 sm:$0xff]  }
  0xe6   : > { %2079 = vmatmul.mubr.bf16.gmra.mrb[12].mxu0 %v5018_v56  ;;  %v5102_v56 = vld [vmem:[%s5507_s4 + $0x248] ss:$12 sps:$4 sm:$0xff]  }
  0xe7   : > { %2088 = vmatprep.mubr.bf16.mxu0 %v5179_v3 }
  0xe8   : > { %1694 = vmatpush1.bf16.msra.mxu1 %v5005_v53  ;;  %v5098_v53 = vld [vmem:[%s5507_s4 + $0x230] ss:$12 sps:$4 sm:$0xff]  }
  0xeb   : > { %1696 = vmatmul.mubr.bf16.vlgmr.msra.gmra.mrb[0].mxu1 %v5007_v54  ;;  %v5093_v54 = vld [vmem:[%s5507_s4 + $0x1f8] ss:$12 sps:$4 sm:$0xff]  }
  0xec   : > { %1705 = vmatprep.mubr.bf16.mxu1 %v5011_v55  ;;  %v5095_v55 = vld [vmem:[%s5507_s4 + $0x214] ss:$12 sps:$4 sm:$0xff]  }
  0xee   : > { %2089 = vmatmul.mubr.bf16.gmra.mrb[16].mxu0 %v5022_v59  ;;  %v5106_v59 = vld [vmem:[%s5507_s4 + $0x260] ss:$12 sps:$4 sm:$0xff]  }
  0xef   : > { %2098 = vmatprep.mubr.bf16.mxu0 %v5179_v3 }
  0xf3   : > { %1706 = vmatmul.mubr.bf16.gmra.mrb[4].mxu1 %v5013_v57  ;;  %v5097_v57 = vld [vmem:[%s5507_s4 + $0x210] ss:$12 sps:$4 sm:$0xff]  }
  0xf4   : > { %1715 = vmatprep.mubr.bf16.mxu1 %v5015_v58  ;;  %v5099_v58 = vld [vmem:[%s5507_s4 + $0x22c] ss:$12 sps:$4 sm:$0xff]  }
  0xf6   : > { %2099 = vmatmul.mubr.bf16.gmra.mrb[20].mxu0 %v5026_v62  ;;  %v5110_v62 = vld [vmem:[%s5507_s4 + $0x278] ss:$12 sps:$4 sm:$0xff]  }
  0xf7   : > { %2108 = vmatprep.mubr.bf16.mxu0 %v5179_v3 }
  0xfb   : > { %1716 = vmatmul.mubr.bf16.gmra.mrb[8].mxu1 %v5017_v60  ;;  %v5101_v60 = vld [vmem:[%s5507_s4 + $0x228] ss:$12 sps:$4 sm:$0xff]  }
  0xfc   : > { %1725 = vmatprep.mubr.bf16.mxu1 %v5019_v61  ;;  %v5103_v61 = vld [vmem:[%s5507_s4 + $0x244] ss:$12 sps:$4 sm:$0xff]  }
  0xfe   : > { %2109 = vmatmul.mubr.bf16.gmra.mrb[24].mxu0 %v5030_v1 }
  0xff   : > { %2118 = vmatprep.mubr.bf16.mxu0 %v5179_v3 }
 0x103   : > { %1726 = vmatmul.mubr.bf16.gmra.mrb[12].mxu1 %v5021_v63  ;;  %v5105_v63 = vld [vmem:[%s5507_s4 + $0x240] ss:$12 sps:$4 sm:$0xff]  }
 0x104   : > { %1735 = vmatprep.mubr.bf16.mxu1 %v5023_v0  ;;  %v5107_v0 = vld [vmem:[%s5507_s4 + $0x25c] ss:$12 sps:$4 sm:$0xff]  }
 0x106   : > { %2119 = vmatmul.mubr.bf16.gmra.mrb[28].mxu0 %v5034_v5 }
 0x107   : > { %2128 = vmatprep.mubr.bf16.mxu0 %v5179_v3 }
 0x10b   : > { %1736 = vmatmul.mubr.bf16.gmra.mrb[16].mxu1 %v5025_v2 }
 0x10c   : > { %1745 = vmatprep.mubr.bf16.mxu1 %v5027_v4  ;;  %v5114_v4 = vld [vmem:[%s5507_s4 + $0x290] ss:$12 sps:$4 sm:$0xff]  }
 0x10e   : > { %2129 = vmatmul.mubr.bf16.gmra.mrb[32].mxu0 %v5038_v8  ;;  %v5111_v8 = vld [vmem:[%s5507_s4 + $0x274] ss:$12 sps:$4 sm:$0xff]  }
 0x10f   : > { %2138 = vmatprep.mubr.bf16.mxu0 %v5179_v3 }
 0x113   : > { %1746 = vmatmul.mubr.bf16.gmra.mrb[20].mxu1 %v5029_v6 }
 0x114   : > { %1755 = vmatprep.mubr.bf16.mxu1 %v5031_v7  ;;  %v5109_v7 = vld [vmem:[%s5507_s4 + $0x258] ss:$12 sps:$4 sm:$0xff]  }
 0x116   : > { %2139 = vmatmul.mubr.bf16.gmra.mrb[36].mxu0 %v5042_v11  ;;  %v5118_v11 = vld [vmem:[%s5507_s4 + $0x2a8] ss:$12 sps:$4 sm:$0xff]  }
 0x117   : > { %2148 = vmatprep.mubr.bf16.mxu0 %v5179_v3 }
 0x11b   : > { %1756 = vmatmul.mubr.bf16.gmra.mrb[24].mxu1 %v5033_v9 }
 0x11c   : > { %1765 = vmatprep.mubr.bf16.mxu1 %v5035_v10 }
 0x11e   : > { %2149 = vmatmul.mubr.bf16.gmra.mrb[40].mxu0 %v5046_v14  ;;  %v5113_v14 = vld [vmem:[%s5507_s4 + $0x270] ss:$12 sps:$4 sm:$0xff]  }
 0x11f   : > { %2158 = vmatprep.mubr.bf16.mxu0 %v5179_v3 }
 0x123   : > { %1766 = vmatmul.mubr.bf16.gmra.mrb[28].mxu1 %v5037_v12 }
 0x124   : > { %1775 = vmatprep.mubr.bf16.mxu1 %v5039_v13 }
 0x126   : > { %2159 = vmatmul.mubr.bf16.gmra.mrb[44].mxu0 %v5050_v17 }
 0x127   : > { %2168 = vmatprep.mubr.bf16.mxu0 %v5179_v3 }
 0x12b   : > { %1776 = vmatmul.mubr.bf16.gmra.mrb[32].mxu1 %v5041_v15  ;;  %v5115_v15 = vld [vmem:[%s5507_s4 + $0x28c] ss:$12 sps:$4 sm:$0xff]  }
 0x12c   : > { %1785 = vmatprep.mubr.bf16.mxu1 %v5043_v16 }
 0x12e   : > { %2169 = vmatmul.mubr.bf16.gmra.mrb[48].mxu0 %v5054_v20 }
 0x12f   : > { %2178 = vmatprep.mubr.bf16.mxu0 %v5179_v3 }
 0x133   : > { %1786 = vmatmul.mubr.bf16.gmra.mrb[36].mxu1 %v5045_v18  ;;  %v5122_v18 = vld [vmem:[%s5507_s4 + $0x2c0] ss:$12 sps:$4 sm:$0xff]  }
 0x134   : > { %1795 = vmatprep.mubr.bf16.mxu1 %v5047_v19 }
 0x136   : > { %2179 = vmatmul.mubr.bf16.gmra.mrb[52].mxu0 %v5058_v23 }
 0x137   : > { %2188 = vmatprep.mubr.bf16.mxu0 %v5179_v3 }
 0x13b   : > { %1796 = vmatmul.mubr.bf16.gmra.mrb[40].mxu1 %v5049_v21  ;;  %v607_v21 = vld [vmem:[#allocation2] sm:$0xff] }
 0x13c   : > { %1805 = vmatprep.mubr.bf16.mxu1 %v5051_v22 }
 0x13e   : > { %2189 = vmatmul.mubr.bf16.gmra.mrb[56].mxu0 %v5062_v26  ;;  %v5117_v26 = vld [vmem:[%s5507_s4 + $0x288] ss:$12 sps:$4 sm:$0xff]  }
 0x13f   : > { %2198 = vmatprep.mubr.bf16.mxu0 %v5179_v3 }
 0x143   : > { %1806 = vmatmul.mubr.bf16.gmra.mrb[44].mxu1 %v5053_v24  ;;  %v608_v24 = vld [vmem:[#allocation2 + $0x8] sm:$0xff] }
 0x144   : > { %1815 = vmatprep.mubr.bf16.mxu1 %v5055_v25 }
 0x146   : > { %2199 = vmatmul.mubr.bf16.gmra.mrb[60].mxu0 %v5066_v29 }
 0x147   : > { %2208 = vmatprep.mubr.bf16.mxu0 %v5179_v3 }
 0x14b   : > { %1816 = vmatmul.mubr.bf16.gmra.mrb[48].mxu1 %v5057_v27 }
 0x14c   : > { %1825 = vmatprep.mubr.bf16.mxu1 %v5059_v28  ;;  %v609_v28 = vld [vmem:[#allocation2 + $0x10] sm:$0xff] }
 0x14e   : > { %2209 = vmatmul.mubr.bf16.gmra.mrb[64].mxu0 %v5070_v32 }
 0x14f   : > { %2218 = vmatprep.mubr.bf16.mxu0 %v5179_v3 }
 0x153   : > { %1826 = vmatmul.mubr.bf16.gmra.mrb[52].mxu1 %v5061_v30  ;;  %v5119_v30 = vld [vmem:[%s5507_s4 + $0x2a4] ss:$12 sps:$4 sm:$0xff]  }
 0x154   : > { %1835 = vmatprep.mubr.bf16.mxu1 %v5063_v31 }
 0x156   : > { %2219 = vmatmul.mubr.bf16.gmra.mrb[68].mxu0 %v5074_v35 }
 0x157   : > { %2228 = vmatprep.mubr.bf16.mxu0 %v5179_v3 }
 0x15b   : > { %1836 = vmatmul.mubr.bf16.gmra.mrb[56].mxu1 %v5065_v33  ;;  %v610_v33 = vld [vmem:[#allocation2 + $0x18] sm:$0xff] }
 0x15c   : > { %1845 = vmatprep.mubr.bf16.mxu1 %v5067_v34 }
 0x15e   : > { %2229 = vmatmul.mubr.bf16.gmra.mrb[72].mxu0 %v5078_v38 }
 0x15f   : > { %2238 = vmatprep.mubr.bf16.mxu0 %v5179_v3 }
 0x163   : > { %1846 = vmatmul.mubr.bf16.gmra.mrb[60].mxu1 %v5069_v36 }
 0x164   : > { %1855 = vmatprep.mubr.bf16.mxu1 %v5071_v37 }
 0x166   : > { %2239 = vmatmul.mubr.bf16.gmra.mrb[76].mxu0 %v5082_v41 }
 0x167   : > { %2248 = vmatprep.mubr.bf16.mxu0 %v5179_v3 }
 0x16b   : > { %1856 = vmatmul.mubr.bf16.gmra.mrb[64].mxu1 %v5073_v39  ;;  %v5126_v39 = vld [vmem:[%s5507_s4 + $0x2d8] ss:$12 sps:$4 sm:$0xff]  }
 0x16c   : > { %1865 = vmatprep.mubr.bf16.mxu1 %v5075_v40 }
 0x16e   : > { %2249 = vmatmul.mubr.bf16.gmra.mrb[80].mxu0 %v5086_v44  ;;  %v611_v44 = vld [vmem:[#allocation2 + $0x20] sm:$0xff] }
 0x16f   : > { %2258 = vmatprep.mubr.bf16.mxu0 %v5179_v3 }
 0x173   : > { %1866 = vmatmul.mubr.bf16.gmra.mrb[68].mxu1 %v5077_v42 }
 0x174   : > { %1875 = vmatprep.mubr.bf16.mxu1 %v5079_v43 }
 0x176   : > { %2259 = vmatmul.mubr.bf16.gmra.mrb[84].mxu0 %v5090_v47  ;;  %v612_v47 = vld [vmem:[#allocation2 + $0x28] sm:$0xff] }
 0x177   : > { %2268 = vmatprep.mubr.bf16.mxu0 %v5179_v3 }
 0x17b   : > { %1876 = vmatmul.mubr.bf16.gmra.mrb[72].mxu1 %v5081_v45 }
 0x17c   : > { %1885 = vmatprep.mubr.bf16.mxu1 %v5083_v46 }
 0x17e   : > { %2269 = vmatmul.mubr.bf16.gmra.mrb[88].mxu0 %v5094_v50 }
 0x17f   : > { %2278 = vmatprep.mubr.bf16.mxu0 %v5179_v3 }
 0x183   : > { %1886 = vmatmul.mubr.bf16.gmra.mrb[76].mxu1 %v5085_v48 }
 0x184   : > { %1895 = vmatprep.mubr.bf16.mxu1 %v5087_v49  ;;  %v5121_v49 = vld [vmem:[%s5507_s4 + $0x2a0] ss:$12 sps:$4 sm:$0xff]  }
 0x186   : > { %2279 = vmatmul.mubr.bf16.gmra.mrb[92].mxu0 %v5098_v53  ;;  %v5123_v53 = vld [vmem:[%s5507_s4 + $0x2bc] ss:$12 sps:$4 sm:$0xff]  }
 0x187   : > { %2288 = vmatprep.mubr.bf16.mxu0 %v5179_v3 }
 0x18b   : > { %1896 = vmatmul.mubr.bf16.gmra.mrb[80].mxu1 %v5089_v51  ;;  %v613_v51 = vld [vmem:[#allocation2 + $0x30] sm:$0xff] }
 0x18c   : > { %1905 = vmatprep.mubr.bf16.mxu1 %v5091_v52 }
 0x18e   : > { %2289 = vmatmul.mubr.bf16.gmra.mrb[96].mxu0 %v5102_v56  ;;  %v614_v56 = vld [vmem:[#allocation2 + $0x38] sm:$0xff] }
 0x18f   : > { %2298 = vmatprep.mubr.bf16.mxu0 %v5179_v3 }
 0x193   : > { %1906 = vmatmul.mubr.bf16.gmra.mrb[84].mxu1 %v5093_v54 }
 0x194   : > { %1915 = vmatprep.mubr.bf16.mxu1 %v5095_v55 }
 0x196   : > { %2299 = vmatmul.mubr.bf16.gmra.mrb[100].mxu0 %v5106_v59 }
 0x197   : > { %2308 = vmatprep.mubr.bf16.mxu0 %v5179_v3 }
 0x19b   : > { %1916 = vmatmul.mubr.bf16.gmra.mrb[88].mxu1 %v5097_v57 }
 0x19c   : > { %1925 = vmatprep.mubr.bf16.mxu1 %v5099_v58 }
 0x19e   : > { %2309 = vmatmul.mubr.bf16.gmra.mrb[104].mxu0 %v5110_v62  ;;  %v5130_v62 = vld [vmem:[%s5507_s4 + $0x2f0] ss:$12 sps:$4 sm:$0xff]  }
 0x19f   : > { %2318 = vmatprep.mubr.bf16.mxu0 %v5179_v3 }
 0x1a1   : > { %v2050_v1 = vpop.f32.mrb[0].mxu0 }
 0x1a2   : > { %v2052_v2 = vpop.f32.mrb[1].mxu0 }
 0x1a3   : > { %1926 = vmatmul.mubr.bf16.gmra.mrb[92].mxu1 %v5101_v60  ;;  %v2054_v5 = vpop.f32.mrb[2].mxu0 }
 0x1a4   : > { %1935 = vmatprep.mubr.bf16.mxu1 %v5103_v61  ;;  %v2056_v6 = vpop.f32.mrb[3].mxu0 }
 0x1a6   : > { %2319 = vmatmul.mubr.bf16.gmra.mrb[108].mxu0 %v5114_v4 }
 0x1a7   : > { %2328 = vmatprep.mubr.bf16.mxu0 %v5179_v3 }
 0x1a9   : > { %v2060_v9 = vpop.f32.mrb[4].mxu0 }
 0x1aa   : > { %v2062_v10 = vpop.f32.mrb[5].mxu0 }
 0x1ab   : > { %1936 = vmatmul.mubr.bf16.gmra.mrb[96].mxu1 %v5105_v63  ;;  %v2064_v12 = vpop.f32.mrb[6].mxu0 }
 0x1ac   : > { %1945 = vmatprep.mubr.bf16.mxu1 %v5107_v0  ;;  %v2066_v13 = vpop.f32.mrb[7].mxu0 }
 0x1ae   : > { %2329 = vmatmul.mubr.bf16.gmra.mrb[112].mxu0 %v5118_v11 }
 0x1af   : > { %2338 = vmatprep.mubr.bf16.mxu0 %v5179_v3 }
 0x1b1   : > { %v5800_v16 = vpop.f32.mrb[8].mxu0 }
 0x1b2   : > { %v5802_v17 = vpop.f32.mrb[9].mxu0 }
 0x1b3   : > { %1946 = vmatmul.mubr.bf16.gmra.mrb[100].mxu1 %v5109_v7  ;;  %v5805_v19 = vpop.f32.mrb[10].mxu0 }
 0x1b4   : > { %1955 = vmatprep.mubr.bf16.mxu1 %v5111_v8  ;;  %v5807_v20 = vpop.f32.mrb[11].mxu0  ;;  %v5125_v8 = vld [vmem:[%s5507_s4 + $0x2b8] ss:$12 sps:$4 sm:$0xff]  }
 0x1b6   : > { %2339 = vmatmul.mubr.bf16.gmra.mrb[116].mxu0 %v5122_v18 }
 0x1b7   : > { %2348 = vmatprep.mubr.bf16.mxu0 %v5179_v3 }
 0x1b9   : > { %v5812_v35 = vpop.f32.mrb[12].mxu0 }
 0x1ba   : > { %v5814_v38 = vpop.f32.mrb[13].mxu0 }
 0x1bb   : > { %1956 = vmatmul.mubr.bf16.gmra.mrb[104].mxu1 %v5113_v14  ;;  %v5817_v41 = vpop.f32.mrb[14].mxu0 }
 0x1bc   : > { %1965 = vmatprep.mubr.bf16.mxu1 %v5115_v15  ;;  %v5819_v43 = vpop.f32.mrb[15].mxu0  ;;  %v618_v15 = vld [vmem:[#allocation2 + $0x58] sm:$0xff] }
 0x1be   : > { %v1697_v22 = vpop.f32.mrb[0].mxu1  ;;  %2349 = vmatmul.mubr.bf16.gmra.mrb[120].mxu0 %v5126_v39  ;;  %v622_v39 = vld [vmem:[#allocation2 + $0x78] sm:$0xff] }
 0x1bf   : > { %v2051_v23 = vadd.f32 %v2050_v1, %v1697_v22  ;;  %v1699_v25 = vpop.f32.mrb[1].mxu1  ;;  %2358 = vmatprep.mubr.bf16.mxu0 %v5179_v3 }
 0x1c0   : > { %v2053_v27 = vadd.f32 %v2052_v2, %v1699_v25  ;;  %v1701_v29 = vpop.f32.mrb[2].mxu1  ;;  %v615_v2 = vld [vmem:[#allocation2 + $0x40] sm:$0xff] }
 0x1c1   : > { %v2369_v31 = vadd.f32 %v2051_v23, %v607_v21  ;;  %v2055_v32 = vadd.f32 %v2054_v5, %v1701_v29  ;;  %v1703_v34 = vpop.f32.mrb[3].mxu1  ;;  %v5824_v58 = vpop.f32.mrb[16].mxu0 }
 0x1c2   : > { %v2370_v36 = vadd.f32 %v2053_v27, %v608_v24  ;;  %v2057_v37 = vadd.f32 %v2056_v6, %v1703_v34  ;;  %v5826_v61 = vpop.f32.mrb[17].mxu0  ;;  %v616_v6 = vld [vmem:[#allocation2 + $0x48] sm:$0xff] }
 0x1c3   : > { %2497 = vst [vmem:[#allocation2] sm:$0xff] %v2369_v31  ;;  %v2371_v40 = vadd.f32 %v2055_v32, %v609_v28  ;;  %1966 = vmatmul.mubr.bf16.gmra.mrb[108].mxu1 %v5117_v26  ;;  %v5829_v3 = vpop.f32.mrb[18].mxu0  ;;  %v619_v26 = vld [vmem:[#allocation2 + $0x60] sm:$0xff]  ;;  %v620_v28 = vld [vmem:[#allocation2 + $0x68] sm:$0xff]  ;;  %v621_v32 = vld [vmem:[#allocation2 + $0x70] sm:$0xff] }
 0x1c4   : > { %2498 = vst [vmem:[#allocation2 + $0x8] sm:$0xff] %v2370_v36  ;;  %v2372_v42 = vadd.f32 %v2057_v37, %v610_v33  ;;  %1975 = vmatprep.mubr.bf16.mxu1 %v5119_v30  ;;  %v5831_v1 = vpop.f32.mrb[19].mxu0  ;;  %v5129_v30 = vld [vmem:[%s5507_s4 + $0x2d0] ss:$12 sps:$4 sm:$0xff]   ;;  %v5131_v34 = vld [vmem:[%s5507_s4 + $0x2ec] ss:$12 sps:$4 sm:$0xff]  }
 0x1c5   : > { %2499 = vst [vmem:[#allocation2 + $0x10] sm:$0xff] %v2371_v40 }
 0x1c6   : > { %2500 = vst [vmem:[#allocation2 + $0x18] sm:$0xff] %v2372_v42  ;;  %v1707_v45 = vpop.f32.mrb[4].mxu1  ;;  %2359 = vmatmul.mubr.bf16.gmra.mrb[124].mxu0 %v5130_v62 }
 0x1c7   : > { %v2061_v46 = vadd.f32 %v2060_v9, %v1707_v45  ;;  %v1709_v48 = vpop.f32.mrb[5].mxu1 }
 0x1c8   : > { %v2063_v50 = vadd.f32 %v2062_v10, %v1709_v48  ;;  %v1711_v52 = vpop.f32.mrb[6].mxu1  ;;  %v617_v10 = vld [vmem:[#allocation2 + $0x50] sm:$0xff] }
 0x1c9   : > { %v2373_v54 = vadd.f32 %v2061_v46, %v611_v44  ;;  %v2065_v55 = vadd.f32 %v2064_v12, %v1711_v52  ;;  %v1713_v57 = vpop.f32.mrb[7].mxu1  ;;  %v5127_v12 = vld [vmem:[%s5507_s4 + $0x2d4] ss:$12 sps:$4 sm:$0xff]   ;;  %v5838_v21 = vpop.f32.mrb[20].mxu0 }
 0x1ca   : > { %v2374_v59 = vadd.f32 %v2063_v50, %v612_v47  ;;  %v2067_v60 = vadd.f32 %v2066_v13, %v1713_v57  ;;  %v5841_v24 = vpop.f32.mrb[21].mxu0  ;;  %v5133_v52 = vld [vmem:[%s5507_s4 + $0x2e8] ss:$12 sps:$4 sm:$0xff]  }
 0x1cb   : > { %2501 = vst [vmem:[#allocation2 + $0x20] sm:$0xff] %v2373_v54  ;;  %v2375_v63 = vadd.f32 %v2065_v55, %v613_v51  ;;  %1976 = vmatmul.mubr.bf16.gmra.mrb[112].mxu1 %v5121_v49  ;;  %v625_v54 = vld [vmem:[#allocation2 + $0x90] sm:$0xff] }
 0x1cc   : > { %2502 = vst [vmem:[#allocation2 + $0x28] sm:$0xff] %v2374_v59  ;;  %v2376_v0 = vadd.f32 %v2067_v60, %v614_v56  ;;  %1985 = vmatprep.mubr.bf16.mxu1 %v5123_v53  ;;  %v626_v59 = vld [vmem:[#allocation2 + $0x98] sm:$0xff] }
 0x1cd   : > { %2503 = vst [vmem:[#allocation2 + $0x30] sm:$0xff] %v2375_v63 }
 0x1ce   : > { %2504 = vst [vmem:[#allocation2 + $0x38] sm:$0xff] %v2376_v0  ;;  %v1717_v4 = vpop.f32.mrb[8].mxu1 }
 0x1cf   : > { %v2071_v5 = vadd.f32 %v5800_v16, %v1717_v4  ;;  %v1719_v7 = vpop.f32.mrb[9].mxu1 }
 0x1d0   : > { %v2073_v9 = vadd.f32 %v5802_v17, %v1719_v7  ;;  %v1721_v11 = vpop.f32.mrb[10].mxu1  ;;  %v5843_v17 = vpop.f32.mrb[22].mxu0 }
 0x1d1   : > { %v2377_v13 = vadd.f32 %v2071_v5, %v615_v2  ;;  %v2075_v14 = vadd.f32 %v5805_v19, %v1721_v11  ;;  %v1723_v18 = vpop.f32.mrb[11].mxu1  ;;  %v5845_v19 = vpop.f32.mrb[23].mxu0 }
 0x1d2   : > { %v2378_v22 = vadd.f32 %v2073_v9, %v616_v6  ;;  %v2077_v23 = vadd.f32 %v5807_v20, %v1723_v18  ;;  %v5852_v42 = vpop.f32.mrb[24].mxu0 }
 0x1d3   : > { %2505 = vst [vmem:[#allocation2 + $0x40] sm:$0xff] %v2377_v13  ;;  %v2379_v16 = vadd.f32 %v2075_v14, %v617_v10  ;;  %1986 = vmatmul.mubr.bf16.gmra.mrb[116].mxu1 %v5125_v8  ;;  %v5855_v46 = vpop.f32.mrb[25].mxu0  ;;  %v628_v8 = vld [vmem:[#allocation2 + $0xa8] sm:$0xff]  ;;  %v629_v10 = vld [vmem:[#allocation2 + $0xb0] sm:$0xff]  ;;  %v630_v14 = vld [vmem:[#allocation2 + $0xb8] sm:$0xff] }
 0x1d4   : > { %2506 = vst [vmem:[#allocation2 + $0x48] sm:$0xff] %v2378_v22  ;;  %v2380_v25 = vadd.f32 %v2077_v23, %v618_v15  ;;  %1995 = vmatprep.mubr.bf16.mxu1 %v5127_v12 }
 0x1d5   : > { %2507 = vst [vmem:[#allocation2 + $0x50] sm:$0xff] %v2379_v16 }
 0x1d6   : > { %2508 = vst [vmem:[#allocation2 + $0x58] sm:$0xff] %v2380_v25  ;;  %v1727_v27 = vpop.f32.mrb[12].mxu1 }
 0x1d7   : > { %v2081_v20 = vadd.f32 %v5812_v35, %v1727_v27  ;;  %v1729_v29 = vpop.f32.mrb[13].mxu1 }
 0x1d8   : > { %v2083_v31 = vadd.f32 %v5814_v38, %v1729_v29  ;;  %v1731_v33 = vpop.f32.mrb[14].mxu1  ;;  %v5857_v38 = vpop.f32.mrb[26].mxu0 }
 0x1d9   : > { %v2381_v36 = vadd.f32 %v2081_v20, %v619_v26  ;;  %v2085_v37 = vadd.f32 %v5817_v41, %v1731_v33  ;;  %v1733_v40 = vpop.f32.mrb[15].mxu1  ;;  %v5859_v48 = vpop.f32.mrb[27].mxu0  ;;  %v623_v41 = vld [vmem:[#allocation2 + $0x80] sm:$0xff] }
 0x1da   : > { %v2382_v44 = vadd.f32 %v2083_v31, %v620_v28  ;;  %v2087_v45 = vadd.f32 %v5819_v43, %v1733_v40  ;;  %v624_v43 = vld [vmem:[#allocation2 + $0x88] sm:$0xff]  ;;  %v5865_v62 = vpop.f32.mrb[28].mxu0 }
 0x1db   : > { %2509 = vst [vmem:[#allocation2 + $0x60] sm:$0xff] %v2381_v36  ;;  %v2383_v35 = vadd.f32 %v2085_v37, %v621_v32  ;;  %1996 = vmatmul.mubr.bf16.gmra.mrb[120].mxu1 %v5129_v30  ;;  %v5868_v2 = vpop.f32.mrb[29].mxu0  ;;  %v632_v28 = vld [vmem:[#allocation2 + $0xc8] sm:$0xff] }
 0x1dc   : > { %2510 = vst [vmem:[#allocation2 + $0x68] sm:$0xff] %v2382_v44  ;;  %v2384_v47 = vadd.f32 %v2087_v45, %v622_v39  ;;  %2005 = vmatprep.mubr.bf16.mxu1 %v5131_v34  ;;  %v5870_v4 = vpop.f32.mrb[30].mxu0  ;;  %v634_v34 = vld [vmem:[#allocation2 + $0xd8] sm:$0xff] }
 0x1dd   : > { %2511 = vst [vmem:[#allocation2 + $0x70] sm:$0xff] %v2383_v35  ;;  %v5872_v5 = vpop.f32.mrb[31].mxu0 }
 0x1de   : > { %2512 = vst [vmem:[#allocation2 + $0x78] sm:$0xff] %v2384_v47  ;;  %v1737_v49 = vpop.f32.mrb[16].mxu1 }
 0x1df   : > { %v2091_v50 = vadd.f32 %v5824_v58, %v1737_v49  ;;  %v1739_v51 = vpop.f32.mrb[17].mxu1  ;;  %v636_v49 = vld [vmem:[#allocation2 + $0xe8] sm:$0xff] }
 0x1e0   : > { %v2093_v53 = vadd.f32 %v5826_v61, %v1739_v51  ;;  %v1741_v55 = vpop.f32.mrb[18].mxu1 }
 0x1e1   : > { %v2385_v56 = vadd.f32 %v2091_v50, %v623_v41  ;;  %v2095_v57 = vadd.f32 %v5829_v3, %v1741_v55  ;;  %v1743_v60 = vpop.f32.mrb[19].mxu1  ;;  %v627_v3 = vld [vmem:[#allocation2 + $0xa0] sm:$0xff]  ;;  %v2130_v18 = vpop.f32.mrb[32].mxu0 }
 0x1e2   : > { %v2386_v63 = vadd.f32 %v2093_v53, %v624_v43  ;;  %v2097_v0 = vadd.f32 %v5831_v1, %v1743_v60  ;;  %v2132_v16 = vpop.f32.mrb[33].mxu0 }
 0x1e3   : > { %2513 = vst [vmem:[#allocation2 + $0x80] sm:$0xff] %v2385_v56  ;;  %v2387_v58 = vadd.f32 %v2095_v57, %v625_v54  ;;  %2006 = vmatmul.mubr.bf16.gmra.mrb[124].mxu1 %v5133_v52  ;;  %v5878_v26 = vpop.f32.mrb[34].mxu0  ;;  %v638_v54 = vld [vmem:[#allocation2 + $0xf8] sm:$0xff] }
 0x1e4   : > { %2514 = vst [vmem:[#allocation2 + $0x88] sm:$0xff] %v2386_v63  ;;  %v2388_v61 = vadd.f32 %v2097_v0, %v626_v59  ;;  %v5880_v27 = vpop.f32.mrb[35].mxu0 }
 0x1e5   : > { %2515 = vst [vmem:[#allocation2 + $0x90] sm:$0xff] %v2387_v58 }
 0x1e6   : > { %2516 = vst [vmem:[#allocation2 + $0x98] sm:$0xff] %v2388_v61  ;;  %v1747_v6 = vpop.f32.mrb[20].mxu1 }
 0x1e7   : > { %v2101_v7 = vadd.f32 %v5838_v21, %v1747_v6  ;;  %v1749_v9 = vpop.f32.mrb[21].mxu1 }
 0x1e8   : > { %v2103_v1 = vadd.f32 %v5841_v24, %v1749_v9  ;;  %v1751_v11 = vpop.f32.mrb[22].mxu1  ;;  %v631_v24 = vld [vmem:[#allocation2 + $0xc0] sm:$0xff] }
 0x1e9   : > { %v2389_v12 = vadd.f32 %v2101_v7, %v627_v3  ;;  %v2105_v13 = vadd.f32 %v5843_v17, %v1751_v11  ;;  %v1753_v15 = vpop.f32.mrb[23].mxu1  ;;  %v2140_v37 = vpop.f32.mrb[36].mxu0  ;;  %v640_v3 = vld [vmem:[#allocation2 + $0x108] sm:$0xff] }
 0x1ea   : > { %v2390_v22 = vadd.f32 %v2103_v1, %v628_v8  ;;  %v2107_v23 = vadd.f32 %v5845_v19, %v1753_v15  ;;  %v633_v19 = vld [vmem:[#allocation2 + $0xd0] sm:$0xff]  ;;  %v2142_v44 = vpop.f32.mrb[37].mxu0 }
 0x1eb   : > { %2517 = vst [vmem:[#allocation2 + $0xa0] sm:$0xff] %v2389_v12  ;;  %v2391_v25 = vadd.f32 %v2105_v13, %v629_v10  ;;  %v5886_v35 = vpop.f32.mrb[38].mxu0  ;;  %v641_v8 = vld [vmem:[#allocation2 + $0x110] sm:$0xff]  ;;  %v642_v10 = vld [vmem:[#allocation2 + $0x118] sm:$0xff] }
 0x1ec   : > { %2518 = vst [vmem:[#allocation2 + $0xa8] sm:$0xff] %v2390_v22  ;;  %v2392_v21 = vadd.f32 %v2107_v23, %v630_v14  ;;  %v5888_v47 = vpop.f32.mrb[39].mxu0 }
 0x1ed   : > { %2519 = vst [vmem:[#allocation2 + $0xb0] sm:$0xff] %v2391_v25 }
 0x1ee   : > { %2520 = vst [vmem:[#allocation2 + $0xb8] sm:$0xff] %v2392_v21  ;;  %v1757_v20 = vpop.f32.mrb[24].mxu1 }
 0x1ef   : > { %v2111_v17 = vadd.f32 %v5852_v42, %v1757_v20  ;;  %v1759_v29 = vpop.f32.mrb[25].mxu1 }
 0x1f0   : > { %v2113_v30 = vadd.f32 %v5855_v46, %v1759_v29  ;;  %v1761_v31 = vpop.f32.mrb[26].mxu1  ;;  %v635_v46 = vld [vmem:[#allocation2 + $0xe0] sm:$0xff] }
 0x1f1   : > { %v2393_v32 = vadd.f32 %v2111_v17, %v631_v24  ;;  %v2115_v33 = vadd.f32 %v5857_v38, %v1761_v31  ;;  %v1763_v36 = vpop.f32.mrb[27].mxu1  ;;  %v2150_v56 = vpop.f32.mrb[40].mxu0  ;;  %v644_v24 = vld [vmem:[#allocation2 + $0x128] sm:$0xff] }
 0x1f2   : > { %v2394_v39 = vadd.f32 %v2113_v30, %v632_v28  ;;  %v2117_v40 = vadd.f32 %v5859_v48, %v1763_v36  ;;  %v637_v48 = vld [vmem:[#allocation2 + $0xf0] sm:$0xff]  ;;  %v2152_v60 = vpop.f32.mrb[41].mxu0 }
 0x1f3   : > { %2521 = vst [vmem:[#allocation2 + $0xc0] sm:$0xff] %v2393_v32  ;;  %v2395_v45 = vadd.f32 %v2115_v33, %v633_v19  ;;  %v5894_v0 = vpop.f32.mrb[42].mxu0  ;;  %v645_v28 = vld [vmem:[#allocation2 + $0x130] sm:$0xff]  ;;  %v646_v19 = vld [vmem:[#allocation2 + $0x138] sm:$0xff] }
 0x1f4   : > { %2522 = vst [vmem:[#allocation2 + $0xc8] sm:$0xff] %v2394_v39  ;;  %v2396_v42 = vadd.f32 %v2117_v40, %v634_v34  ;;  %v5896_v58 = vpop.f32.mrb[43].mxu0 }
 0x1f5   : > { %2523 = vst [vmem:[#allocation2 + $0xd0] sm:$0xff] %v2395_v45 }
 0x1f6   : > { %2524 = vst [vmem:[#allocation2 + $0xd8] sm:$0xff] %v2396_v42  ;;  %v1767_v41 = vpop.f32.mrb[28].mxu1 }
 0x1f7   : > { %v2121_v38 = vadd.f32 %v5865_v62, %v1767_v41  ;;  %v1769_v50 = vpop.f32.mrb[29].mxu1 }
 0x1f8   : > { %v2123_v43 = vadd.f32 %v5868_v2, %v1769_v50  ;;  %v1771_v51 = vpop.f32.mrb[30].mxu1  ;;  %v639_v2 = vld [vmem:[#allocation2 + $0x100] sm:$0xff] }
 0x1f9   : > { %v2397_v52 = vadd.f32 %v2121_v38, %v635_v46  ;;  %v2125_v53 = vadd.f32 %v5870_v4, %v1771_v51  ;;  %v1773_v55 = vpop.f32.mrb[31].mxu1  ;;  %v2160_v12 = vpop.f32.mrb[44].mxu0  ;;  %v648_v46 = vld [vmem:[#allocation2 + $0x148] sm:$0xff] }
 0x1fa   : > { %v2398_v57 = vadd.f32 %v2123_v43, %v636_v49  ;;  %v2127_v59 = vadd.f32 %v5872_v5, %v1773_v55  ;;  %v2162_v15 = vpop.f32.mrb[45].mxu0  ;;  %v649_v49 = vld [vmem:[#allocation2 + $0x150] sm:$0xff] }
 0x1fb   : > { %2525 = vst [vmem:[#allocation2 + $0xe0] sm:$0xff] %v2397_v52  ;;  %v2399_v63 = vadd.f32 %v2125_v53, %v637_v48  ;;  %v5900_v23 = vpop.f32.mrb[46].mxu0  ;;  %v650_v48 = vld [vmem:[#allocation2 + $0x158] sm:$0xff] }
 0x1fc   : > { %2526 = vst [vmem:[#allocation2 + $0xe8] sm:$0xff] %v2398_v57  ;;  %v2400_v62 = vadd.f32 %v2127_v59, %v638_v54  ;;  %v5902_v25 = vpop.f32.mrb[47].mxu0 }
 0x1fd   : > { %2527 = vst [vmem:[#allocation2 + $0xf0] sm:$0xff] %v2399_v63 }
 0x1fe   : > { %2528 = vst [vmem:[#allocation2 + $0xf8] sm:$0xff] %v2400_v62  ;;  %v1777_v61 = vpop.f32.mrb[32].mxu1 }
 0x1ff   : > { %v2131_v4 = vadd.f32 %v2130_v18, %v1777_v61  ;;  %v1779_v6 = vpop.f32.mrb[33].mxu1 }
 0x200   : > { %v2133_v7 = vadd.f32 %v2132_v16, %v1779_v6  ;;  %v1781_v9 = vpop.f32.mrb[34].mxu1  ;;  %v643_v16 = vld [vmem:[#allocation2 + $0x120] sm:$0xff] }
 0x201   : > { %v2401_v5 = vadd.f32 %v2131_v4, %v639_v2  ;;  %v2135_v1 = vadd.f32 %v5878_v26, %v1781_v9  ;;  %v1783_v11 = vpop.f32.mrb[35].mxu1  ;;  %v2170_v32 = vpop.f32.mrb[48].mxu0  ;;  %v652_v2 = vld [vmem:[#allocation2 + $0x168] sm:$0xff] }
 0x202   : > { %v2402_v13 = vadd.f32 %v2133_v7, %v640_v3  ;;  %v2137_v14 = vadd.f32 %v5880_v27, %v1783_v11  ;;  %v2172_v36 = vpop.f32.mrb[49].mxu0  ;;  %v653_v3 = vld [vmem:[#allocation2 + $0x170] sm:$0xff] }
 0x203   : > { %2529 = vst [vmem:[#allocation2 + $0x100] sm:$0xff] %v2401_v5  ;;  %v2403_v22 = vadd.f32 %v2135_v1, %v641_v8  ;;  %v5906_v40 = vpop.f32.mrb[50].mxu0  ;;  %v654_v8 = vld [vmem:[#allocation2 + $0x178] sm:$0xff] }
 0x204   : > { %2530 = vst [vmem:[#allocation2 + $0x108] sm:$0xff] %v2402_v13  ;;  %v2404_v18 = vadd.f32 %v2137_v14, %v642_v10  ;;  %v5908_v45 = vpop.f32.mrb[51].mxu0 }
 0x205   : > { %2531 = vst [vmem:[#allocation2 + $0x110] sm:$0xff] %v2403_v22 }
 0x206   : > { %2532 = vst [vmem:[#allocation2 + $0x118] sm:$0xff] %v2404_v18  ;;  %v1787_v21 = vpop.f32.mrb[36].mxu1 }
 0x207   : > { %v2141_v26 = vadd.f32 %v2140_v37, %v1787_v21  ;;  %v1789_v20 = vpop.f32.mrb[37].mxu1 }
 0x208   : > { %v2143_v17 = vadd.f32 %v2142_v44, %v1789_v20  ;;  %v1791_v29 = vpop.f32.mrb[38].mxu1  ;;  %v647_v44 = vld [vmem:[#allocation2 + $0x140] sm:$0xff] }
 0x209   : > { %v2405_v27 = vadd.f32 %v2141_v26, %v643_v16  ;;  %v2145_v30 = vadd.f32 %v5886_v35, %v1791_v29  ;;  %v1793_v31 = vpop.f32.mrb[39].mxu1  ;;  %v2180_v52 = vpop.f32.mrb[52].mxu0  ;;  %v656_v16 = vld [vmem:[#allocation2 + $0x188] sm:$0xff] }
 0x20a   : > { %v2406_v33 = vadd.f32 %v2143_v17, %v644_v24  ;;  %v2147_v34 = vadd.f32 %v5888_v47, %v1793_v31  ;;  %v2182_v55 = vpop.f32.mrb[53].mxu0  ;;  %v657_v24 = vld [vmem:[#allocation2 + $0x190] sm:$0xff] }
 0x20b   : > { %2533 = vst [vmem:[#allocation2 + $0x120] sm:$0xff] %v2405_v27  ;;  %v2407_v39 = vadd.f32 %v2145_v30, %v645_v28  ;;  %v5912_v59 = vpop.f32.mrb[54].mxu0  ;;  %v658_v28 = vld [vmem:[#allocation2 + $0x198] sm:$0xff] }
 0x20c   : > { %2534 = vst [vmem:[#allocation2 + $0x128] sm:$0xff] %v2406_v33  ;;  %v2408_v37 = vadd.f32 %v2147_v34, %v646_v19  ;;  %v5914_v63 = vpop.f32.mrb[55].mxu0 }
 0x20d   : > { %2535 = vst [vmem:[#allocation2 + $0x130] sm:$0xff] %v2407_v39 }
 0x20e   : > { %2536 = vst [vmem:[#allocation2 + $0x138] sm:$0xff] %v2408_v37  ;;  %v1797_v42 = vpop.f32.mrb[40].mxu1 }
 0x20f   : > { %v2151_v35 = vadd.f32 %v2150_v56, %v1797_v42  ;;  %v1799_v41 = vpop.f32.mrb[41].mxu1 }
 0x210   : > { %v2153_v38 = vadd.f32 %v2152_v60, %v1799_v41  ;;  %v1801_v50 = vpop.f32.mrb[42].mxu1  ;;  %v651_v60 = vld [vmem:[#allocation2 + $0x160] sm:$0xff] }
 0x211   : > { %v2409_v47 = vadd.f32 %v2151_v35, %v647_v44  ;;  %v2155_v43 = vadd.f32 %v5894_v0, %v1801_v50  ;;  %v1803_v51 = vpop.f32.mrb[43].mxu1  ;;  %v2190_v5 = vpop.f32.mrb[56].mxu0  ;;  %v660_v44 = vld [vmem:[#allocation2 + $0x1a8] sm:$0xff] }
 0x212   : > { %v2410_v53 = vadd.f32 %v2153_v38, %v648_v46  ;;  %v2157_v54 = vadd.f32 %v5896_v58, %v1803_v51  ;;  %v2192_v11 = vpop.f32.mrb[57].mxu0  ;;  %v661_v46 = vld [vmem:[#allocation2 + $0x1b0] sm:$0xff] }
 0x213   : > { %2537 = vst [vmem:[#allocation2 + $0x140] sm:$0xff] %v2409_v47  ;;  %v2411_v57 = vadd.f32 %v2155_v43, %v649_v49  ;;  %v5918_v14 = vpop.f32.mrb[58].mxu0  ;;  %v662_v49 = vld [vmem:[#allocation2 + $0x1b8] sm:$0xff] }
 0x214   : > { %2538 = vst [vmem:[#allocation2 + $0x148] sm:$0xff] %v2410_v53  ;;  %v2412_v56 = vadd.f32 %v2157_v54, %v650_v48  ;;  %v5920_v22 = vpop.f32.mrb[59].mxu0 }
 0x215   : > { %2539 = vst [vmem:[#allocation2 + $0x150] sm:$0xff] %v2411_v57 }
 0x216   : > { %2540 = vst [vmem:[#allocation2 + $0x158] sm:$0xff] %v2412_v56  ;;  %v1807_v62 = vpop.f32.mrb[44].mxu1 }
 0x217   : > { %v2161_v0 = vadd.f32 %v2160_v12, %v1807_v62  ;;  %v1809_v61 = vpop.f32.mrb[45].mxu1 }
 0x218   : > { %v2163_v4 = vadd.f32 %v2162_v15, %v1809_v61  ;;  %v1811_v6 = vpop.f32.mrb[46].mxu1  ;;  %v655_v15 = vld [vmem:[#allocation2 + $0x180] sm:$0xff] }
 0x219   : > { %v2413_v58 = vadd.f32 %v2161_v0, %v651_v60  ;;  %v2165_v7 = vadd.f32 %v5900_v23, %v1811_v6  ;;  %v1813_v9 = vpop.f32.mrb[47].mxu1  ;;  %v2200_v27 = vpop.f32.mrb[60].mxu0  ;;  %v664_v60 = vld [vmem:[#allocation2 + $0x1c8] sm:$0xff] }
 0x21a   : > { %v2414_v1 = vadd.f32 %v2163_v4, %v652_v2  ;;  %v2167_v10 = vadd.f32 %v5902_v25, %v1813_v9  ;;  %v2202_v31 = vpop.f32.mrb[61].mxu0  ;;  %v665_v2 = vld [vmem:[#allocation2 + $0x1d0] sm:$0xff] }
 0x21b   : > { %2541 = vst [vmem:[#allocation2 + $0x160] sm:$0xff] %v2413_v58  ;;  %v2415_v13 = vadd.f32 %v2165_v7, %v653_v3  ;;  %v5924_v34 = vpop.f32.mrb[62].mxu0  ;;  %v666_v3 = vld [vmem:[#allocation2 + $0x1d8] sm:$0xff] }
 0x21c   : > { %2542 = vst [vmem:[#allocation2 + $0x168] sm:$0xff] %v2414_v1  ;;  %v2416_v12 = vadd.f32 %v2167_v10, %v654_v8  ;;  %v5926_v39 = vpop.f32.mrb[63].mxu0 }
 0x21d   : > { %2543 = vst [vmem:[#allocation2 + $0x170] sm:$0xff] %v2415_v13 }
 0x21e   : > { %2544 = vst [vmem:[#allocation2 + $0x178] sm:$0xff] %v2416_v12  ;;  %v1817_v18 = vpop.f32.mrb[48].mxu1 }
 0x21f   : > { %v2171_v23 = vadd.f32 %v2170_v32, %v1817_v18  ;;  %v1819_v21 = vpop.f32.mrb[49].mxu1 }
 0x220   : > { %v2173_v26 = vadd.f32 %v2172_v36, %v1819_v21  ;;  %v1821_v20 = vpop.f32.mrb[50].mxu1  ;;  %v659_v36 = vld [vmem:[#allocation2 + $0x1a0] sm:$0xff] }
 0x221   : > { %v2417_v25 = vadd.f32 %v2171_v23, %v655_v15  ;;  %v2175_v17 = vadd.f32 %v5906_v40, %v1821_v20  ;;  %v1823_v29 = vpop.f32.mrb[51].mxu1  ;;  %v2210_v47 = vpop.f32.mrb[64].mxu0  ;;  %v668_v15 = vld [vmem:[#allocation2 + $0x1e8] sm:$0xff] }
 0x222   : > { %v2418_v30 = vadd.f32 %v2173_v26, %v656_v16  ;;  %v2177_v19 = vadd.f32 %v5908_v45, %v1823_v29  ;;  %v2212_v51 = vpop.f32.mrb[65].mxu0  ;;  %v669_v16 = vld [vmem:[#allocation2 + $0x1f0] sm:$0xff] }
 0x223   : > { %2545 = vst [vmem:[#allocation2 + $0x180] sm:$0xff] %v2417_v25  ;;  %v2419_v33 = vadd.f32 %v2175_v17, %v657_v24  ;;  %v5930_v54 = vpop.f32.mrb[66].mxu0  ;;  %v670_v24 = vld [vmem:[#allocation2 + $0x1f8] sm:$0xff] }
 0x224   : > { %2546 = vst [vmem:[#allocation2 + $0x188] sm:$0xff] %v2418_v30  ;;  %v2420_v32 = vadd.f32 %v2177_v19, %v658_v28  ;;  %v5932_v57 = vpop.f32.mrb[67].mxu0 }
 0x225   : > { %2547 = vst [vmem:[#allocation2 + $0x190] sm:$0xff] %v2419_v33 }
 0x226   : > { %2548 = vst [vmem:[#allocation2 + $0x198] sm:$0xff] %v2420_v32  ;;  %v1827_v37 = vpop.f32.mrb[52].mxu1 }
 0x227   : > { %v2181_v40 = vadd.f32 %v2180_v52, %v1827_v37  ;;  %v1829_v42 = vpop.f32.mrb[53].mxu1 }
 0x228   : > { %v2183_v35 = vadd.f32 %v2182_v55, %v1829_v42  ;;  %v1831_v41 = vpop.f32.mrb[54].mxu1  ;;  %v663_v55 = vld [vmem:[#allocation2 + $0x1c0] sm:$0xff] }
 0x229   : > { %v2421_v45 = vadd.f32 %v2181_v40, %v659_v36  ;;  %v2185_v38 = vadd.f32 %v5912_v59, %v1831_v41  ;;  %v1833_v50 = vpop.f32.mrb[55].mxu1  ;;  %v2220_v58 = vpop.f32.mrb[68].mxu0  ;;  %v672_v36 = vld [vmem:[#allocation2 + $0x208] sm:$0xff] }
 0x22a   : > { %v2422_v43 = vadd.f32 %v2183_v35, %v660_v44  ;;  %v2187_v48 = vadd.f32 %v5914_v63, %v1833_v50  ;;  %v2222_v9 = vpop.f32.mrb[69].mxu0  ;;  %v673_v44 = vld [vmem:[#allocation2 + $0x210] sm:$0xff] }
 0x22b   : > { %2549 = vst [vmem:[#allocation2 + $0x1a0] sm:$0xff] %v2421_v45  ;;  %v2423_v53 = vadd.f32 %v2185_v38, %v661_v46  ;;  %v5936_v10 = vpop.f32.mrb[70].mxu0  ;;  %v674_v46 = vld [vmem:[#allocation2 + $0x218] sm:$0xff] }
 0x22c   : > { %2550 = vst [vmem:[#allocation2 + $0x1a8] sm:$0xff] %v2422_v43  ;;  %v2424_v52 = vadd.f32 %v2187_v48, %v662_v49  ;;  %v5938_v13 = vpop.f32.mrb[71].mxu0 }
 0x22d   : > { %2551 = vst [vmem:[#allocation2 + $0x1b0] sm:$0xff] %v2423_v53 }
 0x22e   : > { %2552 = vst [vmem:[#allocation2 + $0x1b8] sm:$0xff] %v2424_v52  ;;  %v1837_v56 = vpop.f32.mrb[56].mxu1 }
 0x22f   : > { %v2191_v59 = vadd.f32 %v2190_v5, %v1837_v56  ;;  %v1839_v62 = vpop.f32.mrb[57].mxu1 }
 0x230   : > { %v2193_v0 = vadd.f32 %v2192_v11, %v1839_v62  ;;  %v1841_v61 = vpop.f32.mrb[58].mxu1  ;;  %v667_v11 = vld [vmem:[#allocation2 + $0x1e0] sm:$0xff] }
 0x231   : > { %v2425_v63 = vadd.f32 %v2191_v59, %v663_v55  ;;  %v2195_v4 = vadd.f32 %v5918_v14, %v1841_v61  ;;  %v1843_v6 = vpop.f32.mrb[59].mxu1  ;;  %v2230_v25 = vpop.f32.mrb[72].mxu0  ;;  %v676_v55 = vld [vmem:[#allocation2 + $0x228] sm:$0xff] }
 0x232   : > { %v2426_v7 = vadd.f32 %v2193_v0, %v664_v60  ;;  %v2197_v8 = vadd.f32 %v5920_v22, %v1843_v6  ;;  %v2232_v29 = vpop.f32.mrb[73].mxu0  ;;  %v677_v60 = vld [vmem:[#allocation2 + $0x230] sm:$0xff] }
 0x233   : > { %2553 = vst [vmem:[#allocation2 + $0x1c0] sm:$0xff] %v2425_v63  ;;  %v2427_v1 = vadd.f32 %v2195_v4, %v665_v2  ;;  %v5942_v19 = vpop.f32.mrb[74].mxu0  ;;  %v678_v2 = vld [vmem:[#allocation2 + $0x238] sm:$0xff] }
 0x234   : > { %2554 = vst [vmem:[#allocation2 + $0x1c8] sm:$0xff] %v2426_v7  ;;  %v2428_v5 = vadd.f32 %v2197_v8, %v666_v3  ;;  %v5944_v33 = vpop.f32.mrb[75].mxu0 }
 0x235   : > { %2555 = vst [vmem:[#allocation2 + $0x1d0] sm:$0xff] %v2427_v1 }
 0x236   : > { %2556 = vst [vmem:[#allocation2 + $0x1d8] sm:$0xff] %v2428_v5  ;;  %v1847_v12 = vpop.f32.mrb[60].mxu1 }
 0x237   : > { %v2201_v14 = vadd.f32 %v2200_v27, %v1847_v12  ;;  %v1849_v18 = vpop.f32.mrb[61].mxu1 }
 0x238   : > { %v2203_v23 = vadd.f32 %v2202_v31, %v1849_v18  ;;  %v1851_v21 = vpop.f32.mrb[62].mxu1  ;;  %v671_v31 = vld [vmem:[#allocation2 + $0x200] sm:$0xff] }
 0x239   : > { %v2429_v22 = vadd.f32 %v2201_v14, %v667_v11  ;;  %v2205_v26 = vadd.f32 %v5924_v34, %v1851_v21  ;;  %v1853_v20 = vpop.f32.mrb[63].mxu1  ;;  %v2240_v45 = vpop.f32.mrb[76].mxu0  ;;  %v680_v11 = vld [vmem:[#allocation2 + $0x248] sm:$0xff] }
 0x23a   : > { %v2430_v17 = vadd.f32 %v2203_v23, %v668_v15  ;;  %v2207_v28 = vadd.f32 %v5926_v39, %v1853_v20  ;;  %v2242_v50 = vpop.f32.mrb[77].mxu0  ;;  %v681_v15 = vld [vmem:[#allocation2 + $0x250] sm:$0xff] }
 0x23b   : > { %2557 = vst [vmem:[#allocation2 + $0x1e0] sm:$0xff] %v2429_v22  ;;  %v2431_v30 = vadd.f32 %v2205_v26, %v669_v16  ;;  %v5948_v48 = vpop.f32.mrb[78].mxu0  ;;  %v682_v16 = vld [vmem:[#allocation2 + $0x258] sm:$0xff] }
 0x23c   : > { %2558 = vst [vmem:[#allocation2 + $0x1e8] sm:$0xff] %v2430_v17  ;;  %v2432_v27 = vadd.f32 %v2207_v28, %v670_v24  ;;  %v5950_v53 = vpop.f32.mrb[79].mxu0 }
 0x23d   : > { %2559 = vst [vmem:[#allocation2 + $0x1f0] sm:$0xff] %v2431_v30 }
 0x23e   : > { %2560 = vst [vmem:[#allocation2 + $0x1f8] sm:$0xff] %v2432_v27  ;;  %v1857_v32 = vpop.f32.mrb[64].mxu1 }
 0x23f   : > { %v2211_v34 = vadd.f32 %v2210_v47, %v1857_v32  ;;  %v1859_v37 = vpop.f32.mrb[65].mxu1 }
 0x240   : > { %v2213_v40 = vadd.f32 %v2212_v51, %v1859_v37  ;;  %v1861_v42 = vpop.f32.mrb[66].mxu1  ;;  %v675_v51 = vld [vmem:[#allocation2 + $0x220] sm:$0xff] }
 0x241   : > { %v2433_v39 = vadd.f32 %v2211_v34, %v671_v31  ;;  %v2215_v35 = vadd.f32 %v5930_v54, %v1861_v42  ;;  %v1863_v41 = vpop.f32.mrb[67].mxu1  ;;  %v2250_v63 = vpop.f32.mrb[80].mxu0  ;;  %v684_v31 = vld [vmem:[#allocation2 + $0x268] sm:$0xff] }
 0x242   : > { %v2434_v38 = vadd.f32 %v2213_v40, %v672_v36  ;;  %v2217_v49 = vadd.f32 %v5932_v57, %v1863_v41  ;;  %v2252_v6 = vpop.f32.mrb[81].mxu0  ;;  %v685_v36 = vld [vmem:[#allocation2 + $0x270] sm:$0xff] }
 0x243   : > { %2561 = vst [vmem:[#allocation2 + $0x200] sm:$0xff] %v2433_v39  ;;  %v2435_v43 = vadd.f32 %v2215_v35, %v673_v44  ;;  %v5954_v8 = vpop.f32.mrb[82].mxu0  ;;  %v686_v44 = vld [vmem:[#allocation2 + $0x278] sm:$0xff] }
 0x244   : > { %2562 = vst [vmem:[#allocation2 + $0x208] sm:$0xff] %v2434_v38  ;;  %v2436_v47 = vadd.f32 %v2217_v49, %v674_v46  ;;  %v5956_v1 = vpop.f32.mrb[83].mxu0 }
 0x245   : > { %2563 = vst [vmem:[#allocation2 + $0x210] sm:$0xff] %v2435_v43 }
 0x246   : > { %2564 = vst [vmem:[#allocation2 + $0x218] sm:$0xff] %v2436_v47  ;;  %v1867_v52 = vpop.f32.mrb[68].mxu1 }
 0x247   : > { %v2221_v54 = vadd.f32 %v2220_v58, %v1867_v52  ;;  %v1869_v56 = vpop.f32.mrb[69].mxu1 }
 0x248   : > { %v2223_v59 = vadd.f32 %v2222_v9, %v1869_v56  ;;  %v1871_v62 = vpop.f32.mrb[70].mxu1  ;;  %v679_v9 = vld [vmem:[#allocation2 + $0x240] sm:$0xff] }
 0x249   : > { %v2437_v57 = vadd.f32 %v2221_v54, %v675_v51  ;;  %v2225_v0 = vadd.f32 %v5936_v10, %v1871_v62  ;;  %v1873_v61 = vpop.f32.mrb[71].mxu1  ;;  %v2260_v22 = vpop.f32.mrb[84].mxu0  ;;  %v688_v51 = vld [vmem:[#allocation2 + $0x288] sm:$0xff] }
 0x24a   : > { %v2438_v4 = vadd.f32 %v2223_v59, %v676_v55  ;;  %v2227_v3 = vadd.f32 %v5938_v13, %v1873_v61  ;;  %v2262_v20 = vpop.f32.mrb[85].mxu0  ;;  %v689_v55 = vld [vmem:[#allocation2 + $0x290] sm:$0xff] }
 0x24b   : > { %2565 = vst [vmem:[#allocation2 + $0x220] sm:$0xff] %v2437_v57  ;;  %v2439_v7 = vadd.f32 %v2225_v0, %v677_v60  ;;  %v5960_v28 = vpop.f32.mrb[86].mxu0  ;;  %v690_v60 = vld [vmem:[#allocation2 + $0x298] sm:$0xff] }
 0x24c   : > { %2566 = vst [vmem:[#allocation2 + $0x228] sm:$0xff] %v2438_v4  ;;  %v2440_v58 = vadd.f32 %v2227_v3, %v678_v2  ;;  %v5962_v30 = vpop.f32.mrb[87].mxu0 }
 0x24d   : > { %2567 = vst [vmem:[#allocation2 + $0x230] sm:$0xff] %v2439_v7 }
 0x24e   : > { %2568 = vst [vmem:[#allocation2 + $0x238] sm:$0xff] %v2440_v58  ;;  %v1877_v5 = vpop.f32.mrb[72].mxu1 }
 0x24f   : > { %v2231_v10 = vadd.f32 %v2230_v25, %v1877_v5  ;;  %v1879_v12 = vpop.f32.mrb[73].mxu1 }
 0x250   : > { %v2233_v14 = vadd.f32 %v2232_v29, %v1879_v12  ;;  %v1881_v18 = vpop.f32.mrb[74].mxu1  ;;  %v683_v29 = vld [vmem:[#allocation2 + $0x260] sm:$0xff] }
 0x251   : > { %v2441_v13 = vadd.f32 %v2231_v10, %v679_v9  ;;  %v2235_v23 = vadd.f32 %v5942_v19, %v1881_v18  ;;  %v1883_v21 = vpop.f32.mrb[75].mxu1  ;;  %v2270_v39 = vpop.f32.mrb[88].mxu0  ;;  %v692_v9 = vld [vmem:[#allocation2 + $0x2a8] sm:$0xff] }
 0x252   : > { %v2442_v26 = vadd.f32 %v2233_v14, %v680_v11  ;;  %v2237_v24 = vadd.f32 %v5944_v33, %v1883_v21  ;;  %v2272_v41 = vpop.f32.mrb[89].mxu0  ;;  %v693_v11 = vld [vmem:[#allocation2 + $0x2b0] sm:$0xff] }
 0x253   : > { %2569 = vst [vmem:[#allocation2 + $0x240] sm:$0xff] %v2441_v13  ;;  %v2443_v17 = vadd.f32 %v2235_v23, %v681_v15  ;;  %v5966_v49 = vpop.f32.mrb[90].mxu0  ;;  %v694_v15 = vld [vmem:[#allocation2 + $0x2b8] sm:$0xff] }
 0x254   : > { %2570 = vst [vmem:[#allocation2 + $0x248] sm:$0xff] %v2442_v26  ;;  %v2444_v25 = vadd.f32 %v2237_v24, %v682_v16  ;;  %v5968_v43 = vpop.f32.mrb[91].mxu0 }
 0x255   : > { %2571 = vst [vmem:[#allocation2 + $0x250] sm:$0xff] %v2443_v17 }
 0x256   : > { %2572 = vst [vmem:[#allocation2 + $0x258] sm:$0xff] %v2444_v25  ;;  %v1887_v27 = vpop.f32.mrb[76].mxu1 }
 0x257   : > { %v2241_v19 = vadd.f32 %v2240_v45, %v1887_v27  ;;  %v1889_v32 = vpop.f32.mrb[77].mxu1 }
 0x258   : > { %v2243_v34 = vadd.f32 %v2242_v50, %v1889_v32  ;;  %v1891_v37 = vpop.f32.mrb[78].mxu1  ;;  %v687_v50 = vld [vmem:[#allocation2 + $0x280] sm:$0xff] }
 0x259   : > { %v2445_v33 = vadd.f32 %v2241_v19, %v683_v29  ;;  %v2245_v40 = vadd.f32 %v5948_v48, %v1891_v37  ;;  %v1893_v42 = vpop.f32.mrb[79].mxu1  ;;  %v2280_v57 = vpop.f32.mrb[92].mxu0  ;;  %v696_v29 = vld [vmem:[#allocation2 + $0x2c8] sm:$0xff] }
 0x25a   : > { %v2446_v35 = vadd.f32 %v2243_v34, %v684_v31  ;;  %v2247_v46 = vadd.f32 %v5950_v53, %v1893_v42  ;;  %v2282_v61 = vpop.f32.mrb[93].mxu0  ;;  %v697_v31 = vld [vmem:[#allocation2 + $0x2d0] sm:$0xff] }
 0x25b   : > { %2573 = vst [vmem:[#allocation2 + $0x260] sm:$0xff] %v2445_v33  ;;  %v2447_v38 = vadd.f32 %v2245_v40, %v685_v36  ;;  %v5972_v3 = vpop.f32.mrb[94].mxu0  ;;  %v698_v36 = vld [vmem:[#allocation2 + $0x2d8] sm:$0xff] }
 0x25c   : > { %2574 = vst [vmem:[#allocation2 + $0x268] sm:$0xff] %v2446_v35  ;;  %v2448_v45 = vadd.f32 %v2247_v46, %v686_v44  ;;  %v5974_v7 = vpop.f32.mrb[95].mxu0 }
 0x25d   : > { %2575 = vst [vmem:[#allocation2 + $0x270] sm:$0xff] %v2447_v38 }
 0x25e   : > { %2576 = vst [vmem:[#allocation2 + $0x278] sm:$0xff] %v2448_v45  ;;  %v1897_v47 = vpop.f32.mrb[80].mxu1 }
 0x25f   : > { %v2251_v48 = vadd.f32 %v2250_v63, %v1897_v47  ;;  %v1899_v52 = vpop.f32.mrb[81].mxu1 }
 0x260   : > { %v2253_v54 = vadd.f32 %v2252_v6, %v1899_v52  ;;  %v1901_v56 = vpop.f32.mrb[82].mxu1  ;;  %v691_v6 = vld [vmem:[#allocation2 + $0x2a0] sm:$0xff] }
 0x261   : > { %v2449_v53 = vadd.f32 %v2251_v48, %v687_v50  ;;  %v2255_v59 = vadd.f32 %v5954_v8, %v1901_v56  ;;  %v1903_v62 = vpop.f32.mrb[83].mxu1  ;;  %v2290_v13 = vpop.f32.mrb[96].mxu0  ;;  %v700_v50 = vld [vmem:[#allocation2 + $0x2e8] sm:$0xff] }
 0x262   : > { %v2450_v0 = vadd.f32 %v2253_v54, %v688_v51  ;;  %v2257_v2 = vadd.f32 %v5956_v1, %v1903_v62  ;;  %v2292_v21 = vpop.f32.mrb[97].mxu0  ;;  %v701_v51 = vld [vmem:[#allocation2 + $0x2f0] sm:$0xff] }
 0x263   : > { %2577 = vst [vmem:[#allocation2 + $0x280] sm:$0xff] %v2449_v53  ;;  %v2451_v4 = vadd.f32 %v2255_v59, %v689_v55  ;;  %v5978_v24 = vpop.f32.mrb[98].mxu0  ;;  %v702_v55 = vld [vmem:[#allocation2 + $0x2f8] sm:$0xff] }
 0x264   : > { %2578 = vst [vmem:[#allocation2 + $0x288] sm:$0xff] %v2450_v0  ;;  %v2452_v63 = vadd.f32 %v2257_v2, %v690_v60  ;;  %v5980_v17 = vpop.f32.mrb[99].mxu0 }
 0x265   : > { %2579 = vst [vmem:[#allocation2 + $0x290] sm:$0xff] %v2451_v4 }
 0x266   : > { %2580 = vst [vmem:[#allocation2 + $0x298] sm:$0xff] %v2452_v63  ;;  %v1907_v58 = vpop.f32.mrb[84].mxu1 }
 0x267   : > { %v2261_v8 = vadd.f32 %v2260_v22, %v1907_v58  ;;  %v1909_v5 = vpop.f32.mrb[85].mxu1 }
 0x268   : > { %v2263_v10 = vadd.f32 %v2262_v20, %v1909_v5  ;;  %v1911_v12 = vpop.f32.mrb[86].mxu1  ;;  %v695_v20 = vld [vmem:[#allocation2 + $0x2c0] sm:$0xff] }
 0x269   : > { %v2453_v1 = vadd.f32 %v2261_v8, %v691_v6  ;;  %v2265_v14 = vadd.f32 %v5960_v28, %v1911_v12  ;;  %v1913_v18 = vpop.f32.mrb[87].mxu1  ;;  %v2300_v33 = vpop.f32.mrb[100].mxu0  ;;  %v704_v6 = vld [vmem:[#allocation2 + $0x308] sm:$0xff] }
 0x26a   : > { %v2454_v23 = vadd.f32 %v2263_v10, %v692_v9  ;;  %v2267_v16 = vadd.f32 %v5962_v30, %v1913_v18  ;;  %v2302_v42 = vpop.f32.mrb[101].mxu0  ;;  %v705_v9 = vld [vmem:[#allocation2 + $0x310] sm:$0xff] }
 0x26b   : > { %2581 = vst [vmem:[#allocation2 + $0x2a0] sm:$0xff] %v2453_v1  ;;  %v2455_v26 = vadd.f32 %v2265_v14, %v693_v11  ;;  %v5984_v46 = vpop.f32.mrb[102].mxu0  ;;  %v706_v11 = vld [vmem:[#allocation2 + $0x318] sm:$0xff] }
 0x26c   : > { %2582 = vst [vmem:[#allocation2 + $0x2a8] sm:$0xff] %v2454_v23  ;;  %v2456_v22 = vadd.f32 %v2267_v16, %v694_v15  ;;  %v5986_v38 = vpop.f32.mrb[103].mxu0 }
 0x26d   : > { %2583 = vst [vmem:[#allocation2 + $0x2b0] sm:$0xff] %v2455_v26 }
 0x26e   : > { %2584 = vst [vmem:[#allocation2 + $0x2b8] sm:$0xff] %v2456_v22  ;;  %v1917_v25 = vpop.f32.mrb[88].mxu1 }
 0x26f   : > { %v2271_v28 = vadd.f32 %v2270_v39, %v1917_v25  ;;  %v1919_v27 = vpop.f32.mrb[89].mxu1 }
 0x270   : > { %v2273_v19 = vadd.f32 %v2272_v41, %v1919_v27  ;;  %v1921_v32 = vpop.f32.mrb[90].mxu1  ;;  %v699_v41 = vld [vmem:[#allocation2 + $0x2e0] sm:$0xff] }
 0x271   : > { %v2457_v30 = vadd.f32 %v2271_v28, %v695_v20  ;;  %v2275_v34 = vadd.f32 %v5966_v49, %v1921_v32  ;;  %v1923_v37 = vpop.f32.mrb[91].mxu1  ;;  %v2310_v53 = vpop.f32.mrb[104].mxu0  ;;  %v708_v20 = vld [vmem:[#allocation2 + $0x328] sm:$0xff] }
 0x272   : > { %v2458_v40 = vadd.f32 %v2273_v19, %v696_v29  ;;  %v2277_v44 = vadd.f32 %v5968_v43, %v1923_v37  ;;  %v2312_v62 = vpop.f32.mrb[105].mxu0  ;;  %v709_v29 = vld [vmem:[#allocation2 + $0x330] sm:$0xff] }
 0x273   : > { %2585 = vst [vmem:[#allocation2 + $0x2c0] sm:$0xff] %v2457_v30  ;;  %v2459_v35 = vadd.f32 %v2275_v34, %v697_v31  ;;  %v5990_v2 = vpop.f32.mrb[106].mxu0  ;;  %v710_v31 = vld [vmem:[#allocation2 + $0x338] sm:$0xff] }
 0x274   : > { %2586 = vst [vmem:[#allocation2 + $0x2c8] sm:$0xff] %v2458_v40  ;;  %v2460_v39 = vadd.f32 %v2277_v44, %v698_v36  ;;  %v5992_v4 = vpop.f32.mrb[107].mxu0 }
 0x275   : > { %2587 = vst [vmem:[#allocation2 + $0x2d0] sm:$0xff] %v2459_v35 }
 0x276   : > { %2588 = vst [vmem:[#allocation2 + $0x2d8] sm:$0xff] %v2460_v39  ;;  %v1927_v45 = vpop.f32.mrb[92].mxu1 }
 0x277   : > { %v2281_v49 = vadd.f32 %v2280_v57, %v1927_v45  ;;  %v1929_v47 = vpop.f32.mrb[93].mxu1 }
 0x278   : > { %v2283_v48 = vadd.f32 %v2282_v61, %v1929_v47  ;;  %v1931_v52 = vpop.f32.mrb[94].mxu1  ;;  %v703_v61 = vld [vmem:[#allocation2 + $0x300] sm:$0xff] }
 0x279   : > { %v2461_v43 = vadd.f32 %v2281_v49, %v699_v41  ;;  %v2285_v54 = vadd.f32 %v5972_v3, %v1931_v52  ;;  %v1933_v56 = vpop.f32.mrb[95].mxu1  ;;  %v2320_v1 = vpop.f32.mrb[108].mxu0  ;;  %v712_v41 = vld [vmem:[#allocation2 + $0x348] sm:$0xff] }
 0x27a   : > { %v2462_v59 = vadd.f32 %v2283_v48, %v700_v50  ;;  %v2287_v60 = vadd.f32 %v5974_v7, %v1933_v56  ;;  %v2322_v18 = vpop.f32.mrb[109].mxu0  ;;  %v713_v50 = vld [vmem:[#allocation2 + $0x350] sm:$0xff] }
 0x27b   : > { %2589 = vst [vmem:[#allocation2 + $0x2e0] sm:$0xff] %v2461_v43  ;;  %v2463_v0 = vadd.f32 %v2285_v54, %v701_v51  ;;  %v5996_v16 = vpop.f32.mrb[110].mxu0  ;;  %v714_v51 = vld [vmem:[#allocation2 + $0x358] sm:$0xff] }
 0x27c   : > { %2590 = vst [vmem:[#allocation2 + $0x2e8] sm:$0xff] %v2462_v59  ;;  %v2464_v57 = vadd.f32 %v2287_v60, %v702_v55  ;;  %v5998_v26 = vpop.f32.mrb[111].mxu0 }
 0x27d   : > { %2591 = vst [vmem:[#allocation2 + $0x2f0] sm:$0xff] %v2463_v0 }
 0x27e   : > { %2592 = vst [vmem:[#allocation2 + $0x2f8] sm:$0xff] %v2464_v57  ;;  %v1937_v63 = vpop.f32.mrb[96].mxu1 }
 0x27f   : > { %v2291_v3 = vadd.f32 %v2290_v13, %v1937_v63  ;;  %v1939_v58 = vpop.f32.mrb[97].mxu1 }
 0x280   : > { %v2293_v8 = vadd.f32 %v2292_v21, %v1939_v58  ;;  %v1941_v5 = vpop.f32.mrb[98].mxu1  ;;  %v707_v21 = vld [vmem:[#allocation2 + $0x320] sm:$0xff] }
 0x281   : > { %v2465_v7 = vadd.f32 %v2291_v3, %v703_v61  ;;  %v2295_v10 = vadd.f32 %v5978_v24, %v1941_v5  ;;  %v1943_v12 = vpop.f32.mrb[99].mxu1  ;;  %v2330_v30 = vpop.f32.mrb[112].mxu0  ;;  %v716_v61 = vld [vmem:[#allocation2 + $0x368] sm:$0xff] }
 0x282   : > { %v2466_v14 = vadd.f32 %v2293_v8, %v704_v6  ;;  %v2297_v15 = vadd.f32 %v5980_v17, %v1943_v12  ;;  %v2332_v37 = vpop.f32.mrb[113].mxu0  ;;  %v717_v6 = vld [vmem:[#allocation2 + $0x370] sm:$0xff] }
 0x283   : > { %2593 = vst [vmem:[#allocation2 + $0x300] sm:$0xff] %v2465_v7  ;;  %v2467_v23 = vadd.f32 %v2295_v10, %v705_v9  ;;  %v6002_v44 = vpop.f32.mrb[114].mxu0  ;;  %v718_v9 = vld [vmem:[#allocation2 + $0x378] sm:$0xff] }
 0x284   : > { %2594 = vst [vmem:[#allocation2 + $0x308] sm:$0xff] %v2466_v14  ;;  %v2468_v13 = vadd.f32 %v2297_v15, %v706_v11  ;;  %v6004_v35 = vpop.f32.mrb[115].mxu0 }
 0x285   : > { %2595 = vst [vmem:[#allocation2 + $0x310] sm:$0xff] %v2467_v23 }
 0x286   : > { %2596 = vst [vmem:[#allocation2 + $0x318] sm:$0xff] %v2468_v13  ;;  %v1947_v22 = vpop.f32.mrb[100].mxu1 }
 0x287   : > { %v2301_v24 = vadd.f32 %v2300_v33, %v1947_v22  ;;  %v1949_v25 = vpop.f32.mrb[101].mxu1  ;;  %v720_v22 = vld [vmem:[#allocation2 + $0x388] sm:$0xff] }
 0x288   : > { %v2303_v28 = vadd.f32 %v2302_v42, %v1949_v25  ;;  %v1951_v27 = vpop.f32.mrb[102].mxu1  ;;  %v711_v42 = vld [vmem:[#allocation2 + $0x340] sm:$0xff] }
 0x289   : > { %v2469_v17 = vadd.f32 %v2301_v24, %v707_v21  ;;  %v2305_v19 = vadd.f32 %v5984_v46, %v1951_v27  ;;  %v1953_v32 = vpop.f32.mrb[103].mxu1  ;;  %v2340_v43 = vpop.f32.mrb[116].mxu0 }
 0x28a   : > { %v2470_v34 = vadd.f32 %v2303_v28, %v708_v20  ;;  %v2307_v36 = vadd.f32 %v5986_v38, %v1953_v32  ;;  %v2342_v56 = vpop.f32.mrb[117].mxu0  ;;  %v721_v20 = vld [vmem:[#allocation2 + $0x390] sm:$0xff] }
 0x28b   : > { %2597 = vst [vmem:[#allocation2 + $0x320] sm:$0xff] %v2469_v17  ;;  %v2471_v40 = vadd.f32 %v2305_v19, %v709_v29  ;;  %v6008_v60 = vpop.f32.mrb[118].mxu0  ;;  %v722_v29 = vld [vmem:[#allocation2 + $0x398] sm:$0xff] }
 0x28c   : > { %2598 = vst [vmem:[#allocation2 + $0x328] sm:$0xff] %v2470_v34  ;;  %v2472_v33 = vadd.f32 %v2307_v36, %v710_v31  ;;  %v6010_v0 = vpop.f32.mrb[119].mxu0 }
 0x28d   : > { %2599 = vst [vmem:[#allocation2 + $0x330] sm:$0xff] %v2471_v40 }
 0x28e   : > { %2600 = vst [vmem:[#allocation2 + $0x338] sm:$0xff] %v2472_v33  ;;  %v1957_v39 = vpop.f32.mrb[104].mxu1 }
 0x28f   : > { %v2311_v46 = vadd.f32 %v2310_v53, %v1957_v39  ;;  %v1959_v45 = vpop.f32.mrb[105].mxu1  ;;  %v724_v39 = vld [vmem:[#allocation2 + $0x3a8] sm:$0xff] }
 0x290   : > { %v2313_v49 = vadd.f32 %v2312_v62, %v1959_v45  ;;  %v1961_v47 = vpop.f32.mrb[106].mxu1  ;;  %v715_v62 = vld [vmem:[#allocation2 + $0x360] sm:$0xff] }
 0x291   : > { %v2473_v38 = vadd.f32 %v2311_v46, %v711_v42  ;;  %v2315_v48 = vadd.f32 %v5990_v2, %v1961_v47  ;;  %v1963_v52 = vpop.f32.mrb[107].mxu1  ;;  %v2350_v7 = vpop.f32.mrb[120].mxu0 }
 0x292   : > { %v2474_v54 = vadd.f32 %v2313_v49, %v712_v41  ;;  %v2317_v55 = vadd.f32 %v5992_v4, %v1963_v52  ;;  %v2352_v12 = vpop.f32.mrb[121].mxu0  ;;  %v725_v41 = vld [vmem:[#allocation2 + $0x3b0] sm:$0xff] }
 0x293   : > { %2601 = vst [vmem:[#allocation2 + $0x340] sm:$0xff] %v2473_v38  ;;  %v2475_v59 = vadd.f32 %v2315_v48, %v713_v50  ;;  %v2354_v15 = vpop.f32.mrb[122].mxu0  ;;  %v726_v50 = vld [vmem:[#allocation2 + $0x3b8] sm:$0xff] }
 0x294   : > { %2602 = vst [vmem:[#allocation2 + $0x348] sm:$0xff] %v2474_v54  ;;  %v2476_v53 = vadd.f32 %v2317_v55, %v714_v51  ;;  %v2356_v23 = vpop.f32.mrb[123].mxu0 }
 0x295   : > { %2603 = vst [vmem:[#allocation2 + $0x350] sm:$0xff] %v2475_v59 }
 0x296   : > { %2604 = vst [vmem:[#allocation2 + $0x358] sm:$0xff] %v2476_v53  ;;  %v1967_v57 = vpop.f32.mrb[108].mxu1 }
 0x297   : > { %v2321_v2 = vadd.f32 %v2320_v1, %v1967_v57  ;;  %v1969_v63 = vpop.f32.mrb[109].mxu1 }
 0x298   : > { %v2323_v3 = vadd.f32 %v2322_v18, %v1969_v63  ;;  %v1971_v58 = vpop.f32.mrb[110].mxu1  ;;  %v719_v18 = vld [vmem:[#allocation2 + $0x380] sm:$0xff] }
 0x299   : > { %v2477_v4 = vadd.f32 %v2321_v2, %v715_v62  ;;  %v2325_v8 = vadd.f32 %v5996_v16, %v1971_v58  ;;  %v1973_v5 = vpop.f32.mrb[111].mxu1  ;;  %v2360_v17 = vpop.f32.mrb[124].mxu0  ;;  %v729_v62 = vld [vmem:[#allocation2 + $0x3d0] sm:$0xff] }
 0x29a   : > { %v2478_v10 = vadd.f32 %v2323_v3, %v716_v61  ;;  %v2327_v11 = vadd.f32 %v5998_v26, %v1973_v5  ;;  %v2362_v32 = vpop.f32.mrb[125].mxu0  ;;  %v730_v61 = vld [vmem:[#allocation2 + $0x3d8] sm:$0xff]  ;;  %v732_v5 = vld [vmem:[#allocation2 + $0x3e8] sm:$0xff] }
 0x29b   : > { %2605 = vst [vmem:[#allocation2 + $0x360] sm:$0xff] %v2477_v4  ;;  %v2479_v14 = vadd.f32 %v2325_v8, %v717_v6  ;;  %v2364_v36 = vpop.f32.mrb[126].mxu0  ;;  %v731_v4 = vld [vmem:[#allocation2 + $0x3e0] sm:$0xff] }
 0x29c   : > { %2606 = vst [vmem:[#allocation2 + $0x368] sm:$0xff] %v2478_v10  ;;  %v2480_v1 = vadd.f32 %v2327_v11, %v718_v9  ;;  %v2366_v40 = vpop.f32.mrb[127].mxu0  ;;  %v733_v11 = vld [vmem:[#allocation2 + $0x3f0] sm:$0xff] }
 0x29d   : > { %2607 = vst [vmem:[#allocation2 + $0x370] sm:$0xff] %v2479_v14 }
 0x29e   : > { %2608 = vst [vmem:[#allocation2 + $0x378] sm:$0xff] %v2480_v1  ;;  %v1977_v13 = vpop.f32.mrb[112].mxu1  ;;  %v734_v1 = vld [vmem:[#allocation2 + $0x3f8] sm:$0xff] }
 0x29f   : > { %v2331_v21 = vadd.f32 %v2330_v30, %v1977_v13  ;;  %v1979_v16 = vpop.f32.mrb[113].mxu1 }
 0x2a0   : > { %v2333_v24 = vadd.f32 %v2332_v37, %v1979_v16  ;;  %v1981_v25 = vpop.f32.mrb[114].mxu1  ;;  %v723_v37 = vld [vmem:[#allocation2 + $0x3a0] sm:$0xff] }
 0x2a1   : > { %v2481_v28 = vadd.f32 %v2331_v21, %v719_v18  ;;  %v2335_v26 = vadd.f32 %v6002_v44, %v1981_v25  ;;  %v1983_v27 = vpop.f32.mrb[115].mxu1 }
 0x2a2   : > { %v2482_v19 = vadd.f32 %v2333_v24, %v720_v22  ;;  %v2337_v31 = vadd.f32 %v6004_v35, %v1983_v27 }
 0x2a3   : > { %2609 = vst [vmem:[#allocation2 + $0x380] sm:$0xff] %v2481_v28  ;;  %v2483_v34 = vadd.f32 %v2335_v26, %v721_v20 }
 0x2a4   : > { %2610 = vst [vmem:[#allocation2 + $0x388] sm:$0xff] %v2482_v19  ;;  %v2484_v30 = vadd.f32 %v2337_v31, %v722_v29 }
 0x2a5   : > { %2611 = vst [vmem:[#allocation2 + $0x390] sm:$0xff] %v2483_v34 }
 0x2a6   : > { %2612 = vst [vmem:[#allocation2 + $0x398] sm:$0xff] %v2484_v30  ;;  %v1987_v33 = vpop.f32.mrb[116].mxu1 }
 0x2a7   : > { %v2341_v42 = vadd.f32 %v2340_v43, %v1987_v33  ;;  %v1989_v44 = vpop.f32.mrb[117].mxu1  ;;  %v727_v43 = vld [vmem:[#allocation2 + $0x3c0] sm:$0xff] }
 0x2a8   : > { %v2343_v46 = vadd.f32 %v2342_v56, %v1989_v44  ;;  %v1991_v45 = vpop.f32.mrb[118].mxu1  ;;  %v728_v56 = vld [vmem:[#allocation2 + $0x3c8] sm:$0xff] }
 0x2a9   : > { %v2485_v49 = vadd.f32 %v2341_v42, %v723_v37  ;;  %v2345_v35 = vadd.f32 %v6008_v60, %v1991_v45  ;;  %v1993_v47 = vpop.f32.mrb[119].mxu1 }
 0x2aa   : > { %v2486_v38 = vadd.f32 %v2343_v46, %v724_v39  ;;  %v2347_v48 = vadd.f32 %v6010_v0, %v1993_v47 }
 0x2ab   : > { %2613 = vst [vmem:[#allocation2 + $0x3a0] sm:$0xff] %v2485_v49  ;;  %v2487_v51 = vadd.f32 %v2345_v35, %v725_v41 }
 0x2ac   : > { %2614 = vst [vmem:[#allocation2 + $0x3a8] sm:$0xff] %v2486_v38  ;;  %v2488_v52 = vadd.f32 %v2347_v48, %v726_v50 }
 0x2ad   : > { %2615 = vst [vmem:[#allocation2 + $0x3b0] sm:$0xff] %v2487_v51 }
 0x2ae   : > { %2616 = vst [vmem:[#allocation2 + $0x3b8] sm:$0xff] %v2488_v52  ;;  %v1997_v54 = vpop.f32.mrb[120].mxu1 }
 0x2af   : > { %v2351_v55 = vadd.f32 %v2350_v7, %v1997_v54  ;;  %v1999_v59 = vpop.f32.mrb[121].mxu1 }
 0x2b0   : > { %v2353_v53 = vadd.f32 %v2352_v12, %v1999_v59  ;;  %v2001_v57 = vpop.f32.mrb[122].mxu1 }
 0x2b1   : > { %v2489_v60 = vadd.f32 %v2351_v55, %v727_v43  ;;  %v2355_v2 = vadd.f32 %v2354_v15, %v2001_v57  ;;  %v2003_v63 = vpop.f32.mrb[123].mxu1 }
 0x2b2   : > { %v2490_v3 = vadd.f32 %v2353_v53, %v728_v56  ;;  %v2357_v0 = vadd.f32 %v2356_v23, %v2003_v63 }
 0x2b3   : > { %2617 = vst [vmem:[#allocation2 + $0x3c0] sm:$0xff] %v2489_v60  ;;  %v2491_v6 = vadd.f32 %v2355_v2, %v729_v62 }
 0x2b4   : > { %2618 = vst [vmem:[#allocation2 + $0x3c8] sm:$0xff] %v2490_v3  ;;  %v2492_v58 = vadd.f32 %v2357_v0, %v730_v61 }
 0x2b5   : > { %2619 = vst [vmem:[#allocation2 + $0x3d0] sm:$0xff] %v2491_v6 }
 0x2b6   : > { %2620 = vst [vmem:[#allocation2 + $0x3d8] sm:$0xff] %v2492_v58  ;;  %v2007_v8 = vpop.f32.mrb[124].mxu1 }
 0x2b7   : > { %v2361_v9 = vadd.f32 %v2360_v17, %v2007_v8  ;;  %v2009_v7 = vpop.f32.mrb[125].mxu1 }
 0x2b8   : > { %v2363_v10 = vadd.f32 %v2362_v32, %v2009_v7  ;;  %v2011_v12 = vpop.f32.mrb[126].mxu1  ;;  %2628 = sbr.rel (%p4627_p11) target bundleno = 1157 (0x485), region = 62 }
 0x2b9   : > { %v2493_v14 = vadd.f32 %v2361_v9, %v731_v4  ;;  %v2365_v15 = vadd.f32 %v2364_v36, %v2011_v12  ;;  %v2013_v18 = vpop.f32.mrb[127].mxu1 }
 0x2ba   : > { %v2494_v13 = vadd.f32 %v2363_v10, %v732_v5  ;;  %v2367_v23 = vadd.f32 %v2366_v40, %v2013_v18 }
 0x2bb   : > { %2621 = vst [vmem:[#allocation2 + $0x3e0] sm:$0xff] %v2493_v14  ;;  %v2495_v21 = vadd.f32 %v2365_v15, %v733_v11 }
 0x2bc   : > { %2622 = vst [vmem:[#allocation2 + $0x3e8] sm:$0xff] %v2494_v13  ;;  %v2496_v22 = vadd.f32 %v2367_v23, %v734_v1 }
 0x2bd   : > { %2623 = vst [vmem:[#allocation2 + $0x3f0] sm:$0xff] %v2495_v21 }
 0x2be   : > { %2624 = vst [vmem:[#allocation2 + $0x3f8] sm:$0xff] %v2496_v22 }
 0x2bf   : > { %v6019_v16 = vld [vmem:[#allocation2] sm:$0xff]  ;;  %v6021_v24 = vld [vmem:[#allocation2 + $0x8] sm:$0xff]  ;;  %v6023_v20 = vld [vmem:[#allocation2 + $0x10] sm:$0xff] }
 0x2c0   : > { %v6025_v25 = vld [vmem:[#allocation2 + $0x18] sm:$0xff]  ;;  %v6027_v28 = vld [vmem:[#allocation2 + $0x20] sm:$0xff]  ;;  %v6029_v26 = vld [vmem:[#allocation2 + $0x28] sm:$0xff]  ;;  %v2757_v29 = vadd.f32 %v6023_v20, %v6019_v16 }
 0x2c1   : > { %v6033_v27 = vld [vmem:[#allocation2 + $0x30] sm:$0xff]  ;;  %v2826_v17 = vadd.f32 %v6025_v25, %v6021_v24  ;;  %v6037_v19 = vld [vmem:[#allocation2 + $0x38] sm:$0xff]  ;;  %v6040_v32 = vld [vmem:[#allocation2 + $0x40] sm:$0xff] }
 0x2c2   : > { %v2758_v31 = vadd.f32 %v2757_v29, %v6027_v28  ;;  %v6043_v36 = vld [vmem:[#allocation2 + $0x48] sm:$0xff]  ;;  %v6046_v40 = vld [vmem:[#allocation2 + $0x50] sm:$0xff]  ;;  %v6049_v33 = vld [vmem:[#allocation2 + $0x58] sm:$0xff] }
 0x2c3   : > { %v2827_v34 = vadd.f32 %v2826_v17, %v6029_v26  ;;  %v6052_v39 = vld [vmem:[#allocation2 + $0x60] sm:$0xff]  ;;  %v6055_v46 = vld [vmem:[#allocation2 + $0x68] sm:$0xff]  ;;  %v6058_v45 = vld [vmem:[#allocation2 + $0x70] sm:$0xff] }
 0x2c4   : > { %v2759_v30 = vadd.f32 %v2758_v31, %v6033_v27  ;;  %v6061_v35 = vld [vmem:[#allocation2 + $0x78] sm:$0xff]  ;;  %v6064_v47 = vld [vmem:[#allocation2 + $0x80] sm:$0xff]  ;;  %v6067_v48 = vld [vmem:[#allocation2 + $0x88] sm:$0xff] }
 0x2c5   : > { %v2828_v37 = vadd.f32 %v2827_v34, %v6037_v19  ;;  %v6070_v52 = vld [vmem:[#allocation2 + $0x90] sm:$0xff]  ;;  %v6073_v54 = vld [vmem:[#allocation2 + $0x98] sm:$0xff]  ;;  %v6076_v56 = vld [vmem:[#allocation2 + $0xa0] sm:$0xff] }
 0x2c6   : > { %v2760_v42 = vadd.f32 %v2759_v30, %v6040_v32  ;;  %7740 = vst [vmem:[#allocation4_spill] sm:$0xff] %v6076_v56  ;;  %v6079_v53 = vld [vmem:[#allocation2 + $0xa8] sm:$0xff]  ;;  %v6082_v57 = vld [vmem:[#allocation2 + $0xb0] sm:$0xff]  ;;  %v6085_v2 = vld [vmem:[#allocation2 + $0xb8] sm:$0xff] }
 0x2c7   : > { %v2829_v44 = vadd.f32 %v2828_v37, %v6043_v36  ;;  %7741 = vst [vmem:[#allocation5_spill] sm:$0xff] %v6079_v53  ;;  %7742 = vst [vmem:[#allocation6_spill] sm:$0xff] %v6082_v57  ;;  %v6088_v63 = vld [vmem:[#allocation2 + $0xc0] sm:$0xff]  ;;  %v6091_v0 = vld [vmem:[#allocation2 + $0xc8] sm:$0xff] }
 0x2c8   : > { %v2761_v41 = vadd.f32 %v2760_v42, %v6046_v40  ;;  %7743 = vst [vmem:[#allocation7_spill] sm:$0xff] %v6085_v2  ;;  %7744 = vst [vmem:[#allocation8_spill] sm:$0xff] %v6088_v63  ;;  %v6094_v58 = vld [vmem:[#allocation2 + $0xd0] sm:$0xff]  ;;  %v6097_v8 = vld [vmem:[#allocation2 + $0xd8] sm:$0xff] }
 0x2c9   : > { %v2830_v49 = vadd.f32 %v2829_v44, %v6049_v33  ;;  %7745 = vst [vmem:[#allocation9_spill] sm:$0xff] %v6091_v0  ;;  %7746 = vst [vmem:[#allocation10_spill] sm:$0xff] %v6094_v58  ;;  %v6100_v5 = vld [vmem:[#allocation2 + $0xe0] sm:$0xff]  ;;  %v6103_v10 = vld [vmem:[#allocation2 + $0xe8] sm:$0xff] }
 0x2ca   : > { %v2762_v50 = vadd.f32 %v2761_v41, %v6052_v39  ;;  %7747 = vst [vmem:[#allocation11_spill] sm:$0xff] %v6097_v8  ;;  %7748 = vst [vmem:[#allocation12_spill] sm:$0xff] %v6100_v5  ;;  %v6106_v12 = vld [vmem:[#allocation2 + $0xf0] sm:$0xff]  ;;  %v6109_v15 = vld [vmem:[#allocation2 + $0xf8] sm:$0xff] }
 0x2cb   : > { %v2831_v38 = vadd.f32 %v2830_v49, %v6055_v46  ;;  %7749 = vst [vmem:[#allocation13_spill] sm:$0xff] %v6103_v10  ;;  %7750 = vst [vmem:[#allocation14_spill] sm:$0xff] %v6106_v12  ;;  %v6112_v18 = vld [vmem:[#allocation2 + $0x100] sm:$0xff]  ;;  %v6115_v23 = vld [vmem:[#allocation2 + $0x108] sm:$0xff] }
 0x2cc   : > { %v2763_v51 = vadd.f32 %v2762_v50, %v6058_v45  ;;  %7751 = vst [vmem:[#allocation15_spill] sm:$0xff] %v6109_v15  ;;  %7752 = vst [vmem:[#allocation16_spill] sm:$0xff] %v6112_v18  ;;  %v6118_v22 = vld [vmem:[#allocation2 + $0x110] sm:$0xff]  ;;  %v6121_v17 = vld [vmem:[#allocation2 + $0x118] sm:$0xff] }
 0x2cd   : > { %v2832_v43 = vadd.f32 %v2831_v38, %v6061_v35  ;;  %7753 = vst [vmem:[#allocation17_spill] sm:$0xff] %v6115_v23  ;;  %7754 = vst [vmem:[#allocation18_spill] sm:$0xff] %v6118_v22  ;;  %v6124_v34 = vld [vmem:[#allocation2 + $0x120] sm:$0xff]  ;;  %v6127_v37 = vld [vmem:[#allocation2 + $0x128] sm:$0xff] }
 0x2ce   : > { %v2764_v55 = vadd.f32 %v2763_v51, %v6064_v47  ;;  %7755 = vst [vmem:[#allocation19_spill] sm:$0xff] %v6121_v17  ;;  %7756 = vst [vmem:[#allocation20_spill] sm:$0xff] %v6124_v34  ;;  %v6130_v44 = vld [vmem:[#allocation2 + $0x130] sm:$0xff]  ;;  %v6133_v49 = vld [vmem:[#allocation2 + $0x138] sm:$0xff] }
 0x2cf   : > { %v2833_v59 = vadd.f32 %v2832_v43, %v6067_v48  ;;  %7757 = vst [vmem:[#allocation21_spill] sm:$0xff] %v6127_v37  ;;  %7758 = vst [vmem:[#allocation22_spill] sm:$0xff] %v6130_v44  ;;  %v6136_v38 = vld [vmem:[#allocation2 + $0x140] sm:$0xff]  ;;  %v6139_v43 = vld [vmem:[#allocation2 + $0x148] sm:$0xff] }
 0x2d0   : > { %v2765_v62 = vadd.f32 %v2764_v55, %v6070_v52  ;;  %7759 = vst [vmem:[#allocation23_spill] sm:$0xff] %v6133_v49  ;;  %7760 = vst [vmem:[#allocation24_spill] sm:$0xff] %v6136_v38 }
 0x2d1   : > { %v2834_v60 = vadd.f32 %v2833_v59, %v6073_v54  ;;  %7761 = vst [vmem:[#allocation25_spill] sm:$0xff] %v6139_v43  ;;  %v6142_v59 = vld [vmem:[#allocation2 + $0x150] sm:$0xff] }
 0x2d2   : > { %v2766_v61 = vadd.f32 %v2765_v62, %v6076_v56  ;;  %7762 = vst [vmem:[#allocation26_spill] sm:$0xff] %v6142_v59 }
 0x2d3   : > { %v2835_v3 = vadd.f32 %v2834_v60, %v6079_v53  ;;  %v6145_v60 = vld [vmem:[#allocation2 + $0x158] sm:$0xff] }
 0x2d4   : > { %v2767_v6 = vadd.f32 %v2766_v61, %v6082_v57  ;;  %7763 = vst [vmem:[#allocation27_spill] sm:$0xff] %v6145_v60 }
 0x2d5   : > { %v2836_v4 = vadd.f32 %v2835_v3, %v6085_v2  ;;  %v6148_v3 = vld [vmem:[#allocation2 + $0x160] sm:$0xff] }
 0x2d6   : > { %v2768_v9 = vadd.f32 %v2767_v6, %v6088_v63  ;;  %7764 = vst [vmem:[#allocation28_spill] sm:$0xff] %v6148_v3 }
 0x2d7   : > { %v2837_v7 = vadd.f32 %v2836_v4, %v6091_v0  ;;  %v6151_v4 = vld [vmem:[#allocation2 + $0x168] sm:$0xff] }
 0x2d8   : > { %v2769_v11 = vadd.f32 %v2768_v9, %v6094_v58  ;;  %7765 = vst [vmem:[#allocation29_spill] sm:$0xff] %v6151_v4 }
 0x2d9   : > { %v2838_v14 = vadd.f32 %v2837_v7, %v6097_v8  ;;  %v6154_v7 = vld [vmem:[#allocation2 + $0x170] sm:$0xff] }
 0x2da   : > { %v2770_v1 = vadd.f32 %v2769_v11, %v6100_v5  ;;  %7766 = vst [vmem:[#allocation30_spill] sm:$0xff] %v6154_v7 }
 0x2db   : > { %v2839_v13 = vadd.f32 %v2838_v14, %v6103_v10  ;;  %v6157_v14 = vld [vmem:[#allocation2 + $0x178] sm:$0xff]  ;;  %v2754_v10 = vld [vmem:[#allocation2 + $0x3e8] sm:$0xff] }
 0x2dc   : > { %v2771_v21 = vadd.f32 %v2770_v1, %v6106_v12  ;;  %7767 = vst [vmem:[#allocation31_spill] sm:$0xff] %v6157_v14  ;;  %v2751_v12 = vld [vmem:[#allocation2 + $0x3d0] sm:$0xff] }
 0x2dd   : > { %v2840_v29 = vadd.f32 %v2839_v13, %v6109_v15  ;;  %v6160_v13 = vld [vmem:[#allocation2 + $0x180] sm:$0xff]  ;;  %v2752_v15 = vld [vmem:[#allocation2 + $0x3d8] sm:$0xff] }
 0x2de   : > { %v2772_v31 = vadd.f32 %v2771_v21, %v6112_v18  ;;  %7768 = vst [vmem:[#allocation32_spill] sm:$0xff] %v6160_v13  ;;  %v2749_v18 = vld [vmem:[#allocation2 + $0x3c0] sm:$0xff] }
 0x2df   : > { %v2841_v30 = vadd.f32 %v2840_v29, %v6115_v23  ;;  %v6163_v29 = vld [vmem:[#allocation2 + $0x188] sm:$0xff] }
 0x2e0   : > { %v2773_v42 = vadd.f32 %v2772_v31, %v6118_v22  ;;  %7769 = vst [vmem:[#allocation33_spill] sm:$0xff] %v6163_v29  ;;  %v2747_v22 = vld [vmem:[#allocation2 + $0x3b0] sm:$0xff]  ;;  %v2750_v23 = vld [vmem:[#allocation2 + $0x3c8] sm:$0xff] }
 0x2e1   : > { %v2842_v41 = vadd.f32 %v2841_v30, %v6121_v17  ;;  %v6166_v30 = vld [vmem:[#allocation2 + $0x190] sm:$0xff] }
 0x2e2   : > { %v2774_v50 = vadd.f32 %v2773_v42, %v6124_v34  ;;  %7770 = vst [vmem:[#allocation34_spill] sm:$0xff] %v6166_v30 }
 0x2e3   : > { %v2843_v51 = vadd.f32 %v2842_v41, %v6127_v37  ;;  %v6169_v41 = vld [vmem:[#allocation2 + $0x198] sm:$0xff] }
 0x2e4   : > { %v2775_v55 = vadd.f32 %v2774_v50, %v6130_v44  ;;  %7771 = vst [vmem:[#allocation35_spill] sm:$0xff] %v6169_v41 }
 0x2e5   : > { %v2844_v62 = vadd.f32 %v2843_v51, %v6133_v49  ;;  %v6172_v51 = vld [vmem:[#allocation2 + $0x1a0] sm:$0xff]  ;;  %v2746_v49 = vld [vmem:[#allocation2 + $0x3a8] sm:$0xff] }
 0x2e6   : > { %v2776_v61 = vadd.f32 %v2775_v55, %v6136_v38  ;;  %7772 = vst [vmem:[#allocation36_spill] sm:$0xff] %v6172_v51 }
 0x2e7   : > { %v2845_v6 = vadd.f32 %v2844_v62, %v6139_v43  ;;  %v6175_v62 = vld [vmem:[#allocation2 + $0x1a8] sm:$0xff]  ;;  %v2744_v43 = vld [vmem:[#allocation2 + $0x398] sm:$0xff] }
 0x2e8   : > { %v2777_v9 = vadd.f32 %v2776_v61, %v6142_v59  ;;  %7773 = vst [vmem:[#allocation37_spill] sm:$0xff] %v6175_v62 }
 0x2e9   : > { %v2846_v11 = vadd.f32 %v2845_v6, %v6145_v60  ;;  %v6178_v6 = vld [vmem:[#allocation2 + $0x1b0] sm:$0xff] }
 0x2ea   : > { %v2778_v1 = vadd.f32 %v2777_v9, %v6148_v3  ;;  %7774 = vst [vmem:[#allocation38_spill] sm:$0xff] %v6178_v6  ;;  %v2742_v3 = vld [vmem:[#allocation2 + $0x388] sm:$0xff] }
 0x2eb   : > { %v2847_v21 = vadd.f32 %v2846_v11, %v6151_v4  ;;  %v6181_v11 = vld [vmem:[#allocation2 + $0x1b8] sm:$0xff] }
 0x2ec   : > { %v2779_v31 = vadd.f32 %v2778_v1, %v6154_v7  ;;  %7775 = vst [vmem:[#allocation39_spill] sm:$0xff] %v6181_v11  ;;  %v2739_v7 = vld [vmem:[#allocation2 + $0x370] sm:$0xff] }
 0x2ed   : > { %v2848_v42 = vadd.f32 %v2847_v21, %v6157_v14  ;;  %v6184_v21 = vld [vmem:[#allocation2 + $0x1c0] sm:$0xff] }
 0x2ee   : > { %v2780_v50 = vadd.f32 %v2779_v31, %v6160_v13  ;;  %7776 = vst [vmem:[#allocation40_spill] sm:$0xff] %v6184_v21  ;;  %v6187_v13 = vld [vmem:[#allocation2 + $0x1c8] sm:$0xff] }
 0x2ef   : > { %v2849_v55 = vadd.f32 %v2848_v42, %v6163_v29  ;;  %7777 = vst [vmem:[#allocation41_spill] sm:$0xff] %v6187_v13  ;;  %v6190_v29 = vld [vmem:[#allocation2 + $0x1d0] sm:$0xff] }
 0x2f0   : > { %v2781_v61 = vadd.f32 %v2780_v50, %v6166_v30  ;;  %7778 = vst [vmem:[#allocation42_spill] sm:$0xff] %v6190_v29  ;;  %v6193_v30 = vld [vmem:[#allocation2 + $0x1d8] sm:$0xff] }
 0x2f1   : > { %v2850_v9 = vadd.f32 %v2849_v55, %v6169_v41  ;;  %7779 = vst [vmem:[#allocation43_spill] sm:$0xff] %v6193_v30  ;;  %v6196_v41 = vld [vmem:[#allocation2 + $0x1e0] sm:$0xff] }
 0x2f2   : > { %v2782_v1 = vadd.f32 %v2781_v61, %v6172_v51  ;;  %7780 = vst [vmem:[#allocation44_spill] sm:$0xff] %v6196_v41  ;;  %v6199_v51 = vld [vmem:[#allocation2 + $0x1e8] sm:$0xff] }
 0x2f3   : > { %v2851_v31 = vadd.f32 %v2850_v9, %v6175_v62  ;;  %7781 = vst [vmem:[#allocation45_spill] sm:$0xff] %v6199_v51  ;;  %v6202_v62 = vld [vmem:[#allocation2 + $0x1f0] sm:$0xff] }
 0x2f4   : > { %v2783_v42 = vadd.f32 %v2782_v1, %v6178_v6  ;;  %7782 = vst [vmem:[#allocation46_spill] sm:$0xff] %v6202_v62  ;;  %v6205_v6 = vld [vmem:[#allocation2 + $0x1f8] sm:$0xff] }
 0x2f5   : > { %v2852_v50 = vadd.f32 %v2851_v31, %v6181_v11  ;;  %7783 = vst [vmem:[#allocation47_spill] sm:$0xff] %v6205_v6  ;;  %v6208_v11 = vld [vmem:[#allocation2 + $0x200] sm:$0xff] }
 0x2f6   : > { %v2784_v55 = vadd.f32 %v2783_v42, %v6184_v21  ;;  %7784 = vst [vmem:[#allocation48_spill] sm:$0xff] %v6208_v11  ;;  %v6211_v21 = vld [vmem:[#allocation2 + $0x208] sm:$0xff] }
 0x2f7   : > { %v2853_v61 = vadd.f32 %v2852_v50, %v6187_v13  ;;  %7785 = vst [vmem:[#allocation49_spill] sm:$0xff] %v6211_v21  ;;  %v6214_v13 = vld [vmem:[#allocation2 + $0x210] sm:$0xff] }
 0x2f8   : > { %v2785_v9 = vadd.f32 %v2784_v55, %v6190_v29  ;;  %7786 = vst [vmem:[#allocation50_spill] sm:$0xff] %v6214_v13  ;;  %v6217_v29 = vld [vmem:[#allocation2 + $0x218] sm:$0xff] }
 0x2f9   : > { %v2854_v1 = vadd.f32 %v2853_v61, %v6193_v30  ;;  %7787 = vst [vmem:[#allocation51_spill] sm:$0xff] %v6217_v29  ;;  %v6220_v30 = vld [vmem:[#allocation2 + $0x220] sm:$0xff] }
 0x2fa   : > { %v2786_v31 = vadd.f32 %v2785_v9, %v6196_v41  ;;  %7788 = vst [vmem:[#allocation52_spill] sm:$0xff] %v6220_v30  ;;  %v6223_v41 = vld [vmem:[#allocation2 + $0x228] sm:$0xff] }
 0x2fb   : > { %v2855_v42 = vadd.f32 %v2854_v1, %v6199_v51  ;;  %7789 = vst [vmem:[#allocation53_spill] sm:$0xff] %v6223_v41  ;;  %v6226_v51 = vld [vmem:[#allocation2 + $0x230] sm:$0xff] }
 0x2fc   : > { %v2787_v50 = vadd.f32 %v2786_v31, %v6202_v62  ;;  %7790 = vst [vmem:[#allocation54_spill] sm:$0xff] %v6226_v51  ;;  %v6229_v62 = vld [vmem:[#allocation2 + $0x238] sm:$0xff] }
 0x2fd   : > { %v2856_v55 = vadd.f32 %v2855_v42, %v6205_v6  ;;  %7791 = vst [vmem:[#allocation55_spill] sm:$0xff] %v6229_v62  ;;  %v6232_v6 = vld [vmem:[#allocation2 + $0x240] sm:$0xff] }
 0x2fe   : > { %v2788_v61 = vadd.f32 %v2787_v50, %v6208_v11  ;;  %7792 = vst [vmem:[#allocation56_spill] sm:$0xff] %v6232_v6  ;;  %v6235_v11 = vld [vmem:[#allocation2 + $0x248] sm:$0xff] }
 0x2ff   : > { %v2857_v9 = vadd.f32 %v2856_v55, %v6211_v21  ;;  %7793 = vst [vmem:[#allocation57_spill] sm:$0xff] %v6235_v11  ;;  %v6238_v21 = vld [vmem:[#allocation2 + $0x250] sm:$0xff] }
 0x300   : > { %v2789_v1 = vadd.f32 %v2788_v61, %v6214_v13  ;;  %7794 = vst [vmem:[#allocation58_spill] sm:$0xff] %v6238_v21  ;;  %v6241_v13 = vld [vmem:[#allocation2 + $0x258] sm:$0xff] }
 0x301   : > { %v2858_v31 = vadd.f32 %v2857_v9, %v6217_v29  ;;  %7795 = vst [vmem:[#allocation59_spill] sm:$0xff] %v6241_v13  ;;  %v6244_v29 = vld [vmem:[#allocation2 + $0x260] sm:$0xff] }
 0x302   : > { %v2790_v42 = vadd.f32 %v2789_v1, %v6220_v30  ;;  %7796 = vst [vmem:[#allocation60_spill] sm:$0xff] %v6244_v29  ;;  %v6247_v30 = vld [vmem:[#allocation2 + $0x268] sm:$0xff] }
 0x303   : > { %v2859_v50 = vadd.f32 %v2858_v31, %v6223_v41  ;;  %7797 = vst [vmem:[#allocation61_spill] sm:$0xff] %v6247_v30  ;;  %v6250_v41 = vld [vmem:[#allocation2 + $0x270] sm:$0xff] }
 0x304   : > { %v2791_v55 = vadd.f32 %v2790_v42, %v6226_v51  ;;  %7798 = vst [vmem:[#allocation62_spill] sm:$0xff] %v6250_v41  ;;  %v6253_v51 = vld [vmem:[#allocation2 + $0x278] sm:$0xff] }
 0x305   : > { %v2860_v61 = vadd.f32 %v2859_v50, %v6229_v62  ;;  %7799 = vst [vmem:[#allocation63_spill] sm:$0xff] %v6253_v51  ;;  %v6256_v62 = vld [vmem:[#allocation2 + $0x280] sm:$0xff] }
 0x306   : > { %v2792_v9 = vadd.f32 %v2791_v55, %v6232_v6  ;;  %7800 = vst [vmem:[#allocation64_spill] sm:$0xff] %v6256_v62  ;;  %v6259_v6 = vld [vmem:[#allocation2 + $0x288] sm:$0xff] }
 0x307   : > { %v2861_v1 = vadd.f32 %v2860_v61, %v6235_v11  ;;  %7801 = vst [vmem:[#allocation65_spill] sm:$0xff] %v6259_v6  ;;  %v6262_v11 = vld [vmem:[#allocation2 + $0x290] sm:$0xff] }
 0x308   : > { %v2793_v31 = vadd.f32 %v2792_v9, %v6238_v21  ;;  %7802 = vst [vmem:[#allocation66_spill] sm:$0xff] %v6262_v11  ;;  %v6265_v21 = vld [vmem:[#allocation2 + $0x298] sm:$0xff] }
 0x309   : > { %v2862_v42 = vadd.f32 %v2861_v1, %v6241_v13  ;;  %7803 = vst [vmem:[#allocation67_spill] sm:$0xff] %v6265_v21  ;;  %v6268_v13 = vld [vmem:[#allocation2 + $0x2a0] sm:$0xff] }
 0x30a   : > { %v2794_v50 = vadd.f32 %v2793_v31, %v6244_v29  ;;  %7804 = vst [vmem:[#allocation68_spill] sm:$0xff] %v6268_v13  ;;  %v6271_v29 = vld [vmem:[#allocation2 + $0x2a8] sm:$0xff] }
 0x30b   : > { %v2863_v55 = vadd.f32 %v2862_v42, %v6247_v30  ;;  %7805 = vst [vmem:[#allocation69_spill] sm:$0xff] %v6271_v29  ;;  %v6274_v30 = vld [vmem:[#allocation2 + $0x2b0] sm:$0xff] }
 0x30c   : > { %v2795_v61 = vadd.f32 %v2794_v50, %v6250_v41  ;;  %7806 = vst [vmem:[#allocation70_spill] sm:$0xff] %v6274_v30  ;;  %v6277_v41 = vld [vmem:[#allocation2 + $0x2b8] sm:$0xff] }
 0x30d   : > { %v2864_v9 = vadd.f32 %v2863_v55, %v6253_v51  ;;  %7807 = vst [vmem:[#allocation71_spill] sm:$0xff] %v6277_v41  ;;  %v6280_v51 = vld [vmem:[#allocation2 + $0x2c0] sm:$0xff] }
 0x30e   : > { %v2796_v1 = vadd.f32 %v2795_v61, %v6256_v62  ;;  %7808 = vst [vmem:[#allocation72_spill] sm:$0xff] %v6280_v51  ;;  %v6283_v62 = vld [vmem:[#allocation2 + $0x2c8] sm:$0xff] }
 0x30f   : > { %v2865_v31 = vadd.f32 %v2864_v9, %v6259_v6  ;;  %7809 = vst [vmem:[#allocation73_spill] sm:$0xff] %v6283_v62  ;;  %v6286_v6 = vld [vmem:[#allocation2 + $0x2d0] sm:$0xff] }
 0x310   : > { %v2797_v42 = vadd.f32 %v2796_v1, %v6262_v11  ;;  %7810 = vst [vmem:[#allocation74_spill] sm:$0xff] %v6286_v6  ;;  %v6289_v11 = vld [vmem:[#allocation2 + $0x2d8] sm:$0xff] }
 0x311   : > { %v2866_v50 = vadd.f32 %v2865_v31, %v6265_v21  ;;  %7811 = vst [vmem:[#allocation75_spill] sm:$0xff] %v6289_v11  ;;  %v6292_v21 = vld [vmem:[#allocation2 + $0x2e0] sm:$0xff] }
 0x312   : > { %v2798_v55 = vadd.f32 %v2797_v42, %v6268_v13  ;;  %7812 = vst [vmem:[#allocation76_spill] sm:$0xff] %v6292_v21  ;;  %v6295_v13 = vld [vmem:[#allocation2 + $0x2e8] sm:$0xff] }
 0x313   : > { %v2867_v61 = vadd.f32 %v2866_v50, %v6271_v29  ;;  %7813 = vst [vmem:[#allocation77_spill] sm:$0xff] %v6295_v13  ;;  %v6298_v29 = vld [vmem:[#allocation2 + $0x2f0] sm:$0xff] }
 0x314   : > { %v2799_v9 = vadd.f32 %v2798_v55, %v6274_v30  ;;  %7814 = vst [vmem:[#allocation78_spill] sm:$0xff] %v6298_v29  ;;  %v6301_v30 = vld [vmem:[#allocation2 + $0x2f8] sm:$0xff] }
 0x315   : > { %v2868_v1 = vadd.f32 %v2867_v61, %v6277_v41  ;;  %7815 = vst [vmem:[#allocation79_spill] sm:$0xff] %v6301_v30  ;;  %v6304_v41 = vld [vmem:[#allocation2 + $0x300] sm:$0xff] }
 0x316   : > { %v2800_v31 = vadd.f32 %v2799_v9, %v6280_v51  ;;  %7816 = vst [vmem:[#allocation80_spill] sm:$0xff] %v6304_v41  ;;  %v6307_v51 = vld [vmem:[#allocation2 + $0x308] sm:$0xff] }
 0x317   : > { %v2869_v42 = vadd.f32 %v2868_v1, %v6283_v62  ;;  %7817 = vst [vmem:[#allocation81_spill] sm:$0xff] %v6307_v51  ;;  %v6310_v62 = vld [vmem:[#allocation2 + $0x310] sm:$0xff] }
 0x318   : > { %v2801_v50 = vadd.f32 %v2800_v31, %v6286_v6  ;;  %7818 = vst [vmem:[#allocation82_spill] sm:$0xff] %v6310_v62  ;;  %v6313_v6 = vld [vmem:[#allocation2 + $0x318] sm:$0xff] }
 0x319   : > { %v2870_v55 = vadd.f32 %v2869_v42, %v6289_v11  ;;  %7819 = vst [vmem:[#allocation83_spill] sm:$0xff] %v6313_v6  ;;  %v6316_v11 = vld [vmem:[#allocation2 + $0x320] sm:$0xff] }
 0x31a   : > { %v2802_v61 = vadd.f32 %v2801_v50, %v6292_v21  ;;  %7820 = vst [vmem:[#allocation84_spill] sm:$0xff] %v6316_v11  ;;  %v6319_v21 = vld [vmem:[#allocation2 + $0x328] sm:$0xff] }
 0x31b   : > { %v2871_v9 = vadd.f32 %v2870_v55, %v6295_v13  ;;  %7821 = vst [vmem:[#allocation85_spill] sm:$0xff] %v6319_v21  ;;  %v6322_v13 = vld [vmem:[#allocation2 + $0x330] sm:$0xff] }
 0x31c   : > { %v2803_v1 = vadd.f32 %v2802_v61, %v6298_v29  ;;  %7822 = vst [vmem:[#allocation86_spill] sm:$0xff] %v6322_v13  ;;  %v6325_v29 = vld [vmem:[#allocation2 + $0x338] sm:$0xff] }
 0x31d   : > { %v2872_v31 = vadd.f32 %v2871_v9, %v6301_v30  ;;  %v6328_v30 = vld [vmem:[#allocation2 + $0x340] sm:$0xff] }
 0x31e   : > { %v2804_v42 = vadd.f32 %v2803_v1, %v6304_v41  ;;  %v6331_v41 = vld [vmem:[#allocation2 + $0x348] sm:$0xff] }
 0x31f   : > { %v2873_v50 = vadd.f32 %v2872_v31, %v6307_v51  ;;  %v6334_v51 = vld [vmem:[#allocation2 + $0x350] sm:$0xff] }
 0x320   : > { %v2805_v55 = vadd.f32 %v2804_v42, %v6310_v62  ;;  %v6337_v62 = vld [vmem:[#allocation2 + $0x358] sm:$0xff] }
 0x321   : > { %v2874_v61 = vadd.f32 %v2873_v50, %v6313_v6  ;;  %v2737_v6 = vld [vmem:[#allocation2 + $0x360] sm:$0xff] }
 0x322   : > { %v2806_v9 = vadd.f32 %v2805_v55, %v6316_v11  ;;  %v2738_v55 = vld [vmem:[#allocation2 + $0x368] sm:$0xff] }
 0x323   : > { %v2875_v1 = vadd.f32 %v2874_v61, %v6319_v21  ;;  %v2740_v21 = vld [vmem:[#allocation2 + $0x378] sm:$0xff] }
 0x324   : > { %v2807_v31 = vadd.f32 %v2806_v9, %v6322_v13  ;;  %v2741_v9 = vld [vmem:[#allocation2 + $0x380] sm:$0xff] }
 0x325   : > { %v2876_v42 = vadd.f32 %v2875_v1, %v6325_v29  ;;  %v2743_v1 = vld [vmem:[#allocation2 + $0x390] sm:$0xff] }
 0x326   : > { %v2808_v50 = vadd.f32 %v2807_v31, %v6328_v30 }
 0x327   : > { %v2877_v14 = vadd.f32 %v2876_v42, %v6331_v41  ;;  %v2745_v42 = vld [vmem:[#allocation2 + $0x3a0] sm:$0xff] }
 0x328   : > { %v2809_v11 = vadd.f32 %v2808_v50, %v6334_v51  ;;  %v2748_v50 = vld [vmem:[#allocation2 + $0x3b8] sm:$0xff] }
 0x329   : > { %v2878_v61 = vadd.f32 %v2877_v14, %v6337_v62 }
 0x32a   : > { %v2810_v4 = vadd.f32 %v2809_v11, %v2737_v6 }
 0x32b   : > { %v2879_v13 = vadd.f32 %v2878_v61, %v2738_v55 }
 0x32c   : > { %v2811_v60 = vadd.f32 %v2810_v4, %v2739_v7 }
 0x32d   : > { %v2880_v59 = vadd.f32 %v2879_v13, %v2740_v21 }
 0x32e   : > { %v2812_v38 = vadd.f32 %v2811_v60, %v2741_v9 }
 0x32f   : > { %v2881_v31 = vadd.f32 %v2880_v59, %v2742_v3  ;;  %v2753_v59 = vld [vmem:[#allocation2 + $0x3e0] sm:$0xff] }
 0x330   : > { %v2813_v44 = vadd.f32 %v2812_v38, %v2743_v1  ;;  %v2756_v38 = vld [vmem:[#allocation2 + $0x3f8] sm:$0xff] }
 0x331   : > { %v2882_v37 = vadd.f32 %v2881_v31, %v2744_v43  ;;  %v2755_v31 = vld [vmem:[#allocation2 + $0x3f0] sm:$0xff] }
 0x332   : > { %v2814_v17 = vadd.f32 %v2813_v44, %v2745_v42 }
 0x333   : > { %v2883_v34 = vadd.f32 %v2882_v37, %v2746_v49 }
 0x334   : > { %v2815_v11 = vadd.f32 %v2814_v17, %v2747_v22 }
 0x335   : > { %v2884_v14 = vadd.f32 %v2883_v34, %v2748_v50 }
 0x336   : > { %v2816_v4 = vadd.f32 %v2815_v11, %v2749_v18 }
 0x337   : > { %v2885_v61 = vadd.f32 %v2884_v14, %v2750_v23 }
 0x338   : > { %v2817_v60 = vadd.f32 %v2816_v4, %v2751_v12 }
 0x339   : > { %v2886_v13 = vadd.f32 %v2885_v61, %v2752_v15 }
 0x33a   : > { %v2818_v8 = vadd.f32 %v2817_v60, %v2753_v59 }
 0x33b   : > { %v2887_v5 = vadd.f32 %v2886_v13, %v2754_v10 }
 0x33c   : > { %v2819_v58 = vadd.f32 %v2818_v8, %v2755_v31 }
 0x33d   : > { %v2888_v37 = vadd.f32 %v2887_v5, %v2756_v38 }
 0x33e   : > { %v2820_v0 = vrot.slane %v2819_v58, 4 }
 0x33f   : > { %v2889_v44 = vrot.slane %v2888_v37, 4 }
 0x340   : > { %v2821_v63 = vadd.f32 %v2820_v0, %v2819_v58 }
 0x341   : > { %v2890_v34 = vadd.f32 %v2889_v44, %v2888_v37 }
 0x342   : > { %v2822_v2 = vrot.slane %v2821_v63, 2 }
 0x343   : > { %v2891_v17 = vrot.slane %v2890_v34, 2 }
 0x344   : > { %v2823_v57 = vadd.f32 %v2822_v2, %v2821_v63 }
 0x345   : > { %v2892_v14 = vadd.f32 %v2891_v17, %v2890_v34 }
 0x346   : > { %v2824_v53 = vrot.slane %v2823_v57, 1 }
 0x347   : > { %v2893_v11 = vrot.slane %v2892_v14, 1 }
 0x348   : > { %v2825_v56 = vadd.f32 %v2824_v53, %v2823_v57 }
 0x349   : > { %v2894_v61 = vadd.f32 %v2893_v11, %v2892_v14 }
 0x34a   : > { %v6345_v13 = vmul.f32 0.001953125, %v2825_v56 }
 0x34b   : > { %v6343_v4 = vmul.f32 0.001953125, %v2894_v61 }
 0x34c   : > { %v6353_v8 = vsub.f32 %v6328_v30, %v6345_v13  ;;  %v6361_v2 = vsub.f32 %v6334_v51, %v6345_v13  ;;  %v6368_v53 = vsub.f32 %v2737_v6, %v6345_v13  ;;  %v6374_v63 = vsub.f32 %v2739_v7, %v6345_v13 }
 0x34d   : > { %v6349_v5 = vsub.f32 %v6325_v29, %v6343_v4  ;;  %v6357_v0 = vsub.f32 %v6331_v41, %v6343_v4  ;;  %v6365_v56 = vsub.f32 %v6337_v62, %v6343_v4  ;;  %v6371_v57 = vsub.f32 %v2738_v55, %v6343_v4 }
 0x34e   : > { %v6377_v58 = vsub.f32 %v2740_v21, %v6343_v4  ;;  %v6380_v29 = vsub.f32 %v2741_v9, %v6345_v13  ;;  %v6383_v30 = vsub.f32 %v2742_v3, %v6343_v4  ;;  %v6386_v41 = vsub.f32 %v2743_v1, %v6345_v13 }
 0x34f   : > { %v6389_v51 = vsub.f32 %v2744_v43, %v6343_v4  ;;  %v6392_v62 = vsub.f32 %v2745_v42, %v6345_v13  ;;  %v6395_v7 = vsub.f32 %v2746_v49, %v6343_v4  ;;  %v6398_v6 = vsub.f32 %v2747_v22, %v6345_v13 }
 0x350   : > { %v6401_v21 = vsub.f32 %v2748_v50, %v6343_v4  ;;  %v6404_v3 = vsub.f32 %v2749_v18, %v6345_v13  ;;  %v6407_v55 = vsub.f32 %v2750_v23, %v6343_v4  ;;  %v6410_v43 = vsub.f32 %v2751_v12, %v6345_v13 }
 0x351   : > { %7823 = vst [vmem:[#allocation87_spill] sm:$0xff] %v6398_v6  ;;  %v6413_v9 = vsub.f32 %v2752_v15, %v6343_v4  ;;  %v6416_v49 = vsub.f32 %v2753_v59, %v6345_v13  ;;  %v6419_v22 = vsub.f32 %v2754_v10, %v6343_v4  ;;  %v6422_v1 = vsub.f32 %v2755_v31, %v6345_v13 }
 0x352   : > { %7824 = vst [vmem:[#allocation88_spill] sm:$0xff] %v6401_v21  ;;  %7825 = vst [vmem:[#allocation89_spill] sm:$0xff] %v6404_v3  ;;  %v6425_v18 = vsub.f32 %v2756_v38, %v6343_v4  ;;  %v6429_v23 = vsub.f32 %v6019_v16, %v6345_v13  ;;  %v6433_v12 = vsub.f32 %v6021_v24, %v6343_v4 }
 0x353   : > { %7826 = vst [vmem:[#allocation90_spill] sm:$0xff] %v6407_v55  ;;  %7827 = vst [vmem:[#allocation91_spill] sm:$0xff] %v6410_v43  ;;  %v6437_v15 = vsub.f32 %v6023_v20, %v6345_v13  ;;  %v6441_v10 = vsub.f32 %v6025_v25, %v6343_v4  ;;  %v6445_v42 = vsub.f32 %v6027_v28, %v6345_v13 }
 0x354   : > { %7828 = vst [vmem:[#allocation92_spill] sm:$0xff] %v6413_v9  ;;  %7829 = vst [vmem:[#allocation93_spill] sm:$0xff] %v6416_v49  ;;  %v6449_v16 = vsub.f32 %v6029_v26, %v6343_v4  ;;  %v6453_v24 = vsub.f32 %v6033_v27, %v6345_v13  ;;  %v6457_v20 = vsub.f32 %v6037_v19, %v6343_v4 }
 0x355   : > { %7830 = vst [vmem:[#allocation94_spill] sm:$0xff] %v6419_v22  ;;  %7831 = vst [vmem:[#allocation95_spill] sm:$0xff] %v6422_v1  ;;  %v3026_v25 = vmul.f32 %v6429_v23, %v6429_v23  ;;  %v3027_v50 = vmul.f32 %v6433_v12, %v6433_v12  ;;  %v3028_v28 = vmul.f32 %v6437_v15, %v6437_v15 }
 0x356   : > { %7832 = vst [vmem:[#allocation96_spill] sm:$0xff] %v6425_v18  ;;  %v3029_v26 = vmul.f32 %v6441_v10, %v6441_v10  ;;  %v6469_v27 = vsub.f32 %v6040_v32, %v6345_v13  ;;  %v6473_v19 = vsub.f32 %v6043_v36, %v6343_v4  ;;  %v3030_v60 = vmul.f32 %v6445_v42, %v6445_v42 }
 0x357   : > { %v3031_v59 = vmul.f32 %v6449_v16, %v6449_v16  ;;  %v6481_v38 = vsub.f32 %v6046_v40, %v6345_v13  ;;  %v6485_v31 = vsub.f32 %v6049_v33, %v6343_v4  ;;  %v3032_v32 = vmul.f32 %v6453_v24, %v6453_v24 }
 0x358   : > { %v3033_v36 = vmul.f32 %v6457_v20, %v6457_v20  ;;  %v3154_v37 = vadd.f32 %v3028_v28, %v3026_v25  ;;  %v3223_v44 = vadd.f32 %v3029_v26, %v3027_v50  ;;  %v6493_v34 = vsub.f32 %v6052_v39, %v6345_v13 }
 0x359   : > { %v6497_v40 = vsub.f32 %v6055_v46, %v6343_v4  ;;  %v3034_v33 = vmul.f32 %v6469_v27, %v6469_v27  ;;  %v3035_v17 = vmul.f32 %v6473_v19, %v6473_v19  ;;  %v6505_v61 = vsub.f32 %v6058_v45, %v6345_v13 }
 0x35a   : > { %v3155_v14 = vadd.f32 %v3154_v37, %v3030_v60  ;;  %v3224_v11 = vadd.f32 %v3223_v44, %v3031_v59  ;;  %v6509_v39 = vsub.f32 %v6061_v35, %v6343_v4  ;;  %v3036_v46 = vmul.f32 %v6481_v38, %v6481_v38 }
 0x35b   : > { %7833 = vst [vmem:[#allocation97_spill] sm:$0xff] %v6505_v61  ;;  %v3037_v25 = vmul.f32 %v6485_v31, %v6485_v31  ;;  %v6517_v26 = vsub.f32 %v6064_v47, %v6345_v13  ;;  %v6521_v45 = vsub.f32 %v6067_v48, %v6343_v4  ;;  %v3038_v35 = vmul.f32 %v6493_v34, %v6493_v34 }
 0x35c   : > { %7834 = vst [vmem:[#allocation98_spill] sm:$0xff] %v6509_v39  ;;  %v3156_v50 = vadd.f32 %v3155_v14, %v3032_v32  ;;  %v3225_v28 = vadd.f32 %v3224_v11, %v3033_v36  ;;  %v3039_v60 = vmul.f32 %v6497_v40, %v6497_v40  ;;  %v6529_v32 = vsub.f32 %v6070_v52, %v6345_v13  ;;  %v7839_v11 = vld [vmem:[#allocation4_spill] sm:$0xff] }
 0x35d   : > { %7835 = vst [vmem:[#allocation99_spill] sm:$0xff] %v6517_v26  ;;  %7836 = vst [vmem:[#allocation100_spill] sm:$0xff] %v6521_v45  ;;  %v6533_v47 = vsub.f32 %v6073_v54, %v6343_v4  ;;  %v3040_v48 = vmul.f32 %v6505_v61, %v6505_v61  ;;  %v3041_v36 = vmul.f32 %v6509_v39, %v6509_v39  ;;  %v7843_v39 = vld [vmem:[#allocation6_spill] sm:$0xff] }
 0x35e   : > { %v3157_v59 = vadd.f32 %v3156_v50, %v3034_v33  ;;  %v3226_v37 = vadd.f32 %v3225_v28, %v3035_v17  ;;  %7837 = vst [vmem:[#allocation101_spill] sm:$0xff] %v6529_v32  ;;  %v6541_v33 = vsub.f32 %v7839_v11, %v6345_v13  ;;  %v7841_v17 = vld [vmem:[#allocation5_spill] sm:$0xff]  ;;  %v3042_v54 = vmul.f32 %v6517_v26, %v6517_v26 }
 0x35f   : > { %7838 = vst [vmem:[#allocation102_spill] sm:$0xff] %v6533_v47  ;;  %v6545_v52 = vsub.f32 %v7841_v17, %v6343_v4  ;;  %v3043_v50 = vmul.f32 %v6521_v45, %v6521_v45  ;;  %v3045_v11 = vmul.f32 %v6533_v47, %v6533_v47  ;;  %v7847_v45 = vld [vmem:[#allocation8_spill] sm:$0xff]  ;;  %v7851_v47 = vld [vmem:[#allocation10_spill] sm:$0xff] }
 0x360   : > { %v3158_v44 = vadd.f32 %v3157_v59, %v3036_v46  ;;  %v3227_v14 = vadd.f32 %v3226_v37, %v3037_v25  ;;  %7840 = vst [vmem:[#allocation4_spill] sm:$0xff] %v6541_v33  ;;  %v6553_v46 = vsub.f32 %v7843_v39, %v6345_v13  ;;  %v7845_v25 = vld [vmem:[#allocation7_spill] sm:$0xff]  ;;  %v3044_v37 = vmul.f32 %v6529_v32, %v6529_v32 }
 0x361   : > { %7842 = vst [vmem:[#allocation5_spill] sm:$0xff] %v6545_v52  ;;  %v6557_v59 = vsub.f32 %v7845_v25, %v6343_v4 }
 0x362   : > { %v3159_v28 = vadd.f32 %v3158_v44, %v3038_v35  ;;  %v3228_v61 = vadd.f32 %v3227_v14, %v3039_v60  ;;  %7844 = vst [vmem:[#allocation6_spill] sm:$0xff] %v6553_v46  ;;  %v6565_v35 = vsub.f32 %v7847_v45, %v6345_v13  ;;  %v7849_v60 = vld [vmem:[#allocation9_spill] sm:$0xff]  ;;  %v3046_v44 = vmul.f32 %v6541_v33, %v6541_v33 }
 0x363   : > { %7846 = vst [vmem:[#allocation7_spill] sm:$0xff] %v6557_v59  ;;  %v6569_v39 = vsub.f32 %v7849_v60, %v6343_v4  ;;  %v3047_v14 = vmul.f32 %v6545_v52, %v6545_v52  ;;  %v7855_v52 = vld [vmem:[#allocation12_spill] sm:$0xff] }
 0x364   : > { %v3160_v17 = vadd.f32 %v3159_v28, %v3040_v48  ;;  %v3229_v26 = vadd.f32 %v3228_v61, %v3041_v36  ;;  %7848 = vst [vmem:[#allocation8_spill] sm:$0xff] %v6565_v35  ;;  %v6577_v48 = vsub.f32 %v7851_v47, %v6345_v13  ;;  %v7853_v61 = vld [vmem:[#allocation11_spill] sm:$0xff]  ;;  %v3048_v36 = vmul.f32 %v6553_v46, %v6553_v46 }
 0x365   : > { %7850 = vst [vmem:[#allocation9_spill] sm:$0xff] %v6569_v39  ;;  %v6581_v45 = vsub.f32 %v7853_v61, %v6343_v4  ;;  %v3049_v28 = vmul.f32 %v6557_v59, %v6557_v59  ;;  %v7859_v59 = vld [vmem:[#allocation14_spill] sm:$0xff] }
 0x366   : > { %v3161_v25 = vadd.f32 %v3160_v17, %v3042_v54  ;;  %v3230_v32 = vadd.f32 %v3229_v26, %v3043_v50  ;;  %7852 = vst [vmem:[#allocation10_spill] sm:$0xff] %v6577_v48  ;;  %v6589_v54 = vsub.f32 %v7855_v52, %v6345_v13  ;;  %v7857_v26 = vld [vmem:[#allocation13_spill] sm:$0xff]  ;;  %v3050_v50 = vmul.f32 %v6565_v35, %v6565_v35 }
 0x367   : > { %7854 = vst [vmem:[#allocation11_spill] sm:$0xff] %v6581_v45  ;;  %v6593_v47 = vsub.f32 %v7857_v26, %v6343_v4  ;;  %v3051_v17 = vmul.f32 %v6569_v39, %v6569_v39  ;;  %v7863_v39 = vld [vmem:[#allocation16_spill] sm:$0xff] }
 0x368   : > { %v3162_v60 = vadd.f32 %v3161_v25, %v3044_v37  ;;  %v3231_v33 = vadd.f32 %v3230_v32, %v3045_v11  ;;  %7856 = vst [vmem:[#allocation12_spill] sm:$0xff] %v6589_v54  ;;  %v6601_v37 = vsub.f32 %v7859_v59, %v6345_v13  ;;  %v7861_v32 = vld [vmem:[#allocation15_spill] sm:$0xff]  ;;  %v3052_v11 = vmul.f32 %v6577_v48, %v6577_v48 }
 0x369   : > { %7858 = vst [vmem:[#allocation13_spill] sm:$0xff] %v6593_v47  ;;  %v6605_v52 = vsub.f32 %v7861_v32, %v6343_v4  ;;  %v3053_v25 = vmul.f32 %v6581_v45, %v6581_v45  ;;  %v7867_v45 = vld [vmem:[#allocation18_spill] sm:$0xff] }
 0x36a   : > { %v3163_v61 = vadd.f32 %v3162_v60, %v3046_v44  ;;  %v3232_v46 = vadd.f32 %v3231_v33, %v3047_v14  ;;  %7860 = vst [vmem:[#allocation14_spill] sm:$0xff] %v6601_v37  ;;  %v6613_v44 = vsub.f32 %v7863_v39, %v6345_v13  ;;  %v7865_v33 = vld [vmem:[#allocation17_spill] sm:$0xff]  ;;  %v3054_v14 = vmul.f32 %v6589_v54, %v6589_v54 }
 0x36b   : > { %7862 = vst [vmem:[#allocation15_spill] sm:$0xff] %v6605_v52  ;;  %v6617_v59 = vsub.f32 %v7865_v33, %v6343_v4  ;;  %v3055_v60 = vmul.f32 %v6593_v47, %v6593_v47  ;;  %v7871_v47 = vld [vmem:[#allocation20_spill] sm:$0xff] }
 0x36c   : > { %v3164_v26 = vadd.f32 %v3163_v61, %v3048_v36  ;;  %v3233_v35 = vadd.f32 %v3232_v46, %v3049_v28  ;;  %7864 = vst [vmem:[#allocation16_spill] sm:$0xff] %v6613_v44  ;;  %v6625_v36 = vsub.f32 %v7867_v45, %v6345_v13  ;;  %v7869_v46 = vld [vmem:[#allocation19_spill] sm:$0xff]  ;;  %v3056_v28 = vmul.f32 %v6601_v37, %v6601_v37 }
 0x36d   : > { %7866 = vst [vmem:[#allocation17_spill] sm:$0xff] %v6617_v59  ;;  %v6629_v39 = vsub.f32 %v7869_v46, %v6343_v4  ;;  %v3057_v61 = vmul.f32 %v6605_v52, %v6605_v52  ;;  %v7875_v52 = vld [vmem:[#allocation22_spill] sm:$0xff] }
 0x36e   : > { %v3165_v32 = vadd.f32 %v3164_v26, %v3050_v50  ;;  %v3234_v48 = vadd.f32 %v3233_v35, %v3051_v17  ;;  %7868 = vst [vmem:[#allocation18_spill] sm:$0xff] %v6625_v36  ;;  %v6637_v50 = vsub.f32 %v7871_v47, %v6345_v13  ;;  %v7873_v35 = vld [vmem:[#allocation21_spill] sm:$0xff]  ;;  %v3058_v17 = vmul.f32 %v6613_v44, %v6613_v44 }
 0x36f   : > { %7870 = vst [vmem:[#allocation19_spill] sm:$0xff] %v6629_v39  ;;  %v6641_v45 = vsub.f32 %v7873_v35, %v6343_v4  ;;  %v3059_v26 = vmul.f32 %v6617_v59, %v6617_v59  ;;  %v7879_v59 = vld [vmem:[#allocation24_spill] sm:$0xff] }
 0x370   : > { %v3166_v33 = vadd.f32 %v3165_v32, %v3052_v11  ;;  %v3235_v54 = vadd.f32 %v3234_v48, %v3053_v25  ;;  %7872 = vst [vmem:[#allocation20_spill] sm:$0xff] %v6637_v50  ;;  %v6649_v11 = vsub.f32 %v7875_v52, %v6345_v13  ;;  %v7877_v48 = vld [vmem:[#allocation23_spill] sm:$0xff]  ;;  %v3060_v25 = vmul.f32 %v6625_v36, %v6625_v36 }
 0x371   : > { %7874 = vst [vmem:[#allocation21_spill] sm:$0xff] %v6641_v45  ;;  %v6653_v47 = vsub.f32 %v7877_v48, %v6343_v4  ;;  %v3061_v32 = vmul.f32 %v6629_v39, %v6629_v39  ;;  %v7883_v39 = vld [vmem:[#allocation26_spill] sm:$0xff] }
 0x372   : > { %v3167_v46 = vadd.f32 %v3166_v33, %v3054_v14  ;;  %v3236_v37 = vadd.f32 %v3235_v54, %v3055_v60  ;;  %7876 = vst [vmem:[#allocation22_spill] sm:$0xff] %v6649_v11  ;;  %v6661_v14 = vsub.f32 %v7879_v59, %v6345_v13  ;;  %v7881_v54 = vld [vmem:[#allocation25_spill] sm:$0xff]  ;;  %v3062_v60 = vmul.f32 %v6637_v50, %v6637_v50 }
 0x373   : > { %7878 = vst [vmem:[#allocation23_spill] sm:$0xff] %v6653_v47  ;;  %v6665_v52 = vsub.f32 %v7881_v54, %v6343_v4  ;;  %v3063_v33 = vmul.f32 %v6641_v45, %v6641_v45  ;;  %v7887_v45 = vld [vmem:[#allocation28_spill] sm:$0xff] }
 0x374   : > { %v3168_v35 = vadd.f32 %v3167_v46, %v3056_v28  ;;  %v3237_v44 = vadd.f32 %v3236_v37, %v3057_v61  ;;  %7880 = vst [vmem:[#allocation24_spill] sm:$0xff] %v6661_v14  ;;  %v6673_v28 = vsub.f32 %v7883_v39, %v6345_v13  ;;  %v7885_v37 = vld [vmem:[#allocation27_spill] sm:$0xff]  ;;  %v3064_v61 = vmul.f32 %v6649_v11, %v6649_v11 }
 0x375   : > { %7882 = vst [vmem:[#allocation25_spill] sm:$0xff] %v6665_v52  ;;  %v6677_v59 = vsub.f32 %v7885_v37, %v6343_v4  ;;  %v3065_v46 = vmul.f32 %v6653_v47, %v6653_v47  ;;  %v7891_v47 = vld [vmem:[#allocation30_spill] sm:$0xff] }
 0x376   : > { %v3169_v48 = vadd.f32 %v3168_v35, %v3058_v17  ;;  %v3238_v36 = vadd.f32 %v3237_v44, %v3059_v26  ;;  %7884 = vst [vmem:[#allocation26_spill] sm:$0xff] %v6673_v28  ;;  %v6685_v17 = vsub.f32 %v7887_v45, %v6345_v13  ;;  %v7889_v44 = vld [vmem:[#allocation29_spill] sm:$0xff]  ;;  %v3066_v26 = vmul.f32 %v6661_v14, %v6661_v14 }
 0x377   : > { %7886 = vst [vmem:[#allocation27_spill] sm:$0xff] %v6677_v59  ;;  %v6689_v39 = vsub.f32 %v7889_v44, %v6343_v4  ;;  %v3067_v35 = vmul.f32 %v6665_v52, %v6665_v52  ;;  %v7895_v52 = vld [vmem:[#allocation32_spill] sm:$0xff] }
 0x378   : > { %v3170_v54 = vadd.f32 %v3169_v48, %v3060_v25  ;;  %v3239_v50 = vadd.f32 %v3238_v36, %v3061_v32  ;;  %7888 = vst [vmem:[#allocation28_spill] sm:$0xff] %v6685_v17  ;;  %v6697_v25 = vsub.f32 %v7891_v47, %v6345_v13  ;;  %v7893_v36 = vld [vmem:[#allocation31_spill] sm:$0xff]  ;;  %v3068_v32 = vmul.f32 %v6673_v28, %v6673_v28 }
 0x379   : > { %7890 = vst [vmem:[#allocation29_spill] sm:$0xff] %v6689_v39  ;;  %v6701_v45 = vsub.f32 %v7893_v36, %v6343_v4  ;;  %v3069_v48 = vmul.f32 %v6677_v59, %v6677_v59  ;;  %v7899_v59 = vld [vmem:[#allocation34_spill] sm:$0xff] }
 0x37a   : > { %v3171_v37 = vadd.f32 %v3170_v54, %v3062_v60  ;;  %v3240_v11 = vadd.f32 %v3239_v50, %v3063_v33  ;;  %7892 = vst [vmem:[#allocation30_spill] sm:$0xff] %v6697_v25  ;;  %v6709_v60 = vsub.f32 %v7895_v52, %v6345_v13  ;;  %v7897_v50 = vld [vmem:[#allocation33_spill] sm:$0xff]  ;;  %v3070_v33 = vmul.f32 %v6685_v17, %v6685_v17 }
 0x37b   : > { %7894 = vst [vmem:[#allocation31_spill] sm:$0xff] %v6701_v45  ;;  %v6713_v47 = vsub.f32 %v7897_v50, %v6343_v4  ;;  %v3071_v54 = vmul.f32 %v6689_v39, %v6689_v39  ;;  %v7903_v39 = vld [vmem:[#allocation36_spill] sm:$0xff] }
 0x37c   : > { %v3172_v44 = vadd.f32 %v3171_v37, %v3064_v61  ;;  %v3241_v14 = vadd.f32 %v3240_v11, %v3065_v46  ;;  %7896 = vst [vmem:[#allocation32_spill] sm:$0xff] %v6709_v60  ;;  %v6721_v61 = vsub.f32 %v7899_v59, %v6345_v13  ;;  %v7901_v11 = vld [vmem:[#allocation35_spill] sm:$0xff]  ;;  %v3072_v46 = vmul.f32 %v6697_v25, %v6697_v25 }
 0x37d   : > { %7898 = vst [vmem:[#allocation33_spill] sm:$0xff] %v6713_v47  ;;  %v6725_v52 = vsub.f32 %v7901_v11, %v6343_v4  ;;  %v3073_v37 = vmul.f32 %v6701_v45, %v6701_v45  ;;  %v7907_v45 = vld [vmem:[#allocation38_spill] sm:$0xff] }
 0x37e   : > { %v3173_v36 = vadd.f32 %v3172_v44, %v3066_v26  ;;  %v3242_v28 = vadd.f32 %v3241_v14, %v3067_v35  ;;  %7900 = vst [vmem:[#allocation34_spill] sm:$0xff] %v6721_v61  ;;  %v6733_v26 = vsub.f32 %v7903_v39, %v6345_v13  ;;  %v7905_v14 = vld [vmem:[#allocation37_spill] sm:$0xff]  ;;  %v3074_v35 = vmul.f32 %v6709_v60, %v6709_v60 }
 0x37f   : > { %7902 = vst [vmem:[#allocation35_spill] sm:$0xff] %v6725_v52  ;;  %v6737_v59 = vsub.f32 %v7905_v14, %v6343_v4  ;;  %v3075_v44 = vmul.f32 %v6713_v47, %v6713_v47  ;;  %v7911_v47 = vld [vmem:[#allocation40_spill] sm:$0xff] }
 0x380   : > { %v3174_v50 = vadd.f32 %v3173_v36, %v3068_v32  ;;  %v3243_v17 = vadd.f32 %v3242_v28, %v3069_v48  ;;  %7904 = vst [vmem:[#allocation36_spill] sm:$0xff] %v6733_v26  ;;  %v6745_v32 = vsub.f32 %v7907_v45, %v6345_v13  ;;  %v7909_v28 = vld [vmem:[#allocation39_spill] sm:$0xff]  ;;  %v3076_v48 = vmul.f32 %v6721_v61, %v6721_v61 }
 0x381   : > { %7906 = vst [vmem:[#allocation37_spill] sm:$0xff] %v6737_v59  ;;  %v6749_v39 = vsub.f32 %v7909_v28, %v6343_v4  ;;  %v3077_v36 = vmul.f32 %v6725_v52, %v6725_v52  ;;  %v7915_v52 = vld [vmem:[#allocation42_spill] sm:$0xff] }
 0x382   : > { %v3175_v11 = vadd.f32 %v3174_v50, %v3070_v33  ;;  %v3244_v25 = vadd.f32 %v3243_v17, %v3071_v54  ;;  %7908 = vst [vmem:[#allocation38_spill] sm:$0xff] %v6745_v32  ;;  %v6757_v33 = vsub.f32 %v7911_v47, %v6345_v13  ;;  %v7913_v17 = vld [vmem:[#allocation41_spill] sm:$0xff]  ;;  %v3078_v54 = vmul.f32 %v6733_v26, %v6733_v26 }
 0x383   : > { %7910 = vst [vmem:[#allocation39_spill] sm:$0xff] %v6749_v39  ;;  %v6761_v45 = vsub.f32 %v7913_v17, %v6343_v4  ;;  %v3079_v50 = vmul.f32 %v6737_v59, %v6737_v59  ;;  %v7919_v59 = vld [vmem:[#allocation44_spill] sm:$0xff] }
 0x384   : > { %v3176_v14 = vadd.f32 %v3175_v11, %v3072_v46  ;;  %v3245_v60 = vadd.f32 %v3244_v25, %v3073_v37  ;;  %7912 = vst [vmem:[#allocation40_spill] sm:$0xff] %v6757_v33  ;;  %v6769_v46 = vsub.f32 %v7915_v52, %v6345_v13  ;;  %v7917_v25 = vld [vmem:[#allocation43_spill] sm:$0xff]  ;;  %v3080_v37 = vmul.f32 %v6745_v32, %v6745_v32 }
 0x385   : > { %7914 = vst [vmem:[#allocation41_spill] sm:$0xff] %v6761_v45  ;;  %v6773_v47 = vsub.f32 %v7917_v25, %v6343_v4  ;;  %v3081_v11 = vmul.f32 %v6749_v39, %v6749_v39  ;;  %v7923_v39 = vld [vmem:[#allocation46_spill] sm:$0xff] }
 0x386   : > { %v3177_v28 = vadd.f32 %v3176_v14, %v3074_v35  ;;  %v3246_v61 = vadd.f32 %v3245_v60, %v3075_v44  ;;  %7916 = vst [vmem:[#allocation42_spill] sm:$0xff] %v6769_v46  ;;  %v6781_v35 = vsub.f32 %v7919_v59, %v6345_v13  ;;  %v7921_v60 = vld [vmem:[#allocation45_spill] sm:$0xff]  ;;  %v3082_v44 = vmul.f32 %v6757_v33, %v6757_v33 }
 0x387   : > { %7918 = vst [vmem:[#allocation43_spill] sm:$0xff] %v6773_v47  ;;  %v6785_v52 = vsub.f32 %v7921_v60, %v6343_v4  ;;  %v3083_v14 = vmul.f32 %v6761_v45, %v6761_v45  ;;  %v7927_v45 = vld [vmem:[#allocation48_spill] sm:$0xff] }
 0x388   : > { %v3178_v17 = vadd.f32 %v3177_v28, %v3076_v48  ;;  %v3247_v26 = vadd.f32 %v3246_v61, %v3077_v36  ;;  %7920 = vst [vmem:[#allocation44_spill] sm:$0xff] %v6781_v35  ;;  %v6793_v48 = vsub.f32 %v7923_v39, %v6345_v13  ;;  %v7925_v61 = vld [vmem:[#allocation47_spill] sm:$0xff]  ;;  %v3084_v36 = vmul.f32 %v6769_v46, %v6769_v46 }
 0x389   : > { %7922 = vst [vmem:[#allocation45_spill] sm:$0xff] %v6785_v52  ;;  %v6797_v59 = vsub.f32 %v7925_v61, %v6343_v4  ;;  %v3085_v28 = vmul.f32 %v6773_v47, %v6773_v47  ;;  %v7931_v47 = vld [vmem:[#allocation50_spill] sm:$0xff] }
 0x38a   : > { %v3179_v25 = vadd.f32 %v3178_v17, %v3078_v54  ;;  %v3248_v32 = vadd.f32 %v3247_v26, %v3079_v50  ;;  %7924 = vst [vmem:[#allocation46_spill] sm:$0xff] %v6793_v48  ;;  %v6805_v54 = vsub.f32 %v7927_v45, %v6345_v13  ;;  %v7929_v26 = vld [vmem:[#allocation49_spill] sm:$0xff]  ;;  %v3086_v50 = vmul.f32 %v6781_v35, %v6781_v35 }
 0x38b   : > { %7926 = vst [vmem:[#allocation47_spill] sm:$0xff] %v6797_v59  ;;  %v6809_v39 = vsub.f32 %v7929_v26, %v6343_v4  ;;  %v3087_v17 = vmul.f32 %v6785_v52, %v6785_v52  ;;  %v7935_v52 = vld [vmem:[#allocation52_spill] sm:$0xff] }
 0x38c   : > { %v3180_v60 = vadd.f32 %v3179_v25, %v3080_v37  ;;  %v3249_v33 = vadd.f32 %v3248_v32, %v3081_v11  ;;  %7928 = vst [vmem:[#allocation48_spill] sm:$0xff] %v6805_v54  ;;  %v6817_v37 = vsub.f32 %v7931_v47, %v6345_v13  ;;  %v7933_v32 = vld [vmem:[#allocation51_spill] sm:$0xff]  ;;  %v3088_v11 = vmul.f32 %v6793_v48, %v6793_v48 }
 0x38d   : > { %7930 = vst [vmem:[#allocation49_spill] sm:$0xff] %v6809_v39  ;;  %v6821_v45 = vsub.f32 %v7933_v32, %v6343_v4  ;;  %v3089_v25 = vmul.f32 %v6797_v59, %v6797_v59  ;;  %v7939_v59 = vld [vmem:[#allocation54_spill] sm:$0xff] }
 0x38e   : > { %v3181_v61 = vadd.f32 %v3180_v60, %v3082_v44  ;;  %v3250_v46 = vadd.f32 %v3249_v33, %v3083_v14  ;;  %7932 = vst [vmem:[#allocation50_spill] sm:$0xff] %v6817_v37  ;;  %v6829_v44 = vsub.f32 %v7935_v52, %v6345_v13  ;;  %v7937_v33 = vld [vmem:[#allocation53_spill] sm:$0xff]  ;;  %v3090_v14 = vmul.f32 %v6805_v54, %v6805_v54 }
 0x38f   : > { %7934 = vst [vmem:[#allocation51_spill] sm:$0xff] %v6821_v45  ;;  %v6833_v47 = vsub.f32 %v7937_v33, %v6343_v4  ;;  %v3091_v60 = vmul.f32 %v6809_v39, %v6809_v39  ;;  %v7943_v39 = vld [vmem:[#allocation56_spill] sm:$0xff] }
 0x390   : > { %v3182_v26 = vadd.f32 %v3181_v61, %v3084_v36  ;;  %v3251_v35 = vadd.f32 %v3250_v46, %v3085_v28  ;;  %7936 = vst [vmem:[#allocation52_spill] sm:$0xff] %v6829_v44  ;;  %v6841_v36 = vsub.f32 %v7939_v59, %v6345_v13  ;;  %v7941_v46 = vld [vmem:[#allocation55_spill] sm:$0xff]  ;;  %v3092_v28 = vmul.f32 %v6817_v37, %v6817_v37 }
 0x391   : > { %7938 = vst [vmem:[#allocation53_spill] sm:$0xff] %v6833_v47  ;;  %v6845_v52 = vsub.f32 %v7941_v46, %v6343_v4  ;;  %v3093_v61 = vmul.f32 %v6821_v45, %v6821_v45  ;;  %v7947_v45 = vld [vmem:[#allocation58_spill] sm:$0xff] }
 0x392   : > { %v3183_v32 = vadd.f32 %v3182_v26, %v3086_v50  ;;  %v3252_v48 = vadd.f32 %v3251_v35, %v3087_v17  ;;  %7940 = vst [vmem:[#allocation54_spill] sm:$0xff] %v6841_v36  ;;  %v6853_v50 = vsub.f32 %v7943_v39, %v6345_v13  ;;  %v7945_v35 = vld [vmem:[#allocation57_spill] sm:$0xff]  ;;  %v3094_v17 = vmul.f32 %v6829_v44, %v6829_v44 }
 0x393   : > { %7942 = vst [vmem:[#allocation55_spill] sm:$0xff] %v6845_v52  ;;  %v6857_v59 = vsub.f32 %v7945_v35, %v6343_v4  ;;  %v3095_v26 = vmul.f32 %v6833_v47, %v6833_v47  ;;  %v7951_v47 = vld [vmem:[#allocation60_spill] sm:$0xff] }
 0x394   : > { %v3184_v33 = vadd.f32 %v3183_v32, %v3088_v11  ;;  %v3253_v54 = vadd.f32 %v3252_v48, %v3089_v25  ;;  %7944 = vst [vmem:[#allocation56_spill] sm:$0xff] %v6853_v50  ;;  %v6865_v11 = vsub.f32 %v7947_v45, %v6345_v13  ;;  %v7949_v48 = vld [vmem:[#allocation59_spill] sm:$0xff]  ;;  %v3096_v25 = vmul.f32 %v6841_v36, %v6841_v36 }
 0x395   : > { %7946 = vst [vmem:[#allocation57_spill] sm:$0xff] %v6857_v59  ;;  %v6869_v39 = vsub.f32 %v7949_v48, %v6343_v4  ;;  %v3097_v32 = vmul.f32 %v6845_v52, %v6845_v52  ;;  %v7955_v52 = vld [vmem:[#allocation62_spill] sm:$0xff] }
 0x396   : > { %v3185_v46 = vadd.f32 %v3184_v33, %v3090_v14  ;;  %v3254_v37 = vadd.f32 %v3253_v54, %v3091_v60  ;;  %7948 = vst [vmem:[#allocation58_spill] sm:$0xff] %v6865_v11  ;;  %v6877_v14 = vsub.f32 %v7951_v47, %v6345_v13  ;;  %v7953_v54 = vld [vmem:[#allocation61_spill] sm:$0xff]  ;;  %v3098_v60 = vmul.f32 %v6853_v50, %v6853_v50 }
 0x397   : > { %7950 = vst [vmem:[#allocation59_spill] sm:$0xff] %v6869_v39  ;;  %v6881_v45 = vsub.f32 %v7953_v54, %v6343_v4  ;;  %v3099_v33 = vmul.f32 %v6857_v59, %v6857_v59  ;;  %v7959_v59 = vld [vmem:[#allocation64_spill] sm:$0xff] }
 0x398   : > { %v3186_v35 = vadd.f32 %v3185_v46, %v3092_v28  ;;  %v3255_v44 = vadd.f32 %v3254_v37, %v3093_v61  ;;  %7952 = vst [vmem:[#allocation60_spill] sm:$0xff] %v6877_v14  ;;  %v6889_v28 = vsub.f32 %v7955_v52, %v6345_v13  ;;  %v7957_v37 = vld [vmem:[#allocation63_spill] sm:$0xff]  ;;  %v3100_v61 = vmul.f32 %v6865_v11, %v6865_v11 }
 0x399   : > { %7954 = vst [vmem:[#allocation61_spill] sm:$0xff] %v6881_v45  ;;  %v6893_v47 = vsub.f32 %v7957_v37, %v6343_v4  ;;  %v3101_v46 = vmul.f32 %v6869_v39, %v6869_v39  ;;  %v7963_v39 = vld [vmem:[#allocation66_spill] sm:$0xff] }
 0x39a   : > { %v3187_v48 = vadd.f32 %v3186_v35, %v3094_v17  ;;  %v3256_v36 = vadd.f32 %v3255_v44, %v3095_v26  ;;  %7956 = vst [vmem:[#allocation62_spill] sm:$0xff] %v6889_v28  ;;  %v6901_v17 = vsub.f32 %v7959_v59, %v6345_v13  ;;  %v7961_v44 = vld [vmem:[#allocation65_spill] sm:$0xff]  ;;  %v3102_v26 = vmul.f32 %v6877_v14, %v6877_v14 }
 0x39b   : > { %7958 = vst [vmem:[#allocation63_spill] sm:$0xff] %v6893_v47  ;;  %v6905_v52 = vsub.f32 %v7961_v44, %v6343_v4  ;;  %v3103_v35 = vmul.f32 %v6881_v45, %v6881_v45  ;;  %v7967_v45 = vld [vmem:[#allocation68_spill] sm:$0xff] }
 0x39c   : > { %v3188_v54 = vadd.f32 %v3187_v48, %v3096_v25  ;;  %v3257_v50 = vadd.f32 %v3256_v36, %v3097_v32  ;;  %7960 = vst [vmem:[#allocation64_spill] sm:$0xff] %v6901_v17  ;;  %v6913_v25 = vsub.f32 %v7963_v39, %v6345_v13  ;;  %v7965_v36 = vld [vmem:[#allocation67_spill] sm:$0xff]  ;;  %v3104_v32 = vmul.f32 %v6889_v28, %v6889_v28 }
 0x39d   : > { %7962 = vst [vmem:[#allocation65_spill] sm:$0xff] %v6905_v52  ;;  %v6917_v59 = vsub.f32 %v7965_v36, %v6343_v4  ;;  %v3105_v48 = vmul.f32 %v6893_v47, %v6893_v47  ;;  %v7971_v47 = vld [vmem:[#allocation70_spill] sm:$0xff] }
 0x39e   : > { %v3189_v37 = vadd.f32 %v3188_v54, %v3098_v60  ;;  %v3258_v11 = vadd.f32 %v3257_v50, %v3099_v33  ;;  %7964 = vst [vmem:[#allocation66_spill] sm:$0xff] %v6913_v25  ;;  %v6925_v60 = vsub.f32 %v7967_v45, %v6345_v13  ;;  %v7969_v50 = vld [vmem:[#allocation69_spill] sm:$0xff]  ;;  %v3106_v33 = vmul.f32 %v6901_v17, %v6901_v17 }
 0x39f   : > { %7966 = vst [vmem:[#allocation67_spill] sm:$0xff] %v6917_v59  ;;  %v6929_v39 = vsub.f32 %v7969_v50, %v6343_v4  ;;  %v3107_v54 = vmul.f32 %v6905_v52, %v6905_v52  ;;  %v7975_v52 = vld [vmem:[#allocation72_spill] sm:$0xff] }
 0x3a0   : > { %v3190_v44 = vadd.f32 %v3189_v37, %v3100_v61  ;;  %v3259_v14 = vadd.f32 %v3258_v11, %v3101_v46  ;;  %7968 = vst [vmem:[#allocation68_spill] sm:$0xff] %v6925_v60  ;;  %v6937_v61 = vsub.f32 %v7971_v47, %v6345_v13  ;;  %v7973_v11 = vld [vmem:[#allocation71_spill] sm:$0xff]  ;;  %v3108_v46 = vmul.f32 %v6913_v25, %v6913_v25 }
 0x3a1   : > { %7970 = vst [vmem:[#allocation69_spill] sm:$0xff] %v6929_v39  ;;  %v6941_v45 = vsub.f32 %v7973_v11, %v6343_v4  ;;  %v3109_v37 = vmul.f32 %v6917_v59, %v6917_v59  ;;  %v7979_v59 = vld [vmem:[#allocation74_spill] sm:$0xff] }
 0x3a2   : > { %v3191_v36 = vadd.f32 %v3190_v44, %v3102_v26  ;;  %v3260_v28 = vadd.f32 %v3259_v14, %v3103_v35  ;;  %7972 = vst [vmem:[#allocation70_spill] sm:$0xff] %v6937_v61  ;;  %v6949_v26 = vsub.f32 %v7975_v52, %v6345_v13  ;;  %v7977_v14 = vld [vmem:[#allocation73_spill] sm:$0xff]  ;;  %v3110_v35 = vmul.f32 %v6925_v60, %v6925_v60 }
 0x3a3   : > { %7974 = vst [vmem:[#allocation71_spill] sm:$0xff] %v6941_v45  ;;  %v6953_v47 = vsub.f32 %v7977_v14, %v6343_v4  ;;  %v3111_v44 = vmul.f32 %v6929_v39, %v6929_v39  ;;  %v7983_v39 = vld [vmem:[#allocation76_spill] sm:$0xff] }
 0x3a4   : > { %v3192_v50 = vadd.f32 %v3191_v36, %v3104_v32  ;;  %v3261_v17 = vadd.f32 %v3260_v28, %v3105_v48  ;;  %7976 = vst [vmem:[#allocation72_spill] sm:$0xff] %v6949_v26  ;;  %v6961_v32 = vsub.f32 %v7979_v59, %v6345_v13  ;;  %v7981_v28 = vld [vmem:[#allocation75_spill] sm:$0xff]  ;;  %v3112_v48 = vmul.f32 %v6937_v61, %v6937_v61 }
 0x3a5   : > { %7978 = vst [vmem:[#allocation73_spill] sm:$0xff] %v6953_v47  ;;  %v6965_v52 = vsub.f32 %v7981_v28, %v6343_v4  ;;  %v3113_v36 = vmul.f32 %v6941_v45, %v6941_v45  ;;  %v7987_v45 = vld [vmem:[#allocation78_spill] sm:$0xff] }
 0x3a6   : > { %v3193_v11 = vadd.f32 %v3192_v50, %v3106_v33  ;;  %v3262_v25 = vadd.f32 %v3261_v17, %v3107_v54  ;;  %7980 = vst [vmem:[#allocation74_spill] sm:$0xff] %v6961_v32  ;;  %v6973_v33 = vsub.f32 %v7983_v39, %v6345_v13  ;;  %v7985_v17 = vld [vmem:[#allocation77_spill] sm:$0xff]  ;;  %v3114_v54 = vmul.f32 %v6949_v26, %v6949_v26 }
 0x3a7   : > { %7982 = vst [vmem:[#allocation75_spill] sm:$0xff] %v6965_v52  ;;  %v6977_v59 = vsub.f32 %v7985_v17, %v6343_v4  ;;  %v3115_v50 = vmul.f32 %v6953_v47, %v6953_v47  ;;  %v7991_v47 = vld [vmem:[#allocation80_spill] sm:$0xff] }
 0x3a8   : > { %v3194_v14 = vadd.f32 %v3193_v11, %v3108_v46  ;;  %v3263_v60 = vadd.f32 %v3262_v25, %v3109_v37  ;;  %7984 = vst [vmem:[#allocation76_spill] sm:$0xff] %v6973_v33  ;;  %v6985_v46 = vsub.f32 %v7987_v45, %v6345_v13  ;;  %v7989_v25 = vld [vmem:[#allocation79_spill] sm:$0xff]  ;;  %v3116_v37 = vmul.f32 %v6961_v32, %v6961_v32 }
 0x3a9   : > { %7986 = vst [vmem:[#allocation77_spill] sm:$0xff] %v6977_v59  ;;  %v6989_v39 = vsub.f32 %v7989_v25, %v6343_v4  ;;  %v3117_v11 = vmul.f32 %v6965_v52, %v6965_v52  ;;  %v7993_v52 = vld [vmem:[#allocation82_spill] sm:$0xff] }
 0x3aa   : > { %v3195_v28 = vadd.f32 %v3194_v14, %v3110_v35  ;;  %v3264_v61 = vadd.f32 %v3263_v60, %v3111_v44  ;;  %7988 = vst [vmem:[#allocation78_spill] sm:$0xff] %v6985_v46  ;;  %v6997_v35 = vsub.f32 %v7991_v47, %v6345_v13  ;;  %v7992_v60 = vld [vmem:[#allocation81_spill] sm:$0xff]  ;;  %v3118_v44 = vmul.f32 %v6973_v33, %v6973_v33 }
 0x3ab   : > { %7990 = vst [vmem:[#allocation79_spill] sm:$0xff] %v6989_v39  ;;  %v7001_v45 = vsub.f32 %v7992_v60, %v6343_v4  ;;  %v3119_v14 = vmul.f32 %v6977_v59, %v6977_v59  ;;  %v7995_v59 = vld [vmem:[#allocation84_spill] sm:$0xff] }
 0x3ac   : > { %v3196_v17 = vadd.f32 %v3195_v28, %v3112_v48  ;;  %v3265_v26 = vadd.f32 %v3264_v61, %v3113_v36  ;;  %v7009_v48 = vsub.f32 %v7993_v52, %v6345_v13  ;;  %v7994_v61 = vld [vmem:[#allocation83_spill] sm:$0xff]  ;;  %v3120_v36 = vmul.f32 %v6985_v46, %v6985_v46 }
 0x3ad   : > { %v7013_v47 = vsub.f32 %v7994_v61, %v6343_v4  ;;  %v3121_v28 = vmul.f32 %v6989_v39, %v6989_v39  ;;  %v7997_v39 = vld [vmem:[#allocation86_spill] sm:$0xff] }
 0x3ae   : > { %v3197_v25 = vadd.f32 %v3196_v17, %v3114_v54  ;;  %v3266_v32 = vadd.f32 %v3265_v26, %v3115_v50  ;;  %v7021_v54 = vsub.f32 %v7995_v59, %v6345_v13  ;;  %v7996_v26 = vld [vmem:[#allocation85_spill] sm:$0xff]  ;;  %v3122_v50 = vmul.f32 %v6997_v35, %v6997_v35 }
 0x3af   : > { %v7025_v52 = vsub.f32 %v7996_v26, %v6343_v4  ;;  %v3123_v17 = vmul.f32 %v7001_v45, %v7001_v45  ;;  %v3125_v59 = vmul.f32 %v7013_v47, %v7013_v47 }
 0x3b0   : > { %v3198_v60 = vadd.f32 %v3197_v25, %v3116_v37  ;;  %v3267_v33 = vadd.f32 %v3266_v32, %v3117_v11  ;;  %v7033_v37 = vsub.f32 %v7997_v39, %v6345_v13  ;;  %v3124_v32 = vmul.f32 %v7009_v48, %v7009_v48 }
 0x3b1   : > { %v3126_v25 = vmul.f32 %v7021_v54, %v7021_v54  ;;  %v3127_v26 = vmul.f32 %v7025_v52, %v7025_v52  ;;  %v3129_v39 = vmul.f32 %v6349_v5, %v6349_v5 }
 0x3b2   : > { %v3199_v61 = vadd.f32 %v3198_v60, %v3118_v44  ;;  %v3268_v46 = vadd.f32 %v3267_v33, %v3119_v14  ;;  %v3128_v13 = vmul.f32 %v7033_v37, %v7033_v37 }
 0x3b4   : > { %v3200_v4 = vadd.f32 %v3199_v61, %v3120_v36  ;;  %v3269_v11 = vadd.f32 %v3268_v46, %v3121_v28  ;;  %v3130_v36 = vmul.f32 %v6353_v8, %v6353_v8  ;;  %v3131_v46 = vmul.f32 %v6357_v0, %v6357_v0 }
 0x3b6   : > { %v3201_v44 = vadd.f32 %v3200_v4, %v3122_v50  ;;  %v3270_v33 = vadd.f32 %v3269_v11, %v3123_v17  ;;  %v3132_v50 = vmul.f32 %v6361_v2, %v6361_v2  ;;  %v3133_v17 = vmul.f32 %v6365_v56, %v6365_v56 }
 0x3b8   : > { %v3202_v14 = vadd.f32 %v3201_v44, %v3124_v32  ;;  %v3271_v60 = vadd.f32 %v3270_v33, %v3125_v59  ;;  %v3134_v32 = vmul.f32 %v6368_v53, %v6368_v53  ;;  %v3135_v59 = vmul.f32 %v6371_v57, %v6371_v57 }
 0x3ba   : > { %v3203_v28 = vadd.f32 %v3202_v14, %v3126_v25  ;;  %v3272_v61 = vadd.f32 %v3271_v60, %v3127_v26  ;;  %v3136_v25 = vmul.f32 %v6374_v63, %v6374_v63  ;;  %v3137_v26 = vmul.f32 %v6377_v58, %v6377_v58 }
 0x3bc   : > { %v3204_v4 = vadd.f32 %v3203_v28, %v3128_v13  ;;  %v3273_v11 = vadd.f32 %v3272_v61, %v3129_v39  ;;  %v3138_v13 = vmul.f32 %v6380_v29, %v6380_v29  ;;  %v3139_v39 = vmul.f32 %v6383_v30, %v6383_v30 }
 0x3be   : > { %v3205_v44 = vadd.f32 %v3204_v4, %v3130_v36  ;;  %v3274_v33 = vadd.f32 %v3273_v11, %v3131_v46  ;;  %v3140_v36 = vmul.f32 %v6386_v41, %v6386_v41  ;;  %v3141_v46 = vmul.f32 %v6389_v51, %v6389_v51 }
 0x3c0   : > { %v3206_v14 = vadd.f32 %v3205_v44, %v3132_v50  ;;  %v3275_v60 = vadd.f32 %v3274_v33, %v3133_v17  ;;  %v3142_v50 = vmul.f32 %v6392_v62, %v6392_v62  ;;  %v3143_v17 = vmul.f32 %v6395_v7, %v6395_v7 }
 0x3c2   : > { %v3207_v28 = vadd.f32 %v3206_v14, %v3134_v32  ;;  %v3276_v61 = vadd.f32 %v3275_v60, %v3135_v59  ;;  %v3144_v32 = vmul.f32 %v6398_v6, %v6398_v6  ;;  %v3145_v59 = vmul.f32 %v6401_v21, %v6401_v21 }
 0x3c4   : > { %v3208_v4 = vadd.f32 %v3207_v28, %v3136_v25  ;;  %v3277_v11 = vadd.f32 %v3276_v61, %v3137_v26  ;;  %v3146_v25 = vmul.f32 %v6404_v3, %v6404_v3  ;;  %v3147_v26 = vmul.f32 %v6407_v55, %v6407_v55 }
 0x3c6   : > { %v3209_v44 = vadd.f32 %v3208_v4, %v3138_v13  ;;  %v3278_v33 = vadd.f32 %v3277_v11, %v3139_v39  ;;  %v3148_v13 = vmul.f32 %v6410_v43, %v6410_v43  ;;  %v3149_v39 = vmul.f32 %v6413_v9, %v6413_v9 }
 0x3c8   : > { %v3210_v14 = vadd.f32 %v3209_v44, %v3140_v36  ;;  %v3279_v60 = vadd.f32 %v3278_v33, %v3141_v46  ;;  %v3150_v36 = vmul.f32 %v6416_v49, %v6416_v49  ;;  %v3151_v46 = vmul.f32 %v6419_v22, %v6419_v22 }
 0x3ca   : > { %v3211_v28 = vadd.f32 %v3210_v14, %v3142_v50  ;;  %v3280_v61 = vadd.f32 %v3279_v60, %v3143_v17  ;;  %v3152_v50 = vmul.f32 %v6422_v1, %v6422_v1  ;;  %v3153_v17 = vmul.f32 %v6425_v18, %v6425_v18 }
 0x3cc   : > { %v3212_v4 = vadd.f32 %v3211_v28, %v3144_v32  ;;  %v3281_v11 = vadd.f32 %v3280_v61, %v3145_v59 }
 0x3ce   : > { %v3213_v44 = vadd.f32 %v3212_v4, %v3146_v25  ;;  %v3282_v33 = vadd.f32 %v3281_v11, %v3147_v26 }
 0x3d0   : > { %v3214_v14 = vadd.f32 %v3213_v44, %v3148_v13  ;;  %v3283_v60 = vadd.f32 %v3282_v33, %v3149_v39 }
 0x3d2   : > { %v3215_v43 = vadd.f32 %v3214_v14, %v3150_v36  ;;  %v3284_v9 = vadd.f32 %v3283_v60, %v3151_v46 }
 0x3d4   : > { %v3216_v32 = vadd.f32 %v3215_v43, %v3152_v50  ;;  %v3285_v59 = vadd.f32 %v3284_v9, %v3153_v17 }
 0x3d6   : > { %v3217_v28 = vrot.slane %v3216_v32, 4  ;;  %v3286_v61 = vrot.slane %v3285_v59, 4 }
 0x3d8   : > { %v3218_v49 = vadd.f32 %v3217_v28, %v3216_v32  ;;  %v3287_v55 = vadd.f32 %v3286_v61, %v3285_v59 }
 0x3da   : > { %v3219_v3 = vrot.slane %v3218_v49, 2  ;;  %v3288_v22 = vrot.slane %v3287_v55, 2 }
 0x3dc   : > { %v3220_v25 = vadd.f32 %v3219_v3, %v3218_v49  ;;  %v3289_v26 = vadd.f32 %v3288_v22, %v3287_v55 }
 0x3de   : > { %v3221_v4 = vrot.slane %v3220_v25, 1  ;;  %v3290_v11 = vrot.slane %v3289_v26, 1 }
 0x3e0   : > { %v3222_v1 = vadd.f32 %v3221_v4, %v3220_v25  ;;  %v3291_v21 = vadd.f32 %v3290_v11, %v3289_v26 }
 0x3e2   : > { %v3292_v6 = vmul.f32 0.001953125, %v3222_v1  ;;  %v3293_v18 = vmul.f32 0.001953125, %v3291_v21 }
 0x3e4   : > { %v3294_v13 = vadd.f32 1e-05, %v3292_v6  ;;  %v3295_v39 = vadd.f32 1e-05, %v3293_v18 }
 0x3e6   : > { %5134 = vrsqrt.f32 %v3294_v13 }
 0x3e7   : > { %5136 = vrsqrt.f32 %v3295_v39 }
 0x3f0   : > { %v7095_v43 = vpop.eup %5134 }
 0x3f1   : > { %v7097_v9 = vpop.eup %5136  ;;  %v3298_v36 = vmul.f32 %v7095_v43, %v6429_v23  ;;  %v3300_v3 = vmul.f32 %v7095_v43, %v6437_v15  ;;  %v3302_v55 = vmul.f32 %v7095_v43, %v6445_v42  ;;  %v3304_v21 = vmul.f32 %v7095_v43, %v6453_v24 }
 0x3f2   : > { %v3299_v6 = vmul.f32 %v7097_v9, %v6433_v12  ;;  %v3301_v49 = vmul.f32 %v7097_v9, %v6441_v10  ;;  %v3303_v22 = vmul.f32 %v7097_v9, %v6449_v16  ;;  %v3305_v1 = vmul.f32 %v7097_v9, %v6457_v20 }
 0x3f3   : > { %vm3426_vm0 = vcmp.gt.f32.partialorder %v3298_v36, 0.0  ;;  %v3554_v18 = vmul.f32 0.2, %v3298_v36  ;;  %vm3428_vm1 = vcmp.gt.f32.partialorder %v3300_v3, 0.0  ;;  %v3556_v23 = vmul.f32 0.2, %v3300_v3 }
 0x3f4   : > { %vm3427_vm2 = vcmp.gt.f32.partialorder %v3299_v6, 0.0  ;;  %v3555_v15 = vmul.f32 0.2, %v3299_v6  ;;  %vm3429_vm3 = vcmp.gt.f32.partialorder %v3301_v49, 0.0  ;;  %v3557_v42 = vmul.f32 0.2, %v3301_v49 }
 0x3f5   : > { %v3682_v24 = vsel %vm3426_vm0, %v3298_v36, %v3554_v18  ;;  %v3684_v46 = vsel %vm3428_vm1, %v3300_v3, %v3556_v23  ;;  %vm3430_vm4 = vcmp.gt.f32.partialorder %v3302_v55, 0.0  ;;  %vm3431_vm5 = vcmp.gt.f32.partialorder %v3303_v22, 0.0 }
 0x3f6   : > { %v3683_v12 = vsel %vm3427_vm2, %v3299_v6, %v3555_v15  ;;  %v3685_v10 = vsel %vm3429_vm3, %v3301_v49, %v3557_v42  ;;  %v3558_v44 = vmul.f32 0.2, %v3302_v55  ;;  %v3559_v33 = vmul.f32 0.2, %v3303_v22  ;;  %v7999_v15 = vld [vmem:[#allocation98_spill] sm:$0xff] }
 0x3f7   : > { %v4698_v16 = vpack.c.bf16 %v3683_v12, %v3682_v24  ;;  %v4699_v50 = vpack.c.bf16 %v3685_v10, %v3684_v46  ;;  %vm3432_vm6 = vcmp.gt.f32.partialorder %v3304_v21, 0.0  ;;  %vm3433_vm7 = vcmp.gt.f32.partialorder %v3305_v1, 0.0  ;;  %v8000_v46 = vld [vmem:[#allocation99_spill] sm:$0xff]  ;;  %v8001_v10 = vld [vmem:[#allocation100_spill] sm:$0xff] }
 0x3f8   : > { %v3686_v20 = vsel %vm3430_vm4, %v3302_v55, %v3558_v44  ;;  %v3687_v17 = vsel %vm3431_vm5, %v3303_v22, %v3559_v33  ;;  %v3560_v14 = vmul.f32 0.2, %v3304_v21  ;;  %v3561_v60 = vmul.f32 0.2, %v3305_v1 }
 0x3f9   : > { %4194 = vst [vmem:[%s7564_s2] sm:$0xff] %v4698_v16  ;;  %4195 = vst [vmem:[%s7564_s2 + $0x8] sm:$0xff] %v4699_v50  ;;  %v4700_v32 = vpack.c.bf16 %v3687_v17, %v3686_v20  ;;  %v3306_v59 = vmul.f32 %v7095_v43, %v6469_v27  ;;  %v3307_v28 = vmul.f32 %v7097_v9, %v6473_v19  ;;  %v8002_v50 = vld [vmem:[#allocation101_spill] sm:$0xff] }
 0x3fa   : > { %v3308_v61 = vmul.f32 %v7095_v43, %v6481_v38  ;;  %v3688_v25 = vsel %vm3432_vm6, %v3304_v21, %v3560_v14  ;;  %v3689_v26 = vsel %vm3433_vm7, %v3305_v1, %v3561_v60  ;;  %v3309_v4 = vmul.f32 %v7097_v9, %v6485_v31  ;;  %v7998_v21 = vld [vmem:[#allocation97_spill] sm:$0xff] }
 0x3fb   : > { %v3310_v11 = vmul.f32 %v7095_v43, %v6493_v34  ;;  %4196 = vst [vmem:[%s7564_s2 + $0x10] sm:$0xff] %v4700_v32  ;;  %v4701_v13 = vpack.c.bf16 %v3689_v26, %v3688_v25  ;;  %vm3434_vm8 = vcmp.gt.f32.partialorder %v3306_v59, 0.0  ;;  %vm3435_vm9 = vcmp.gt.f32.partialorder %v3307_v28, 0.0 }
 0x3fc   : > { %v3562_v27 = vmul.f32 0.2, %v3306_v59  ;;  %v3563_v19 = vmul.f32 0.2, %v3307_v28  ;;  %vm3436_vm10 = vcmp.gt.f32.partialorder %v3308_v61, 0.0  ;;  %vm3437_vm11 = vcmp.gt.f32.partialorder %v3309_v4, 0.0 }
 0x3fd   : > { %v3564_v38 = vmul.f32 0.2, %v3308_v61  ;;  %4197 = vst [vmem:[%s7564_s2 + $0x18] sm:$0xff] %v4701_v13  ;;  %v3565_v39 = vmul.f32 0.2, %v3309_v4  ;;  %v3311_v34 = vmul.f32 %v7097_v9, %v6497_v40  ;;  %vm3438_vm12 = vcmp.gt.f32.partialorder %v3310_v11, 0.0 }
 0x3fe   : > { %v3690_v31 = vsel %vm3434_vm8, %v3306_v59, %v3562_v27  ;;  %v3691_v36 = vsel %vm3435_vm9, %v3307_v28, %v3563_v19  ;;  %v3566_v55 = vmul.f32 0.2, %v3310_v11  ;;  %v3312_v6 = vmul.f32 %v7095_v43, %v7998_v21  ;;  %v8003_v59 = vld [vmem:[#allocation102_spill] sm:$0xff]  ;;  %v8005_v19 = vld [vmem:[#allocation5_spill] sm:$0xff] }
 0x3ff   : > { %v3692_v3 = vsel %vm3436_vm10, %v3308_v61, %v3564_v38  ;;  %v4702_v49 = vpack.c.bf16 %v3691_v36, %v3690_v31  ;;  %v3693_v22 = vsel %vm3437_vm11, %v3309_v4, %v3565_v39  ;;  %vm3439_vm13 = vcmp.gt.f32.partialorder %v3311_v34, 0.0  ;;  %v8004_v4 = vld [vmem:[#allocation4_spill] sm:$0xff] }
 0x400   : > { %v3567_v1 = vmul.f32 0.2, %v3311_v34  ;;  %v4703_v18 = vpack.c.bf16 %v3693_v22, %v3692_v3  ;;  %v3694_v23 = vsel %vm3438_vm12, %v3310_v11, %v3566_v55  ;;  %v3313_v42 = vmul.f32 %v7097_v9, %v7999_v15  ;;  %v8006_v55 = vld [vmem:[#allocation6_spill] sm:$0xff]  ;;  %v8007_v22 = vld [vmem:[#allocation7_spill] sm:$0xff] }
 0x401   : > { %vm3440_vm14 = vcmp.gt.f32.partialorder %v3312_v6, 0.0  ;;  %4198 = vst [vmem:[%s7564_s2 + $0x20] sm:$0xff] %v4702_v49  ;;  %v3568_v24 = vmul.f32 0.2, %v3312_v6  ;;  %v3314_v12 = vmul.f32 %v7095_v43, %v8000_v46  ;;  %v3315_v44 = vmul.f32 %v7097_v9, %v8001_v10 }
 0x402   : > { %v3695_v40 = vsel %vm3439_vm13, %v3311_v34, %v3567_v1  ;;  %4199 = vst [vmem:[%s7564_s2 + $0x28] sm:$0xff] %v4703_v18  ;;  %vm3441_vm15 = vcmp.gt.f32.partialorder %v3313_v42, 0.0  ;;  %v3569_v16 = vmul.f32 0.2, %v3313_v42  ;;  %v3316_v20 = vmul.f32 %v7095_v43, %v8002_v50  ;;  %v8008_v18 = vld [vmem:[#allocation8_spill] sm:$0xff]  ;;  %v8010_v50 = vld [vmem:[#allocation10_spill] sm:$0xff] }
 0x403   : > { %v4704_v33 = vpack.c.bf16 %v3695_v40, %v3694_v23  ;;  %v3696_v17 = vsel %vm3440_vm14, %v3312_v6, %v3568_v24  ;;  %vm3442_vm0 = vcmp.gt.f32.partialorder %v3314_v12, 0.0  ;;  %vm3443_vm1 = vcmp.gt.f32.partialorder %v3315_v44, 0.0  ;;  %v8009_v40 = vld [vmem:[#allocation9_spill] sm:$0xff] }
 0x404   : > { %v3570_v14 = vmul.f32 0.2, %v3314_v12  ;;  %v3697_v60 = vsel %vm3441_vm15, %v3313_v42, %v3569_v16  ;;  %v3571_v32 = vmul.f32 0.2, %v3315_v44  ;;  %v3317_v28 = vmul.f32 %v7097_v9, %v8003_v59 }
 0x405   : > { %4200 = vst [vmem:[%s7564_s2 + $0x30] sm:$0xff] %v4704_v33  ;;  %vm3444_vm2 = vcmp.gt.f32.partialorder %v3316_v20, 0.0  ;;  %v4705_v61 = vpack.c.bf16 %v3697_v60, %v3696_v17  ;;  %v3572_v26 = vmul.f32 0.2, %v3316_v20  ;;  %v3318_v11 = vmul.f32 %v7095_v43, %v8004_v4  ;;  %v8011_v17 = vld [vmem:[#allocation11_spill] sm:$0xff]  ;;  %v8012_v60 = vld [vmem:[#allocation12_spill] sm:$0xff] }
 0x406   : > { %v3698_v25 = vsel %vm3442_vm0, %v3314_v12, %v3570_v14  ;;  %v3699_v13 = vsel %vm3443_vm1, %v3315_v44, %v3571_v32  ;;  %vm3445_vm3 = vcmp.gt.f32.partialorder %v3317_v28, 0.0  ;;  %v3573_v27 = vmul.f32 0.2, %v3317_v28 }
 0x407   : > { %v3319_v38 = vmul.f32 %v7097_v9, %v8005_v19  ;;  %4201 = vst [vmem:[%s7564_s2 + $0x38] sm:$0xff] %v4705_v61  ;;  %v4706_v31 = vpack.c.bf16 %v3699_v13, %v3698_v25  ;;  %v3700_v39 = vsel %vm3444_vm2, %v3316_v20, %v3572_v26  ;;  %vm3446_vm4 = vcmp.gt.f32.partialorder %v3318_v11, 0.0  ;;  %v8013_v25 = vld [vmem:[#allocation13_spill] sm:$0xff] }
 0x408   : > { %v3574_v34 = vmul.f32 0.2, %v3318_v11  ;;  %v3701_v36 = vsel %vm3445_vm3, %v3317_v28, %v3573_v27  ;;  %v3320_v21 = vmul.f32 %v7095_v43, %v8006_v55  ;;  %v3321_v1 = vmul.f32 %v7097_v9, %v8007_v22 }
 0x409   : > { %vm3447_vm5 = vcmp.gt.f32.partialorder %v3319_v38, 0.0  ;;  %v3575_v3 = vmul.f32 0.2, %v3319_v38  ;;  %4202 = vst [vmem:[%s7564_s2 + $0x40] sm:$0xff] %v4706_v31  ;;  %v4707_v6 = vpack.c.bf16 %v3701_v36, %v3700_v39  ;;  %v3322_v23 = vmul.f32 %v7095_v43, %v8008_v18  ;;  %v8014_v31 = vld [vmem:[#allocation14_spill] sm:$0xff] }
 0x40a   : > { %v3702_v49 = vsel %vm3446_vm4, %v3318_v11, %v3574_v34  ;;  %vm3448_vm6 = vcmp.gt.f32.partialorder %v3320_v21, 0.0  ;;  %v3576_v42 = vmul.f32 0.2, %v3320_v21  ;;  %v3323_v24 = vmul.f32 %v7097_v9, %v8009_v40  ;;  %v8015_v34 = vld [vmem:[#allocation15_spill] sm:$0xff] }
 0x40b   : > { %v3703_v15 = vsel %vm3447_vm5, %v3319_v38, %v3575_v3  ;;  %4203 = vst [vmem:[%s7564_s2 + $0x48] sm:$0xff] %v4707_v6  ;;  %vm3449_vm7 = vcmp.gt.f32.partialorder %v3321_v1, 0.0  ;;  %v3577_v12 = vmul.f32 0.2, %v3321_v1  ;;  %vm3450_vm8 = vcmp.gt.f32.partialorder %v3322_v23, 0.0 }
 0x40c   : > { %v4708_v46 = vpack.c.bf16 %v3703_v15, %v3702_v49  ;;  %v3704_v10 = vsel %vm3448_vm6, %v3320_v21, %v3576_v42  ;;  %vm3451_vm9 = vcmp.gt.f32.partialorder %v3323_v24, 0.0  ;;  %v3578_v44 = vmul.f32 0.2, %v3322_v23  ;;  %v8016_v21 = vld [vmem:[#allocation16_spill] sm:$0xff]  ;;  %v8017_v49 = vld [vmem:[#allocation17_spill] sm:$0xff] }
 0x40d   : > { %v3579_v33 = vmul.f32 0.2, %v3323_v24  ;;  %v3705_v16 = vsel %vm3449_vm7, %v3321_v1, %v3577_v12  ;;  %v3324_v20 = vmul.f32 %v7095_v43, %v8010_v50  ;;  %v3325_v14 = vmul.f32 %v7097_v9, %v8011_v17  ;;  %v8020_v50 = vld [vmem:[#allocation20_spill] sm:$0xff] }
 0x40e   : > { %4204 = vst [vmem:[%s7564_s2 + $0x50] sm:$0xff] %v4708_v46  ;;  %v3326_v32 = vmul.f32 %v7095_v43, %v8012_v60  ;;  %v4709_v59 = vpack.c.bf16 %v3705_v16, %v3704_v10  ;;  %v3706_v28 = vsel %vm3450_vm8, %v3322_v23, %v3578_v44  ;;  %v3327_v26 = vmul.f32 %v7097_v9, %v8013_v25  ;;  %v8018_v46 = vld [vmem:[#allocation18_spill] sm:$0xff] }
 0x40f   : > { %v3707_v61 = vsel %vm3451_vm9, %v3323_v24, %v3579_v33  ;;  %vm3452_vm10 = vcmp.gt.f32.partialorder %v3324_v20, 0.0  ;;  %vm3453_vm11 = vcmp.gt.f32.partialorder %v3325_v14, 0.0  ;;  %v3580_v11 = vmul.f32 0.2, %v3324_v20  ;;  %v8019_v33 = vld [vmem:[#allocation19_spill] sm:$0xff] }
 0x410   : > { %v4710_v4 = vpack.c.bf16 %v3707_v61, %v3706_v28  ;;  %4205 = vst [vmem:[%s7564_s2 + $0x58] sm:$0xff] %v4709_v59  ;;  %v3581_v13 = vmul.f32 0.2, %v3325_v14  ;;  %vm3454_vm12 = vcmp.gt.f32.partialorder %v3326_v32, 0.0  ;;  %vm3455_vm13 = vcmp.gt.f32.partialorder %v3327_v26, 0.0  ;;  %v8021_v61 = vld [vmem:[#allocation21_spill] sm:$0xff] }
 0x411   : > { %v3582_v27 = vmul.f32 0.2, %v3326_v32  ;;  %v3708_v19 = vsel %vm3452_vm10, %v3324_v20, %v3580_v11  ;;  %v3583_v38 = vmul.f32 0.2, %v3327_v26  ;;  %v3328_v39 = vmul.f32 %v7095_v43, %v8014_v31  ;;  %v8024_v31 = vld [vmem:[#allocation24_spill] sm:$0xff] }
 0x412   : > { %4206 = vst [vmem:[%s7564_s2 + $0x60] sm:$0xff] %v4710_v4  ;;  %v3329_v36 = vmul.f32 %v7097_v9, %v8015_v34  ;;  %v3709_v3 = vsel %vm3453_vm11, %v3325_v14, %v3581_v13  ;;  %v3330_v6 = vmul.f32 %v7095_v43, %v8016_v21  ;;  %v3331_v22 = vmul.f32 %v7097_v9, %v8017_v49  ;;  %v8022_v4 = vld [vmem:[#allocation22_spill] sm:$0xff]  ;;  %v8025_v49 = vld [vmem:[#allocation25_spill] sm:$0xff] }
 0x413   : > { %v3710_v55 = vsel %vm3454_vm12, %v3326_v32, %v3582_v27  ;;  %v4711_v1 = vpack.c.bf16 %v3709_v3, %v3708_v19  ;;  %v3711_v18 = vsel %vm3455_vm13, %v3327_v26, %v3583_v38  ;;  %vm3456_vm14 = vcmp.gt.f32.partialorder %v3328_v39, 0.0  ;;  %v8023_v19 = vld [vmem:[#allocation23_spill] sm:$0xff] }
 0x414   : > { %vm3457_vm15 = vcmp.gt.f32.partialorder %v3329_v36, 0.0  ;;  %v4712_v23 = vpack.c.bf16 %v3711_v18, %v3710_v55  ;;  %v3584_v15 = vmul.f32 0.2, %v3328_v39  ;;  %v3585_v42 = vmul.f32 0.2, %v3329_v36 }
 0x415   : > { %vm3458_vm0 = vcmp.gt.f32.partialorder %v3330_v6, 0.0  ;;  %4207 = vst [vmem:[%s7564_s2 + $0x68] sm:$0xff] %v4711_v1  ;;  %vm3459_vm1 = vcmp.gt.f32.partialorder %v3331_v22, 0.0  ;;  %v3586_v40 = vmul.f32 0.2, %v3330_v6  ;;  %v3332_v12 = vmul.f32 %v7095_v43, %v8018_v46 }
 0x416   : > { %v3587_v24 = vmul.f32 0.2, %v3331_v22  ;;  %4208 = vst [vmem:[%s7564_s2 + $0x70] sm:$0xff] %v4712_v23  ;;  %v3712_v10 = vsel %vm3456_vm14, %v3328_v39, %v3584_v15  ;;  %v3713_v44 = vsel %vm3457_vm15, %v3329_v36, %v3585_v42  ;;  %v3333_v16 = vmul.f32 %v7097_v9, %v8019_v33  ;;  %v8026_v42 = vld [vmem:[#allocation26_spill] sm:$0xff] }
 0x417   : > { %v3334_v20 = vmul.f32 %v7095_v43, %v8020_v50  ;;  %v4713_v17 = vpack.c.bf16 %v3713_v44, %v3712_v10  ;;  %v3714_v14 = vsel %vm3458_vm0, %v3330_v6, %v3586_v40  ;;  %vm3460_vm2 = vcmp.gt.f32.partialorder %v3332_v12, 0.0  ;;  %v8027_v10 = vld [vmem:[#allocation27_spill] sm:$0xff] }
 0x418   : > { %v3715_v60 = vsel %vm3459_vm1, %v3331_v22, %v3587_v24  ;;  %vm3461_vm3 = vcmp.gt.f32.partialorder %v3333_v16, 0.0  ;;  %v3588_v59 = vmul.f32 0.2, %v3332_v12  ;;  %v3589_v28 = vmul.f32 0.2, %v3333_v16 }
 0x419   : > { %v4714_v32 = vpack.c.bf16 %v3715_v60, %v3714_v14  ;;  %4209 = vst [vmem:[%s7564_s2 + $0x78] sm:$0xff] %v4713_v17  ;;  %v3335_v25 = vmul.f32 %v7097_v9, %v8021_v61  ;;  %vm3462_vm4 = vcmp.gt.f32.partialorder %v3334_v20, 0.0  ;;  %v3590_v26 = vmul.f32 0.2, %v3334_v20  ;;  %v8029_v17 = vld [vmem:[#allocation29_spill] sm:$0xff]  ;;  %v8030_v60 = vld [vmem:[#allocation30_spill] sm:$0xff] }
 0x41a   : > { %v3336_v11 = vmul.f32 %v7095_v43, %v8022_v4  ;;  %v3716_v13 = vsel %vm3460_vm2, %v3332_v12, %v3588_v59  ;;  %v3717_v27 = vsel %vm3461_vm3, %v3333_v16, %v3589_v28  ;;  %v3337_v38 = vmul.f32 %v7097_v9, %v8023_v19  ;;  %v8028_v16 = vld [vmem:[#allocation28_spill] sm:$0xff]  ;;  %v8031_v59 = vld [vmem:[#allocation31_spill] sm:$0xff] }
 0x41b   : > { %4210 = vst [vmem:[%s7564_s2 + $0x80] sm:$0xff] %v4714_v32  ;;  %v3338_v39 = vmul.f32 %v7095_v43, %v8024_v31  ;;  %v4715_v34 = vpack.c.bf16 %v3717_v27, %v3716_v13  ;;  %vm3463_vm5 = vcmp.gt.f32.partialorder %v3335_v25, 0.0  ;;  %v3591_v36 = vmul.f32 0.2, %v3335_v25 }
 0x41c   : > { %v3718_v3 = vsel %vm3462_vm4, %v3334_v20, %v3590_v26  ;;  %vm3464_vm6 = vcmp.gt.f32.partialorder %v3336_v11, 0.0  ;;  %vm3465_vm7 = vcmp.gt.f32.partialorder %v3337_v38, 0.0  ;;  %v3592_v55 = vmul.f32 0.2, %v3336_v11 }
 0x41d   : > { %v3593_v21 = vmul.f32 0.2, %v3337_v38  ;;  %4211 = vst [vmem:[%s7564_s2 + $0x88] sm:$0xff] %v4715_v34  ;;  %v3719_v6 = vsel %vm3463_vm5, %v3335_v25, %v3591_v36  ;;  %v3339_v22 = vmul.f32 %v7097_v9, %v8025_v49  ;;  %vm3466_vm8 = vcmp.gt.f32.partialorder %v3338_v39, 0.0 }
 0x41e   : > { %v3594_v1 = vmul.f32 0.2, %v3338_v39  ;;  %v4716_v18 = vpack.c.bf16 %v3719_v6, %v3718_v3  ;;  %v3720_v23 = vsel %vm3464_vm6, %v3336_v11, %v3592_v55  ;;  %v3340_v40 = vmul.f32 %v7095_v43, %v8026_v42  ;;  %v8032_v3 = vld [vmem:[#allocation32_spill] sm:$0xff] }
 0x41f   : > { %v3721_v15 = vsel %vm3465_vm7, %v3337_v38, %v3593_v21  ;;  %vm3467_vm9 = vcmp.gt.f32.partialorder %v3339_v22, 0.0  ;;  %v3595_v46 = vmul.f32 0.2, %v3339_v22  ;;  %v3341_v44 = vmul.f32 %v7097_v9, %v8027_v10  ;;  %v8033_v21 = vld [vmem:[#allocation33_spill] sm:$0xff] }
 0x420   : > { %v4717_v24 = vpack.c.bf16 %v3721_v15, %v3720_v23  ;;  %v3722_v12 = vsel %vm3466_vm8, %v3338_v39, %v3594_v1  ;;  %4212 = vst [vmem:[%s7564_s2 + $0x90] sm:$0xff] %v4716_v18  ;;  %vm3468_vm10 = vcmp.gt.f32.partialorder %v3340_v40, 0.0  ;;  %v3596_v33 = vmul.f32 0.2, %v3340_v40  ;;  %v8035_v18 = vld [vmem:[#allocation35_spill] sm:$0xff]  ;;  %v8036_v15 = vld [vmem:[#allocation36_spill] sm:$0xff] }
 0x421   : > { %v3342_v50 = vmul.f32 %v7095_v43, %v8028_v16  ;;  %v3723_v20 = vsel %vm3467_vm9, %v3339_v22, %v3595_v46  ;;  %v3343_v14 = vmul.f32 %v7097_v9, %v8029_v17  ;;  %v3344_v32 = vmul.f32 %v7095_v43, %v8030_v60  ;;  %v8034_v22 = vld [vmem:[#allocation34_spill] sm:$0xff] }
 0x422   : > { %4213 = vst [vmem:[%s7564_s2 + $0x98] sm:$0xff] %v4717_v24  ;;  %v3345_v28 = vmul.f32 %v7097_v9, %v8031_v59  ;;  %v4718_v61 = vpack.c.bf16 %v3723_v20, %v3722_v12  ;;  %vm3469_vm11 = vcmp.gt.f32.partialorder %v3341_v44, 0.0  ;;  %v3597_v25 = vmul.f32 0.2, %v3341_v44 }
 0x423   : > { %v3724_v26 = vsel %vm3468_vm10, %v3340_v40, %v3596_v33  ;;  %vm3470_vm12 = vcmp.gt.f32.partialorder %v3342_v50, 0.0  ;;  %vm3471_vm13 = vcmp.gt.f32.partialorder %v3343_v14, 0.0  ;;  %v3598_v4 = vmul.f32 0.2, %v3342_v50  ;;  %v8037_v33 = vld [vmem:[#allocation37_spill] sm:$0xff] }
 0x424   : > { %v3599_v11 = vmul.f32 0.2, %v3343_v14  ;;  %4214 = vst [vmem:[%s7564_s2 + $0xa0] sm:$0xff] %v4718_v61  ;;  %v3725_v13 = vsel %vm3469_vm11, %v3341_v44, %v3597_v25  ;;  %vm3472_vm14 = vcmp.gt.f32.partialorder %v3344_v32, 0.0  ;;  %vm3473_vm15 = vcmp.gt.f32.partialorder %v3345_v28, 0.0 }
 0x425   : > { %v3600_v27 = vmul.f32 0.2, %v3344_v32  ;;  %v4719_v19 = vpack.c.bf16 %v3725_v13, %v3724_v26  ;;  %v3726_v38 = vsel %vm3470_vm12, %v3342_v50, %v3598_v4  ;;  %v3601_v39 = vmul.f32 0.2, %v3345_v28  ;;  %v8039_v26 = vld [vmem:[#allocation39_spill] sm:$0xff] }
 0x426   : > { %v3727_v31 = vsel %vm3471_vm13, %v3343_v14, %v3599_v11  ;;  %v3346_v55 = vmul.f32 %v7095_v43, %v8032_v3  ;;  %v3347_v6 = vmul.f32 %v7097_v9, %v8033_v21  ;;  %v3348_v1 = vmul.f32 %v7095_v43, %v8034_v22  ;;  %v8038_v14 = vld [vmem:[#allocation38_spill] sm:$0xff]  ;;  %v8043_v22 = vld [vmem:[#allocation43_spill] sm:$0xff] }
 0x427   : > { %v4720_v34 = vpack.c.bf16 %v3727_v31, %v3726_v38  ;;  %v3728_v36 = vsel %vm3472_vm14, %v3344_v32, %v3600_v27  ;;  %4215 = vst [vmem:[%s7564_s2 + $0xa8] sm:$0xff] %v4719_v19  ;;  %v3729_v49 = vsel %vm3473_vm15, %v3345_v28, %v3601_v39  ;;  %v3349_v23 = vmul.f32 %v7097_v9, %v8035_v18  ;;  %v8040_v27 = vld [vmem:[#allocation40_spill] sm:$0xff]  ;;  %v8041_v38 = vld [vmem:[#allocation41_spill] sm:$0xff] }
 0x428   : > { %v3350_v42 = vmul.f32 %v7095_v43, %v8036_v15  ;;  %v4721_v40 = vpack.c.bf16 %v3729_v49, %v3728_v36  ;;  %vm3474_vm0 = vcmp.gt.f32.partialorder %v3346_v55, 0.0  ;;  %vm3475_vm1 = vcmp.gt.f32.partialorder %v3347_v6, 0.0  ;;  %v8042_v36 = vld [vmem:[#allocation42_spill] sm:$0xff] }
 0x429   : > { %4216 = vst [vmem:[%s7564_s2 + $0xb0] sm:$0xff] %v4720_v34  ;;  %v3602_v24 = vmul.f32 0.2, %v3346_v55  ;;  %v3603_v46 = vmul.f32 0.2, %v3347_v6  ;;  %vm3476_vm2 = vcmp.gt.f32.partialorder %v3348_v1, 0.0  ;;  %v3351_v16 = vmul.f32 %v7097_v9, %v8037_v33 }
 0x42a   : > { %vm3477_vm3 = vcmp.gt.f32.partialorder %v3349_v23, 0.0  ;;  %v3604_v12 = vmul.f32 0.2, %v3348_v1  ;;  %4217 = vst [vmem:[%s7564_s2 + $0xb8] sm:$0xff] %v4721_v40  ;;  %v3605_v44 = vmul.f32 0.2, %v3349_v23  ;;  %v3352_v60 = vmul.f32 %v7095_v43, %v8038_v14 }
 0x42b   : > { %v3730_v10 = vsel %vm3474_vm0, %v3346_v55, %v3602_v24  ;;  %vm3478_vm4 = vcmp.gt.f32.partialorder %v3350_v42, 0.0  ;;  %v3731_v50 = vsel %vm3475_vm1, %v3347_v6, %v3603_v46  ;;  %v3606_v17 = vmul.f32 0.2, %v3350_v42 }
 0x42c   : > { %v3732_v20 = vsel %vm3476_vm2, %v3348_v1, %v3604_v12  ;;  %v4722_v32 = vpack.c.bf16 %v3731_v50, %v3730_v10  ;;  %v3733_v59 = vsel %vm3477_vm3, %v3349_v23, %v3605_v44  ;;  %vm3479_vm5 = vcmp.gt.f32.partialorder %v3351_v16, 0.0  ;;  %v8045_v12 = vld [vmem:[#allocation45_spill] sm:$0xff] }
 0x42d   : > { %v3607_v28 = vmul.f32 0.2, %v3351_v16  ;;  %v4723_v61 = vpack.c.bf16 %v3733_v59, %v3732_v20  ;;  %v3734_v25 = vsel %vm3478_vm4, %v3350_v42, %v3606_v17  ;;  %v3353_v4 = vmul.f32 %v7097_v9, %v8039_v26  ;;  %v8044_v42 = vld [vmem:[#allocation44_spill] sm:$0xff]  ;;  %v8046_v17 = vld [vmem:[#allocation46_spill] sm:$0xff]  ;;  %v8047_v59 = vld [vmem:[#allocation47_spill] sm:$0xff] }
 0x42e   : > { %vm3480_vm6 = vcmp.gt.f32.partialorder %v3352_v60, 0.0  ;;  %4218 = vst [vmem:[%s7564_s2 + $0xc0] sm:$0xff] %v4722_v32  ;;  %v3608_v13 = vmul.f32 0.2, %v3352_v60  ;;  %v3354_v19 = vmul.f32 %v7095_v43, %v8040_v27  ;;  %v3355_v31 = vmul.f32 %v7097_v9, %v8041_v38 }
 0x42f   : > { %v3735_v11 = vsel %vm3479_vm5, %v3351_v16, %v3607_v28  ;;  %4219 = vst [vmem:[%s7564_s2 + $0xc8] sm:$0xff] %v4723_v61  ;;  %vm3481_vm7 = vcmp.gt.f32.partialorder %v3353_v4, 0.0  ;;  %v3609_v34 = vmul.f32 0.2, %v3353_v4  ;;  %v3356_v3 = vmul.f32 %v7095_v43, %v8042_v36  ;;  %v8048_v61 = vld [vmem:[#allocation48_spill] sm:$0xff]  ;;  %v8050_v36 = vld [vmem:[#allocation50_spill] sm:$0xff] }
 0x430   : > { %v4724_v39 = vpack.c.bf16 %v3735_v11, %v3734_v25  ;;  %v3736_v55 = vsel %vm3480_vm6, %v3352_v60, %v3608_v13  ;;  %vm3482_vm8 = vcmp.gt.f32.partialorder %v3354_v19, 0.0  ;;  %vm3483_vm9 = vcmp.gt.f32.partialorder %v3355_v31, 0.0  ;;  %v8049_v11 = vld [vmem:[#allocation49_spill] sm:$0xff] }
 0x431   : > { %v3610_v21 = vmul.f32 0.2, %v3354_v19  ;;  %v3737_v6 = vsel %vm3481_vm7, %v3353_v4, %v3609_v34  ;;  %v3611_v49 = vmul.f32 0.2, %v3355_v31  ;;  %v3357_v1 = vmul.f32 %v7097_v9, %v8043_v22 }
 0x432   : > { %4220 = vst [vmem:[%s7564_s2 + $0xd0] sm:$0xff] %v4724_v39  ;;  %vm3484_vm10 = vcmp.gt.f32.partialorder %v3356_v3, 0.0  ;;  %v4725_v18 = vpack.c.bf16 %v3737_v6, %v3736_v55  ;;  %v3612_v15 = vmul.f32 0.2, %v3356_v3  ;;  %v3358_v40 = vmul.f32 %v7095_v43, %v8044_v42  ;;  %v8051_v55 = vld [vmem:[#allocation51_spill] sm:$0xff]  ;;  %v8052_v6 = vld [vmem:[#allocation52_spill] sm:$0xff] }
 0x433   : > { %v3738_v23 = vsel %vm3482_vm8, %v3354_v19, %v3610_v21  ;;  %v3739_v24 = vsel %vm3483_vm9, %v3355_v31, %v3611_v49  ;;  %vm3485_vm11 = vcmp.gt.f32.partialorder %v3357_v1, 0.0  ;;  %v3613_v46 = vmul.f32 0.2, %v3357_v1 }
 0x434   : > { %v3359_v10 = vmul.f32 %v7097_v9, %v8045_v12  ;;  %4221 = vst [vmem:[%s7564_s2 + $0xd8] sm:$0xff] %v4725_v18  ;;  %v4726_v44 = vpack.c.bf16 %v3739_v24, %v3738_v23  ;;  %v3740_v33 = vsel %vm3484_vm10, %v3356_v3, %v3612_v15  ;;  %vm3486_vm12 = vcmp.gt.f32.partialorder %v3358_v40, 0.0  ;;  %v8053_v23 = vld [vmem:[#allocation53_spill] sm:$0xff] }
 0x435   : > { %v3614_v16 = vmul.f32 0.2, %v3358_v40  ;;  %v3741_v50 = vsel %vm3485_vm11, %v3357_v1, %v3613_v46  ;;  %v3360_v14 = vmul.f32 %v7095_v43, %v8046_v17  ;;  %v3361_v28 = vmul.f32 %v7097_v9, %v8047_v59 }
 0x436   : > { %vm3487_vm13 = vcmp.gt.f32.partialorder %v3359_v10, 0.0  ;;  %v3615_v20 = vmul.f32 0.2, %v3359_v10  ;;  %4222 = vst [vmem:[%s7564_s2 + $0xe0] sm:$0xff] %v4726_v44  ;;  %v4727_v60 = vpack.c.bf16 %v3741_v50, %v3740_v33  ;;  %v3362_v25 = vmul.f32 %v7095_v43, %v8048_v61  ;;  %v8054_v44 = vld [vmem:[#allocation54_spill] sm:$0xff] }
 0x437   : > { %v3742_v32 = vsel %vm3486_vm12, %v3358_v40, %v3614_v16  ;;  %vm3488_vm14 = vcmp.gt.f32.partialorder %v3360_v14, 0.0  ;;  %v3616_v4 = vmul.f32 0.2, %v3360_v14  ;;  %v3363_v13 = vmul.f32 %v7097_v9, %v8049_v11  ;;  %v8055_v16 = vld [vmem:[#allocation55_spill] sm:$0xff] }
 0x438   : > { %v3743_v26 = vsel %vm3487_vm13, %v3359_v10, %v3615_v20  ;;  %4223 = vst [vmem:[%s7564_s2 + $0xe8] sm:$0xff] %v4727_v60  ;;  %vm3489_vm15 = vcmp.gt.f32.partialorder %v3361_v28, 0.0  ;;  %v3617_v19 = vmul.f32 0.2, %v3361_v28  ;;  %vm3490_vm0 = vcmp.gt.f32.partialorder %v3362_v25, 0.0 }
 0x439   : > { %v4728_v27 = vpack.c.bf16 %v3743_v26, %v3742_v32  ;;  %v3744_v38 = vsel %vm3488_vm14, %v3360_v14, %v3616_v4  ;;  %vm3491_vm1 = vcmp.gt.f32.partialorder %v3363_v13, 0.0  ;;  %v3618_v31 = vmul.f32 0.2, %v3362_v25  ;;  %v8056_v14 = vld [vmem:[#allocation56_spill] sm:$0xff]  ;;  %v8057_v32 = vld [vmem:[#allocation57_spill] sm:$0xff] }
 0x43a   : > { %v3619_v39 = vmul.f32 0.2, %v3363_v13  ;;  %v3745_v34 = vsel %vm3489_vm15, %v3361_v28, %v3617_v19  ;;  %v3364_v3 = vmul.f32 %v7095_v43, %v8050_v36  ;;  %v3365_v21 = vmul.f32 %v7097_v9, %v8051_v55  ;;  %v8060_v36 = vld [vmem:[#allocation60_spill] sm:$0xff] }
 0x43b   : > { %4224 = vst [vmem:[%s7564_s2 + $0xf0] sm:$0xff] %v4728_v27  ;;  %v3366_v49 = vmul.f32 %v7095_v43, %v8052_v6  ;;  %v4729_v22 = vpack.c.bf16 %v3745_v34, %v3744_v38  ;;  %v3746_v1 = vsel %vm3490_vm0, %v3362_v25, %v3618_v31  ;;  %v3367_v15 = vmul.f32 %v7097_v9, %v8053_v23  ;;  %v8058_v27 = vld [vmem:[#allocation58_spill] sm:$0xff] }
 0x43c   : > { %v3747_v18 = vsel %vm3491_vm1, %v3363_v13, %v3619_v39  ;;  %vm3492_vm2 = vcmp.gt.f32.partialorder %v3364_v3, 0.0  ;;  %vm3493_vm3 = vcmp.gt.f32.partialorder %v3365_v21, 0.0  ;;  %v3620_v40 = vmul.f32 0.2, %v3364_v3  ;;  %v8059_v39 = vld [vmem:[#allocation59_spill] sm:$0xff] }
 0x43d   : > { %v4730_v42 = vpack.c.bf16 %v3747_v18, %v3746_v1  ;;  %4225 = vst [vmem:[%s7564_s2 + $0xf8] sm:$0xff] %v4729_v22  ;;  %v3621_v24 = vmul.f32 0.2, %v3365_v21  ;;  %vm3494_vm4 = vcmp.gt.f32.partialorder %v3366_v49, 0.0  ;;  %vm3495_vm5 = vcmp.gt.f32.partialorder %v3367_v15, 0.0  ;;  %v8061_v18 = vld [vmem:[#allocation61_spill] sm:$0xff] }
 0x43e   : > { %v3622_v46 = vmul.f32 0.2, %v3366_v49  ;;  %v3748_v12 = vsel %vm3492_vm2, %v3364_v3, %v3620_v40  ;;  %v3623_v10 = vmul.f32 0.2, %v3367_v15  ;;  %v3368_v33 = vmul.f32 %v7095_v43, %v8054_v44  ;;  %v8064_v44 = vld [vmem:[#allocation64_spill] sm:$0xff] }
 0x43f   : > { %4226 = vst [vmem:[%s7564_s2 + $0x100] sm:$0xff] %v4730_v42  ;;  %v3369_v50 = vmul.f32 %v7097_v9, %v8055_v16  ;;  %v3749_v20 = vsel %vm3493_vm3, %v3365_v21, %v3621_v24  ;;  %v3370_v60 = vmul.f32 %v7095_v43, %v8056_v14  ;;  %v3371_v59 = vmul.f32 %v7097_v9, %v8057_v32  ;;  %v8062_v42 = vld [vmem:[#allocation62_spill] sm:$0xff]  ;;  %v8065_v32 = vld [vmem:[#allocation65_spill] sm:$0xff] }
 0x440   : > { %v3750_v17 = vsel %vm3494_vm4, %v3366_v49, %v3622_v46  ;;  %v4731_v28 = vpack.c.bf16 %v3749_v20, %v3748_v12  ;;  %v3751_v61 = vsel %vm3495_vm5, %v3367_v15, %v3623_v10  ;;  %vm3496_vm6 = vcmp.gt.f32.partialorder %v3368_v33, 0.0  ;;  %v8063_v12 = vld [vmem:[#allocation63_spill] sm:$0xff] }
 0x441   : > { %vm3497_vm7 = vcmp.gt.f32.partialorder %v3369_v50, 0.0  ;;  %v4732_v25 = vpack.c.bf16 %v3751_v61, %v3750_v17  ;;  %v3624_v26 = vmul.f32 0.2, %v3368_v33  ;;  %v3625_v4 = vmul.f32 0.2, %v3369_v50 }
 0x442   : > { %vm3498_vm8 = vcmp.gt.f32.partialorder %v3370_v60, 0.0  ;;  %4227 = vst [vmem:[%s7564_s2 + $0x108] sm:$0xff] %v4731_v28  ;;  %vm3499_vm9 = vcmp.gt.f32.partialorder %v3371_v59, 0.0  ;;  %v3626_v11 = vmul.f32 0.2, %v3370_v60  ;;  %v3372_v19 = vmul.f32 %v7095_v43, %v8058_v27 }
 0x443   : > { %v3627_v13 = vmul.f32 0.2, %v3371_v59  ;;  %4228 = vst [vmem:[%s7564_s2 + $0x110] sm:$0xff] %v4732_v25  ;;  %v3752_v38 = vsel %vm3496_vm6, %v3368_v33, %v3624_v26  ;;  %v3753_v31 = vsel %vm3497_vm7, %v3369_v50, %v3625_v4  ;;  %v3373_v34 = vmul.f32 %v7097_v9, %v8059_v39  ;;  %v8066_v4 = vld [vmem:[#allocation66_spill] sm:$0xff] }
 0x444   : > { %v3374_v3 = vmul.f32 %v7095_v43, %v8060_v36  ;;  %v4733_v55 = vpack.c.bf16 %v3753_v31, %v3752_v38  ;;  %v3754_v21 = vsel %vm3498_vm8, %v3370_v60, %v3626_v11  ;;  %vm3500_vm10 = vcmp.gt.f32.partialorder %v3372_v19, 0.0  ;;  %v8067_v38 = vld [vmem:[#allocation67_spill] sm:$0xff] }
 0x445   : > { %v3755_v6 = vsel %vm3499_vm9, %v3371_v59, %v3627_v13  ;;  %vm3501_vm11 = vcmp.gt.f32.partialorder %v3373_v34, 0.0  ;;  %v3628_v22 = vmul.f32 0.2, %v3372_v19  ;;  %v3629_v1 = vmul.f32 0.2, %v3373_v34 }
 0x446   : > { %v4734_v49 = vpack.c.bf16 %v3755_v6, %v3754_v21  ;;  %4229 = vst [vmem:[%s7564_s2 + $0x118] sm:$0xff] %v4733_v55  ;;  %v3375_v23 = vmul.f32 %v7097_v9, %v8061_v18  ;;  %vm3502_vm12 = vcmp.gt.f32.partialorder %v3374_v3, 0.0  ;;  %v3630_v15 = vmul.f32 0.2, %v3374_v3  ;;  %v8069_v55 = vld [vmem:[#allocation69_spill] sm:$0xff]  ;;  %v8070_v6 = vld [vmem:[#allocation70_spill] sm:$0xff] }
 0x447   : > { %v3376_v40 = vmul.f32 %v7095_v43, %v8062_v42  ;;  %v3756_v24 = vsel %vm3500_vm10, %v3372_v19, %v3628_v22  ;;  %v3757_v46 = vsel %vm3501_vm11, %v3373_v34, %v3629_v1  ;;  %v3377_v10 = vmul.f32 %v7097_v9, %v8063_v12  ;;  %v8068_v34 = vld [vmem:[#allocation68_spill] sm:$0xff]  ;;  %v8071_v22 = vld [vmem:[#allocation71_spill] sm:$0xff] }
 0x448   : > { %4230 = vst [vmem:[%s7564_s2 + $0x120] sm:$0xff] %v4734_v49  ;;  %v3378_v33 = vmul.f32 %v7095_v43, %v8064_v44  ;;  %v4735_v16 = vpack.c.bf16 %v3757_v46, %v3756_v24  ;;  %vm3503_vm13 = vcmp.gt.f32.partialorder %v3375_v23, 0.0  ;;  %v3631_v50 = vmul.f32 0.2, %v3375_v23 }
 0x449   : > { %v3758_v20 = vsel %vm3502_vm12, %v3374_v3, %v3630_v15  ;;  %vm3504_vm14 = vcmp.gt.f32.partialorder %v3376_v40, 0.0  ;;  %vm3505_vm15 = vcmp.gt.f32.partialorder %v3377_v10, 0.0  ;;  %v3632_v17 = vmul.f32 0.2, %v3376_v40 }
 0x44a   : > { %v3633_v14 = vmul.f32 0.2, %v3377_v10  ;;  %4231 = vst [vmem:[%s7564_s2 + $0x128] sm:$0xff] %v4735_v16  ;;  %v3759_v60 = vsel %vm3503_vm13, %v3375_v23, %v3631_v50  ;;  %v3379_v59 = vmul.f32 %v7097_v9, %v8065_v32  ;;  %vm3506_vm0 = vcmp.gt.f32.partialorder %v3378_v33, 0.0 }
 0x44b   : > { %v3634_v28 = vmul.f32 0.2, %v3378_v33  ;;  %v4736_v61 = vpack.c.bf16 %v3759_v60, %v3758_v20  ;;  %v3760_v25 = vsel %vm3504_vm14, %v3376_v40, %v3632_v17  ;;  %v3380_v11 = vmul.f32 %v7095_v43, %v8066_v4  ;;  %v8072_v20 = vld [vmem:[#allocation72_spill] sm:$0xff] }
 0x44c   : > { %v3761_v26 = vsel %vm3505_vm15, %v3377_v10, %v3633_v14  ;;  %vm3507_vm1 = vcmp.gt.f32.partialorder %v3379_v59, 0.0  ;;  %v3635_v27 = vmul.f32 0.2, %v3379_v59  ;;  %v3381_v31 = vmul.f32 %v7097_v9, %v8067_v38  ;;  %v8073_v14 = vld [vmem:[#allocation73_spill] sm:$0xff] }
 0x44d   : > { %v4737_v13 = vpack.c.bf16 %v3761_v26, %v3760_v25  ;;  %v3762_v19 = vsel %vm3506_vm0, %v3378_v33, %v3634_v28  ;;  %4232 = vst [vmem:[%s7564_s2 + $0x130] sm:$0xff] %v4736_v61  ;;  %vm3508_vm2 = vcmp.gt.f32.partialorder %v3380_v11, 0.0  ;;  %v3636_v39 = vmul.f32 0.2, %v3380_v11  ;;  %v8075_v61 = vld [vmem:[#allocation75_spill] sm:$0xff]  ;;  %v8076_v26 = vld [vmem:[#allocation76_spill] sm:$0xff] }
 0x44e   : > { %v3382_v36 = vmul.f32 %v7095_v43, %v8068_v34  ;;  %v3763_v3 = vsel %vm3507_vm1, %v3379_v59, %v3635_v27  ;;  %v3383_v21 = vmul.f32 %v7097_v9, %v8069_v55  ;;  %v3384_v49 = vmul.f32 %v7095_v43, %v8070_v6  ;;  %v8074_v59 = vld [vmem:[#allocation74_spill] sm:$0xff] }
 0x44f   : > { %4233 = vst [vmem:[%s7564_s2 + $0x138] sm:$0xff] %v4737_v13  ;;  %v3385_v1 = vmul.f32 %v7097_v9, %v8071_v22  ;;  %v4738_v18 = vpack.c.bf16 %v3763_v3, %v3762_v19  ;;  %vm3509_vm3 = vcmp.gt.f32.partialorder %v3381_v31, 0.0  ;;  %v3637_v23 = vmul.f32 0.2, %v3381_v31 }
 0x450   : > { %v3764_v15 = vsel %vm3508_vm2, %v3380_v11, %v3636_v39  ;;  %vm3510_vm4 = vcmp.gt.f32.partialorder %v3382_v36, 0.0  ;;  %vm3511_vm5 = vcmp.gt.f32.partialorder %v3383_v21, 0.0  ;;  %v3638_v42 = vmul.f32 0.2, %v3382_v36  ;;  %v8077_v39 = vld [vmem:[#allocation77_spill] sm:$0xff] }
 0x451   : > { %v3639_v40 = vmul.f32 0.2, %v3383_v21  ;;  %4234 = vst [vmem:[%s7564_s2 + $0x140] sm:$0xff] %v4738_v18  ;;  %v3765_v24 = vsel %vm3509_vm3, %v3381_v31, %v3637_v23  ;;  %vm3512_vm6 = vcmp.gt.f32.partialorder %v3384_v49, 0.0  ;;  %vm3513_vm7 = vcmp.gt.f32.partialorder %v3385_v1, 0.0 }
 0x452   : > { %v3640_v46 = vmul.f32 0.2, %v3384_v49  ;;  %v4739_v12 = vpack.c.bf16 %v3765_v24, %v3764_v15  ;;  %v3766_v10 = vsel %vm3510_vm4, %v3382_v36, %v3638_v42  ;;  %v3641_v33 = vmul.f32 0.2, %v3385_v1  ;;  %v8079_v15 = vld [vmem:[#allocation79_spill] sm:$0xff] }
 0x453   : > { %v3767_v44 = vsel %vm3511_vm5, %v3383_v21, %v3639_v40  ;;  %v3386_v17 = vmul.f32 %v7095_v43, %v8072_v20  ;;  %v3387_v60 = vmul.f32 %v7097_v9, %v8073_v14  ;;  %v3388_v28 = vmul.f32 %v7095_v43, %v8074_v59  ;;  %v8078_v21 = vld [vmem:[#allocation78_spill] sm:$0xff] }
 0x454   : > { %v4740_v16 = vpack.c.bf16 %v3767_v44, %v3766_v10  ;;  %v3768_v50 = vsel %vm3512_vm6, %v3384_v49, %v3640_v46  ;;  %4235 = vst [vmem:[%s7564_s2 + $0x148] sm:$0xff] %v4739_v12  ;;  %v3769_v32 = vsel %vm3513_vm7, %v3385_v1, %v3641_v33  ;;  %v3389_v25 = vmul.f32 %v7097_v9, %v8075_v61 }
 0x455   : > { %v3390_v4 = vmul.f32 %v7095_v43, %v8076_v26  ;;  %v4741_v11 = vpack.c.bf16 %v3769_v32, %v3768_v50  ;;  %vm3514_vm8 = vcmp.gt.f32.partialorder %v3386_v17, 0.0  ;;  %vm3515_vm9 = vcmp.gt.f32.partialorder %v3387_v60, 0.0 }
 0x456   : > { %4236 = vst [vmem:[%s7564_s2 + $0x150] sm:$0xff] %v4740_v16  ;;  %v3642_v13 = vmul.f32 0.2, %v3386_v17  ;;  %v3643_v27 = vmul.f32 0.2, %v3387_v60  ;;  %vm3516_vm10 = vcmp.gt.f32.partialorder %v3388_v28, 0.0  ;;  %v3391_v34 = vmul.f32 %v7097_v9, %v8077_v39 }
 0x457   : > { %vm3517_vm11 = vcmp.gt.f32.partialorder %v3389_v25, 0.0  ;;  %v3644_v19 = vmul.f32 0.2, %v3388_v28  ;;  %4237 = vst [vmem:[%s7564_s2 + $0x158] sm:$0xff] %v4741_v11  ;;  %v3645_v31 = vmul.f32 0.2, %v3389_v25  ;;  %v3392_v6 = vmul.f32 %v7095_v43, %v8078_v21 }
 0x458   : > { %v3770_v38 = vsel %vm3514_vm8, %v3386_v17, %v3642_v13  ;;  %vm3518_vm12 = vcmp.gt.f32.partialorder %v3390_v4, 0.0  ;;  %v3771_v36 = vsel %vm3515_vm9, %v3387_v60, %v3643_v27  ;;  %v3646_v55 = vmul.f32 0.2, %v3390_v4 }
 0x459   : > { %v3772_v3 = vsel %vm3516_vm10, %v3388_v28, %v3644_v19  ;;  %v4742_v49 = vpack.c.bf16 %v3771_v36, %v3770_v38  ;;  %v3773_v22 = vsel %vm3517_vm11, %v3389_v25, %v3645_v31  ;;  %vm3519_vm13 = vcmp.gt.f32.partialorder %v3391_v34, 0.0 }
 0x45a   : > { %v3647_v1 = vmul.f32 0.2, %v3391_v34  ;;  %v4743_v18 = vpack.c.bf16 %v3773_v22, %v3772_v3  ;;  %v3774_v23 = vsel %vm3518_vm12, %v3390_v4, %v3646_v55  ;;  %v3393_v42 = vmul.f32 %v7097_v9, %v8079_v15 }
 0x45b   : > { %vm3520_vm14 = vcmp.gt.f32.partialorder %v3392_v6, 0.0  ;;  %4238 = vst [vmem:[%s7564_s2 + $0x160] sm:$0xff] %v4742_v49  ;;  %v3648_v24 = vmul.f32 0.2, %v3392_v6  ;;  %v3394_v46 = vmul.f32 %v7095_v43, %v6997_v35  ;;  %v3395_v12 = vmul.f32 %v7097_v9, %v7001_v45 }
 0x45c   : > { %v3775_v40 = vsel %vm3519_vm13, %v3391_v34, %v3647_v1  ;;  %4239 = vst [vmem:[%s7564_s2 + $0x168] sm:$0xff] %v4743_v18  ;;  %vm3521_vm15 = vcmp.gt.f32.partialorder %v3393_v42, 0.0  ;;  %v3649_v44 = vmul.f32 0.2, %v3393_v42  ;;  %v3396_v33 = vmul.f32 %v7095_v43, %v7009_v48 }
 0x45d   : > { %v4744_v10 = vpack.c.bf16 %v3775_v40, %v3774_v23  ;;  %v3776_v16 = vsel %vm3520_vm14, %v3392_v6, %v3648_v24  ;;  %vm3522_vm0 = vcmp.gt.f32.partialorder %v3394_v46, 0.0  ;;  %vm3523_vm1 = vcmp.gt.f32.partialorder %v3395_v12, 0.0 }
 0x45e   : > { %v3650_v50 = vmul.f32 0.2, %v3394_v46  ;;  %v3777_v35 = vsel %vm3521_vm15, %v3393_v42, %v3649_v44  ;;  %v3651_v45 = vmul.f32 0.2, %v3395_v12  ;;  %v3397_v20 = vmul.f32 %v7097_v9, %v7013_v47 }
 0x45f   : > { %4240 = vst [vmem:[%s7564_s2 + $0x170] sm:$0xff] %v4744_v10  ;;  %vm3524_vm2 = vcmp.gt.f32.partialorder %v3396_v33, 0.0  ;;  %v4745_v17 = vpack.c.bf16 %v3777_v35, %v3776_v16  ;;  %v3652_v60 = vmul.f32 0.2, %v3396_v33  ;;  %v3398_v48 = vmul.f32 %v7095_v43, %v7021_v54 }
 0x460   : > { %v3778_v14 = vsel %vm3522_vm0, %v3394_v46, %v3650_v50  ;;  %v3779_v32 = vsel %vm3523_vm1, %v3395_v12, %v3651_v45  ;;  %vm3525_vm3 = vcmp.gt.f32.partialorder %v3397_v20, 0.0  ;;  %v3653_v59 = vmul.f32 0.2, %v3397_v20 }
 0x461   : > { %v3399_v28 = vmul.f32 %v7097_v9, %v7025_v52  ;;  %4241 = vst [vmem:[%s7564_s2 + $0x178] sm:$0xff] %v4745_v17  ;;  %v4746_v61 = vpack.c.bf16 %v3779_v32, %v3778_v14  ;;  %v3780_v25 = vsel %vm3524_vm2, %v3396_v33, %v3652_v60  ;;  %vm3526_vm4 = vcmp.gt.f32.partialorder %v3398_v48, 0.0 }
 0x462   : > { %v3654_v47 = vmul.f32 0.2, %v3398_v48  ;;  %v3781_v26 = vsel %vm3525_vm3, %v3397_v20, %v3653_v59  ;;  %v3400_v54 = vmul.f32 %v7095_v43, %v7033_v37  ;;  %v3401_v13 = vmul.f32 %v7097_v9, %v6349_v5  ;;  %v8080_v59 = vld [vmem:[#allocation87_spill] sm:$0xff] }
 0x463   : > { %vm3527_vm5 = vcmp.gt.f32.partialorder %v3399_v28, 0.0  ;;  %v3655_v4 = vmul.f32 0.2, %v3399_v28  ;;  %4242 = vst [vmem:[%s7564_s2 + $0x180] sm:$0xff] %v4746_v61  ;;  %v4747_v11 = vpack.c.bf16 %v3781_v26, %v3780_v25  ;;  %v3402_v27 = vmul.f32 %v7095_v43, %v6353_v8  ;;  %v8081_v25 = vld [vmem:[#allocation88_spill] sm:$0xff]  ;;  %v8082_v26 = vld [vmem:[#allocation89_spill] sm:$0xff] }
 0x464   : > { %v3782_v52 = vsel %vm3526_vm4, %v3398_v48, %v3654_v47  ;;  %vm3528_vm6 = vcmp.gt.f32.partialorder %v3400_v54, 0.0  ;;  %v3656_v38 = vmul.f32 0.2, %v3400_v54  ;;  %v3403_v31 = vmul.f32 %v7097_v9, %v6357_v0 }
 0x465   : > { %v3783_v19 = vsel %vm3527_vm5, %v3399_v28, %v3655_v4  ;;  %4243 = vst [vmem:[%s7564_s2 + $0x188] sm:$0xff] %v4747_v11  ;;  %vm3529_vm7 = vcmp.gt.f32.partialorder %v3401_v13, 0.0  ;;  %v3657_v39 = vmul.f32 0.2, %v3401_v13  ;;  %vm3530_vm8 = vcmp.gt.f32.partialorder %v3402_v27, 0.0 }
 0x466   : > { %v4748_v37 = vpack.c.bf16 %v3783_v19, %v3782_v52  ;;  %v3784_v34 = vsel %vm3528_vm6, %v3400_v54, %v3656_v38  ;;  %vm3531_vm9 = vcmp.gt.f32.partialorder %v3403_v31, 0.0  ;;  %v3658_v5 = vmul.f32 0.2, %v3402_v27  ;;  %v8083_v19 = vld [vmem:[#allocation90_spill] sm:$0xff] }
 0x467   : > { %v3659_v36 = vmul.f32 0.2, %v3403_v31  ;;  %v3785_v8 = vsel %vm3529_vm7, %v3401_v13, %v3657_v39  ;;  %v3404_v0 = vmul.f32 %v7095_v43, %v6361_v2  ;;  %v3405_v3 = vmul.f32 %v7097_v9, %v6365_v56 }
 0x468   : > { %4244 = vst [vmem:[%s7564_s2 + $0x190] sm:$0xff] %v4748_v37  ;;  %v3406_v55 = vmul.f32 %v7095_v43, %v6368_v53  ;;  %v4749_v21 = vpack.c.bf16 %v3785_v8, %v3784_v34  ;;  %v3786_v6 = vsel %vm3530_vm8, %v3402_v27, %v3658_v5  ;;  %v3407_v22 = vmul.f32 %v7097_v9, %v6371_v57  ;;  %v8084_v5 = vld [vmem:[#allocation91_spill] sm:$0xff] }
 0x469   : > { %v3787_v49 = vsel %vm3531_vm9, %v3403_v31, %v3659_v36  ;;  %vm3532_vm10 = vcmp.gt.f32.partialorder %v3404_v0, 0.0  ;;  %vm3533_vm11 = vcmp.gt.f32.partialorder %v3405_v3, 0.0  ;;  %v3660_v18 = vmul.f32 0.2, %v3404_v0 }
 0x46a   : > { %v4750_v1 = vpack.c.bf16 %v3787_v49, %v3786_v6  ;;  %4245 = vst [vmem:[%s7564_s2 + $0x198] sm:$0xff] %v4749_v21  ;;  %v3661_v2 = vmul.f32 0.2, %v3405_v3  ;;  %vm3534_vm12 = vcmp.gt.f32.partialorder %v3406_v55, 0.0  ;;  %vm3535_vm13 = vcmp.gt.f32.partialorder %v3407_v22, 0.0  ;;  %v8086_v49 = vld [vmem:[#allocation93_spill] sm:$0xff] }
 0x46b   : > { %v3662_v56 = vmul.f32 0.2, %v3406_v55  ;;  %v3788_v53 = vsel %vm3532_vm10, %v3404_v0, %v3660_v18  ;;  %v3663_v23 = vmul.f32 0.2, %v3407_v22  ;;  %v3408_v57 = vmul.f32 %v7095_v43, %v6374_v63  ;;  %v8087_v18 = vld [vmem:[#allocation94_spill] sm:$0xff] }
 0x46c   : > { %4246 = vst [vmem:[%s7564_s2 + $0x1a0] sm:$0xff] %v4750_v1  ;;  %v3409_v15 = vmul.f32 %v7097_v9, %v6377_v58  ;;  %v3789_v42 = vsel %vm3533_vm11, %v3405_v3, %v3661_v2  ;;  %v3410_v24 = vmul.f32 %v7095_v43, %v6380_v29  ;;  %v3411_v46 = vmul.f32 %v7097_v9, %v6383_v30 }
 0x46d   : > { %v3790_v40 = vsel %vm3534_vm12, %v3406_v55, %v3662_v56  ;;  %v4751_v12 = vpack.c.bf16 %v3789_v42, %v3788_v53  ;;  %v3791_v10 = vsel %vm3535_vm13, %v3407_v22, %v3663_v23  ;;  %vm3536_vm14 = vcmp.gt.f32.partialorder %v3408_v57, 0.0  ;;  %v8085_v55 = vld [vmem:[#allocation92_spill] sm:$0xff]  ;;  %v8088_v56 = vld [vmem:[#allocation95_spill] sm:$0xff] }
 0x46e   : > { %vm3537_vm15 = vcmp.gt.f32.partialorder %v3409_v15, 0.0  ;;  %v4752_v44 = vpack.c.bf16 %v3791_v10, %v3790_v40  ;;  %v3664_v33 = vmul.f32 0.2, %v3408_v57  ;;  %v3665_v16 = vmul.f32 0.2, %v3409_v15  ;;  %v8089_v23 = vld [vmem:[#allocation96_spill] sm:$0xff] }
 0x46f   : > { %vm3538_vm0 = vcmp.gt.f32.partialorder %v3410_v24, 0.0  ;;  %4247 = vst [vmem:[%s7564_s2 + $0x1a8] sm:$0xff] %v4751_v12  ;;  %vm3539_vm1 = vcmp.gt.f32.partialorder %v3411_v46, 0.0  ;;  %v3666_v63 = vmul.f32 0.2, %v3410_v24  ;;  %v3412_v29 = vmul.f32 %v7095_v43, %v6386_v41 }
 0x470   : > { %v3667_v58 = vmul.f32 0.2, %v3411_v46  ;;  %4248 = vst [vmem:[%s7564_s2 + $0x1b0] sm:$0xff] %v4752_v44  ;;  %v3792_v30 = vsel %vm3536_vm14, %v3408_v57, %v3664_v33  ;;  %v3793_v50 = vsel %vm3537_vm15, %v3409_v15, %v3665_v16  ;;  %v3413_v35 = vmul.f32 %v7097_v9, %v6389_v51 }
 0x471   : > { %v3414_v45 = vmul.f32 %v7095_v43, %v6392_v62  ;;  %v4753_v20 = vpack.c.bf16 %v3793_v50, %v3792_v30  ;;  %v3794_v17 = vsel %vm3538_vm0, %v3410_v24, %v3666_v63  ;;  %vm3540_vm2 = vcmp.gt.f32.partialorder %v3412_v29, 0.0 }
 0x472   : > { %v3795_v14 = vsel %vm3539_vm1, %v3411_v46, %v3667_v58  ;;  %vm3541_vm3 = vcmp.gt.f32.partialorder %v3413_v35, 0.0  ;;  %v3668_v48 = vmul.f32 0.2, %v3412_v29  ;;  %v3669_v41 = vmul.f32 0.2, %v3413_v35 }
 0x473   : > { %v4754_v60 = vpack.c.bf16 %v3795_v14, %v3794_v17  ;;  %4249 = vst [vmem:[%s7564_s2 + $0x1b8] sm:$0xff] %v4753_v20  ;;  %v3415_v32 = vmul.f32 %v7097_v9, %v6395_v7  ;;  %vm3542_vm4 = vcmp.gt.f32.partialorder %v3414_v45, 0.0  ;;  %v3670_v51 = vmul.f32 0.2, %v3414_v45 }
 0x474   : > { %v3416_v62 = vmul.f32 %v7095_v43, %v8080_v59  ;;  %v3796_v28 = vsel %vm3540_vm2, %v3412_v29, %v3668_v48  ;;  %v3797_v61 = vsel %vm3541_vm3, %v3413_v35, %v3669_v41  ;;  %v3417_v47 = vmul.f32 %v7097_v9, %v8081_v25 }
 0x475   : > { %4250 = vst [vmem:[%s7564_s2 + $0x1c0] sm:$0xff] %v4754_v60  ;;  %v3418_v4 = vmul.f32 %v7095_v43, %v8082_v26  ;;  %v4755_v54 = vpack.c.bf16 %v3797_v61, %v3796_v28  ;;  %vm3543_vm5 = vcmp.gt.f32.partialorder %v3415_v32, 0.0  ;;  %v3671_v7 = vmul.f32 0.2, %v3415_v32 }
 0x476   : > { %v3798_v11 = vsel %vm3542_vm4, %v3414_v45, %v3670_v51  ;;  %vm3544_vm6 = vcmp.gt.f32.partialorder %v3416_v62, 0.0  ;;  %vm3545_vm7 = vcmp.gt.f32.partialorder %v3417_v47, 0.0  ;;  %v3672_v52 = vmul.f32 0.2, %v3416_v62 }
 0x477   : > { %v3673_v13 = vmul.f32 0.2, %v3417_v47  ;;  %4251 = vst [vmem:[%s7564_s2 + $0x1c8] sm:$0xff] %v4755_v54  ;;  %v3799_v27 = vsel %vm3543_vm5, %v3415_v32, %v3671_v7  ;;  %v3419_v38 = vmul.f32 %v7097_v9, %v8083_v19  ;;  %vm3546_vm8 = vcmp.gt.f32.partialorder %v3418_v4, 0.0 }
 0x478   : > { %v3674_v31 = vmul.f32 0.2, %v3418_v4  ;;  %v4756_v37 = vpack.c.bf16 %v3799_v27, %v3798_v11  ;;  %v3800_v39 = vsel %vm3544_vm6, %v3416_v62, %v3672_v52  ;;  %v3420_v36 = vmul.f32 %v7095_v43, %v8084_v5 }
 0x479   : > { %v3801_v34 = vsel %vm3545_vm7, %v3417_v47, %v3673_v13  ;;  %vm3547_vm9 = vcmp.gt.f32.partialorder %v3419_v38, 0.0  ;;  %v3675_v0 = vmul.f32 0.2, %v3419_v38  ;;  %v3421_v21 = vmul.f32 %v7097_v9, %v8085_v55 }
 0x47a   : > { %v4757_v8 = vpack.c.bf16 %v3801_v34, %v3800_v39  ;;  %v3802_v3 = vsel %vm3546_vm8, %v3418_v4, %v3674_v31  ;;  %4252 = vst [vmem:[%s7564_s2 + $0x1d0] sm:$0xff] %v4756_v37  ;;  %vm3548_vm10 = vcmp.gt.f32.partialorder %v3420_v36, 0.0  ;;  %v3676_v6 = vmul.f32 0.2, %v3420_v36 }
 0x47b   : > { %v3422_v22 = vmul.f32 %v7095_v43, %v8086_v49  ;;  %v3803_v1 = vsel %vm3547_vm9, %v3419_v38, %v3675_v0  ;;  %v3423_v2 = vmul.f32 %v7097_v9, %v8087_v18  ;;  %v3424_v53 = vmul.f32 %v7095_v43, %v8088_v56 }
 0x47c   : > { %4253 = vst [vmem:[%s7564_s2 + $0x1d8] sm:$0xff] %v4757_v8  ;;  %v3425_v57 = vmul.f32 %v7097_v9, %v8089_v23  ;;  %v4758_v15 = vpack.c.bf16 %v3803_v1, %v3802_v3  ;;  %vm3549_vm11 = vcmp.gt.f32.partialorder %v3421_v21, 0.0  ;;  %v3677_v42 = vmul.f32 0.2, %v3421_v21 }
 0x47d   : > { %v3804_v40 = vsel %vm3548_vm10, %v3420_v36, %v3676_v6  ;;  %vm3550_vm12 = vcmp.gt.f32.partialorder %v3422_v22, 0.0  ;;  %vm3551_vm13 = vcmp.gt.f32.partialorder %v3423_v2, 0.0  ;;  %v3678_v24 = vmul.f32 0.2, %v3422_v22 }
 0x47e   : > { %v3679_v46 = vmul.f32 0.2, %v3423_v2  ;;  %4254 = vst [vmem:[%s7564_s2 + $0x1e0] sm:$0xff] %v4758_v15  ;;  %v3805_v12 = vsel %vm3549_vm11, %v3421_v21, %v3677_v42  ;;  %vm3552_vm14 = vcmp.gt.f32.partialorder %v3424_v53, 0.0  ;;  %vm3553_vm15 = vcmp.gt.f32.partialorder %v3425_v57, 0.0 }
 0x47f   : > { %v3680_v10 = vmul.f32 0.2, %v3424_v53  ;;  %v4759_v43 = vpack.c.bf16 %v3805_v12, %v3804_v40  ;;  %v3806_v44 = vsel %vm3550_vm12, %v3422_v22, %v3678_v24  ;;  %v3681_v9 = vmul.f32 0.2, %v3425_v57 }
 0x480   : > { %v3807_v33 = vsel %vm3551_vm13, %v3423_v2, %v3679_v46 }
 0x481   : > { %v4760_v16 = vpack.c.bf16 %v3807_v33, %v3806_v44  ;;  %v3808_v63 = vsel %vm3552_vm14, %v3424_v53, %v3680_v10  ;;  %4255 = vst [vmem:[%s7564_s2 + $0x1e8] sm:$0xff] %v4759_v43  ;;  %v3809_v58 = vsel %vm3553_vm15, %v3425_v57, %v3681_v9 }
 0x482   : > { %v4761_v29 = vpack.c.bf16 %v3809_v58, %v3808_v63 }
 0x483   : > { %4256 = vst [vmem:[%s7564_s2 + $0x1f0] sm:$0xff] %v4760_v16 }
 0x484   : > { %4257 = vst [vmem:[%s7564_s2 + $0x1f8] sm:$0xff] %v4761_v29 }
 0x485 PF: > { %s12_s13 = sadd.s32 1, %s5176_s13   ;;  %s8090_s9 = smov %s5164_s10 }
 0x486   : > { %p9_p12 = scmp.ge.s32.totalorder %s12_s13, 5   ;;  %s8091_s10 = smov %s5230_s17 }
 0x487   : > { %s8092_s11 = smov %s5172_s12  ;;  %s8093_s12 = smov %s8095_s14 }
 0x488   :  { %11 = sbr.rel (!%p9_p12) target bundleno = 3 (0x3), region = 106 }

// kernel: image_down_forward.6
= control target key start
LH: loop header
LB: loop body
LE: loop exit
PB: predicated region body
PF: predicated region fallthrough
CT: control target
= control target key end

     0   :  { %s3261_s9 = smov 0   ;;  %s3263_s10 = smov 0   ;;  %s4434_s0 = inlined_call_operand.vmem [shape: bf16[128,2304], index: 0, kind: input, shape index: {}]   ;;  %s4435_s1 = inlined_call_operand.vmem [shape: bf16[2304,512], index: 1, kind: input, shape index: {}]   ;;  %s4436_s2 = inlined_call_operand.vmem [shape: bf16[128,512], index: 2, kind: output, shape index: {}]  }
   0x1   :  { %s3265_s11 = smov 0   ;;  %s3267_s12 = smov 0  }
   0x2   :  { %s3269_s13 = smov 0  }
   0x3 LB: > { %s21_s14 = sadd.s32 1, %s3238_s12  ;;  %p40_p1 = scmp.ne.s32.totalorder %s3230_s10, %s3226_s9  ;;  %s3242_s13 = sphi %s3269_s13, %s12_s13   ;;  %s3238_s12 = sphi %s3267_s12, %s4569_s12   ;;  %s3234_s11 = sphi %s3265_s11, %s4568_s11   ;;  %s3230_s10 = sphi %s3263_s10, %s4567_s10   ;;  %s3226_s9 = sphi %s3261_s9, %s4566_s9  }
   0x4   : > { %p22_p0 = scmp.ge.s32.totalorder %s21_s14, 6  ;;  %p41_p2 = scmp.eq.s32.totalorder %s3242_s13, 0 }
   0x5   : > { %s33_s16 = sadd.s32 1, %s3230_s10  ;;  %p2683_p5 = scmp.ge.s32.totalorder %s3242_s13, 6 }
   0x6   : > { %s4571_s14 = smov (%p22_p0, %s21_s14), 0  ;;  %p42_p3 = por %p41_p2, %p40_p1 }
   0x7   : > { %s29_s15 = ssub.s32 %s3238_s12, %s4571_s14  ;;  %118 = sbr.rel (%p2683_p5) target bundleno = 37 (0x25), region = 16 }
   0x8   : > { %p31_p4 = scmp.eq.s32.totalorder %s29_s15, 0 }
   0xa   : > { %s3296_s17 = scalar_select %p31_p4, %s3230_s10, %s33_s16  }
   0xe   : > { %121 = sbr.rel (!%p42_p3) target bundleno = 37 (0x25), region = 20  ;;  %s123_s18 = sand.u32 (%p42_p3), 1, %s3230_s10  }
   0xf   : > { %s2878_s19 = smul.u32 (%p42_p3), 12, %s3238_s12 }
  0x10   : > { %s2976_s20 = smul.u32 (%p42_p3), 192, %s123_s18 }
  0x11   : > { %s3304_s23 = scalar_lea.vmem (%p42_p3), %s4434_s0, %s2878_s19 }
  0x12   : > { %v146_v0 = vld [vmem:[%s3304_s23] sm:$0xff] (%p42_p3)  ;;  %v148_v1 = vld [vmem:[%s3304_s23 + $0x48] sm:$0xff] (%p42_p3)  ;;  %v150_v2 = vld [vmem:[%s3304_s23 + $0x90] sm:$0xff] (%p42_p3)  ;;  %s3309_s24 = scalar_lea.vmem (%p42_p3), [#allocation3], %s2976_s20 }
  0x13   : > { %147 = vst [vmem:[%s3309_s24] sm:$0xff] (%p42_p3), %v146_v0  ;;  %149 = vst [vmem:[%s3309_s24 + $0xc] sm:$0xff] (%p42_p3), %v148_v1  ;;  %v152_v3 = vld [vmem:[%s3304_s23 + $0xd8] sm:$0xff] (%p42_p3)  ;;  %v154_v4 = vld [vmem:[%s3304_s23 + $0x120] sm:$0xff] (%p42_p3) }
  0x14   : > { %151 = vst [vmem:[%s3309_s24 + $0x18] sm:$0xff] (%p42_p3), %v150_v2  ;;  %v156_v5 = vld [vmem:[%s3304_s23 + $0x168] sm:$0xff] (%p42_p3)  ;;  %153 = vst [vmem:[%s3309_s24 + $0x24] sm:$0xff] (%p42_p3), %v152_v3  ;;  %v158_v6 = vld [vmem:[%s3304_s23 + $0x1b0] sm:$0xff] (%p42_p3) }
  0x15   : > { %155 = vst [vmem:[%s3309_s24 + $0x30] sm:$0xff] %v154_v4  ;;  %157 = vst [vmem:[%s3309_s24 + $0x3c] sm:$0xff] %v156_v5  ;;  %v160_v7 = vld [vmem:[%s3304_s23 + $0x1f8] sm:$0xff]  ;;  %v162_v8 = vld [vmem:[%s3304_s23 + $0x240] sm:$0xff] }
  0x16   : > { %159 = vst [vmem:[%s3309_s24 + $0x48] sm:$0xff] %v158_v6  ;;  %161 = vst [vmem:[%s3309_s24 + $0x54] sm:$0xff] %v160_v7  ;;  %v164_v9 = vld [vmem:[%s3304_s23 + $0x288] sm:$0xff]  ;;  %v166_v10 = vld [vmem:[%s3304_s23 + $0x2d0] sm:$0xff] }
  0x17   : > { %163 = vst [vmem:[%s3309_s24 + $0x60] sm:$0xff] %v162_v8  ;;  %v168_v11 = vld [vmem:[%s3304_s23 + $0x318] sm:$0xff]  ;;  %165 = vst [vmem:[%s3309_s24 + $0x6c] sm:$0xff] %v164_v9  ;;  %v170_v12 = vld [vmem:[%s3304_s23 + $0x360] sm:$0xff] }
  0x18   : > { %167 = vst [vmem:[%s3309_s24 + $0x78] sm:$0xff] %v166_v10  ;;  %169 = vst [vmem:[%s3309_s24 + $0x84] sm:$0xff] %v168_v11  ;;  %v172_v13 = vld [vmem:[%s3304_s23 + $0x3a8] sm:$0xff]  ;;  %v174_v14 = vld [vmem:[%s3304_s23 + $0x3f0] sm:$0xff] }
  0x19   : > { %171 = vst [vmem:[%s3309_s24 + $0x90] sm:$0xff] %v170_v12  ;;  %173 = vst [vmem:[%s3309_s24 + $0x9c] sm:$0xff] %v172_v13  ;;  %v176_v15 = vld [vmem:[%s3304_s23 + $0x438] sm:$0xff]  ;;  %v2685_v16 = vld [vmem:[%s3304_s23 + $0x8] sm:$0xf] }
  0x1a   : > { %175 = vst [vmem:[%s3309_s24 + $0xa8] sm:$0xff] %v174_v14  ;;  %v2687_v17 = vld [vmem:[%s3304_s23 + $0x50] sm:$0xf]  ;;  %177 = vst [vmem:[%s3309_s24 + $0xb4] sm:$0xff] %v176_v15  ;;  %v2689_v18 = vld [vmem:[%s3304_s23 + $0x98] sm:$0xf] }
  0x1b   : > { %2686 = vst [vmem:[%s3309_s24 + $0x8] sm:$0xf] %v2685_v16  ;;  %2688 = vst [vmem:[%s3309_s24 + $0x14] sm:$0xf] %v2687_v17  ;;  %v2691_v19 = vld [vmem:[%s3304_s23 + $0xe0] sm:$0xf] }
  0x1c   : > { %v2693_v20 = vld [vmem:[%s3304_s23 + $0x128] sm:$0xf]  ;;  %2690 = vst [vmem:[%s3309_s24 + $0x20] sm:$0xf] %v2689_v18  ;;  %2692 = vst [vmem:[%s3309_s24 + $0x2c] sm:$0xf] %v2691_v19 }
  0x1d   : > { %2694 = vst [vmem:[%s3309_s24 + $0x38] sm:$0xf] %v2693_v20  ;;  %v2695_v21 = vld [vmem:[%s3304_s23 + $0x170] sm:$0xf]  ;;  %v2697_v22 = vld [vmem:[%s3304_s23 + $0x1b8] sm:$0xf] }
  0x1e   : > { %v2699_v23 = vld [vmem:[%s3304_s23 + $0x200] sm:$0xf]  ;;  %2696 = vst [vmem:[%s3309_s24 + $0x44] sm:$0xf] %v2695_v21  ;;  %2698 = vst [vmem:[%s3309_s24 + $0x50] sm:$0xf] %v2697_v22 }
  0x1f   : > { %2700 = vst [vmem:[%s3309_s24 + $0x5c] sm:$0xf] %v2699_v23  ;;  %v2701_v24 = vld [vmem:[%s3304_s23 + $0x248] sm:$0xf]  ;;  %v2703_v25 = vld [vmem:[%s3304_s23 + $0x290] sm:$0xf] }
  0x20   : > { %v2705_v26 = vld [vmem:[%s3304_s23 + $0x2d8] sm:$0xf]  ;;  %2702 = vst [vmem:[%s3309_s24 + $0x68] sm:$0xf] %v2701_v24  ;;  %2704 = vst [vmem:[%s3309_s24 + $0x74] sm:$0xf] %v2703_v25 }
  0x21   : > { %2706 = vst [vmem:[%s3309_s24 + $0x80] sm:$0xf] %v2705_v26  ;;  %v2707_v27 = vld [vmem:[%s3304_s23 + $0x320] sm:$0xf]  ;;  %v2709_v28 = vld [vmem:[%s3304_s23 + $0x368] sm:$0xf] }
  0x22   : > { %v2711_v29 = vld [vmem:[%s3304_s23 + $0x3b0] sm:$0xf]  ;;  %2708 = vst [vmem:[%s3309_s24 + $0x8c] sm:$0xf] %v2707_v27  ;;  %2710 = vst [vmem:[%s3309_s24 + $0x98] sm:$0xf] %v2709_v28 }
  0x23   : > { %2712 = vst [vmem:[%s3309_s24 + $0xa4] sm:$0xf] %v2711_v29  ;;  %v2713_v30 = vld [vmem:[%s3304_s23 + $0x3f8] sm:$0xf]  ;;  %v2715_v31 = vld [vmem:[%s3304_s23 + $0x440] sm:$0xf] }
  0x24   : > { %2714 = vst [vmem:[%s3309_s24 + $0xb0] sm:$0xf] %v2713_v30  ;;  %2716 = vst [vmem:[%s3309_s24 + $0xbc] sm:$0xf] %v2715_v31 }
  0x25 PF: > { %p2717_p6 = scmp.ge.s32.totalorder %s3242_s13, 1  ;;  %p231_p7 = scmp.lt.s32.totalorder %s3242_s13, 7 }
  0x27   : > { %p232_p8 = pnand %p2717_p6, %p231_p7 }
  0x28   : > { %s238_s25 = sand.u32 (!%p232_p8), 1, %s3226_s9   ;;  %s268_s26 = smul.u32 (!%p232_p8), 48, %s3234_s11 }
  0x29   : > { %235 = sbr.rel (%p232_p8) target bundleno = 676 (0x2a4), region = 50  ;;  %p2720_p10 = scmp.ne.s32.totalorder (!%p232_p8), %s3234_s11, 0 }
  0x2a   : > { %s2977_s27 = smul.u32 (!%p232_p8), 192, %s238_s25  ;;  %p269_p9 = scmp.lt.s32.totalorder (!%p232_p8), %s268_s26, 287 }
  0x2c   : > { %s3381_s4 = scalar_lea.vmem (!%p232_p8), [#allocation3], %s2977_s27 }
  0x30   : > { %s4573_s26 = smov (!%p269_p9, %s268_s26), 287  ;;  %286 = sbr.rel (%p2720_p10) target bundleno = 82 (0x52), region = 58 }
  0x31   : > { %s2879_s28 = sshll.u32 %s4573_s26, 4  ;;  %v3244_v32 = vmov (!%p2720_p10), 0.0  }
  0x32   : > { %s3379_s3 = scalar_lea.vmem %s4435_s1, %s2879_s28  ;;  %287 = vst [vmem:[#allocation2] sm:$0xff] (!%p2720_p10), %v3244_v32  ;;  %288 = vst [vmem:[#allocation2 + $0x8] sm:$0xff] (!%p2720_p10), %v3244_v32 }
  0x33   : > { %289 = vst [vmem:[#allocation2 + $0x10] sm:$0xff] (!%p2720_p10), %v3244_v32  ;;  %290 = vst [vmem:[#allocation2 + $0x18] sm:$0xff] (!%p2720_p10), %v3244_v32 }
  0x34   : > { %291 = vst [vmem:[#allocation2 + $0x20] sm:$0xff] (!%p2720_p10), %v3244_v32  ;;  %292 = vst [vmem:[#allocation2 + $0x28] sm:$0xff] (!%p2720_p10), %v3244_v32 }
  0x35   : > { %293 = vst [vmem:[#allocation2 + $0x30] sm:$0xff] (!%p2720_p10), %v3244_v32  ;;  %294 = vst [vmem:[#allocation2 + $0x38] sm:$0xff] (!%p2720_p10), %v3244_v32 }
  0x36   : > { %295 = vst [vmem:[#allocation2 + $0x40] sm:$0xff] (!%p2720_p10), %v3244_v32  ;;  %296 = vst [vmem:[#allocation2 + $0x48] sm:$0xff] (!%p2720_p10), %v3244_v32 }
  0x37   : > { %297 = vst [vmem:[#allocation2 + $0x50] sm:$0xff] %v3244_v32  ;;  %298 = vst [vmem:[#allocation2 + $0x58] sm:$0xff] %v3244_v32 }
  0x38   : > { %299 = vst [vmem:[#allocation2 + $0x60] sm:$0xff] %v3244_v32  ;;  %300 = vst [vmem:[#allocation2 + $0x68] sm:$0xff] %v3244_v32 }
  0x39   : > { %301 = vst [vmem:[#allocation2 + $0x70] sm:$0xff] %v3244_v32  ;;  %302 = vst [vmem:[#allocation2 + $0x78] sm:$0xff] %v3244_v32 }
  0x3a   : > { %303 = vst [vmem:[#allocation2 + $0x80] sm:$0xff] %v3244_v32  ;;  %304 = vst [vmem:[#allocation2 + $0x88] sm:$0xff] %v3244_v32 }
  0x3b   : > { %305 = vst [vmem:[#allocation2 + $0x90] sm:$0xff] %v3244_v32  ;;  %306 = vst [vmem:[#allocation2 + $0x98] sm:$0xff] %v3244_v32 }
  0x3c   : > { %307 = vst [vmem:[#allocation2 + $0xa0] sm:$0xff] %v3244_v32  ;;  %308 = vst [vmem:[#allocation2 + $0xa8] sm:$0xff] %v3244_v32 }
  0x3d   : > { %309 = vst [vmem:[#allocation2 + $0xb0] sm:$0xff] %v3244_v32  ;;  %310 = vst [vmem:[#allocation2 + $0xb8] sm:$0xff] %v3244_v32 }
  0x3e   : > { %311 = vst [vmem:[#allocation2 + $0xc0] sm:$0xff] %v3244_v32  ;;  %312 = vst [vmem:[#allocation2 + $0xc8] sm:$0xff] %v3244_v32 }
  0x3f   : > { %313 = vst [vmem:[#allocation2 + $0xd0] sm:$0xff] %v3244_v32  ;;  %314 = vst [vmem:[#allocation2 + $0xd8] sm:$0xff] %v3244_v32 }
  0x40   : > { %315 = vst [vmem:[#allocation2 + $0xe0] sm:$0xff] %v3244_v32  ;;  %316 = vst [vmem:[#allocation2 + $0xe8] sm:$0xff] %v3244_v32 }
  0x41   : > { %317 = vst [vmem:[#allocation2 + $0xf0] sm:$0xff] %v3244_v32  ;;  %318 = vst [vmem:[#allocation2 + $0xf8] sm:$0xff] %v3244_v32 }
  0x42   : > { %319 = vst [vmem:[#allocation2 + $0x100] sm:$0xff] %v3244_v32  ;;  %320 = vst [vmem:[#allocation2 + $0x108] sm:$0xff] %v3244_v32 }
  0x43   : > { %321 = vst [vmem:[#allocation2 + $0x110] sm:$0xff] %v3244_v32  ;;  %322 = vst [vmem:[#allocation2 + $0x118] sm:$0xff] %v3244_v32 }
  0x44   : > { %323 = vst [vmem:[#allocation2 + $0x120] sm:$0xff] %v3244_v32  ;;  %324 = vst [vmem:[#allocation2 + $0x128] sm:$0xff] %v3244_v32 }
  0x45   : > { %325 = vst [vmem:[#allocation2 + $0x130] sm:$0xff] %v3244_v32  ;;  %326 = vst [vmem:[#allocation2 + $0x138] sm:$0xff] %v3244_v32 }
  0x46   : > { %327 = vst [vmem:[#allocation2 + $0x140] sm:$0xff] %v3244_v32  ;;  %328 = vst [vmem:[#allocation2 + $0x148] sm:$0xff] %v3244_v32 }
  0x47   : > { %329 = vst [vmem:[#allocation2 + $0x150] sm:$0xff] %v3244_v32  ;;  %330 = vst [vmem:[#allocation2 + $0x158] sm:$0xff] %v3244_v32 }
  0x48   : > { %331 = vst [vmem:[#allocation2 + $0x160] sm:$0xff] %v3244_v32  ;;  %332 = vst [vmem:[#allocation2 + $0x168] sm:$0xff] %v3244_v32 }
  0x49   : > { %333 = vst [vmem:[#allocation2 + $0x170] sm:$0xff] %v3244_v32  ;;  %334 = vst [vmem:[#allocation2 + $0x178] sm:$0xff] %v3244_v32 }
  0x4a   : > { %335 = vst [vmem:[#allocation2 + $0x180] sm:$0xff] %v3244_v32  ;;  %336 = vst [vmem:[#allocation2 + $0x188] sm:$0xff] %v3244_v32 }
  0x4b   : > { %337 = vst [vmem:[#allocation2 + $0x190] sm:$0xff] %v3244_v32  ;;  %338 = vst [vmem:[#allocation2 + $0x198] sm:$0xff] %v3244_v32 }
  0x4c   : > { %339 = vst [vmem:[#allocation2 + $0x1a0] sm:$0xff] %v3244_v32  ;;  %340 = vst [vmem:[#allocation2 + $0x1a8] sm:$0xff] %v3244_v32 }
  0x4d   : > { %341 = vst [vmem:[#allocation2 + $0x1b0] sm:$0xff] %v3244_v32  ;;  %342 = vst [vmem:[#allocation2 + $0x1b8] sm:$0xff] %v3244_v32 }
  0x4e   : > { %343 = vst [vmem:[#allocation2 + $0x1c0] sm:$0xff] %v3244_v32  ;;  %344 = vst [vmem:[#allocation2 + $0x1c8] sm:$0xff] %v3244_v32 }
  0x4f   : > { %345 = vst [vmem:[#allocation2 + $0x1d0] sm:$0xff] %v3244_v32  ;;  %346 = vst [vmem:[#allocation2 + $0x1d8] sm:$0xff] %v3244_v32 }
  0x50   : > { %347 = vst [vmem:[#allocation2 + $0x1e0] sm:$0xff] %v3244_v32  ;;  %348 = vst [vmem:[#allocation2 + $0x1e8] sm:$0xff] %v3244_v32 }
  0x51   : > { %349 = vst [vmem:[#allocation2 + $0x1f0] sm:$0xff] %v3244_v32  ;;  %350 = vst [vmem:[#allocation2 + $0x1f8] sm:$0xff] %v3244_v32 }
  0x52 PF: > { %v3020_v33 = vld [vmem:[%s3379_s3 + $0x4] ss:$16 sps:$4 sm:$0xff]   ;;  %v3022_v34 = vld [vmem:[%s3379_s3 + $0xc] ss:$16 sps:$4 sm:$0xff]   ;;  %v3024_v35 = vld [vmem:[%s3379_s3] ss:$16 sps:$4 sm:$0xff]  }
  0x53   : > { %1151 = vmatprep.subr.bf16.mxu0 %v3020_v33  ;;  %v3025_v36 = vld [vmem:[%s3379_s3 + $0x8] ss:$16 sps:$4 sm:$0xff]   ;;  %1377 = vmatprep.subr.bf16.mxu1 %v3022_v34  ;;  %v3026_v37 = vld [vmem:[%s3379_s3 + $0x24] ss:$16 sps:$4 sm:$0xff]   ;;  %v3028_v38 = vld [vmem:[%s3379_s3 + $0x2c] ss:$16 sps:$4 sm:$0xff]  }
  0x54   : > { %1152 = vmatpush1.bf16.msra.mxu0 %v3024_v35  ;;  %1378 = vmatpush1.bf16.msra.mxu1 %v3025_v36  ;;  %v3030_v39 = vld [vmem:[%s3379_s3 + $0x20] ss:$16 sps:$4 sm:$0xff]   ;;  %v3031_v40 = vld [vmem:[%s3379_s3 + $0x28] ss:$16 sps:$4 sm:$0xff]   ;;  %v3032_v41 = vld [vmem:[%s3379_s3 + $0x44] ss:$16 sps:$4 sm:$0xff]  }
  0x55   : > { %1153 = vmatprep.subr.bf16.mxu0 %v3026_v37  ;;  %1379 = vmatprep.subr.bf16.mxu1 %v3028_v38  ;;  %v3034_v42 = vld [vmem:[%s3379_s3 + $0x4c] ss:$16 sps:$4 sm:$0xff]   ;;  %v3036_v43 = vld [vmem:[%s3379_s3 + $0x40] ss:$16 sps:$4 sm:$0xff]   ;;  %v3037_v44 = vld [vmem:[%s3379_s3 + $0x48] ss:$16 sps:$4 sm:$0xff]  }
  0x56   : > { %v3038_v45 = vld [vmem:[%s3379_s3 + $0x64] ss:$16 sps:$4 sm:$0xff]   ;;  %v3040_v46 = vld [vmem:[%s3379_s3 + $0x6c] ss:$16 sps:$4 sm:$0xff]   ;;  %v3042_v47 = vld [vmem:[%s3379_s3 + $0x60] ss:$16 sps:$4 sm:$0xff]  }
  0x57   : > { %v3043_v48 = vld [vmem:[%s3379_s3 + $0x68] ss:$16 sps:$4 sm:$0xff]   ;;  %v3044_v49 = vld [vmem:[%s3379_s3 + $0x84] ss:$16 sps:$4 sm:$0xff]   ;;  %v3046_v50 = vld [vmem:[%s3379_s3 + $0x8c] ss:$16 sps:$4 sm:$0xff]  }
  0x58   : > { %1154 = vmatpush1.bf16.msra.mxu0 %v3030_v39  ;;  %1380 = vmatpush1.bf16.msra.mxu1 %v3031_v40  ;;  %v3048_v51 = vld [vmem:[%s3379_s3 + $0x80] ss:$16 sps:$4 sm:$0xff]   ;;  %v3049_v52 = vld [vmem:[%s3379_s3 + $0x88] ss:$16 sps:$4 sm:$0xff]   ;;  %v3050_v53 = vld [vmem:[%s3379_s3 + $0xa4] ss:$16 sps:$4 sm:$0xff]  }
  0x59   : > { %1155 = vmatprep.subr.bf16.mxu0 %v3032_v41  ;;  %1381 = vmatprep.subr.bf16.mxu1 %v3034_v42  ;;  %v3052_v54 = vld [vmem:[%s3379_s3 + $0xac] ss:$16 sps:$4 sm:$0xff]   ;;  %v3054_v55 = vld [vmem:[%s3379_s3 + $0xa0] ss:$16 sps:$4 sm:$0xff]   ;;  %v3055_v56 = vld [vmem:[%s3379_s3 + $0xa8] ss:$16 sps:$4 sm:$0xff]  }
  0x5a   : > { %v3056_v57 = vld [vmem:[%s3379_s3 + $0xc4] ss:$16 sps:$4 sm:$0xff]   ;;  %v3058_v58 = vld [vmem:[%s3379_s3 + $0xcc] ss:$16 sps:$4 sm:$0xff]   ;;  %v3060_v59 = vld [vmem:[%s3379_s3 + $0xc0] ss:$16 sps:$4 sm:$0xff]  }
  0x5b   : > { %v3061_v60 = vld [vmem:[%s3379_s3 + $0xc8] ss:$16 sps:$4 sm:$0xff]   ;;  %v3062_v61 = vld [vmem:[%s3379_s3 + $0xe4] ss:$16 sps:$4 sm:$0xff]   ;;  %v3064_v62 = vld [vmem:[%s3379_s3 + $0xec] ss:$16 sps:$4 sm:$0xff]  }
  0x5c   : > { %1156 = vmatpush1.bf16.msra.mxu0 %v3036_v43  ;;  %1382 = vmatpush1.bf16.msra.mxu1 %v3037_v44  ;;  %v3066_v63 = vld [vmem:[%s3379_s3 + $0xe0] ss:$16 sps:$4 sm:$0xff]   ;;  %v3067_v0 = vld [vmem:[%s3379_s3 + $0xe8] ss:$16 sps:$4 sm:$0xff]   ;;  %v3068_v1 = vld [vmem:[%s3379_s3 + $0x104] ss:$16 sps:$4 sm:$0xff]  }
  0x5d   : > { %1157 = vmatprep.subr.bf16.mxu0 %v3038_v45  ;;  %1383 = vmatprep.subr.bf16.mxu1 %v3040_v46  ;;  %v3070_v2 = vld [vmem:[%s3379_s3 + $0x10c] ss:$16 sps:$4 sm:$0xff]   ;;  %v3072_v3 = vld [vmem:[%s3379_s3 + $0x100] ss:$16 sps:$4 sm:$0xff]   ;;  %v3073_v4 = vld [vmem:[%s3379_s3 + $0x108] ss:$16 sps:$4 sm:$0xff]  }
  0x5e   : > { %v3074_v5 = vld [vmem:[%s3379_s3 + $0x124] ss:$16 sps:$4 sm:$0xff]   ;;  %v3076_v6 = vld [vmem:[%s3379_s3 + $0x12c] ss:$16 sps:$4 sm:$0xff]   ;;  %v3078_v7 = vld [vmem:[%s3379_s3 + $0x120] ss:$16 sps:$4 sm:$0xff]  }
  0x5f   : > { %v3079_v8 = vld [vmem:[%s3379_s3 + $0x128] ss:$16 sps:$4 sm:$0xff]   ;;  %v3080_v9 = vld [vmem:[%s3379_s3 + $0x144] ss:$16 sps:$4 sm:$0xff]   ;;  %v3082_v10 = vld [vmem:[%s3379_s3 + $0x14c] ss:$16 sps:$4 sm:$0xff]  }
  0x60   : > { %1158 = vmatpush1.bf16.msra.mxu0 %v3042_v47  ;;  %1384 = vmatpush1.bf16.msra.mxu1 %v3043_v48  ;;  %v3084_v11 = vld [vmem:[%s3379_s3 + $0x140] ss:$16 sps:$4 sm:$0xff]   ;;  %v3085_v12 = vld [vmem:[%s3379_s3 + $0x148] ss:$16 sps:$4 sm:$0xff]   ;;  %v3086_v13 = vld [vmem:[%s3379_s3 + $0x164] ss:$16 sps:$4 sm:$0xff]  }
  0x61   : > { %1159 = vmatprep.subr.bf16.mxu0 %v3044_v49  ;;  %1385 = vmatprep.subr.bf16.mxu1 %v3046_v50  ;;  %v3088_v14 = vld [vmem:[%s3379_s3 + $0x16c] ss:$16 sps:$4 sm:$0xff]   ;;  %v3090_v15 = vld [vmem:[%s3379_s3 + $0x160] ss:$16 sps:$4 sm:$0xff]   ;;  %v3091_v16 = vld [vmem:[%s3379_s3 + $0x168] ss:$16 sps:$4 sm:$0xff]  }
  0x62   : > { %v3118_v17 = vld [vmem:[%s3381_s4 + $0x4] ss:$12 sps:$4 sm:$0xff]   ;;  %v3094_v19 = vld [vmem:[%s3379_s3 + $0x18c] ss:$16 sps:$4 sm:$0xff]   ;;  %v3097_v21 = vld [vmem:[%s3379_s3 + $0x188] ss:$16 sps:$4 sm:$0xff]  }
  0x63   : > { %v3092_v18 = vld [vmem:[%s3379_s3 + $0x184] ss:$16 sps:$4 sm:$0xff]   ;;  %1183 = vmatprep.mubr.bf16.mxu0 %v3118_v17  ;;  %1409 = vmatprep.mubr.bf16.mxu1 %v3118_v17  ;;  %v3096_v20 = vld [vmem:[%s3379_s3 + $0x180] ss:$16 sps:$4 sm:$0xff]   ;;  %v3100_v23 = vld [vmem:[%s3379_s3 + $0x1ac] ss:$16 sps:$4 sm:$0xff]  }
  0x64   : > { %1160 = vmatpush1.bf16.msra.mxu0 %v3048_v51  ;;  %1386 = vmatpush1.bf16.msra.mxu1 %v3049_v52  ;;  %v3098_v22 = vld [vmem:[%s3379_s3 + $0x1a4] ss:$16 sps:$4 sm:$0xff]   ;;  %v3102_v24 = vld [vmem:[%s3379_s3 + $0x1a0] ss:$16 sps:$4 sm:$0xff]   ;;  %v3103_v25 = vld [vmem:[%s3379_s3 + $0x1a8] ss:$16 sps:$4 sm:$0xff]  }
  0x65   : > { %1161 = vmatprep.subr.bf16.mxu0 %v3050_v53  ;;  %1387 = vmatprep.subr.bf16.mxu1 %v3052_v54  ;;  %v3104_v26 = vld [vmem:[%s3379_s3 + $0x1c4] ss:$16 sps:$4 sm:$0xff]   ;;  %v3106_v27 = vld [vmem:[%s3379_s3 + $0x1cc] ss:$16 sps:$4 sm:$0xff]   ;;  %v3108_v28 = vld [vmem:[%s3379_s3 + $0x1c0] ss:$16 sps:$4 sm:$0xff]  }
  0x66   : > { %v3109_v29 = vld [vmem:[%s3379_s3 + $0x1c8] ss:$16 sps:$4 sm:$0xff]   ;;  %v3110_v30 = vld [vmem:[%s3379_s3 + $0x1e4] ss:$16 sps:$4 sm:$0xff]   ;;  %v3112_v31 = vld [vmem:[%s3379_s3 + $0x1ec] ss:$16 sps:$4 sm:$0xff]  }
  0x67   : > { %v3114_v32 = vld [vmem:[%s3379_s3 + $0x1e0] ss:$16 sps:$4 sm:$0xff]   ;;  %v3115_v33 = vld [vmem:[%s3379_s3 + $0x1e8] ss:$16 sps:$4 sm:$0xff]   ;;  %v3121_v34 = vld [vmem:[%s3379_s3 + $0x204] ss:$16 sps:$4 sm:$0xff]  }
  0x68   : > { %1162 = vmatpush1.bf16.msra.mxu0 %v3054_v55  ;;  %1388 = vmatpush1.bf16.msra.mxu1 %v3055_v56  ;;  %v3124_v35 = vld [vmem:[%s3379_s3 + $0x20c] ss:$16 sps:$4 sm:$0xff]   ;;  %v3119_v37 = vld [vmem:[%s3379_s3 + $0x200] ss:$16 sps:$4 sm:$0xff]   ;;  %v3122_v38 = vld [vmem:[%s3379_s3 + $0x208] ss:$16 sps:$4 sm:$0xff]  }
  0x69   : > { %1163 = vmatprep.subr.bf16.mxu0 %v3056_v57  ;;  %1389 = vmatprep.subr.bf16.mxu1 %v3058_v58  ;;  %v3116_v36 = vld [vmem:[%s3381_s4] ss:$12 sps:$4 sm:$0xff]   ;;  %v3125_v39 = vld [vmem:[%s3381_s4 + $0x1c] ss:$12 sps:$4 sm:$0xff]   ;;  %v3130_v40 = vld [vmem:[%s3379_s3 + $0x224] ss:$16 sps:$4 sm:$0xff]  }
  0x6a   : > { %v3133_v41 = vld [vmem:[%s3379_s3 + $0x22c] ss:$16 sps:$4 sm:$0xff]   ;;  %v3128_v42 = vld [vmem:[%s3379_s3 + $0x220] ss:$16 sps:$4 sm:$0xff]   ;;  %v3131_v43 = vld [vmem:[%s3379_s3 + $0x228] ss:$16 sps:$4 sm:$0xff]  }
  0x6b   : > { %v3139_v44 = vld [vmem:[%s3379_s3 + $0x244] ss:$16 sps:$4 sm:$0xff]   ;;  %v3142_v45 = vld [vmem:[%s3379_s3 + $0x24c] ss:$16 sps:$4 sm:$0xff]   ;;  %v3137_v48 = vld [vmem:[%s3379_s3 + $0x240] ss:$16 sps:$4 sm:$0xff]  }
  0x6c   : > { %1164 = vmatpush1.bf16.msra.mxu0 %v3060_v59  ;;  %1390 = vmatpush1.bf16.msra.mxu1 %v3061_v60  ;;  %v3127_v46 = vld [vmem:[%s3381_s4 + $0x18] ss:$12 sps:$4 sm:$0xff]   ;;  %v3134_v47 = vld [vmem:[%s3381_s4 + $0x34] ss:$12 sps:$4 sm:$0xff]   ;;  %v3151_v51 = vld [vmem:[%s3379_s3 + $0x26c] ss:$16 sps:$4 sm:$0xff]  }
  0x6d   : > { %1165 = vmatprep.subr.bf16.mxu0 %v3062_v61  ;;  %1391 = vmatprep.subr.bf16.mxu1 %v3064_v62  ;;  %v3140_v49 = vld [vmem:[%s3379_s3 + $0x248] ss:$16 sps:$4 sm:$0xff]   ;;  %v3148_v50 = vld [vmem:[%s3379_s3 + $0x264] ss:$16 sps:$4 sm:$0xff]   ;;  %v3146_v52 = vld [vmem:[%s3379_s3 + $0x260] ss:$16 sps:$4 sm:$0xff]  }
  0x6e   : > { %v3149_v53 = vld [vmem:[%s3379_s3 + $0x268] ss:$16 sps:$4 sm:$0xff]   ;;  %v3136_v54 = vld [vmem:[%s3381_s4 + $0x30] ss:$12 sps:$4 sm:$0xff]   ;;  %v3157_v55 = vld [vmem:[%s3379_s3 + $0x284] ss:$16 sps:$4 sm:$0xff]  }
  0x6f   : > { %v3160_v56 = vld [vmem:[%s3379_s3 + $0x28c] ss:$16 sps:$4 sm:$0xff]   ;;  %v3155_v58 = vld [vmem:[%s3379_s3 + $0x280] ss:$16 sps:$4 sm:$0xff]   ;;  %v3158_v59 = vld [vmem:[%s3379_s3 + $0x288] ss:$16 sps:$4 sm:$0xff]  }
  0x70   : > { %1166 = vmatpush1.bf16.msra.mxu0 %v3066_v63  ;;  %1392 = vmatpush1.bf16.msra.mxu1 %v3067_v0  ;;  %v3143_v57 = vld [vmem:[%s3381_s4 + $0x4c] ss:$12 sps:$4 sm:$0xff]   ;;  %v3166_v60 = vld [vmem:[%s3379_s3 + $0x2a4] ss:$16 sps:$4 sm:$0xff]   ;;  %v3164_v62 = vld [vmem:[%s3379_s3 + $0x2a0] ss:$16 sps:$4 sm:$0xff]  }
  0x71   : > { %1167 = vmatprep.subr.bf16.mxu0 %v3068_v1  ;;  %1393 = vmatprep.subr.bf16.mxu1 %v3070_v2  ;;  %v3169_v61 = vld [vmem:[%s3379_s3 + $0x2ac] ss:$16 sps:$4 sm:$0xff]   ;;  %v3167_v63 = vld [vmem:[%s3379_s3 + $0x2a8] ss:$16 sps:$4 sm:$0xff]   ;;  %v3175_v0 = vld [vmem:[%s3379_s3 + $0x2c4] ss:$16 sps:$4 sm:$0xff]  }
  0x72   : > { %v3178_v1 = vld [vmem:[%s3379_s3 + $0x2cc] ss:$16 sps:$4 sm:$0xff]   ;;  %v3145_v2 = vld [vmem:[%s3381_s4 + $0x48] ss:$12 sps:$4 sm:$0xff]   ;;  %v3245_v17 = vmov 0   ;;  %p2841_p11 = scmp.ne.s32.totalorder %s3234_s11, 5 }
  0x74   : > { %1168 = vmatpush1.bf16.msra.mxu0 %v3072_v3  ;;  %1394 = vmatpush1.bf16.msra.mxu1 %v3073_v4  ;;  %v3152_v3 = vld [vmem:[%s3381_s4 + $0x64] ss:$12 sps:$4 sm:$0xff]  }
  0x75   : > { %1169 = vmatprep.subr.bf16.mxu0 %v3074_v5  ;;  %1395 = vmatprep.subr.bf16.mxu1 %v3076_v6  ;;  %v3173_v4 = vld [vmem:[%s3379_s3 + $0x2c0] ss:$16 sps:$4 sm:$0xff]   ;;  %v3176_v5 = vld [vmem:[%s3379_s3 + $0x2c8] ss:$16 sps:$4 sm:$0xff]   ;;  %v3184_v6 = vld [vmem:[%s3379_s3 + $0x2e4] ss:$16 sps:$4 sm:$0xff]  }
  0x78   : > { %1170 = vmatpush1.bf16.msra.mxu0 %v3078_v7  ;;  %1396 = vmatpush1.bf16.msra.mxu1 %v3079_v8  ;;  %v3187_v7 = vld [vmem:[%s3379_s3 + $0x2ec] ss:$16 sps:$4 sm:$0xff]   ;;  %v3182_v8 = vld [vmem:[%s3379_s3 + $0x2e0] ss:$16 sps:$4 sm:$0xff]  }
  0x79   : > { %1171 = vmatprep.subr.bf16.mxu0 %v3080_v9  ;;  %1397 = vmatprep.subr.bf16.mxu1 %v3082_v10  ;;  %v3185_v9 = vld [vmem:[%s3379_s3 + $0x2e8] ss:$16 sps:$4 sm:$0xff]   ;;  %v3154_v10 = vld [vmem:[%s3381_s4 + $0x60] ss:$12 sps:$4 sm:$0xff]  }
  0x7c   : > { %1172 = vmatpush1.bf16.msra.mxu0 %v3084_v11  ;;  %1398 = vmatpush1.bf16.msra.mxu1 %v3085_v12  ;;  %v3161_v11 = vld [vmem:[%s3381_s4 + $0x7c] ss:$12 sps:$4 sm:$0xff]   ;;  %v3163_v12 = vld [vmem:[%s3381_s4 + $0x78] ss:$12 sps:$4 sm:$0xff]  }
  0x7d   : > { %1173 = vmatprep.subr.bf16.mxu0 %v3086_v13  ;;  %1399 = vmatprep.subr.bf16.mxu1 %v3088_v14  ;;  %v3170_v13 = vld [vmem:[%s3381_s4 + $0x94] ss:$12 sps:$4 sm:$0xff]   ;;  %v3172_v14 = vld [vmem:[%s3381_s4 + $0x90] ss:$12 sps:$4 sm:$0xff]  }
  0x80   : > { %1174 = vmatpush1.bf16.msra.mxu0 %v3090_v15  ;;  %1400 = vmatpush1.bf16.msra.mxu1 %v3091_v16  ;;  %v3179_v15 = vld [vmem:[%s3381_s4 + $0xac] ss:$12 sps:$4 sm:$0xff]   ;;  %v3181_v16 = vld [vmem:[%s3381_s4 + $0xa8] ss:$12 sps:$4 sm:$0xff]  }
  0x81   : > { %1175 = vmatprep.subr.bf16.mxu0 %v3092_v18  ;;  %1401 = vmatprep.subr.bf16.mxu1 %v3094_v19  ;;  %v3188_v18 = vld [vmem:[%s3381_s4 + $0x8] ss:$12 sps:$4 sm:$0xff]   ;;  %v3189_v19 = vld [vmem:[%s3381_s4 + $0x20] ss:$12 sps:$4 sm:$0xff]  }
  0x84   : > { %1176 = vmatpush1.bf16.msra.mxu0 %v3096_v20  ;;  %1402 = vmatpush1.bf16.msra.mxu1 %v3097_v21  ;;  %v3190_v20 = vld [vmem:[%s3381_s4 + $0x38] ss:$12 sps:$4 sm:$0xff]   ;;  %v3191_v21 = vld [vmem:[%s3381_s4 + $0x50] ss:$12 sps:$4 sm:$0xff]  }
  0x85   : > { %1177 = vmatprep.subr.bf16.mxu0 %v3098_v22  ;;  %1403 = vmatprep.subr.bf16.mxu1 %v3100_v23  ;;  %v3192_v22 = vld [vmem:[%s3381_s4 + $0x68] ss:$12 sps:$4 sm:$0xff]   ;;  %v3193_v23 = vld [vmem:[%s3381_s4 + $0x80] ss:$12 sps:$4 sm:$0xff]  }
  0x88   : > { %1178 = vmatpush1.bf16.msra.mxu0 %v3102_v24  ;;  %1404 = vmatpush1.bf16.msra.mxu1 %v3103_v25  ;;  %v3194_v24 = vld [vmem:[%s3381_s4 + $0x98] ss:$12 sps:$4 sm:$0xff]   ;;  %v3195_v25 = vld [vmem:[%s3381_s4 + $0xb0] ss:$12 sps:$4 sm:$0xff]  }
  0x89   : > { %1179 = vmatprep.subr.bf16.mxu0 %v3104_v26  ;;  %1405 = vmatprep.subr.bf16.mxu1 %v3106_v27  ;;  %v351_v26 = vld [vmem:[#allocation2] sm:$0xff]  ;;  %v353_v27 = vld [vmem:[#allocation2 + $0x10] sm:$0xff] }
  0x8c   : > { %1180 = vmatpush1.bf16.msra.mxu0 %v3108_v28  ;;  %1406 = vmatpush1.bf16.msra.mxu1 %v3109_v29  ;;  %v352_v28 = vld [vmem:[#allocation2 + $0x8] sm:$0xff]  ;;  %v354_v29 = vld [vmem:[#allocation2 + $0x18] sm:$0xff] }
  0x8d   : > { %1181 = vmatprep.subr.bf16.mxu0 %v3110_v30  ;;  %1407 = vmatprep.subr.bf16.mxu1 %v3112_v31 }
  0x90   : > { %1182 = vmatpush1.bf16.msra.mxu0 %v3114_v32  ;;  %1408 = vmatpush1.bf16.msra.mxu1 %v3115_v33  ;;  %v355_v32 = vld [vmem:[#allocation2 + $0x20] sm:$0xff]  ;;  %v357_v33 = vld [vmem:[#allocation2 + $0x30] sm:$0xff] }
  0x91   : > { %1264 = vmatprep.subr.bf16.mxu0 %v3121_v34  ;;  %1490 = vmatprep.subr.bf16.mxu1 %v3124_v35 }
  0x93   : > { %1184 = vmatmul.mubr.bf16.vlgmr.msra.gmra.mrb[0].mxu0 %v3116_v36  ;;  %1410 = vmatmul.mubr.bf16.vlgmr.msra.gmra.mrb[0].mxu1 %v3116_v36 }
  0x94   : > { %1265 = vmatpush1.bf16.msra.mxu0 %v3119_v37  ;;  %1491 = vmatpush1.bf16.msra.mxu1 %v3122_v38  ;;  %v356_v38 = vld [vmem:[#allocation2 + $0x28] sm:$0xff] }
  0x95   : > { %1193 = vmatprep.mubr.bf16.mxu0 %v3125_v39  ;;  %1419 = vmatprep.mubr.bf16.mxu1 %v3125_v39  ;;  %v358_v39 = vld [vmem:[#allocation2 + $0x38] sm:$0xff] }
  0x96   : > { %1266 = vmatprep.subr.bf16.mxu0 %v3130_v40  ;;  %1492 = vmatprep.subr.bf16.mxu1 %v3133_v41 }
  0x98   : > { %1267 = vmatpush1.bf16.msra.mxu0 %v3128_v42  ;;  %1493 = vmatpush1.bf16.msra.mxu1 %v3131_v43 }
  0x99   : > { %1268 = vmatprep.subr.bf16.mxu0 %v3139_v44  ;;  %1494 = vmatprep.subr.bf16.mxu1 %v3142_v45 }
  0x9b   : > { %1194 = vmatmul.mubr.bf16.gmra.mrb[4].mxu0 %v3127_v46  ;;  %1420 = vmatmul.mubr.bf16.gmra.mrb[4].mxu1 %v3127_v46 }
  0x9c   : > { %1203 = vmatprep.mubr.bf16.mxu0 %v3134_v47  ;;  %1429 = vmatprep.mubr.bf16.mxu1 %v3134_v47 }
  0x9d   : > { %1269 = vmatpush1.bf16.msra.mxu0 %v3137_v48  ;;  %1495 = vmatpush1.bf16.msra.mxu1 %v3140_v49 }
  0x9e   : > { %1270 = vmatprep.subr.bf16.mxu0 %v3148_v50  ;;  %1496 = vmatprep.subr.bf16.mxu1 %v3151_v51  ;;  %v359_v50 = vld [vmem:[#allocation2 + $0x40] sm:$0xff]  ;;  %v361_v51 = vld [vmem:[#allocation2 + $0x50] sm:$0xff] }
  0xa1   : > { %1271 = vmatpush1.bf16.msra.mxu0 %v3146_v52  ;;  %1497 = vmatpush1.bf16.msra.mxu1 %v3149_v53  ;;  %v360_v52 = vld [vmem:[#allocation2 + $0x48] sm:$0xff]  ;;  %v362_v53 = vld [vmem:[#allocation2 + $0x58] sm:$0xff] }
  0xa2   : > { %1272 = vmatprep.subr.bf16.mxu0 %v3157_v55  ;;  %1498 = vmatprep.subr.bf16.mxu1 %v3160_v56  ;;  %v363_v56 = vld [vmem:[#allocation2 + $0x60] sm:$0xff] }
  0xa3   : > { %1204 = vmatmul.mubr.bf16.gmra.mrb[8].mxu0 %v3136_v54  ;;  %1430 = vmatmul.mubr.bf16.gmra.mrb[8].mxu1 %v3136_v54 }
  0xa4   : > { %1213 = vmatprep.mubr.bf16.mxu0 %v3143_v57  ;;  %1439 = vmatprep.mubr.bf16.mxu1 %v3143_v57  ;;  %v365_v57 = vld [vmem:[#allocation2 + $0x70] sm:$0xff] }
  0xa5   : > { %1273 = vmatpush1.bf16.msra.mxu0 %v3155_v58  ;;  %1499 = vmatpush1.bf16.msra.mxu1 %v3158_v59 }
  0xa6   : > { %1274 = vmatprep.subr.bf16.mxu0 %v3166_v60  ;;  %1500 = vmatprep.subr.bf16.mxu1 %v3169_v61 }
  0xa9   : > { %1275 = vmatpush1.bf16.msra.mxu0 %v3164_v62  ;;  %1501 = vmatpush1.bf16.msra.mxu1 %v3167_v63  ;;  %v364_v62 = vld [vmem:[#allocation2 + $0x68] sm:$0xff]  ;;  %v366_v63 = vld [vmem:[#allocation2 + $0x78] sm:$0xff] }
  0xaa   : > { %1276 = vmatprep.subr.bf16.mxu0 %v3175_v0  ;;  %1502 = vmatprep.subr.bf16.mxu1 %v3178_v1 }
  0xab   : > { %1214 = vmatmul.mubr.bf16.gmra.mrb[12].mxu0 %v3145_v2  ;;  %1440 = vmatmul.mubr.bf16.gmra.mrb[12].mxu1 %v3145_v2 }
  0xac   : > { %1223 = vmatprep.mubr.bf16.mxu0 %v3152_v3  ;;  %1449 = vmatprep.mubr.bf16.mxu1 %v3152_v3 }
  0xad   : > { %1277 = vmatpush1.bf16.msra.mxu0 %v3173_v4  ;;  %1503 = vmatpush1.bf16.msra.mxu1 %v3176_v5 }
  0xae   : > { %1278 = vmatprep.subr.bf16.mxu0 %v3184_v6  ;;  %1504 = vmatprep.subr.bf16.mxu1 %v3187_v7 }
  0xb1   : > { %1279 = vmatpush1.bf16.msra.mxu0 %v3182_v8  ;;  %1505 = vmatpush1.bf16.msra.mxu1 %v3185_v9 }
  0xb3   : > { %1224 = vmatmul.mubr.bf16.gmra.mrb[16].mxu0 %v3154_v10  ;;  %1450 = vmatmul.mubr.bf16.gmra.mrb[16].mxu1 %v3154_v10  ;;  %v367_v10 = vld [vmem:[#allocation2 + $0x80] sm:$0xff] }
  0xb4   : > { %1233 = vmatprep.mubr.bf16.mxu0 %v3161_v11  ;;  %1459 = vmatprep.mubr.bf16.mxu1 %v3161_v11  ;;  %v369_v11 = vld [vmem:[#allocation2 + $0x90] sm:$0xff] }
  0xbb   : > { %1234 = vmatmul.mubr.bf16.gmra.mrb[20].mxu0 %v3163_v12  ;;  %1460 = vmatmul.mubr.bf16.gmra.mrb[20].mxu1 %v3163_v12  ;;  %v368_v12 = vld [vmem:[#allocation2 + $0x88] sm:$0xff] }
  0xbc   : > { %1243 = vmatprep.mubr.bf16.mxu0 %v3170_v13  ;;  %1469 = vmatprep.mubr.bf16.mxu1 %v3170_v13  ;;  %v370_v13 = vld [vmem:[#allocation2 + $0x98] sm:$0xff] }
  0xc3   : > { %1244 = vmatmul.mubr.bf16.gmra.mrb[24].mxu0 %v3172_v14  ;;  %1470 = vmatmul.mubr.bf16.gmra.mrb[24].mxu1 %v3172_v14 }
  0xc4   : > { %1253 = vmatprep.mubr.bf16.mxu0 %v3179_v15  ;;  %1479 = vmatprep.mubr.bf16.mxu1 %v3179_v15 }
  0xcb   : > { %1254 = vmatmul.mubr.bf16.gmra.mrb[28].mxu0 %v3181_v16  ;;  %1480 = vmatmul.mubr.bf16.gmra.mrb[28].mxu1 %v3181_v16  ;;  %v371_v16 = vld [vmem:[#allocation2 + $0xa0] sm:$0xff] }
  0xcc   : > { %1296 = vmatprep.mubr.bf16.mxu0 %v3245_v17  ;;  %1522 = vmatprep.mubr.bf16.mxu1 %v3245_v17 }
  0xd3   : > { %1297 = vmatmul.mubr.bf16.vlgmr.msra.gmra.mrb[0].mxu0 %v3188_v18  ;;  %1523 = vmatmul.mubr.bf16.vlgmr.msra.gmra.mrb[0].mxu1 %v3188_v18 }
  0xd4   : > { %1306 = vmatprep.mubr.bf16.mxu0 %v3245_v17  ;;  %1532 = vmatprep.mubr.bf16.mxu1 %v3245_v17 }
  0xdb   : > { %1307 = vmatmul.mubr.bf16.gmra.mrb[4].mxu0 %v3189_v19  ;;  %1533 = vmatmul.mubr.bf16.gmra.mrb[4].mxu1 %v3189_v19 }
  0xdc   : > { %1316 = vmatprep.mubr.bf16.mxu0 %v3245_v17  ;;  %1542 = vmatprep.mubr.bf16.mxu1 %v3245_v17 }
  0xe3   : > { %1317 = vmatmul.mubr.bf16.gmra.mrb[8].mxu0 %v3190_v20  ;;  %1543 = vmatmul.mubr.bf16.gmra.mrb[8].mxu1 %v3190_v20 }
  0xe4   : > { %1326 = vmatprep.mubr.bf16.mxu0 %v3245_v17  ;;  %1552 = vmatprep.mubr.bf16.mxu1 %v3245_v17 }
  0xeb   : > { %1327 = vmatmul.mubr.bf16.gmra.mrb[12].mxu0 %v3191_v21  ;;  %1553 = vmatmul.mubr.bf16.gmra.mrb[12].mxu1 %v3191_v21 }
  0xec   : > { %1336 = vmatprep.mubr.bf16.mxu0 %v3245_v17  ;;  %1562 = vmatprep.mubr.bf16.mxu1 %v3245_v17 }
  0xf3   : > { %1337 = vmatmul.mubr.bf16.gmra.mrb[16].mxu0 %v3192_v22  ;;  %1563 = vmatmul.mubr.bf16.gmra.mrb[16].mxu1 %v3192_v22  ;;  %v372_v22 = vld [vmem:[#allocation2 + $0xa8] sm:$0xff] }
  0xf4   : > { %1346 = vmatprep.mubr.bf16.mxu0 %v3245_v17  ;;  %1572 = vmatprep.mubr.bf16.mxu1 %v3245_v17 }
  0xfb   : > { %1347 = vmatmul.mubr.bf16.gmra.mrb[20].mxu0 %v3193_v23  ;;  %1573 = vmatmul.mubr.bf16.gmra.mrb[20].mxu1 %v3193_v23  ;;  %v374_v23 = vld [vmem:[#allocation2 + $0xb8] sm:$0xff] }
  0xfc   : > { %1356 = vmatprep.mubr.bf16.mxu0 %v3245_v17  ;;  %1582 = vmatprep.mubr.bf16.mxu1 %v3245_v17 }
 0x103   : > { %1357 = vmatmul.mubr.bf16.gmra.mrb[24].mxu0 %v3194_v24  ;;  %1583 = vmatmul.mubr.bf16.gmra.mrb[24].mxu1 %v3194_v24 }
 0x104   : > { %1366 = vmatprep.mubr.bf16.mxu0 %v3245_v17  ;;  %1592 = vmatprep.mubr.bf16.mxu1 %v3245_v17  ;;  %v373_v17 = vld [vmem:[#allocation2 + $0xb0] sm:$0xff] }
 0x10b   : > { %1367 = vmatmul.mubr.bf16.gmra.mrb[28].mxu0 %v3195_v25  ;;  %1593 = vmatmul.mubr.bf16.gmra.mrb[28].mxu1 %v3195_v25 }
 0x1a6   : > { %v1298_v30 = vpop.f32.mrb[0].mxu0  ;;  %v1524_v31 = vpop.f32.mrb[0].mxu1 }
 0x1a7   : > { %v1603_v34 = vadd.f32 %v1298_v30, %v351_v26  ;;  %v1605_v35 = vadd.f32 %v1524_v31, %v353_v27  ;;  %v1300_v36 = vpop.f32.mrb[1].mxu0  ;;  %v1526_v37 = vpop.f32.mrb[1].mxu1 }
 0x1a8   : > { %v1604_v40 = vadd.f32 %v1300_v36, %v352_v28  ;;  %v1606_v41 = vadd.f32 %v1526_v37, %v354_v29  ;;  %v1302_v42 = vpop.f32.mrb[2].mxu0  ;;  %v1528_v43 = vpop.f32.mrb[2].mxu1  ;;  %v376_v36 = vld [vmem:[#allocation2 + $0xc8] sm:$0xff]  ;;  %v378_v37 = vld [vmem:[#allocation2 + $0xd8] sm:$0xff] }
 0x1a9   : > { %1667 = vst [vmem:[#allocation2] sm:$0xff] %v1603_v34  ;;  %1669 = vst [vmem:[#allocation2 + $0x10] sm:$0xff] %v1605_v35  ;;  %v1607_v44 = vadd.f32 %v1302_v42, %v355_v32  ;;  %v1609_v45 = vadd.f32 %v1528_v43, %v357_v33  ;;  %v1304_v46 = vpop.f32.mrb[3].mxu0  ;;  %v1530_v47 = vpop.f32.mrb[3].mxu1  ;;  %v375_v34 = vld [vmem:[#allocation2 + $0xc0] sm:$0xff]  ;;  %v377_v35 = vld [vmem:[#allocation2 + $0xd0] sm:$0xff] }
 0x1aa   : > { %1668 = vst [vmem:[#allocation2 + $0x8] sm:$0xff] %v1604_v40  ;;  %1670 = vst [vmem:[#allocation2 + $0x18] sm:$0xff] %v1606_v41  ;;  %v1608_v48 = vadd.f32 %v1304_v46, %v356_v38  ;;  %v1610_v49 = vadd.f32 %v1530_v47, %v358_v39  ;;  %v379_v40 = vld [vmem:[#allocation2 + $0xe0] sm:$0xff]  ;;  %v381_v41 = vld [vmem:[#allocation2 + $0xf0] sm:$0xff] }
 0x1ab   : > { %1671 = vst [vmem:[#allocation2 + $0x20] sm:$0xff] %v1607_v44  ;;  %1673 = vst [vmem:[#allocation2 + $0x30] sm:$0xff] %v1609_v45  ;;  %v380_v46 = vld [vmem:[#allocation2 + $0xe8] sm:$0xff]  ;;  %v382_v47 = vld [vmem:[#allocation2 + $0xf8] sm:$0xff] }
 0x1ac   : > { %1672 = vst [vmem:[#allocation2 + $0x28] sm:$0xff] %v1608_v48  ;;  %1674 = vst [vmem:[#allocation2 + $0x38] sm:$0xff] %v1610_v49 }
 0x1ae   : > { %v1308_v54 = vpop.f32.mrb[4].mxu0  ;;  %v1534_v55 = vpop.f32.mrb[4].mxu1 }
 0x1af   : > { %v1611_v58 = vadd.f32 %v1308_v54, %v359_v50  ;;  %v1613_v59 = vadd.f32 %v1534_v55, %v361_v51  ;;  %v1310_v60 = vpop.f32.mrb[5].mxu0  ;;  %v1536_v61 = vpop.f32.mrb[5].mxu1 }
 0x1b0   : > { %v1612_v0 = vadd.f32 %v1310_v60, %v360_v52  ;;  %v1614_v1 = vadd.f32 %v1536_v61, %v362_v53  ;;  %v1312_v2 = vpop.f32.mrb[6].mxu0  ;;  %v1538_v3 = vpop.f32.mrb[6].mxu1  ;;  %v384_v60 = vld [vmem:[#allocation2 + $0x108] sm:$0xff]  ;;  %v386_v61 = vld [vmem:[#allocation2 + $0x118] sm:$0xff] }
 0x1b1   : > { %1675 = vst [vmem:[#allocation2 + $0x40] sm:$0xff] %v1611_v58  ;;  %1677 = vst [vmem:[#allocation2 + $0x50] sm:$0xff] %v1613_v59  ;;  %v1615_v4 = vadd.f32 %v1312_v2, %v363_v56  ;;  %v1617_v5 = vadd.f32 %v1538_v3, %v365_v57  ;;  %v1314_v6 = vpop.f32.mrb[7].mxu0  ;;  %v1540_v7 = vpop.f32.mrb[7].mxu1  ;;  %v383_v58 = vld [vmem:[#allocation2 + $0x100] sm:$0xff]  ;;  %v385_v59 = vld [vmem:[#allocation2 + $0x110] sm:$0xff] }
 0x1b2   : > { %1676 = vst [vmem:[#allocation2 + $0x48] sm:$0xff] %v1612_v0  ;;  %1678 = vst [vmem:[#allocation2 + $0x58] sm:$0xff] %v1614_v1  ;;  %v1616_v8 = vadd.f32 %v1314_v6, %v364_v62  ;;  %v1618_v9 = vadd.f32 %v1540_v7, %v366_v63  ;;  %v387_v0 = vld [vmem:[#allocation2 + $0x120] sm:$0xff]  ;;  %v389_v1 = vld [vmem:[#allocation2 + $0x130] sm:$0xff] }
 0x1b3   : > { %1679 = vst [vmem:[#allocation2 + $0x60] sm:$0xff] %v1615_v4  ;;  %1681 = vst [vmem:[#allocation2 + $0x70] sm:$0xff] %v1617_v5  ;;  %v388_v6 = vld [vmem:[#allocation2 + $0x128] sm:$0xff]  ;;  %v390_v7 = vld [vmem:[#allocation2 + $0x138] sm:$0xff] }
 0x1b4   : > { %1680 = vst [vmem:[#allocation2 + $0x68] sm:$0xff] %v1616_v8  ;;  %1682 = vst [vmem:[#allocation2 + $0x78] sm:$0xff] %v1618_v9 }
 0x1b6   : > { %v1318_v14 = vpop.f32.mrb[8].mxu0  ;;  %v1544_v15 = vpop.f32.mrb[8].mxu1 }
 0x1b7   : > { %v1619_v18 = vadd.f32 %v1318_v14, %v367_v10  ;;  %v1621_v19 = vadd.f32 %v1544_v15, %v369_v11  ;;  %v1320_v20 = vpop.f32.mrb[9].mxu0  ;;  %v1546_v21 = vpop.f32.mrb[9].mxu1 }
 0x1b8   : > { %v1620_v24 = vadd.f32 %v1320_v20, %v368_v12  ;;  %v1622_v25 = vadd.f32 %v1546_v21, %v370_v13  ;;  %v1322_v26 = vpop.f32.mrb[10].mxu0  ;;  %v1548_v27 = vpop.f32.mrb[10].mxu1  ;;  %v392_v20 = vld [vmem:[#allocation2 + $0x148] sm:$0xff]  ;;  %v394_v21 = vld [vmem:[#allocation2 + $0x158] sm:$0xff] }
 0x1b9   : > { %1683 = vst [vmem:[#allocation2 + $0x80] sm:$0xff] %v1619_v18  ;;  %1685 = vst [vmem:[#allocation2 + $0x90] sm:$0xff] %v1621_v19  ;;  %v1623_v28 = vadd.f32 %v1322_v26, %v371_v16  ;;  %v1625_v29 = vadd.f32 %v1548_v27, %v373_v17  ;;  %v1324_v30 = vpop.f32.mrb[11].mxu0  ;;  %v1550_v31 = vpop.f32.mrb[11].mxu1  ;;  %v391_v18 = vld [vmem:[#allocation2 + $0x140] sm:$0xff]  ;;  %v393_v19 = vld [vmem:[#allocation2 + $0x150] sm:$0xff] }
 0x1ba   : > { %1684 = vst [vmem:[#allocation2 + $0x88] sm:$0xff] %v1620_v24  ;;  %1686 = vst [vmem:[#allocation2 + $0x98] sm:$0xff] %v1622_v25  ;;  %v1624_v32 = vadd.f32 %v1324_v30, %v372_v22  ;;  %v1626_v33 = vadd.f32 %v1550_v31, %v374_v23  ;;  %v395_v24 = vld [vmem:[#allocation2 + $0x160] sm:$0xff]  ;;  %v397_v25 = vld [vmem:[#allocation2 + $0x170] sm:$0xff] }
 0x1bb   : > { %1687 = vst [vmem:[#allocation2 + $0xa0] sm:$0xff] %v1623_v28  ;;  %1689 = vst [vmem:[#allocation2 + $0xb0] sm:$0xff] %v1625_v29  ;;  %v396_v30 = vld [vmem:[#allocation2 + $0x168] sm:$0xff]  ;;  %v398_v31 = vld [vmem:[#allocation2 + $0x178] sm:$0xff] }
 0x1bc   : > { %1688 = vst [vmem:[#allocation2 + $0xa8] sm:$0xff] %v1624_v32  ;;  %1690 = vst [vmem:[#allocation2 + $0xb8] sm:$0xff] %v1626_v33 }
 0x1be   : > { %v1328_v38 = vpop.f32.mrb[12].mxu0  ;;  %v1554_v39 = vpop.f32.mrb[12].mxu1 }
 0x1bf   : > { %v1627_v42 = vadd.f32 %v1328_v38, %v375_v34  ;;  %v1629_v43 = vadd.f32 %v1554_v39, %v377_v35  ;;  %v1330_v44 = vpop.f32.mrb[13].mxu0  ;;  %v1556_v45 = vpop.f32.mrb[13].mxu1 }
 0x1c0   : > { %v1628_v48 = vadd.f32 %v1330_v44, %v376_v36  ;;  %v1630_v49 = vadd.f32 %v1556_v45, %v378_v37  ;;  %v1332_v50 = vpop.f32.mrb[14].mxu0  ;;  %v1558_v51 = vpop.f32.mrb[14].mxu1  ;;  %v400_v44 = vld [vmem:[#allocation2 + $0x188] sm:$0xff]  ;;  %v402_v45 = vld [vmem:[#allocation2 + $0x198] sm:$0xff] }
 0x1c1   : > { %1691 = vst [vmem:[#allocation2 + $0xc0] sm:$0xff] %v1627_v42  ;;  %1693 = vst [vmem:[#allocation2 + $0xd0] sm:$0xff] %v1629_v43  ;;  %v1631_v52 = vadd.f32 %v1332_v50, %v379_v40  ;;  %v1633_v53 = vadd.f32 %v1558_v51, %v381_v41  ;;  %v1334_v54 = vpop.f32.mrb[15].mxu0  ;;  %v1560_v55 = vpop.f32.mrb[15].mxu1  ;;  %v399_v42 = vld [vmem:[#allocation2 + $0x180] sm:$0xff]  ;;  %v401_v43 = vld [vmem:[#allocation2 + $0x190] sm:$0xff] }
 0x1c2   : > { %1692 = vst [vmem:[#allocation2 + $0xc8] sm:$0xff] %v1628_v48  ;;  %1694 = vst [vmem:[#allocation2 + $0xd8] sm:$0xff] %v1630_v49  ;;  %v1632_v56 = vadd.f32 %v1334_v54, %v380_v46  ;;  %v1634_v57 = vadd.f32 %v1560_v55, %v382_v47  ;;  %v403_v48 = vld [vmem:[#allocation2 + $0x1a0] sm:$0xff]  ;;  %v405_v49 = vld [vmem:[#allocation2 + $0x1b0] sm:$0xff] }
 0x1c3   : > { %1695 = vst [vmem:[#allocation2 + $0xe0] sm:$0xff] %v1631_v52  ;;  %1697 = vst [vmem:[#allocation2 + $0xf0] sm:$0xff] %v1633_v53  ;;  %v404_v54 = vld [vmem:[#allocation2 + $0x1a8] sm:$0xff]  ;;  %v406_v55 = vld [vmem:[#allocation2 + $0x1b8] sm:$0xff] }
 0x1c4   : > { %1696 = vst [vmem:[#allocation2 + $0xe8] sm:$0xff] %v1632_v56  ;;  %1698 = vst [vmem:[#allocation2 + $0xf8] sm:$0xff] %v1634_v57 }
 0x1c6   : > { %v1338_v62 = vpop.f32.mrb[16].mxu0  ;;  %v1564_v63 = vpop.f32.mrb[16].mxu1 }
 0x1c7   : > { %v1635_v2 = vadd.f32 %v1338_v62, %v383_v58  ;;  %v1637_v3 = vadd.f32 %v1564_v63, %v385_v59  ;;  %v1340_v4 = vpop.f32.mrb[17].mxu0  ;;  %v1566_v5 = vpop.f32.mrb[17].mxu1 }
 0x1c8   : > { %v1636_v8 = vadd.f32 %v1340_v4, %v384_v60  ;;  %v1638_v9 = vadd.f32 %v1566_v5, %v386_v61  ;;  %v1342_v10 = vpop.f32.mrb[18].mxu0  ;;  %v1568_v11 = vpop.f32.mrb[18].mxu1  ;;  %v408_v4 = vld [vmem:[#allocation2 + $0x1c8] sm:$0xff]  ;;  %v410_v5 = vld [vmem:[#allocation2 + $0x1d8] sm:$0xff] }
 0x1c9   : > { %1699 = vst [vmem:[#allocation2 + $0x100] sm:$0xff] %v1635_v2  ;;  %1701 = vst [vmem:[#allocation2 + $0x110] sm:$0xff] %v1637_v3  ;;  %v1639_v12 = vadd.f32 %v1342_v10, %v387_v0  ;;  %v1641_v13 = vadd.f32 %v1568_v11, %v389_v1  ;;  %v1344_v14 = vpop.f32.mrb[19].mxu0  ;;  %v1570_v15 = vpop.f32.mrb[19].mxu1  ;;  %v407_v2 = vld [vmem:[#allocation2 + $0x1c0] sm:$0xff]  ;;  %v409_v3 = vld [vmem:[#allocation2 + $0x1d0] sm:$0xff] }
 0x1ca   : > { %1700 = vst [vmem:[#allocation2 + $0x108] sm:$0xff] %v1636_v8  ;;  %1702 = vst [vmem:[#allocation2 + $0x118] sm:$0xff] %v1638_v9  ;;  %v1640_v16 = vadd.f32 %v1344_v14, %v388_v6  ;;  %v1642_v17 = vadd.f32 %v1570_v15, %v390_v7  ;;  %v411_v8 = vld [vmem:[#allocation2 + $0x1e0] sm:$0xff]  ;;  %v413_v9 = vld [vmem:[#allocation2 + $0x1f0] sm:$0xff] }
 0x1cb   : > { %1703 = vst [vmem:[#allocation2 + $0x120] sm:$0xff] %v1639_v12  ;;  %1705 = vst [vmem:[#allocation2 + $0x130] sm:$0xff] %v1641_v13  ;;  %v412_v14 = vld [vmem:[#allocation2 + $0x1e8] sm:$0xff]  ;;  %v414_v15 = vld [vmem:[#allocation2 + $0x1f8] sm:$0xff] }
 0x1cc   : > { %1704 = vst [vmem:[#allocation2 + $0x128] sm:$0xff] %v1640_v16  ;;  %1706 = vst [vmem:[#allocation2 + $0x138] sm:$0xff] %v1642_v17 }
 0x1ce   : > { %v1348_v22 = vpop.f32.mrb[20].mxu0  ;;  %v1574_v23 = vpop.f32.mrb[20].mxu1 }
 0x1cf   : > { %v1643_v26 = vadd.f32 %v1348_v22, %v391_v18  ;;  %v1645_v27 = vadd.f32 %v1574_v23, %v393_v19  ;;  %v1350_v28 = vpop.f32.mrb[21].mxu0  ;;  %v1576_v29 = vpop.f32.mrb[21].mxu1 }
 0x1d0   : > { %v1644_v32 = vadd.f32 %v1350_v28, %v392_v20  ;;  %v1646_v33 = vadd.f32 %v1576_v29, %v394_v21  ;;  %v1352_v34 = vpop.f32.mrb[22].mxu0  ;;  %v1578_v35 = vpop.f32.mrb[22].mxu1 }
 0x1d1   : > { %1707 = vst [vmem:[#allocation2 + $0x140] sm:$0xff] %v1643_v26  ;;  %1709 = vst [vmem:[#allocation2 + $0x150] sm:$0xff] %v1645_v27  ;;  %v1647_v36 = vadd.f32 %v1352_v34, %v395_v24  ;;  %v1649_v37 = vadd.f32 %v1578_v35, %v397_v25  ;;  %v1354_v38 = vpop.f32.mrb[23].mxu0  ;;  %v1580_v39 = vpop.f32.mrb[23].mxu1 }
 0x1d2   : > { %1708 = vst [vmem:[#allocation2 + $0x148] sm:$0xff] %v1644_v32  ;;  %1710 = vst [vmem:[#allocation2 + $0x158] sm:$0xff] %v1646_v33  ;;  %v1648_v40 = vadd.f32 %v1354_v38, %v396_v30  ;;  %v1650_v41 = vadd.f32 %v1580_v39, %v398_v31 }
 0x1d3   : > { %1711 = vst [vmem:[#allocation2 + $0x160] sm:$0xff] %v1647_v36  ;;  %1713 = vst [vmem:[#allocation2 + $0x170] sm:$0xff] %v1649_v37 }
 0x1d4   : > { %1712 = vst [vmem:[#allocation2 + $0x168] sm:$0xff] %v1648_v40  ;;  %1714 = vst [vmem:[#allocation2 + $0x178] sm:$0xff] %v1650_v41 }
 0x1d6   : > { %v1358_v46 = vpop.f32.mrb[24].mxu0  ;;  %v1584_v47 = vpop.f32.mrb[24].mxu1 }
 0x1d7   : > { %v1651_v50 = vadd.f32 %v1358_v46, %v399_v42  ;;  %v1653_v51 = vadd.f32 %v1584_v47, %v401_v43  ;;  %v1360_v52 = vpop.f32.mrb[25].mxu0  ;;  %v1586_v53 = vpop.f32.mrb[25].mxu1 }
 0x1d8   : > { %v1652_v56 = vadd.f32 %v1360_v52, %v400_v44  ;;  %v1654_v57 = vadd.f32 %v1586_v53, %v402_v45  ;;  %v1362_v58 = vpop.f32.mrb[26].mxu0  ;;  %v1588_v59 = vpop.f32.mrb[26].mxu1 }
 0x1d9   : > { %1715 = vst [vmem:[#allocation2 + $0x180] sm:$0xff] %v1651_v50  ;;  %1717 = vst [vmem:[#allocation2 + $0x190] sm:$0xff] %v1653_v51  ;;  %v1655_v60 = vadd.f32 %v1362_v58, %v403_v48  ;;  %v1657_v61 = vadd.f32 %v1588_v59, %v405_v49  ;;  %v1364_v62 = vpop.f32.mrb[27].mxu0  ;;  %v1590_v63 = vpop.f32.mrb[27].mxu1 }
 0x1da   : > { %1716 = vst [vmem:[#allocation2 + $0x188] sm:$0xff] %v1652_v56  ;;  %1718 = vst [vmem:[#allocation2 + $0x198] sm:$0xff] %v1654_v57  ;;  %v1656_v0 = vadd.f32 %v1364_v62, %v404_v54  ;;  %v1658_v1 = vadd.f32 %v1590_v63, %v406_v55 }
 0x1db   : > { %1719 = vst [vmem:[#allocation2 + $0x1a0] sm:$0xff] %v1655_v60  ;;  %1721 = vst [vmem:[#allocation2 + $0x1b0] sm:$0xff] %v1657_v61 }
 0x1dc   : > { %1720 = vst [vmem:[#allocation2 + $0x1a8] sm:$0xff] %v1656_v0  ;;  %1722 = vst [vmem:[#allocation2 + $0x1b8] sm:$0xff] %v1658_v1 }
 0x1de   : > { %v1368_v6 = vpop.f32.mrb[28].mxu0  ;;  %v1594_v7 = vpop.f32.mrb[28].mxu1  ;;  %1734 = sbr.rel (%p2841_p11) target bundleno = 676 (0x2a4), region = 62 }
 0x1df   : > { %v1659_v10 = vadd.f32 %v1368_v6, %v407_v2  ;;  %v1661_v11 = vadd.f32 %v1594_v7, %v409_v3  ;;  %v1370_v12 = vpop.f32.mrb[29].mxu0  ;;  %v1596_v13 = vpop.f32.mrb[29].mxu1 }
 0x1e0   : > { %v1660_v16 = vadd.f32 %v1370_v12, %v408_v4  ;;  %v1662_v17 = vadd.f32 %v1596_v13, %v410_v5  ;;  %v1372_v18 = vpop.f32.mrb[30].mxu0  ;;  %v1598_v19 = vpop.f32.mrb[30].mxu1 }
 0x1e1   : > { %1723 = vst [vmem:[#allocation2 + $0x1c0] sm:$0xff] %v1659_v10  ;;  %1725 = vst [vmem:[#allocation2 + $0x1d0] sm:$0xff] %v1661_v11  ;;  %v1663_v20 = vadd.f32 %v1372_v18, %v411_v8  ;;  %v1665_v21 = vadd.f32 %v1598_v19, %v413_v9  ;;  %v1374_v22 = vpop.f32.mrb[31].mxu0  ;;  %v1600_v23 = vpop.f32.mrb[31].mxu1 }
 0x1e2   : > { %1724 = vst [vmem:[#allocation2 + $0x1c8] sm:$0xff] %v1660_v16  ;;  %1726 = vst [vmem:[#allocation2 + $0x1d8] sm:$0xff] %v1662_v17  ;;  %v1664_v24 = vadd.f32 %v1374_v22, %v412_v14  ;;  %v1666_v25 = vadd.f32 %v1600_v23, %v414_v15 }
 0x1e3   : > { %1727 = vst [vmem:[#allocation2 + $0x1e0] sm:$0xff] %v1663_v20  ;;  %1729 = vst [vmem:[#allocation2 + $0x1f0] sm:$0xff] %v1665_v21 }
 0x1e4   : > { %1728 = vst [vmem:[#allocation2 + $0x1e8] sm:$0xff] %v1664_v24  ;;  %1730 = vst [vmem:[#allocation2 + $0x1f8] sm:$0xff] %v1666_v25 }
 0x1e5   : > { %v3569_v26 = vld [vmem:[#allocation2] sm:$0xff]  ;;  %v3571_v27 = vld [vmem:[#allocation2 + $0x8] sm:$0xff]  ;;  %v3613_v52 = vld [vmem:[#allocation2 + $0x10] sm:$0xff] }
 0x1e6   : > { %v3573_v28 = vld [vmem:[#allocation2 + $0x20] sm:$0xff]  ;;  %v3575_v29 = vld [vmem:[#allocation2 + $0x28] sm:$0xff]  ;;  %v3616_v54 = vld [vmem:[#allocation2 + $0x18] sm:$0xff] }
 0x1e7   : > { %v3577_v30 = vld [vmem:[#allocation2 + $0x40] sm:$0xff]  ;;  %v3579_v31 = vld [vmem:[#allocation2 + $0x48] sm:$0xff]  ;;  %v1799_v32 = vadd.f32 %v3573_v28, %v3569_v26  ;;  %v1820_v34 = vadd.f32 %v3575_v29, %v3571_v27  ;;  %v3618_v55 = vld [vmem:[#allocation2 + $0x30] sm:$0xff] }
 0x1e8   : > { %v3583_v33 = vld [vmem:[#allocation2 + $0x60] sm:$0xff]  ;;  %v3587_v35 = vld [vmem:[#allocation2 + $0x68] sm:$0xff]  ;;  %v3620_v56 = vld [vmem:[#allocation2 + $0x38] sm:$0xff]  ;;  %v1841_v61 = vadd.f32 %v3618_v55, %v3613_v52 }
 0x1e9   : > { %v1800_v36 = vadd.f32 %v1799_v32, %v3577_v30  ;;  %v3590_v37 = vld [vmem:[#allocation2 + $0x80] sm:$0xff]  ;;  %v1821_v38 = vadd.f32 %v1820_v34, %v3579_v31  ;;  %v3593_v39 = vld [vmem:[#allocation2 + $0x88] sm:$0xff]  ;;  %v3625_v59 = vld [vmem:[#allocation2 + $0x50] sm:$0xff]  ;;  %v1862_v62 = vadd.f32 %v3620_v56, %v3616_v54 }
 0x1ea   : > { %v3596_v41 = vld [vmem:[#allocation2 + $0xa0] sm:$0xff]  ;;  %v3599_v43 = vld [vmem:[#allocation2 + $0xa8] sm:$0xff]  ;;  %v3627_v60 = vld [vmem:[#allocation2 + $0x58] sm:$0xff]  ;;  %v1842_v5 = vadd.f32 %v1841_v61, %v3625_v59 }
 0x1eb   : > { %v1801_v40 = vadd.f32 %v1800_v36, %v3583_v33  ;;  %v1822_v42 = vadd.f32 %v1821_v38, %v3587_v35  ;;  %v3602_v45 = vld [vmem:[#allocation2 + $0xc0] sm:$0xff]  ;;  %v3605_v47 = vld [vmem:[#allocation2 + $0xc8] sm:$0xff]  ;;  %v3636_v1 = vld [vmem:[#allocation2 + $0x70] sm:$0xff]  ;;  %v1863_v6 = vadd.f32 %v1862_v62, %v3627_v60 }
 0x1ec   : > { %v3608_v49 = vld [vmem:[#allocation2 + $0xe0] sm:$0xff]  ;;  %v3610_v50 = vld [vmem:[#allocation2 + $0xe8] sm:$0xff]  ;;  %v3638_v2 = vld [vmem:[#allocation2 + $0x78] sm:$0xff]  ;;  %v1843_v13 = vadd.f32 %v1842_v5, %v3636_v1 }
 0x1ed   : > { %v1802_v44 = vadd.f32 %v1801_v40, %v3590_v37  ;;  %v1823_v46 = vadd.f32 %v1822_v42, %v3593_v39  ;;  %v3622_v57 = vld [vmem:[#allocation2 + $0x100] sm:$0xff]  ;;  %v3633_v63 = vld [vmem:[#allocation2 + $0x108] sm:$0xff]  ;;  %v3648_v9 = vld [vmem:[#allocation2 + $0x90] sm:$0xff]  ;;  %v1864_v14 = vadd.f32 %v1863_v6, %v3638_v2 }
 0x1ee   : > { %v3640_v3 = vld [vmem:[#allocation2 + $0x120] sm:$0xff]  ;;  %v3645_v7 = vld [vmem:[#allocation2 + $0x128] sm:$0xff]  ;;  %v3650_v10 = vld [vmem:[#allocation2 + $0x98] sm:$0xff]  ;;  %v1844_v21 = vadd.f32 %v1843_v13, %v3648_v9 }
 0x1ef   : > { %v1803_v48 = vadd.f32 %v1802_v44, %v3596_v41  ;;  %v1824_v51 = vadd.f32 %v1823_v46, %v3599_v43  ;;  %v3652_v11 = vld [vmem:[#allocation2 + $0x140] sm:$0xff]  ;;  %v3657_v15 = vld [vmem:[#allocation2 + $0x148] sm:$0xff]  ;;  %v3660_v17 = vld [vmem:[#allocation2 + $0xb0] sm:$0xff]  ;;  %v1865_v22 = vadd.f32 %v1864_v14, %v3650_v10 }
 0x1f0   : > { %v3662_v18 = vld [vmem:[#allocation2 + $0xb8] sm:$0xff]  ;;  %v3664_v19 = vld [vmem:[#allocation2 + $0x160] sm:$0xff]  ;;  %v3669_v23 = vld [vmem:[#allocation2 + $0x168] sm:$0xff]  ;;  %v1845_v38 = vadd.f32 %v1844_v21, %v3660_v17 }
 0x1f1   : > { %v1804_v53 = vadd.f32 %v1803_v48, %v3602_v45  ;;  %v1825_v58 = vadd.f32 %v1824_v51, %v3605_v47  ;;  %4480 = vst [vmem:[#allocation4_spill] sm:$0xff] %v3662_v18  ;;  %v3672_v25 = vld [vmem:[#allocation2 + $0xd0] sm:$0xff]  ;;  %v3674_v32 = vld [vmem:[#allocation2 + $0xd8] sm:$0xff]  ;;  %v3676_v34 = vld [vmem:[#allocation2 + $0x180] sm:$0xff]  ;;  %v1866_v40 = vadd.f32 %v1865_v22, %v3662_v18 }
 0x1f2   : > { %4481 = vst [vmem:[#allocation5_spill] sm:$0xff] %v3672_v25  ;;  %4482 = vst [vmem:[#allocation6_spill] sm:$0xff] %v3674_v32  ;;  %v3681_v42 = vld [vmem:[#allocation2 + $0x188] sm:$0xff]  ;;  %v3684_v46 = vld [vmem:[#allocation2 + $0xf0] sm:$0xff] }
 0x1f3   : > { %v1805_v0 = vadd.f32 %v1804_v53, %v3608_v49  ;;  %v1826_v4 = vadd.f32 %v1825_v58, %v3610_v50  ;;  %4483 = vst [vmem:[#allocation7_spill] sm:$0xff] %v3684_v46  ;;  %v3686_v48 = vld [vmem:[#allocation2 + $0xf8] sm:$0xff]  ;;  %v3688_v51 = vld [vmem:[#allocation2 + $0x1a0] sm:$0xff]  ;;  %v1846_v58 = vadd.f32 %v1845_v38, %v3672_v25  ;;  %v1867_v61 = vadd.f32 %v1866_v40, %v3674_v32  ;;  %v3693_v62 = vld [vmem:[#allocation2 + $0x1a8] sm:$0xff] }
 0x1f4   : > { %4484 = vst [vmem:[#allocation8_spill] sm:$0xff] %v3686_v48  ;;  %v3698_v5 = vld [vmem:[#allocation2 + $0x118] sm:$0xff]  ;;  %v3700_v6 = vld [vmem:[#allocation2 + $0x1c0] sm:$0xff]  ;;  %v3705_v14 = vld [vmem:[#allocation2 + $0x1c8] sm:$0xff] }
 0x1f5   : > { %v1806_v8 = vadd.f32 %v1805_v0, %v3622_v57  ;;  %v1827_v12 = vadd.f32 %v1826_v4, %v3633_v63  ;;  %v3696_v4 = vld [vmem:[#allocation2 + $0x110] sm:$0xff]  ;;  %4486 = vst [vmem:[#allocation10_spill] sm:$0xff] %v3698_v5  ;;  %v1868_v13 = vadd.f32 %v1867_v61, %v3686_v48  ;;  %v3710_v21 = vld [vmem:[#allocation2 + $0x138] sm:$0xff]  ;;  %v3712_v22 = vld [vmem:[#allocation2 + $0x1e0] sm:$0xff] }
 0x1f6   : > { %4485 = vst [vmem:[#allocation9_spill] sm:$0xff] %v3696_v4  ;;  %4488 = vst [vmem:[#allocation12_spill] sm:$0xff] %v3710_v21  ;;  %v3717_v40 = vld [vmem:[#allocation2 + $0x1e8] sm:$0xff]  ;;  %v3724_v48 = vld [vmem:[#allocation2 + $0x150] sm:$0xff] }
 0x1f7   : > { %v1807_v16 = vadd.f32 %v1806_v8, %v3640_v3  ;;  %v1828_v20 = vadd.f32 %v1827_v12, %v3645_v7  ;;  %v1847_v12 = vadd.f32 %v1846_v58, %v3684_v46  ;;  %v1869_v38 = vadd.f32 %v1868_v13, %v3698_v5  ;;  %4489 = vst [vmem:[#allocation13_spill] sm:$0xff] %v3724_v48  ;;  %v3726_v46 = vld [vmem:[#allocation2 + $0x158] sm:$0xff] }
 0x1f8   : > { %4490 = vst [vmem:[#allocation14_spill] sm:$0xff] %v3726_v46  ;;  %v3739_v18 = vld [vmem:[#allocation2 + $0x198] sm:$0xff] }
 0x1f9   : > { %v1808_v24 = vadd.f32 %v1807_v16, %v3652_v11  ;;  %v1829_v36 = vadd.f32 %v1828_v20, %v3657_v15  ;;  %v3708_v20 = vld [vmem:[#allocation2 + $0x130] sm:$0xff]  ;;  %v1870_v61 = vadd.f32 %v1869_v38, %v3710_v21  ;;  %4493 = vst [vmem:[#allocation17_spill] sm:$0xff] %v3739_v18 }
 0x1fa   : > { %4487 = vst [vmem:[#allocation11_spill] sm:$0xff] %v3708_v20 }
 0x1fb   : > { %v1809_v44 = vadd.f32 %v1808_v24, %v3664_v19  ;;  %v1830_v53 = vadd.f32 %v1829_v36, %v3669_v23  ;;  %v1848_v36 = vadd.f32 %v1847_v12, %v3696_v4 }
 0x1fd   : > { %v1810_v0 = vadd.f32 %v1809_v44, %v3676_v34  ;;  %v1831_v8 = vadd.f32 %v1830_v53, %v3681_v42  ;;  %v1849_v58 = vadd.f32 %v1848_v36, %v3708_v20  ;;  %v3733_v36 = vld [vmem:[#allocation2 + $0x178] sm:$0xff] }
 0x1fe   : > { %4491 = vst [vmem:[#allocation15_spill] sm:$0xff] %v3733_v36 }
 0x1ff   : > { %v1811_v16 = vadd.f32 %v1810_v0, %v3688_v51  ;;  %v1832_v24 = vadd.f32 %v1831_v8, %v3693_v62  ;;  %v1850_v5 = vadd.f32 %v1849_v58, %v3724_v48  ;;  %v3743_v48 = vld [vmem:[#allocation2 + $0x1b0] sm:$0xff] }
 0x201   : > { %v1812_v44 = vadd.f32 %v1811_v16, %v3700_v6  ;;  %v1833_v53 = vadd.f32 %v1832_v24, %v3705_v14  ;;  %v1871_v16 = vadd.f32 %v1870_v61, %v3726_v46  ;;  %v3731_v24 = vld [vmem:[#allocation2 + $0x170] sm:$0xff] }
 0x202   : > { %v1851_v20 = vadd.f32 %v1850_v5, %v3731_v24 }
 0x203   : > { %v1813_v0 = vadd.f32 %v1812_v44, %v3712_v22  ;;  %v1834_v8 = vadd.f32 %v1833_v53, %v3717_v40  ;;  %v1872_v32 = vadd.f32 %v1871_v16, %v3733_v36  ;;  %v3737_v53 = vld [vmem:[#allocation2 + $0x190] sm:$0xff]  ;;  %v3751_v36 = vld [vmem:[#allocation2 + $0x1d8] sm:$0xff] }
 0x204   : > { %4492 = vst [vmem:[#allocation16_spill] sm:$0xff] %v3737_v53  ;;  %v1852_v61 = vadd.f32 %v1851_v20, %v3737_v53  ;;  %v3749_v16 = vld [vmem:[#allocation2 + $0x1d0] sm:$0xff]  ;;  %v3761_v53 = vld [vmem:[#allocation2 + $0x1f8] sm:$0xff] }
 0x205   : > { %v1814_v12 = vrot.slane %v1813_v0, 4  ;;  %v1835_v13 = vrot.slane %v1834_v8, 4  ;;  %4494 = vst [vmem:[#allocation18_spill] sm:$0xff] %v3761_v53 }
 0x206   : > { %v1853_v5 = vadd.f32 %v1852_v61, %v3743_v48 }
 0x207   : > { %v1815_v4 = vadd.f32 %v1814_v12, %v1813_v0  ;;  %v1836_v38 = vadd.f32 %v1835_v13, %v1834_v8  ;;  %v1873_v0 = vadd.f32 %v1872_v32, %v3739_v18  ;;  %v3745_v8 = vld [vmem:[#allocation2 + $0x1b8] sm:$0xff]  ;;  %v3759_v18 = vld [vmem:[#allocation2 + $0x1f0] sm:$0xff] }
 0x208   : > { %v1854_v20 = vadd.f32 %v1853_v5, %v3749_v16 }
 0x209   : > { %v1816_v21 = vrot.slane %v1815_v4, 2  ;;  %v1837_v44 = vrot.slane %v1836_v38, 2  ;;  %v1874_v13 = vadd.f32 %v1873_v0, %v3745_v8 }
 0x20a   : > { %v1855_v61 = vadd.f32 %v1854_v20, %v3759_v18 }
 0x20b   : > { %v1817_v25 = vadd.f32 %v1816_v21, %v1815_v4  ;;  %v1838_v58 = vadd.f32 %v1837_v44, %v1836_v38  ;;  %v1875_v32 = vadd.f32 %v1874_v13, %v3751_v36 }
 0x20c   : > { %v1856_v13 = vrot.slane %v1855_v61, 4 }
 0x20d   : > { %v1818_v12 = vrot.slane %v1817_v25, 1  ;;  %v1839_v46 = vrot.slane %v1838_v58, 1 }
 0x20f   : > { %v1819_v4 = vadd.f32 %v1818_v12, %v1817_v25  ;;  %v1840_v21 = vadd.f32 %v1839_v46, %v1838_v58  ;;  %v1876_v25 = vadd.f32 %v1875_v32, %v3761_v53 }
 0x211   : > { %v3755_v38 = vmul.f32 0.0078125, %v1819_v4  ;;  %v3757_v44 = vmul.f32 0.0078125, %v1840_v21  ;;  %v1877_v4 = vrot.slane %v1876_v25, 4 }
 0x213   : > { %v3767_v46 = vsub.f32 %v3569_v26, %v3755_v38  ;;  %v3771_v58 = vsub.f32 %v3571_v27, %v3757_v44  ;;  %v3775_v0 = vsub.f32 %v3573_v28, %v3755_v38  ;;  %v3779_v12 = vsub.f32 %v3575_v29, %v3757_v44 }
 0x214   : > { %v3783_v5 = vsub.f32 %v3577_v30, %v3755_v38  ;;  %v3787_v26 = vsub.f32 %v3579_v31, %v3757_v44  ;;  %v3791_v27 = vsub.f32 %v3583_v33, %v3755_v38  ;;  %v3795_v28 = vsub.f32 %v3587_v35, %v3757_v44 }
 0x215   : > { %4495 = vst [vmem:[#allocation19_spill] sm:$0xff] %v3767_v46  ;;  %4496 = vst [vmem:[#allocation20_spill] sm:$0xff] %v3771_v58  ;;  %v1952_v29 = vmul.f32 %v3767_v46, %v3767_v46  ;;  %v1953_v30 = vmul.f32 %v3771_v58, %v3771_v58  ;;  %v1956_v31 = vmul.f32 %v3775_v0, %v3775_v0 }
 0x216   : > { %4497 = vst [vmem:[#allocation21_spill] sm:$0xff] %v3775_v0  ;;  %4498 = vst [vmem:[#allocation22_spill] sm:$0xff] %v3779_v12  ;;  %v1957_v21 = vmul.f32 %v3779_v12, %v3779_v12  ;;  %v3807_v33 = vsub.f32 %v3590_v37, %v3755_v38  ;;  %v3811_v35 = vsub.f32 %v3593_v39, %v3757_v44 }
 0x217   : > { %4499 = vst [vmem:[#allocation23_spill] sm:$0xff] %v3783_v5  ;;  %4500 = vst [vmem:[#allocation24_spill] sm:$0xff] %v3787_v26  ;;  %v1960_v20 = vmul.f32 %v3783_v5, %v3783_v5  ;;  %v1961_v32 = vmul.f32 %v3787_v26, %v3787_v26  ;;  %v3819_v58 = vsub.f32 %v3596_v41, %v3755_v38 }
 0x218   : > { %4501 = vst [vmem:[#allocation25_spill] sm:$0xff] %v3811_v35  ;;  %v3823_v12 = vsub.f32 %v3599_v43, %v3757_v44  ;;  %v1857_v37 = vadd.f32 %v1856_v13, %v1855_v61  ;;  %v1878_v0 = vadd.f32 %v1877_v4, %v1876_v25  ;;  %v1964_v39 = vmul.f32 %v3791_v27, %v3791_v27 }
 0x219   : > { %v1965_v46 = vmul.f32 %v3795_v28, %v3795_v28  ;;  %v2016_v5 = vadd.f32 %v1956_v31, %v1952_v29  ;;  %v2037_v53 = vadd.f32 %v1957_v21, %v1953_v30  ;;  %v3831_v26 = vsub.f32 %v3602_v45, %v3755_v38 }
 0x21a   : > { %v3835_v41 = vsub.f32 %v3605_v47, %v3757_v44  ;;  %v1968_v43 = vmul.f32 %v3807_v33, %v3807_v33  ;;  %v1969_v61 = vmul.f32 %v3811_v35, %v3811_v35  ;;  %v3843_v4 = vsub.f32 %v3608_v49, %v3755_v38 }
 0x21b   : > { %4502 = vst [vmem:[#allocation26_spill] sm:$0xff] %v3831_v26  ;;  %v2017_v25 = vadd.f32 %v2016_v5, %v1960_v20  ;;  %v2038_v13 = vadd.f32 %v2037_v53, %v1961_v32  ;;  %v3847_v45 = vsub.f32 %v3610_v50, %v3757_v44  ;;  %v1858_v29 = vrot.slane %v1857_v37, 2 }
 0x21c   : > { %4503 = vst [vmem:[#allocation27_spill] sm:$0xff] %v3835_v41  ;;  %v1879_v30 = vrot.slane %v1878_v0, 2  ;;  %v1972_v47 = vmul.f32 %v3819_v58, %v3819_v58  ;;  %v1973_v31 = vmul.f32 %v3823_v12, %v3823_v12  ;;  %v3855_v53 = vsub.f32 %v3622_v57, %v3755_v38 }
 0x21d   : > { %v2018_v21 = vadd.f32 %v2017_v25, %v1964_v39  ;;  %v2039_v35 = vadd.f32 %v2038_v13, %v1965_v46  ;;  %v3859_v49 = vsub.f32 %v3633_v63, %v3757_v44  ;;  %v1976_v50 = vmul.f32 %v3831_v26, %v3831_v26 }
 0x21e   : > { %v1977_v5 = vmul.f32 %v3835_v41, %v3835_v41  ;;  %v3867_v39 = vsub.f32 %v3640_v3, %v3755_v38  ;;  %v3871_v57 = vsub.f32 %v3645_v7, %v3757_v44  ;;  %v1859_v46 = vadd.f32 %v1858_v29, %v1857_v37 }
 0x21f   : > { %v2019_v20 = vadd.f32 %v2018_v21, %v1968_v43  ;;  %v2040_v32 = vadd.f32 %v2039_v35, %v1969_v61  ;;  %v1880_v25 = vadd.f32 %v1879_v30, %v1878_v0  ;;  %v1980_v63 = vmul.f32 %v3843_v4, %v3843_v4 }
 0x220   : > { %v1981_v13 = vmul.f32 %v3847_v45, %v3847_v45  ;;  %v3879_v35 = vsub.f32 %v3652_v11, %v3755_v38  ;;  %v3883_v3 = vsub.f32 %v3657_v15, %v3757_v44  ;;  %v1984_v7 = vmul.f32 %v3855_v53, %v3855_v53 }
 0x221   : > { %v2020_v26 = vadd.f32 %v2019_v20, %v1972_v47  ;;  %v2041_v41 = vadd.f32 %v2040_v32, %v1973_v31  ;;  %v1985_v0 = vmul.f32 %v3859_v49, %v3859_v49  ;;  %v3891_v61 = vsub.f32 %v3664_v19, %v3755_v38 }
 0x222   : > { %v3895_v11 = vsub.f32 %v3669_v23, %v3757_v44  ;;  %v1860_v29 = vrot.slane %v1859_v46, 1  ;;  %v1881_v30 = vrot.slane %v1880_v25, 1  ;;  %v1988_v15 = vmul.f32 %v3867_v39, %v3867_v39 }
 0x223   : > { %v2021_v37 = vadd.f32 %v2020_v26, %v1976_v50  ;;  %v2042_v43 = vadd.f32 %v2041_v41, %v1977_v5  ;;  %v1989_v47 = vmul.f32 %v3871_v57, %v3871_v57  ;;  %v3903_v26 = vsub.f32 %v3676_v34, %v3755_v38 }
 0x224   : > { %v3907_v19 = vsub.f32 %v3681_v42, %v3757_v44  ;;  %v1992_v23 = vmul.f32 %v3879_v35, %v3879_v35  ;;  %v1993_v41 = vmul.f32 %v3883_v3, %v3883_v3  ;;  %v3915_v20 = vsub.f32 %v3688_v51, %v3755_v38 }
 0x225   : > { %v2022_v31 = vadd.f32 %v2021_v37, %v1980_v63  ;;  %v2043_v21 = vadd.f32 %v2042_v43, %v1981_v13  ;;  %v3919_v34 = vsub.f32 %v3693_v62, %v3757_v44  ;;  %v1861_v32 = vadd.f32 %v1860_v29, %v1859_v46 }
 0x226   : > { %4504 = vst [vmem:[#allocation28_spill] sm:$0xff] %v3915_v20  ;;  %v1882_v63 = vadd.f32 %v1881_v30, %v1880_v25  ;;  %v1996_v42 = vmul.f32 %v3891_v61, %v3891_v61  ;;  %v1997_v13 = vmul.f32 %v3895_v11, %v3895_v11  ;;  %v3931_v51 = vsub.f32 %v3705_v14, %v3757_v44 }
 0x227   : > { %v2023_v50 = vadd.f32 %v2022_v31, %v1984_v7  ;;  %v2044_v5 = vadd.f32 %v2043_v21, %v1985_v0  ;;  %4505 = vst [vmem:[#allocation29_spill] sm:$0xff] %v3919_v34  ;;  %v3927_v7 = vsub.f32 %v3700_v6, %v3755_v38  ;;  %v2000_v62 = vmul.f32 %v3903_v26, %v3903_v26 }
 0x228   : > { %4507 = vst [vmem:[#allocation31_spill] sm:$0xff] %v3931_v51  ;;  %v2001_v46 = vmul.f32 %v3907_v19, %v3907_v19  ;;  %v3939_v29 = vsub.f32 %v3712_v22, %v3755_v38  ;;  %v3943_v6 = vsub.f32 %v3717_v40, %v3757_v44  ;;  %v3945_v30 = vmul.f32 0.0078125, %v1861_v32 }
 0x229   : > { %v2024_v37 = vadd.f32 %v2023_v50, %v1988_v15  ;;  %v2045_v43 = vadd.f32 %v2044_v5, %v1989_v47  ;;  %4506 = vst [vmem:[#allocation30_spill] sm:$0xff] %v3927_v7  ;;  %v3947_v14 = vmul.f32 0.0078125, %v1882_v63  ;;  %v2004_v15 = vmul.f32 %v3915_v20, %v3915_v20 }
 0x22a   : > { %4508 = vst [vmem:[#allocation32_spill] sm:$0xff] %v3939_v29  ;;  %4509 = vst [vmem:[#allocation33_spill] sm:$0xff] %v3943_v6  ;;  %v2005_v47 = vmul.f32 %v3919_v34, %v3919_v34  ;;  %v2008_v22 = vmul.f32 %v3927_v7, %v3927_v7  ;;  %v2009_v38 = vmul.f32 %v3931_v51, %v3931_v51 }
 0x22b   : > { %v2025_v25 = vadd.f32 %v2024_v37, %v1992_v23  ;;  %v2046_v0 = vadd.f32 %v2045_v43, %v1993_v41  ;;  %v3959_v23 = vsub.f32 %v3613_v52, %v3945_v30  ;;  %v3963_v41 = vsub.f32 %v3616_v54, %v3947_v14 }
 0x22c   : > { %v3967_v50 = vsub.f32 %v3618_v55, %v3945_v30  ;;  %v3971_v5 = vsub.f32 %v3620_v56, %v3947_v14  ;;  %v2012_v32 = vmul.f32 %v3939_v29, %v3939_v29  ;;  %v2013_v63 = vmul.f32 %v3943_v6, %v3943_v6 }
 0x22d   : > { %v2026_v31 = vadd.f32 %v2025_v25, %v1996_v42  ;;  %v2047_v21 = vadd.f32 %v2046_v0, %v1997_v13  ;;  %v3979_v54 = vsub.f32 %v3625_v59, %v3945_v30  ;;  %v3983_v55 = vsub.f32 %v3627_v60, %v3947_v14 }
 0x22e   : > { %v3987_v56 = vsub.f32 %v3636_v1, %v3945_v30  ;;  %v3991_v43 = vsub.f32 %v3638_v2, %v3947_v14  ;;  %v1955_v59 = vmul.f32 %v3963_v41, %v3963_v41  ;;  %v1958_v60 = vmul.f32 %v3967_v50, %v3967_v50 }
 0x22f   : > { %v2027_v40 = vadd.f32 %v2026_v31, %v2000_v62  ;;  %v2048_v44 = vadd.f32 %v2047_v21, %v2001_v46  ;;  %v1954_v62 = vmul.f32 %v3959_v23, %v3959_v23  ;;  %v1959_v46 = vmul.f32 %v3971_v5, %v3971_v5 }
 0x230   : > { %v4003_v1 = vsub.f32 %v3648_v9, %v3945_v30  ;;  %v4007_v2 = vsub.f32 %v3650_v10, %v3947_v14  ;;  %v1966_v10 = vmul.f32 %v3987_v56, %v3987_v56 }
 0x231   : > { %v2028_v52 = vadd.f32 %v2027_v40, %v2004_v15  ;;  %v2049_v42 = vadd.f32 %v2048_v44, %v2005_v47  ;;  %v1962_v15 = vmul.f32 %v3979_v54, %v3979_v54  ;;  %v1963_v47 = vmul.f32 %v3983_v55, %v3983_v55 }
 0x232   : > { %v1967_v40 = vmul.f32 %v3991_v43, %v3991_v43  ;;  %v2058_v44 = vadd.f32 %v1958_v60, %v1954_v62  ;;  %v1971_v6 = vmul.f32 %v4007_v2, %v4007_v2  ;;  %v4516_v60 = vld [vmem:[#allocation7_spill] sm:$0xff] }
 0x233   : > { %v2029_v13 = vadd.f32 %v2028_v52, %v2008_v22  ;;  %v2050_v37 = vadd.f32 %v2049_v42, %v2009_v38  ;;  %v4015_v22 = vsub.f32 %v3660_v17, %v3945_v30  ;;  %v4510_v38 = vld [vmem:[#allocation4_spill] sm:$0xff]  ;;  %v4512_v42 = vld [vmem:[#allocation5_spill] sm:$0xff]  ;;  %v4514_v17 = vld [vmem:[#allocation6_spill] sm:$0xff] }
 0x234   : > { %v4019_v9 = vsub.f32 %v4510_v38, %v3947_v14  ;;  %v1970_v38 = vmul.f32 %v4003_v1, %v4003_v1  ;;  %v2059_v29 = vadd.f32 %v2058_v44, %v1962_v15  ;;  %v4520_v44 = vld [vmem:[#allocation9_spill] sm:$0xff] }
 0x235   : > { %v2030_v25 = vadd.f32 %v2029_v13, %v2012_v32  ;;  %v2051_v0 = vadd.f32 %v2050_v37, %v2013_v63  ;;  %v2079_v32 = vadd.f32 %v1959_v46, %v1955_v59  ;;  %v4027_v13 = vsub.f32 %v4512_v42, %v3945_v30 }
 0x236   : > { %4511 = vst [vmem:[#allocation4_spill] sm:$0xff] %v4019_v9  ;;  %v4031_v37 = vsub.f32 %v4514_v17, %v3947_v14  ;;  %v4039_v46 = vsub.f32 %v4516_v60, %v3945_v30  ;;  %v2060_v42 = vadd.f32 %v2059_v29, %v1966_v10  ;;  %v4521_v60 = vld [vmem:[#allocation10_spill] sm:$0xff]  ;;  %v4522_v10 = vld [vmem:[#allocation11_spill] sm:$0xff] }
 0x237   : > { %v2031_v31 = vrot.slane %v2030_v25, 4  ;;  %v2052_v21 = vrot.slane %v2051_v0, 4  ;;  %4513 = vst [vmem:[#allocation5_spill] sm:$0xff] %v4027_v13  ;;  %v2080_v51 = vadd.f32 %v2079_v32, %v1963_v47  ;;  %v4051_v32 = vsub.f32 %v4520_v44, %v3945_v30 }
 0x238   : > { %4515 = vst [vmem:[#allocation6_spill] sm:$0xff] %v4031_v37  ;;  %4517 = vst [vmem:[#allocation7_spill] sm:$0xff] %v4039_v46  ;;  %v4055_v7 = vsub.f32 %v4521_v60, %v3947_v14  ;;  %v1979_v34 = vmul.f32 %v4031_v37, %v4031_v37  ;;  %v2061_v20 = vadd.f32 %v2060_v42, %v1970_v38  ;;  %v4525_v42 = vld [vmem:[#allocation13_spill] sm:$0xff] }
 0x239   : > { %v2032_v63 = vadd.f32 %v2031_v31, %v2030_v25  ;;  %v2053_v52 = vadd.f32 %v2052_v21, %v2051_v0  ;;  %v4518_v25 = vld [vmem:[#allocation8_spill] sm:$0xff]  ;;  %v1974_v31 = vmul.f32 %v4015_v22, %v4015_v22  ;;  %v1975_v21 = vmul.f32 %v4019_v9, %v4019_v9 }
 0x23a   : > { %v4043_v0 = vsub.f32 %v4518_v25, %v3947_v14  ;;  %v2081_v17 = vadd.f32 %v2080_v51, %v1967_v40  ;;  %v1978_v25 = vmul.f32 %v4027_v13, %v4027_v13  ;;  %v4063_v40 = vsub.f32 %v4522_v10, %v3945_v30  ;;  %v4526_v10 = vld [vmem:[#allocation14_spill] sm:$0xff] }
 0x23b   : > { %v2033_v62 = vrot.slane %v2032_v63, 2  ;;  %v2054_v59 = vrot.slane %v2053_v52, 2  ;;  %v2062_v44 = vadd.f32 %v2061_v20, %v1974_v31  ;;  %v4079_v37 = vsub.f32 %v4526_v10, %v3947_v14 }
 0x23c   : > { %4519 = vst [vmem:[#allocation8_spill] sm:$0xff] %v4043_v0  ;;  %v2082_v9 = vadd.f32 %v2081_v17, %v1971_v6  ;;  %v4075_v17 = vsub.f32 %v4525_v42, %v3945_v30  ;;  %v4087_v31 = vsub.f32 %v3731_v24, %v3945_v30  ;;  %v4529_v24 = vld [vmem:[#allocation17_spill] sm:$0xff] }
 0x23d   : > { %v2034_v15 = vadd.f32 %v2033_v62, %v2032_v63  ;;  %v2055_v47 = vadd.f32 %v2054_v59, %v2053_v52  ;;  %v4523_v63 = vld [vmem:[#allocation12_spill] sm:$0xff]  ;;  %v1982_v62 = vmul.f32 %v4039_v46, %v4039_v46  ;;  %v1983_v59 = vmul.f32 %v4043_v0, %v4043_v0 }
 0x23e   : > { %v4067_v52 = vsub.f32 %v4523_v63, %v3947_v14  ;;  %v2083_v60 = vadd.f32 %v2082_v9, %v1975_v21  ;;  %v1986_v63 = vmul.f32 %v4051_v32, %v4051_v32  ;;  %v1987_v46 = vmul.f32 %v4055_v7, %v4055_v7  ;;  %v4527_v21 = vld [vmem:[#allocation15_spill] sm:$0xff] }
 0x23f   : > { %v2035_v29 = vrot.slane %v2034_v15, 1  ;;  %v2056_v51 = vrot.slane %v2055_v47, 1  ;;  %v2063_v13 = vadd.f32 %v2062_v44, %v1978_v25  ;;  %v4528_v44 = vld [vmem:[#allocation16_spill] sm:$0xff]  ;;  %v1995_v10 = vmul.f32 %v4079_v37, %v4079_v37 }
 0x240   : > { %4524 = vst [vmem:[#allocation9_spill] sm:$0xff] %v4067_v52  ;;  %v2084_v0 = vadd.f32 %v2083_v60, %v1979_v34  ;;  %v4099_v60 = vsub.f32 %v4528_v44, %v3945_v30 }
 0x241   : > { %v2036_v38 = vadd.f32 %v2035_v29, %v2034_v15  ;;  %v2057_v6 = vadd.f32 %v2056_v51, %v2055_v47  ;;  %v4091_v15 = vsub.f32 %v4527_v21, %v3947_v14  ;;  %v1990_v47 = vmul.f32 %v4063_v40, %v4063_v40 }
 0x242   : > { %v1991_v29 = vmul.f32 %v4067_v52, %v4067_v52  ;;  %v2064_v51 = vadd.f32 %v2063_v13, %v1982_v62  ;;  %v2085_v42 = vadd.f32 %v2084_v0, %v1983_v59  ;;  %v4111_v13 = vsub.f32 %v3743_v48, %v3945_v30 }
 0x243   : > { %v2100_v20 = vmul.f32 0.0078125, %v2036_v38  ;;  %v2101_v9 = vmul.f32 0.0078125, %v2057_v6  ;;  %v4103_v38 = vsub.f32 %v4529_v24, %v3947_v14  ;;  %v1994_v6 = vmul.f32 %v4075_v17, %v4075_v17 }
 0x244   : > { %v2065_v21 = vadd.f32 %v2064_v51, %v1986_v63  ;;  %v2086_v52 = vadd.f32 %v2085_v42, %v1987_v46  ;;  %4531 = vst [vmem:[#allocation11_spill] sm:$0xff] %v4111_v13  ;;  %v4115_v0 = vsub.f32 %v3745_v8, %v3947_v14  ;;  %v1998_v62 = vmul.f32 %v4087_v31, %v4087_v31 }
 0x245   : > { %v2104_v25 = vadd.f32 1e-05, %v2100_v20  ;;  %v2105_v34 = vadd.f32 1e-05, %v2101_v9  ;;  %4530 = vst [vmem:[#allocation10_spill] sm:$0xff] %v4103_v38  ;;  %v1999_v59 = vmul.f32 %v4091_v15, %v4091_v15  ;;  %v4123_v46 = vsub.f32 %v3749_v16, %v3945_v30 }
 0x246   : > { %4532 = vst [vmem:[#allocation12_spill] sm:$0xff] %v4115_v0  ;;  %v2066_v20 = vadd.f32 %v2065_v21, %v1990_v47  ;;  %v2087_v9 = vadd.f32 %v2086_v52, %v1991_v29  ;;  %v4127_v48 = vsub.f32 %v3751_v36, %v3947_v14  ;;  %v2002_v8 = vmul.f32 %v4099_v60, %v4099_v60  ;;  %v4536_v52 = vld [vmem:[#allocation18_spill] sm:$0xff] }
 0x247   : > { %3196 = vrsqrt.f32 %v2104_v25  ;;  %4533 = vst [vmem:[#allocation13_spill] sm:$0xff] %v4123_v46  ;;  %v2003_v63 = vmul.f32 %v4103_v38, %v4103_v38  ;;  %v4135_v47 = vsub.f32 %v3759_v18, %v3945_v30  ;;  %v4139_v16 = vsub.f32 %v4536_v52, %v3947_v14  ;;  %v4539_v52 = vld [vmem:[#allocation21_spill] sm:$0xff] }
 0x248   : > { %3198 = vrsqrt.f32 %v2105_v34  ;;  %4534 = vst [vmem:[#allocation14_spill] sm:$0xff] %v4127_v48  ;;  %v2067_v51 = vadd.f32 %v2066_v20, %v1994_v6  ;;  %v2088_v42 = vadd.f32 %v2087_v9, %v1995_v10  ;;  %v2006_v36 = vmul.f32 %v4111_v13, %v4111_v13 }
 0x249   : > { %4535 = vst [vmem:[#allocation15_spill] sm:$0xff] %v4135_v47  ;;  %4537 = vst [vmem:[#allocation16_spill] sm:$0xff] %v4139_v16  ;;  %v2007_v29 = vmul.f32 %v4115_v0, %v4115_v0  ;;  %v2010_v44 = vmul.f32 %v4123_v46, %v4123_v46  ;;  %v2011_v24 = vmul.f32 %v4127_v48, %v4127_v48 }
 0x24a   : > { %v2068_v25 = vadd.f32 %v2067_v51, %v1998_v62  ;;  %v2089_v34 = vadd.f32 %v2088_v42, %v1999_v59  ;;  %v2014_v14 = vmul.f32 %v4135_v47, %v4135_v47  ;;  %v2015_v6 = vmul.f32 %v4139_v16, %v4139_v16  ;;  %v4538_v59 = vld [vmem:[#allocation19_spill] sm:$0xff] }
 0x24c   : > { %v2069_v18 = vadd.f32 %v2068_v25, %v2002_v8  ;;  %v2090_v30 = vadd.f32 %v2089_v34, %v2003_v63  ;;  %v4540_v63 = vld [vmem:[#allocation20_spill] sm:$0xff]  ;;  %v4541_v34 = vld [vmem:[#allocation22_spill] sm:$0xff] }
 0x24e   : > { %v2070_v10 = vadd.f32 %v2069_v18, %v2006_v36  ;;  %v2091_v21 = vadd.f32 %v2090_v30, %v2007_v29  ;;  %v4542_v36 = vld [vmem:[#allocation23_spill] sm:$0xff]  ;;  %v4543_v18 = vld [vmem:[#allocation24_spill] sm:$0xff] }
 0x250   : > { %v2071_v51 = vadd.f32 %v2070_v10, %v2010_v44  ;;  %v2092_v42 = vadd.f32 %v2091_v21, %v2011_v24 }
 0x251   : > { %v4153_v20 = vpop.eup %3196 }
 0x252   : > { %v4155_v62 = vpop.eup %3198  ;;  %v2112_v9 = vmul.f32 %v4153_v20, %v4538_v59  ;;  %v2116_v8 = vmul.f32 %v4153_v20, %v4539_v52  ;;  %v2120_v29 = vmul.f32 %v4153_v20, %v4542_v36  ;;  %v2072_v59 = vadd.f32 %v2071_v51, %v2014_v14 }
 0x253   : > { %v2113_v25 = vmul.f32 %v4155_v62, %v4540_v63  ;;  %v2117_v16 = vmul.f32 %v4155_v62, %v4541_v34  ;;  %v2121_v30 = vmul.f32 %v4155_v62, %v4543_v18  ;;  %v2093_v44 = vadd.f32 %v2092_v42, %v2015_v6 }
 0x254   : > { %vm2176_vm0 = vcmp.gt.f32.partialorder %v2112_v9, 0.0  ;;  %v2240_v47 = vmul.f32 0.2, %v2112_v9  ;;  %vm2180_vm2 = vcmp.gt.f32.partialorder %v2116_v8, 0.0  ;;  %v2073_v21 = vrot.slane %v2072_v59, 4 }
 0x255   : > { %vm2177_vm1 = vcmp.gt.f32.partialorder %v2113_v25, 0.0  ;;  %v2241_v24 = vmul.f32 0.2, %v2113_v25  ;;  %vm2181_vm3 = vcmp.gt.f32.partialorder %v2117_v16, 0.0  ;;  %v2094_v52 = vrot.slane %v2093_v44, 4 }
 0x256   : > { %v2304_v10 = vsel %vm2176_vm0, %v2112_v9, %v2240_v47  ;;  %v2244_v63 = vmul.f32 0.2, %v2116_v8  ;;  %v2245_v34 = vmul.f32 0.2, %v2117_v16  ;;  %vm2184_vm4 = vcmp.gt.f32.partialorder %v2120_v29, 0.0 }
 0x257   : > { %v2305_v48 = vsel %vm2177_vm1, %v2113_v25, %v2241_v24  ;;  %vm2185_vm5 = vcmp.gt.f32.partialorder %v2121_v30, 0.0  ;;  %v2074_v46 = vadd.f32 %v2073_v21, %v2072_v59  ;;  %v2095_v0 = vadd.f32 %v2094_v52, %v2093_v44 }
 0x258   : > { %v2880_v36 = vpack.c.bf16 %v2305_v48, %v2304_v10  ;;  %v2308_v18 = vsel %vm2180_vm2, %v2116_v8, %v2244_v63  ;;  %v2309_v13 = vsel %vm2181_vm3, %v2117_v16, %v2245_v34  ;;  %v2248_v38 = vmul.f32 0.2, %v2120_v29  ;;  %v4544_v10 = vld [vmem:[#allocation25_spill] sm:$0xff] }
 0x259   : > { %v2249_v14 = vmul.f32 0.2, %v2121_v30  ;;  %v2124_v6 = vmul.f32 %v4153_v20, %v3791_v27  ;;  %v2075_v47 = vrot.slane %v2074_v46, 2  ;;  %v2096_v9 = vrot.slane %v2095_v0, 2 }
 0x25a   : > { %2560 = vst [vmem:[%s4436_s2] sm:$0xff] %v2880_v36  ;;  %v2882_v51 = vpack.c.bf16 %v2309_v13, %v2308_v18  ;;  %v2125_v42 = vmul.f32 %v4155_v62, %v3795_v28  ;;  %v2312_v48 = vsel %vm2184_vm4, %v2120_v29, %v2248_v38  ;;  %v2128_v13 = vmul.f32 %v4153_v20, %v3807_v33 }
 0x25b   : > { %v2313_v25 = vsel %vm2185_vm5, %v2121_v30, %v2249_v14  ;;  %vm2188_vm6 = vcmp.gt.f32.partialorder %v2124_v6, 0.0  ;;  %v2252_v8 = vmul.f32 0.2, %v2124_v6  ;;  %v2076_v16 = vadd.f32 %v2075_v47, %v2074_v46 }
 0x25c   : > { %v2097_v59 = vadd.f32 %v2096_v9, %v2095_v0  ;;  %2562 = vst [vmem:[%s4436_s2 + $0x10] sm:$0xff] %v2882_v51  ;;  %v2884_v27 = vpack.c.bf16 %v2313_v25, %v2312_v48  ;;  %vm2189_vm7 = vcmp.gt.f32.partialorder %v2125_v42, 0.0  ;;  %v2253_v44 = vmul.f32 0.2, %v2125_v42  ;;  %v4545_v51 = vld [vmem:[#allocation26_spill] sm:$0xff]  ;;  %v4546_v48 = vld [vmem:[#allocation27_spill] sm:$0xff] }
 0x25d   : > { %v2316_v24 = vsel %vm2188_vm6, %v2124_v6, %v2252_v8  ;;  %v2129_v28 = vmul.f32 %v4155_v62, %v4544_v10  ;;  %v2077_v38 = vrot.slane %v2076_v16, 1  ;;  %v2132_v0 = vmul.f32 %v4153_v20, %v3819_v58 }
 0x25e   : > { %v2098_v29 = vrot.slane %v2097_v59, 1  ;;  %2564 = vst [vmem:[%s4436_s2 + $0x20] sm:$0xff] %v2884_v27  ;;  %v2133_v46 = vmul.f32 %v4155_v62, %v3823_v12  ;;  %v2317_v30 = vsel %vm2189_vm7, %v2125_v42, %v2253_v44  ;;  %vm2192_vm8 = vcmp.gt.f32.partialorder %v2128_v13, 0.0 }
 0x25f   : > { %vm2193_vm9 = vcmp.gt.f32.partialorder %v2129_v28, 0.0  ;;  %v2256_v21 = vmul.f32 0.2, %v2128_v13  ;;  %v2078_v33 = vadd.f32 %v2077_v38, %v2076_v16  ;;  %v2886_v63 = vpack.c.bf16 %v2317_v30, %v2316_v24 }
 0x260   : > { %v2099_v52 = vadd.f32 %v2098_v29, %v2097_v59  ;;  %v2257_v34 = vmul.f32 0.2, %v2129_v28  ;;  %vm2196_vm10 = vcmp.gt.f32.partialorder %v2132_v0, 0.0  ;;  %vm2197_vm11 = vcmp.gt.f32.partialorder %v2133_v46, 0.0 }
 0x261   : > { %v2320_v36 = vsel %vm2192_vm8, %v2128_v13, %v2256_v21  ;;  %v2260_v18 = vmul.f32 0.2, %v2132_v0  ;;  %v2102_v14 = vmul.f32 0.0078125, %v2078_v33  ;;  %2566 = vst [vmem:[%s4436_s2 + $0x30] sm:$0xff] %v2886_v63  ;;  %v2261_v12 = vmul.f32 0.2, %v2133_v46 }
 0x262   : > { %v2103_v6 = vmul.f32 0.0078125, %v2099_v52  ;;  %v2321_v58 = vsel %vm2193_vm9, %v2129_v28, %v2257_v34  ;;  %v2136_v42 = vmul.f32 %v4153_v20, %v4545_v51  ;;  %v2137_v25 = vmul.f32 %v4155_v62, %v4546_v48 }
 0x263   : > { %v2888_v47 = vpack.c.bf16 %v2321_v58, %v2320_v36  ;;  %v2324_v9 = vsel %vm2196_vm10, %v2132_v0, %v2260_v18  ;;  %v2106_v8 = vadd.f32 1e-05, %v2102_v14  ;;  %v2325_v59 = vsel %vm2197_vm11, %v2133_v46, %v2261_v12 }
 0x264   : > { %v2107_v16 = vadd.f32 1e-05, %v2103_v6  ;;  %v2140_v27 = vmul.f32 %v4153_v20, %v3843_v4  ;;  %v2890_v44 = vpack.c.bf16 %v2325_v59, %v2324_v9  ;;  %vm2200_vm12 = vcmp.gt.f32.partialorder %v2136_v42, 0.0 }
 0x265   : > { %2568 = vst [vmem:[%s4436_s2 + $0x40] sm:$0xff] %v2888_v47  ;;  %vm2201_vm13 = vcmp.gt.f32.partialorder %v2137_v25, 0.0  ;;  %v2264_v24 = vmul.f32 0.2, %v2136_v42  ;;  %3200 = vrsqrt.f32 %v2106_v8  ;;  %v2265_v13 = vmul.f32 0.2, %v2137_v25 }
 0x266   : > { %v2141_v10 = vmul.f32 %v4155_v62, %v3847_v45  ;;  %vm2204_vm14 = vcmp.gt.f32.partialorder %v2140_v27, 0.0  ;;  %3202 = vrsqrt.f32 %v2107_v16  ;;  %2570 = vst [vmem:[%s4436_s2 + $0x50] sm:$0xff] %v2890_v44  ;;  %v2268_v28 = vmul.f32 0.2, %v2140_v27 }
 0x267   : > { %v2328_v4 = vsel %vm2200_vm12, %v2136_v42, %v2264_v24  ;;  %v2144_v38 = vmul.f32 %v4153_v20, %v3855_v53  ;;  %v2329_v29 = vsel %vm2201_vm13, %v2137_v25, %v2265_v13  ;;  %v2145_v46 = vmul.f32 %v4155_v62, %v3859_v49 }
 0x268   : > { %vm2205_vm15 = vcmp.gt.f32.partialorder %v2141_v10, 0.0  ;;  %v2269_v0 = vmul.f32 0.2, %v2141_v10  ;;  %v2892_v30 = vpack.c.bf16 %v2329_v29, %v2328_v4  ;;  %v2332_v21 = vsel %vm2204_vm14, %v2140_v27, %v2268_v28 }
 0x269   : > { %vm2208_vm0 = vcmp.gt.f32.partialorder %v2144_v38, 0.0  ;;  %v2272_v45 = vmul.f32 0.2, %v2144_v38  ;;  %vm2209_vm1 = vcmp.gt.f32.partialorder %v2145_v46, 0.0  ;;  %v2273_v52 = vmul.f32 0.2, %v2145_v46 }
 0x26a   : > { %v2333_v33 = vsel %vm2205_vm15, %v2141_v10, %v2269_v0  ;;  %v2148_v63 = vmul.f32 %v4153_v20, %v3867_v39  ;;  %2572 = vst [vmem:[%s4436_s2 + $0x60] sm:$0xff] %v2892_v30  ;;  %v2149_v36 = vmul.f32 %v4155_v62, %v3871_v57  ;;  %v2152_v49 = vmul.f32 %v4153_v20, %v3879_v35 }
 0x26b   : > { %v2894_v53 = vpack.c.bf16 %v2333_v33, %v2332_v21  ;;  %v2336_v34 = vsel %vm2208_vm0, %v2144_v38, %v2272_v45  ;;  %v2337_v18 = vsel %vm2209_vm1, %v2145_v46, %v2273_v52  ;;  %v2153_v6 = vmul.f32 %v4155_v62, %v3883_v3 }
 0x26c   : > { %vm2212_vm2 = vcmp.gt.f32.partialorder %v2148_v63, 0.0  ;;  %v2276_v14 = vmul.f32 0.2, %v2148_v63  ;;  %v2896_v39 = vpack.c.bf16 %v2337_v18, %v2336_v34  ;;  %vm2213_vm3 = vcmp.gt.f32.partialorder %v2149_v36, 0.0  ;;  %v4547_v34 = vld [vmem:[#allocation4_spill] sm:$0xff] }
 0x26d   : > { %2574 = vst [vmem:[%s4436_s2 + $0x70] sm:$0xff] %v2894_v53  ;;  %v2277_v58 = vmul.f32 0.2, %v2149_v36  ;;  %vm2216_vm4 = vcmp.gt.f32.partialorder %v2152_v49, 0.0  ;;  %vm2217_vm5 = vcmp.gt.f32.partialorder %v2153_v6, 0.0  ;;  %v4230_v3 = vmul.f32 %v4153_v20, %v3891_v61 }
 0x26e   : > { %v2340_v12 = vsel %vm2212_vm2, %v2148_v63, %v2276_v14  ;;  %v2280_v57 = vmul.f32 0.2, %v2152_v49  ;;  %v2281_v47 = vmul.f32 0.2, %v2153_v6  ;;  %2576 = vst [vmem:[%s4436_s2 + $0x80] sm:$0xff] %v2896_v39  ;;  %v4234_v9 = vmul.f32 %v4155_v62, %v3895_v11 }
 0x26f   : > { %v2341_v35 = vsel %vm2213_vm3, %v2149_v36, %v2277_v58  ;;  %v4238_v51 = vmul.f32 %v4153_v20, %v3903_v26  ;;  %v4240_v42 = vpop.eup %3200  ;;  %v4248_v16 = vmul.f32 %v4155_v62, %v3907_v19  ;;  %v4549_v58 = vld [vmem:[#allocation6_spill] sm:$0xff] }
 0x270   : > { %v2898_v48 = vpack.c.bf16 %v2341_v35, %v2340_v12  ;;  %v4242_v25 = vsel %vm2216_vm4, %v2152_v49, %v2280_v57  ;;  %v4244_v8 = vsel %vm2217_vm5, %v2153_v6, %v2281_v47  ;;  %v4250_v61 = vpop.eup %3202  ;;  %v2114_v11 = vmul.f32 %v4240_v42, %v3959_v23  ;;  %v4548_v49 = vld [vmem:[#allocation5_spill] sm:$0xff] }
 0x271   : > { %v2118_v26 = vmul.f32 %v4240_v42, %v3967_v50  ;;  %v2122_v59 = vmul.f32 %v4240_v42, %v3979_v54  ;;  %v2126_v27 = vmul.f32 %v4240_v42, %v3987_v56  ;;  %v2115_v44 = vmul.f32 %v4250_v61, %v3963_v41 }
 0x272   : > { %v2119_v19 = vmul.f32 %v4250_v61, %v3971_v5  ;;  %v2123_v24 = vmul.f32 %v4250_v61, %v3983_v55  ;;  %v2127_v23 = vmul.f32 %v4250_v61, %v3991_v43  ;;  %2578 = vst [vmem:[%s4436_s2 + $0x90] sm:$0xff] %v2898_v48  ;;  %vm2178_vm6 = vcmp.gt.f32.partialorder %v2114_v11, 0.0  ;;  %v4550_v48 = vld [vmem:[#allocation7_spill] sm:$0xff] }
 0x273   : > { %v2242_v50 = vmul.f32 0.2, %v2114_v11  ;;  %vm2182_vm7 = vcmp.gt.f32.partialorder %v2118_v26, 0.0  ;;  %v2246_v54 = vmul.f32 0.2, %v2118_v26  ;;  %vm2179_vm8 = vcmp.gt.f32.partialorder %v2115_v44, 0.0 }
 0x274   : > { %v2243_v56 = vmul.f32 0.2, %v2115_v44  ;;  %vm2183_vm9 = vcmp.gt.f32.partialorder %v2119_v19, 0.0  ;;  %v2247_v41 = vmul.f32 0.2, %v2119_v19  ;;  %vm2186_vm10 = vcmp.gt.f32.partialorder %v2122_v59, 0.0 }
 0x275   : > { %v2306_v13 = vsel %vm2178_vm6, %v2114_v11, %v2242_v50  ;;  %v2310_v5 = vsel %vm2182_vm7, %v2118_v26, %v2246_v54  ;;  %vm2187_vm11 = vcmp.gt.f32.partialorder %v2123_v24, 0.0  ;;  %v2250_v4 = vmul.f32 0.2, %v2122_v59 }
 0x276   : > { %v2307_v55 = vsel %vm2179_vm8, %v2115_v44, %v2243_v56  ;;  %v2311_v10 = vsel %vm2183_vm9, %v2119_v19, %v2247_v41  ;;  %v2251_v43 = vmul.f32 0.2, %v2123_v24  ;;  %vm2190_vm12 = vcmp.gt.f32.partialorder %v2126_v27, 0.0 }
 0x277   : > { %v2881_v28 = vpack.c.bf16 %v2307_v55, %v2306_v13  ;;  %v2883_v38 = vpack.c.bf16 %v2311_v10, %v2310_v5  ;;  %vm2191_vm13 = vcmp.gt.f32.partialorder %v2127_v23, 0.0  ;;  %v2314_v29 = vsel %vm2186_vm10, %v2122_v59, %v2250_v4 }
 0x278   : > { %v2315_v0 = vsel %vm2187_vm11, %v2123_v24, %v2251_v43  ;;  %v2254_v46 = vmul.f32 0.2, %v2126_v27  ;;  %v2255_v30 = vmul.f32 0.2, %v2127_v23  ;;  %v2130_v45 = vmul.f32 %v4240_v42, %v4003_v1  ;;  %v4551_v24 = vld [vmem:[#allocation8_spill] sm:$0xff]  ;;  %v4552_v43 = vld [vmem:[#allocation9_spill] sm:$0xff] }
 0x279   : > { %2561 = vst [vmem:[%s4436_s2 + $0x8] sm:$0xff] %v2881_v28  ;;  %2563 = vst [vmem:[%s4436_s2 + $0x18] sm:$0xff] %v2883_v38  ;;  %v2885_v21 = vpack.c.bf16 %v2315_v0, %v2314_v29  ;;  %v2131_v33 = vmul.f32 %v4250_v61, %v4007_v2  ;;  %v2134_v52 = vmul.f32 %v4240_v42, %v4015_v22  ;;  %vm2220_vm10 = vcmp.gt.f32.partialorder %v4230_v3, 0.0 }
 0x27a   : > { %v2318_v63 = vsel %vm2190_vm12, %v2126_v27, %v2254_v46  ;;  %v2319_v53 = vsel %vm2191_vm13, %v2127_v23, %v2255_v30  ;;  %v2135_v36 = vmul.f32 %v4250_v61, %v4547_v34  ;;  %v2138_v18 = vmul.f32 %v4240_v42, %v4548_v49 }
 0x27b   : > { %2565 = vst [vmem:[%s4436_s2 + $0x28] sm:$0xff] %v2885_v21  ;;  %v2887_v14 = vpack.c.bf16 %v2319_v53, %v2318_v63  ;;  %vm2194_vm14 = vcmp.gt.f32.partialorder %v2130_v45, 0.0  ;;  %vm2195_vm15 = vcmp.gt.f32.partialorder %v2131_v33, 0.0  ;;  %v2258_v1 = vmul.f32 0.2, %v2130_v45 }
 0x27c   : > { %v2259_v2 = vmul.f32 0.2, %v2131_v33  ;;  %vm2198_vm0 = vcmp.gt.f32.partialorder %v2134_v52, 0.0  ;;  %vm2199_vm1 = vcmp.gt.f32.partialorder %v2135_v36, 0.0  ;;  %v2262_v22 = vmul.f32 0.2, %v2134_v52 }
 0x27d   : > { %2567 = vst [vmem:[%s4436_s2 + $0x38] sm:$0xff] %v2887_v14  ;;  %v2322_v6 = vsel %vm2194_vm14, %v2130_v45, %v2258_v1  ;;  %v2263_v39 = vmul.f32 0.2, %v2135_v36  ;;  %v2139_v12 = vmul.f32 %v4250_v61, %v4549_v58  ;;  %vm2202_vm2 = vcmp.gt.f32.partialorder %v2138_v18, 0.0  ;;  %v4553_v58 = vld [vmem:[#allocation10_spill] sm:$0xff] }
 0x27e   : > { %v2323_v57 = vsel %vm2195_vm15, %v2131_v33, %v2259_v2  ;;  %v2326_v47 = vsel %vm2198_vm0, %v2134_v52, %v2262_v22  ;;  %v2266_v35 = vmul.f32 0.2, %v2138_v18  ;;  %v2142_v11 = vmul.f32 %v4240_v42, %v4550_v48 }
 0x27f   : > { %v2889_v26 = vpack.c.bf16 %v2323_v57, %v2322_v6  ;;  %v2327_v59 = vsel %vm2199_vm1, %v2135_v36, %v2263_v39  ;;  %vm2203_vm3 = vcmp.gt.f32.partialorder %v2139_v12, 0.0  ;;  %v2267_v27 = vmul.f32 0.2, %v2139_v12 }
 0x280   : > { %v2891_v44 = vpack.c.bf16 %v2327_v59, %v2326_v47  ;;  %v2330_v19 = vsel %vm2202_vm2, %v2138_v18, %v2266_v35  ;;  %v2143_v23 = vmul.f32 %v4250_v61, %v4551_v24  ;;  %vm2206_vm4 = vcmp.gt.f32.partialorder %v2142_v11, 0.0 }
 0x281   : > { %2569 = vst [vmem:[%s4436_s2 + $0x48] sm:$0xff] %v2889_v26  ;;  %v2331_v50 = vsel %vm2203_vm3, %v2139_v12, %v2267_v27  ;;  %v2270_v54 = vmul.f32 0.2, %v2142_v11  ;;  %v2146_v56 = vmul.f32 %v4240_v42, %v4051_v32  ;;  %v2147_v41 = vmul.f32 %v4250_v61, %v4055_v7 }
 0x282   : > { %2571 = vst [vmem:[%s4436_s2 + $0x58] sm:$0xff] %v2891_v44  ;;  %v2893_v13 = vpack.c.bf16 %v2331_v50, %v2330_v19  ;;  %vm2207_vm5 = vcmp.gt.f32.partialorder %v2143_v23, 0.0  ;;  %v2271_v5 = vmul.f32 0.2, %v2143_v23  ;;  %v2150_v55 = vmul.f32 %v4240_v42, %v4063_v40 }
 0x283   : > { %v2334_v10 = vsel %vm2206_vm4, %v2142_v11, %v2270_v54  ;;  %vm2210_vm6 = vcmp.gt.f32.partialorder %v2146_v56, 0.0  ;;  %vm2211_vm7 = vcmp.gt.f32.partialorder %v2147_v41, 0.0  ;;  %v2274_v4 = vmul.f32 0.2, %v2146_v56  ;;  %v4555_v11 = vld [vmem:[#allocation29_spill] sm:$0xff] }
 0x284   : > { %2573 = vst [vmem:[%s4436_s2 + $0x68] sm:$0xff] %v2893_v13  ;;  %v2335_v32 = vsel %vm2207_vm5, %v2143_v23, %v2271_v5  ;;  %v2275_v7 = vmul.f32 0.2, %v2147_v41  ;;  %v2151_v28 = vmul.f32 %v4250_v61, %v4552_v43  ;;  %vm2214_vm8 = vcmp.gt.f32.partialorder %v2150_v55, 0.0  ;;  %v4556_v23 = vld [vmem:[#allocation11_spill] sm:$0xff]  ;;  %v4558_v13 = vld [vmem:[#allocation30_spill] sm:$0xff] }
 0x285   : > { %v2895_v38 = vpack.c.bf16 %v2335_v32, %v2334_v10  ;;  %v2338_v29 = vsel %vm2210_vm6, %v2146_v56, %v2274_v4  ;;  %v2278_v0 = vmul.f32 0.2, %v2150_v55  ;;  %v2900_v40 = vpack.c.bf16 %v4244_v8, %v4242_v25  ;;  %v4557_v56 = vld [vmem:[#allocation12_spill] sm:$0xff] }
 0x286   : > { %v2339_v46 = vsel %vm2211_vm7, %v2147_v41, %v2275_v7  ;;  %vm2215_vm9 = vcmp.gt.f32.partialorder %v2151_v28, 0.0  ;;  %v2279_v30 = vmul.f32 0.2, %v2151_v28  ;;  %v2154_v21 = vmul.f32 %v4240_v42, %v4075_v17 }
 0x287   : > { %2575 = vst [vmem:[%s4436_s2 + $0x78] sm:$0xff] %v2895_v38  ;;  %v2897_v45 = vpack.c.bf16 %v2339_v46, %v2338_v29  ;;  %v2342_v33 = vsel %vm2214_vm8, %v2150_v55, %v2278_v0  ;;  %2580 = vst [vmem:[%s4436_s2 + $0xa0] sm:$0xff] %v2900_v40  ;;  %v2155_v52 = vmul.f32 %v4250_v61, %v4079_v37  ;;  %vm2221_vm12 = vcmp.gt.f32.partialorder %v4234_v9, 0.0  ;;  %v4560_v0 = vld [vmem:[#allocation13_spill] sm:$0xff] }
 0x288   : > { %v2343_v25 = vsel %vm2215_vm9, %v2151_v28, %v2279_v30  ;;  %vm2218_vm11 = vcmp.gt.f32.partialorder %v2154_v21, 0.0  ;;  %v2282_v8 = vmul.f32 0.2, %v2154_v21  ;;  %v2284_v53 = vmul.f32 0.2, %v4230_v3  ;;  %v4559_v28 = vld [vmem:[#allocation31_spill] sm:$0xff] }
 0x289   : > { %2577 = vst [vmem:[%s4436_s2 + $0x88] sm:$0xff] %v2897_v45  ;;  %v2899_v17 = vpack.c.bf16 %v2343_v25, %v2342_v33  ;;  %vm2219_vm13 = vcmp.gt.f32.partialorder %v2155_v52, 0.0  ;;  %v2283_v63 = vmul.f32 0.2, %v2155_v52  ;;  %v2285_v36 = vmul.f32 0.2, %v4234_v9 }
 0x28a   : > { %v2346_v34 = vsel %vm2218_vm11, %v2154_v21, %v2282_v8  ;;  %v2158_v37 = vmul.f32 %v4240_v42, %v4087_v31  ;;  %v2159_v49 = vmul.f32 %v4250_v61, %v4091_v15  ;;  %v2348_v14 = vsel %vm2220_vm10, %v4230_v3, %v2284_v53  ;;  %v4561_v21 = vld [vmem:[#allocation14_spill] sm:$0xff]  ;;  %v4562_v33 = vld [vmem:[#allocation32_spill] sm:$0xff] }
 0x28b   : > { %2579 = vst [vmem:[%s4436_s2 + $0x98] sm:$0xff] %v2899_v17  ;;  %v2347_v18 = vsel %vm2219_vm13, %v2155_v52, %v2283_v63  ;;  %vm2224_vm14 = vcmp.gt.f32.partialorder %v4238_v51, 0.0  ;;  %vm2225_vm15 = vcmp.gt.f32.partialorder %v4248_v16, 0.0  ;;  %v2349_v31 = vsel %vm2221_vm12, %v4234_v9, %v2285_v36  ;;  %v4554_v9 = vld [vmem:[#allocation28_spill] sm:$0xff]  ;;  %v4563_v36 = vld [vmem:[#allocation33_spill] sm:$0xff] }
 0x28c   : > { %v2901_v1 = vpack.c.bf16 %v2347_v18, %v2346_v34  ;;  %vm2222_vm0 = vcmp.gt.f32.partialorder %v2158_v37, 0.0  ;;  %vm2223_vm1 = vcmp.gt.f32.partialorder %v2159_v49, 0.0  ;;  %v2902_v15 = vpack.c.bf16 %v2349_v31, %v2348_v14 }
 0x28d   : > { %v2286_v2 = vmul.f32 0.2, %v2158_v37  ;;  %v2287_v22 = vmul.f32 0.2, %v2159_v49  ;;  %v2288_v6 = vmul.f32 0.2, %v4238_v51  ;;  %v2162_v39 = vmul.f32 %v4240_v42, %v4099_v60 }
 0x28e   : > { %2581 = vst [vmem:[%s4436_s2 + $0xa8] sm:$0xff] %v2901_v1  ;;  %v2289_v3 = vmul.f32 0.2, %v4248_v16  ;;  %v2163_v12 = vmul.f32 %v4250_v61, %v4553_v58  ;;  %v2164_v57 = vmul.f32 %v4153_v20, %v4554_v9  ;;  %2582 = vst [vmem:[%s4436_s2 + $0xb0] sm:$0xff] %v2902_v15  ;;  %v2165_v26 = vmul.f32 %v4155_v62, %v4555_v11  ;;  %v4564_v1 = vld [vmem:[#allocation15_spill] sm:$0xff] }
 0x28f   : > { %v2350_v47 = vsel %vm2222_vm0, %v2158_v37, %v2286_v2  ;;  %v2351_v35 = vsel %vm2223_vm1, %v2159_v49, %v2287_v22  ;;  %v2352_v48 = vsel %vm2224_vm14, %v4238_v51, %v2288_v6  ;;  %vm2226_vm2 = vcmp.gt.f32.partialorder %v2162_v39, 0.0  ;;  %v4565_v6 = vld [vmem:[#allocation16_spill] sm:$0xff] }
 0x290   : > { %v2903_v60 = vpack.c.bf16 %v2351_v35, %v2350_v47  ;;  %v2353_v59 = vsel %vm2225_vm15, %v4248_v16, %v2289_v3  ;;  %vm2227_vm3 = vcmp.gt.f32.partialorder %v2163_v12, 0.0  ;;  %v2290_v44 = vmul.f32 0.2, %v2162_v39 }
 0x291   : > { %v2904_v27 = vpack.c.bf16 %v2353_v59, %v2352_v48  ;;  %v2291_v19 = vmul.f32 0.2, %v2163_v12  ;;  %vm2228_vm4 = vcmp.gt.f32.partialorder %v2164_v57, 0.0  ;;  %vm2229_vm5 = vcmp.gt.f32.partialorder %v2165_v26, 0.0 }
 0x292   : > { %2583 = vst [vmem:[%s4436_s2 + $0xb8] sm:$0xff] %v2903_v60  ;;  %v2292_v51 = vmul.f32 0.2, %v2164_v57  ;;  %v2293_v24 = vmul.f32 0.2, %v2165_v26  ;;  %v2166_v50 = vmul.f32 %v4240_v42, %v4556_v23  ;;  %v2354_v16 = vsel %vm2226_vm2, %v2162_v39, %v2290_v44 }
 0x293   : > { %2584 = vst [vmem:[%s4436_s2 + $0xc0] sm:$0xff] %v2904_v27  ;;  %v2355_v54 = vsel %vm2227_vm3, %v2163_v12, %v2291_v19  ;;  %v2167_v41 = vmul.f32 %v4250_v61, %v4557_v56  ;;  %v2168_v5 = vmul.f32 %v4153_v20, %v4558_v13  ;;  %v2169_v38 = vmul.f32 %v4155_v62, %v4559_v28 }
 0x294   : > { %v2905_v55 = vpack.c.bf16 %v2355_v54, %v2354_v16  ;;  %v2356_v10 = vsel %vm2228_vm4, %v2164_v57, %v2292_v51  ;;  %v2357_v4 = vsel %vm2229_vm5, %v2165_v26, %v2293_v24  ;;  %vm2230_vm6 = vcmp.gt.f32.partialorder %v2166_v50, 0.0 }
 0x295   : > { %v2906_v32 = vpack.c.bf16 %v2357_v4, %v2356_v10  ;;  %vm2231_vm7 = vcmp.gt.f32.partialorder %v2167_v41, 0.0  ;;  %v2294_v7 = vmul.f32 0.2, %v2166_v50  ;;  %v2295_v43 = vmul.f32 0.2, %v2167_v41 }
 0x296   : > { %2585 = vst [vmem:[%s4436_s2 + $0xc8] sm:$0xff] %v2905_v55  ;;  %vm2232_vm8 = vcmp.gt.f32.partialorder %v2168_v5, 0.0  ;;  %v2296_v29 = vmul.f32 0.2, %v2168_v5  ;;  %v2170_v40 = vmul.f32 %v4240_v42, %v4560_v0  ;;  %v2171_v45 = vmul.f32 %v4250_v61, %v4561_v21 }
 0x297   : > { %2586 = vst [vmem:[%s4436_s2 + $0xd0] sm:$0xff] %v2906_v32  ;;  %v2358_v46 = vsel %vm2230_vm6, %v2166_v50, %v2294_v7  ;;  %v2359_v30 = vsel %vm2231_vm7, %v2167_v41, %v2295_v43  ;;  %v2172_v52 = vmul.f32 %v4153_v20, %v4562_v33  ;;  %vm2233_vm9 = vcmp.gt.f32.partialorder %v2169_v38, 0.0 }
 0x298   : > { %v2907_v25 = vpack.c.bf16 %v2359_v30, %v2358_v46  ;;  %v2297_v8 = vmul.f32 0.2, %v2169_v38  ;;  %v2360_v17 = vsel %vm2232_vm8, %v2168_v5, %v2296_v29  ;;  %vm2234_vm10 = vcmp.gt.f32.partialorder %v2170_v40, 0.0 }
 0x299   : > { %vm2235_vm11 = vcmp.gt.f32.partialorder %v2171_v45, 0.0  ;;  %v2298_v63 = vmul.f32 0.2, %v2170_v40  ;;  %v2299_v53 = vmul.f32 0.2, %v2171_v45  ;;  %v2173_v37 = vmul.f32 %v4155_v62, %v4563_v36 }
 0x29a   : > { %2587 = vst [vmem:[%s4436_s2 + $0xd8] sm:$0xff] %v2907_v25  ;;  %v2361_v34 = vsel %vm2233_vm9, %v2169_v38, %v2297_v8  ;;  %vm2236_vm12 = vcmp.gt.f32.partialorder %v2172_v52, 0.0  ;;  %v2300_v49 = vmul.f32 0.2, %v2172_v52  ;;  %v2174_v31 = vmul.f32 %v4240_v42, %v4564_v1 }
 0x29b   : > { %v2908_v18 = vpack.c.bf16 %v2361_v34, %v2360_v17  ;;  %v2362_v20 = vsel %vm2234_vm10, %v2170_v40, %v2298_v63  ;;  %v2363_v14 = vsel %vm2235_vm11, %v2171_v45, %v2299_v53  ;;  %vm2237_vm13 = vcmp.gt.f32.partialorder %v2173_v37, 0.0 }
 0x29c   : > { %v2909_v15 = vpack.c.bf16 %v2363_v14, %v2362_v20  ;;  %v2301_v2 = vmul.f32 0.2, %v2173_v37  ;;  %v2364_v22 = vsel %vm2236_vm12, %v2172_v52, %v2300_v49  ;;  %v2175_v3 = vmul.f32 %v4250_v61, %v4565_v6 }
 0x29d   : > { %2588 = vst [vmem:[%s4436_s2 + $0xe0] sm:$0xff] %v2908_v18  ;;  %vm2238_vm14 = vcmp.gt.f32.partialorder %v2174_v31, 0.0  ;;  %v2302_v62 = vmul.f32 0.2, %v2174_v31 }
 0x29e   : > { %2589 = vst [vmem:[%s4436_s2 + $0xe8] sm:$0xff] %v2909_v15  ;;  %v2365_v39 = vsel %vm2237_vm13, %v2173_v37, %v2301_v2  ;;  %vm2239_vm15 = vcmp.gt.f32.partialorder %v2175_v3, 0.0  ;;  %v2303_v42 = vmul.f32 0.2, %v2175_v3 }
 0x29f   : > { %v2910_v58 = vpack.c.bf16 %v2365_v39, %v2364_v22  ;;  %v2366_v12 = vsel %vm2238_vm14, %v2174_v31, %v2302_v62 }
 0x2a0   : > { %v2367_v9 = vsel %vm2239_vm15, %v2175_v3, %v2303_v42 }
 0x2a1   : > { %2590 = vst [vmem:[%s4436_s2 + $0xf0] sm:$0xff] %v2910_v58  ;;  %v2911_v57 = vpack.c.bf16 %v2367_v9, %v2366_v12 }
 0x2a3   : > { %2591 = vst [vmem:[%s4436_s2 + $0xf8] sm:$0xff] %v2911_v57 }
 0x2a4 PF: > { %s12_s13 = sadd.s32 1, %s3242_s13   ;;  %s4566_s9 = smov %s3230_s10 }
 0x2a5   : > { %p9_p12 = scmp.ge.s32.totalorder %s12_s13, 8   ;;  %s4567_s10 = smov %s3296_s17 }
 0x2a6   : > { %s4568_s11 = smov %s3238_s12  ;;  %s4569_s12 = smov %s4571_s14 }
 0x2a7   :  { %11 = sbr.rel (!%p9_p12) target bundleno = 3 (0x3), region = 106 }

// kernel: image_down_forward.7
= control target key start
LH: loop header
LB: loop body
LE: loop exit
PB: predicated region body
PF: predicated region fallthrough
CT: control target
= control target key end

     0   :  { %7 = vsyncpa [#allocation5], 0  ;;  %s1001_s9 = smov 0   ;;  %s1003_s10 = smov 0   ;;  %s1131_s0 = inlined_call_operand.vmem [shape: bf16[32,4608], index: 0, kind: input, shape index: {}]   ;;  %s1132_s1 = inlined_call_operand.vmem [shape: bf16[4608,128], index: 1, kind: input, shape index: {}]   ;;  %s1133_s2 = inlined_call_operand.hbm [shape: f32[32,128], index: 2, kind: output, shape index: {}]  }
   0x1   :  { %s1005_s11 = smov 0   ;;  %s1007_s12 = smov 0  }
   0x2   :  { %s1009_s13 = smov 0  }
   0x3 LB: > { %s717_s14 = sadd.s32 4294967295, %s980_s13   ;;  %s22_s15 = sadd.s32 1, %s976_s12  ;;  %s980_s13 = sphi %s1009_s13, %s13_s13   ;;  %s976_s12 = sphi %s1007_s12, %s1138_s12   ;;  %s972_s11 = sphi %s1005_s11, %s1137_s11   ;;  %s968_s10 = sphi %s1003_s10, %s1136_s10   ;;  %s964_s9 = sphi %s1001_s9, %s1135_s9  }
   0x4   : > { %p23_p0 = scmp.ge.s32.totalorder %s22_s15, 12  ;;  %p41_p1 = scmp.ne.s32.totalorder %s968_s10, %s964_s9 }
   0x5   : > { %p42_p2 = scmp.eq.s32.totalorder %s980_s13, 0  ;;  %s34_s17 = sadd.s32 1, %s968_s10 }
   0x6   : > { %s1140_s15 = smov (%p23_p0, %s22_s15), 0  ;;  %p719_p5 = scmp.ge.s32.totalorder %s980_s13, 12 }
   0x7   : > { %p43_p3 = por %p42_p2, %p41_p1  ;;  %s30_s16 = ssub.s32 %s976_s12, %s1140_s15 }
   0x8   : > { %p32_p4 = scmp.eq.s32.totalorder %s30_s16, 0  ;;  %119 = sbr.rel (%p719_p5) target bundleno = 24 (0x18), region = 16 }
   0xa   : > { %s1037_s18 = scalar_select %p32_p4, %s968_s10, %s34_s17  }
   0xf   : > { %122 = sbr.rel (!%p43_p3) target bundleno = 24 (0x18), region = 20  ;;  %s124_s19 = sand.u32 (%p43_p3), 1, %s968_s10  }
  0x10   : > { %s767_s20 = smul.u32 (%p43_p3), 12, %s976_s12 }
  0x11   : > { %s826_s21 = smul.u32 (%p43_p3), 48, %s124_s19 }
  0x12   : > { %s132_s24 = scalar_lea.vmem (%p43_p3), %s1131_s0, %s767_s20 }
  0x13   : > { %v147_v0 = vld [vmem:[%s132_s24] sm:$0xff] (%p43_p3)  ;;  %v149_v1 = vld [vmem:[%s132_s24 + $0x90] sm:$0xff] (%p43_p3)  ;;  %s126_s25 = scalar_lea.vmem (%p43_p3), [#allocation3], %s826_s21  ;;  %v721_v4 = vld [vmem:[%s132_s24 + $0x8] sm:$0xf] (%p43_p3) }
  0x14   : > { %v151_v2 = vld [vmem:[%s132_s24 + $0x120] sm:$0xff] (%p43_p3)  ;;  %148 = vst [vmem:[%s126_s25] sm:$0xff] (%p43_p3), %v147_v0  ;;  %150 = vst [vmem:[%s126_s25 + $0xc] sm:$0xff] (%p43_p3), %v149_v1  ;;  %v153_v3 = vld [vmem:[%s132_s24 + $0x1b0] sm:$0xff] (%p43_p3) }
  0x15   : > { %152 = vst [vmem:[%s126_s25 + $0x18] sm:$0xff] (%p43_p3), %v151_v2  ;;  %v723_v5 = vld [vmem:[%s132_s24 + $0x98] sm:$0xf] (%p43_p3)  ;;  %154 = vst [vmem:[%s126_s25 + $0x24] sm:$0xff] (%p43_p3), %v153_v3  ;;  %v725_v6 = vld [vmem:[%s132_s24 + $0x128] sm:$0xf] (%p43_p3) }
  0x16   : > { %722 = vst [vmem:[%s126_s25 + $0x8] sm:$0xf] %v721_v4  ;;  %724 = vst [vmem:[%s126_s25 + $0x14] sm:$0xf] %v723_v5  ;;  %v727_v7 = vld [vmem:[%s132_s24 + $0x1b8] sm:$0xf] }
  0x17   : > { %726 = vst [vmem:[%s126_s25 + $0x20] sm:$0xf] %v725_v6  ;;  %728 = vst [vmem:[%s126_s25 + $0x2c] sm:$0xf] %v727_v7 }
  0x18 PF: > { %p729_p6 = scmp.ge.s32.totalorder %s980_s13, 1  ;;  %p183_p7 = scmp.lt.s32.totalorder %s980_s13, 13 }
  0x1a   : > { %p184_p8 = pnand %p729_p6, %p183_p7 }
  0x1b   : > { %s190_s26 = sand.u32 (!%p184_p8), 1, %s964_s9   ;;  %s213_s27 = smul.u32 (!%p184_p8), 48, %s972_s11 }
  0x1c   : > { %187 = sbr.rel (%p184_p8) target bundleno = 398 (0x18e), region = 50  ;;  %p731_p10 = scmp.ne.s32.totalorder (!%p184_p8), %s972_s11, 0 }
  0x1d   : > { %s827_s28 = smul.u32 (!%p184_p8), 48, %s190_s26  ;;  %p214_p9 = scmp.lt.s32.totalorder (!%p184_p8), %s213_s27, 575 }
  0x1f   : > { %s1054_s5 = scalar_lea.vmem (!%p184_p8), [#allocation3], %s827_s28 }
  0x23   : > { %s1142_s27 = smov (!%p214_p9, %s213_s27), 575  ;;  %224 = sbr.rel (%p731_p10) target bundleno = 42 (0x2a), region = 58 }
  0x24   : > { %s730_s29 = sshll.u32 %s1142_s27, 2  ;;  %v982_v8 = vmov (!%p731_p10), 0.0  }
  0x25   : > { %s1052_s4 = scalar_lea.vmem %s1132_s1, %s730_s29  ;;  %225 = vst [vmem:[#allocation2] sm:$0xff] (!%p731_p10), %v982_v8  ;;  %226 = vst [vmem:[#allocation2 + $0x8] sm:$0xff] (!%p731_p10), %v982_v8 }
  0x26   : > { %227 = vst [vmem:[#allocation2 + $0x10] sm:$0xff] (!%p731_p10), %v982_v8  ;;  %228 = vst [vmem:[#allocation2 + $0x18] sm:$0xff] (!%p731_p10), %v982_v8 }
  0x2a PF: > { %v878_v9 = vld [vmem:[%s1052_s4 + $0x40] sm:$0xff]   ;;  %v881_v12 = vld [vmem:[%s1052_s4 + $0x48] sm:$0xff]   ;;  %v884_v15 = vld [vmem:[%s1052_s4 + $0x50] sm:$0xff]   ;;  %p762_p11 = scmp.ne.s32.totalorder %s972_s11, 11 }
  0x2b   : > { %v879_v10 = vld [vmem:[%s1052_s4] sm:$0xff]   ;;  %768 = vmatprep.subr.bf16.mxu0 %v878_v9  ;;  %v882_v13 = vld [vmem:[%s1052_s4 + $0x8] sm:$0xff]   ;;  %v885_v16 = vld [vmem:[%s1052_s4 + $0x10] sm:$0xff]  }
  0x2c   : > { %v880_v11 = vld [vmem:[%s1052_s4 + $0x80] sm:$0xff]   ;;  %769 = vmatpush3.bf16.msra.mxu0 %v879_v10  ;;  %v883_v14 = vld [vmem:[%s1052_s4 + $0x88] sm:$0xff]   ;;  %v886_v17 = vld [vmem:[%s1052_s4 + $0x90] sm:$0xff]  }
  0x2d   : > { %806 = vmatprep.subr.bf16.mxu1 %v880_v11  ;;  %770 = vmatprep.subr.bf16.mxu0 %v881_v12  ;;  %v887_v18 = vld [vmem:[%s1052_s4 + $0x58] sm:$0xff]   ;;  %v890_v21 = vld [vmem:[%s1052_s4 + $0x60] sm:$0xff]   ;;  %v893_v24 = vld [vmem:[%s1052_s4 + $0x68] sm:$0xff]  }
  0x2e   : > { %807 = vmatpush3.bf16.msra.mxu1 %v880_v11  ;;  %v888_v19 = vld [vmem:[%s1052_s4 + $0x18] sm:$0xff]   ;;  %v892_v22 = vld [vmem:[%s1052_s4 + $0xa0] sm:$0xff]   ;;  %v895_v25 = vld [vmem:[%s1052_s4 + $0xa8] sm:$0xff]  }
  0x2f   : > { %808 = vmatprep.subr.bf16.mxu1 %v883_v14  ;;  %v889_v20 = vld [vmem:[%s1052_s4 + $0x98] sm:$0xff]   ;;  %v891_v23 = vld [vmem:[%s1052_s4 + $0x20] sm:$0xff]   ;;  %v894_v26 = vld [vmem:[%s1052_s4 + $0x28] sm:$0xff]  }
  0x30   : > { %771 = vmatpush3.bf16.msra.mxu0 %v882_v13  ;;  %v896_v27 = vld [vmem:[%s1052_s4 + $0x70] sm:$0xff]   ;;  %v899_v30 = vld [vmem:[%s1052_s4 + $0x78] sm:$0xff]   ;;  %v229_v45 = vld [vmem:[#allocation2] sm:$0xff] }
  0x31   : > { %772 = vmatprep.subr.bf16.mxu0 %v884_v15  ;;  %v897_v28 = vld [vmem:[%s1052_s4 + $0x30] sm:$0xff]   ;;  %v901_v31 = vld [vmem:[%s1052_s4 + $0xb8] sm:$0xff]   ;;  %v230_v50 = vld [vmem:[#allocation2 + $0x8] sm:$0xff] }
  0x32   : > { %809 = vmatpush3.bf16.msra.mxu1 %v883_v14  ;;  %v898_v29 = vld [vmem:[%s1052_s4 + $0xb0] sm:$0xff]   ;;  %v900_v34 = vld [vmem:[%s1052_s4 + $0x38] sm:$0xff]  }
  0x33   : > { %810 = vmatprep.subr.bf16.mxu1 %v886_v17  ;;  %v904_v32 = vld [vmem:[%s1054_s5 + $0x4] ss:$12 sps:$4 sm:$0xff]   ;;  %v905_v33 = vld [vmem:[%s1054_s5 + $0x8] ss:$12 sps:$4 sm:$0xff]   ;;  %v902_v35 = vld [vmem:[%s1054_s5] ss:$12 sps:$4 sm:$0xff]  }
  0x34   : > { %773 = vmatpush3.bf16.msra.mxu0 %v885_v16  ;;  %497 = vmatprep.mubr.bf16.mxu0 %v904_v32  ;;  %v907_v36 = vld [vmem:[%s1054_s5 + $0x1c] ss:$12 sps:$4 sm:$0xff]   ;;  %v906_v37 = vld [vmem:[%s1054_s5 + $0x20] ss:$12 sps:$4 sm:$0xff]   ;;  %v909_v38 = vld [vmem:[%s1054_s5 + $0x18] ss:$12 sps:$4 sm:$0xff]  }
  0x35   : > { %774 = vmatprep.subr.bf16.mxu0 %v887_v18  ;;  %822 = vmatprep.mubr.bf16.mxu1 %v905_v33  ;;  %v231_v59 = vld [vmem:[#allocation2 + $0x10] sm:$0xff]  ;;  %v232_v63 = vld [vmem:[#allocation2 + $0x18] sm:$0xff] }
  0x36   : > { %811 = vmatpush3.bf16.msra.mxu1 %v886_v17 }
  0x37   : > { %812 = vmatprep.subr.bf16.mxu1 %v889_v20 }
  0x38   : > { %775 = vmatpush3.bf16.msra.mxu0 %v888_v19 }
  0x39   : > { %776 = vmatprep.subr.bf16.mxu0 %v890_v21 }
  0x3a   : > { %813 = vmatpush3.bf16.msra.mxu1 %v889_v20 }
  0x3b   : > { %814 = vmatprep.subr.bf16.mxu1 %v892_v22 }
  0x3c   : > { %777 = vmatpush3.bf16.msra.mxu0 %v891_v23 }
  0x3d   : > { %778 = vmatprep.subr.bf16.mxu0 %v893_v24 }
  0x3e   : > { %815 = vmatpush3.bf16.msra.mxu1 %v892_v22 }
  0x3f   : > { %816 = vmatprep.subr.bf16.mxu1 %v895_v25 }
  0x40   : > { %779 = vmatpush3.bf16.msra.mxu0 %v894_v26 }
  0x41   : > { %780 = vmatprep.subr.bf16.mxu0 %v896_v27 }
  0x42   : > { %817 = vmatpush3.bf16.msra.mxu1 %v895_v25 }
  0x43   : > { %818 = vmatprep.subr.bf16.mxu1 %v898_v29 }
  0x44   : > { %781 = vmatpush3.bf16.msra.mxu0 %v897_v28 }
  0x45   : > { %782 = vmatprep.subr.bf16.mxu0 %v899_v30 }
  0x46   : > { %819 = vmatpush3.bf16.msra.mxu1 %v898_v29 }
  0x47   : > { %820 = vmatprep.subr.bf16.mxu1 %v901_v31 }
  0x48   : > { %783 = vmatpush3.bf16.msra.mxu0 %v900_v34 }
  0x4a   : > { %821 = vmatpush3.bf16.msra.mxu1 %v901_v31 }
  0x4b   : > { %498 = vmatmul.mubr.bf16.vlgmr.msra.gmra.mrb[0].mxu0 %v902_v35 }
  0x4c   : > { %505 = vmatprep.mubr.bf16.mxu0 %v907_v36 }
  0x4d   : > { %823 = vmatmul.mubr.bf16.vlgmr.msra.gmra.mrb[0].mxu1 %v906_v37 }
  0x53   : > { %506 = vmatmul.mubr.bf16.gmra.mrb[4].mxu0 %v909_v38 }
 0x11e   : > { %v784_v39 = vpop.f32.mrb[0].mxu0 }
 0x11f   : > { %v785_v40 = vpop.f32.mrb[1].mxu0 }
 0x120   : > { %v786_v41 = vadd.f32 %v785_v40, %v784_v39  ;;  %v787_v42 = vpop.f32.mrb[2].mxu0  ;;  %v824_v43 = vpop.f32.mrb[0].mxu1 }
 0x121   : > { %v788_v44 = vpop.f32.mrb[3].mxu0  ;;  %v548_v46 = vpop.f32.mrb[1].mxu1 }
 0x122   : > { %v789_v47 = vadd.f32 %v788_v44, %v787_v42  ;;  %v549_v48 = vadd.f32 %v786_v41, %v548_v46  ;;  %v825_v49 = vpop.f32.mrb[2].mxu1 }
 0x123   : > { %v551_v51 = vpop.f32.mrb[3].mxu1 }
 0x124   : > { %v563_v52 = vadd.f32 %v549_v48, %v229_v45  ;;  %v552_v53 = vadd.f32 %v789_v47, %v551_v51 }
 0x126   : > { %567 = vst [vmem:[#allocation2] sm:$0xff] %v563_v52  ;;  %v564_v54 = vadd.f32 %v552_v53, %v230_v50  ;;  %v790_v55 = vpop.f32.mrb[4].mxu0 }
 0x127   : > { %v791_v56 = vpop.f32.mrb[5].mxu0 }
 0x128   : > { %568 = vst [vmem:[#allocation2 + $0x8] sm:$0xff] %v564_v54  ;;  %v792_v57 = vadd.f32 %v791_v56, %v790_v55  ;;  %v793_v58 = vpop.f32.mrb[6].mxu0 }
 0x129   : > { %v794_v60 = vpop.f32.mrb[7].mxu0 }
 0x12a   : > { %v557_v61 = vadd.f32 %v824_v43, %v792_v57  ;;  %v795_v62 = vadd.f32 %v794_v60, %v793_v58  ;;  %574 = sbr.rel (%p762_p11) target bundleno = 372 (0x174), region = 62 }
 0x12c   : > { %v565_v0 = vadd.f32 %v557_v61, %v231_v59  ;;  %v560_v1 = vadd.f32 %v825_v49, %v795_v62 }
 0x12d   : > { %v575_v3 = vld [vmem:[#allocation2] sm:$0xff] (!%p762_p11) }
 0x12e   : > { %569 = vst [vmem:[#allocation2 + $0x10] sm:$0xff] %v565_v0  ;;  %v566_v2 = vadd.f32 %v560_v1, %v232_v63 }
 0x12f   : > { %v576_v4 = vld [vmem:[#allocation2 + $0x8] sm:$0xff] (!%p762_p11) }
 0x130   : > { %570 = vst [vmem:[#allocation2 + $0x18] sm:$0xff] %v566_v2  ;;  %v579_v6 = vadd.f32 (!%p762_p11), %v576_v4, %v575_v3 }
 0x135   : > { %v577_v5 = vld [vmem:[#allocation2 + $0x10] sm:$0xff] }
 0x136   : > { %v580_v8 = vadd.f32 %v579_v6, %v577_v5 }
 0x137   : > { %v578_v7 = vld [vmem:[#allocation2 + $0x18] sm:$0xff] }
 0x138   : > { %v581_v9 = vadd.f32 %v580_v8, %v578_v7 }
 0x13a   : > { %v582_v10 = vrot.slane %v581_v9, 4 }
 0x13c   : > { %v583_v11 = vadd.f32 %v582_v10, %v581_v9 }
 0x13e   : > { %v584_v12 = vrot.slane %v583_v11, 2 }
 0x140   : > { %v585_v13 = vadd.f32 %v584_v12, %v583_v11 }
 0x142   : > { %v586_v14 = vrot.slane %v585_v13, 1 }
 0x144   : > { %v587_v15 = vadd.f32 %v586_v14, %v585_v13 }
 0x146   : > { %v589_v16 = vmul.f32 0.03125, %v587_v15 }
 0x148   : > { %v590_v17 = vsub.f32 %v575_v3, %v589_v16  ;;  %v591_v18 = vsub.f32 %v576_v4, %v589_v16  ;;  %v592_v19 = vsub.f32 %v577_v5, %v589_v16  ;;  %v593_v20 = vsub.f32 %v578_v7, %v589_v16 }
 0x14a   : > { %v594_v21 = vmul.f32 %v590_v17, %v590_v17  ;;  %v595_v22 = vmul.f32 %v591_v18, %v591_v18  ;;  %v596_v23 = vmul.f32 %v592_v19, %v592_v19  ;;  %v597_v24 = vmul.f32 %v593_v20, %v593_v20 }
 0x14c   : > { %v598_v25 = vadd.f32 %v595_v22, %v594_v21 }
 0x14e   : > { %v599_v26 = vadd.f32 %v598_v25, %v596_v23 }
 0x150   : > { %v600_v27 = vadd.f32 %v599_v26, %v597_v24 }
 0x152   : > { %v601_v28 = vrot.slane %v600_v27, 4 }
 0x154   : > { %v602_v29 = vadd.f32 %v601_v28, %v600_v27 }
 0x156   : > { %v603_v30 = vrot.slane %v602_v29, 2 }
 0x158   : > { %v604_v31 = vadd.f32 %v603_v30, %v602_v29 }
 0x15a   : > { %v605_v32 = vrot.slane %v604_v31, 1 }
 0x15c   : > { %v606_v33 = vadd.f32 %v605_v32, %v604_v31 }
 0x15e   : > { %v607_v34 = vmul.f32 0.03125, %v606_v33 }
 0x160   : > { %v608_v35 = vadd.f32 1e-05, %v607_v34 }
 0x162   : > { %910 = vrsqrt.f32 %v608_v35 }
 0x16c   : > { %v911_v36 = vpop.eup %910 }
 0x16d   : > { %v610_v37 = vmul.f32 %v911_v36, %v590_v17  ;;  %v611_v38 = vmul.f32 %v911_v36, %v591_v18  ;;  %v612_v39 = vmul.f32 %v911_v36, %v592_v19  ;;  %v613_v40 = vmul.f32 %v911_v36, %v593_v20 }
 0x16f   : > { %vm614_vm0 = vcmp.gt.f32.partialorder %v610_v37, 0.0  ;;  %v618_v41 = vmul.f32 0.2, %v610_v37  ;;  %vm615_vm1 = vcmp.gt.f32.partialorder %v611_v38, 0.0  ;;  %v619_v42 = vmul.f32 0.2, %v611_v38 }
 0x170   : > { %vm616_vm2 = vcmp.gt.f32.partialorder %v612_v39, 0.0  ;;  %v620_v43 = vmul.f32 0.2, %v612_v39  ;;  %vm617_vm3 = vcmp.gt.f32.partialorder %v613_v40, 0.0  ;;  %v621_v44 = vmul.f32 0.2, %v613_v40 }
 0x171   : > { %v622_v45 = vsel %vm614_vm0, %v610_v37, %v618_v41  ;;  %v623_v46 = vsel %vm615_vm1, %v611_v38, %v619_v42 }
 0x172   : > { %626 = vst [vmem:[#allocation4] sm:$0xff] %v622_v45  ;;  %627 = vst [vmem:[#allocation4 + $0x8] sm:$0xff] %v623_v46  ;;  %v624_v47 = vsel %vm616_vm2, %v612_v39, %v620_v43  ;;  %v625_v48 = vsel %vm617_vm3, %v613_v40, %v621_v44 }
 0x173   : > { %628 = vst [vmem:[#allocation4 + $0x10] sm:$0xff] %v624_v47  ;;  %629 = vst [vmem:[#allocation4 + $0x18] sm:$0xff] %v625_v48 }
 0x174 PF: > { %p1090_p12 = scmp.eq.s32.totalorder %s717_s14, 11  ;;  %s983_s7 = smov [#allocation4]  }
 0x175   : > { %s639_s8 = sshll.u32 %s983_s7, 4  ;;  %s640_s8 = int_to_ptr.vmem [resolvable:$true] %s639_s8 }
 0x176   : > { %s912_s9 = scalar_lea.vmem %s640_s8, 512  ;;  %p919_p2 = scmp.lt.s32.totalorder %s640_s8, %s640_s8 }
 0x177   : > { %p913_p13 = scmp.ne.s32.totalorder %s640_s8, %s912_s9  ;;  %p920_p3 = scmp.lt.s32.totalorder %s912_s9, %s912_s9 }
 0x179   : > { %p914_p0 = pnand %p913_p13, %p1090_p12  ;;  %p921_p4 = por %p920_p3, %p919_p2 }
 0x17b   : > { %p915_p1 = pneg %p914_p0 }
 0x17d   : > { %p922_p5 = pnand %p921_p4, %p915_p1 }
 0x17f   : > { %925 = shalt.err (!%p922_p5)
}
 0x180   : > { %s926_s14 = scalar_lea.hbm %s1133_s2, 512 }
 0x181   : > { %p927_p6 = scmp.ne.s32.totalorder %s1133_s2, %s926_s14  ;;  %p932_p9 = scmp.lt.u32.totalorder %s926_s14, %s1133_s2 }
 0x183   : > { %p928_p7 = pnand %p927_p6, %p1090_p12 }
 0x185   : > { %p929_p8 = pneg %p928_p7 }
 0x187   : > { %p934_p10 = pnand %p932_p9, %p929_p8 }
 0x189   : > { %937 = shalt.err (!%p934_p10)
}
 0x18a   : > { %s984_s22 = smov 128   ;;  %s985_s23 = smov 8  }
 0x18b   : > { %829 = dma.vmem_to_hbm [thread:$0]  (%p1090_p12), %s640_s8, 512, %s1133_s2, [#allocation5], %s984_s22, %s984_s22, %s985_s23  }
 0x18c   : > { %959 = dma.done.wait (%p1090_p12), [#allocation5], 512  }
 0x18d   : > { %961 = vsyncadd (%p1090_p12), [#allocation5], 4294966784 }
 0x18e PF: > { %s13_s13 = sadd.s32 1, %s980_s13   ;;  %s1135_s9 = smov %s968_s10 }
 0x18f   : > { %p10_p11 = scmp.ge.s32.totalorder %s13_s13, 14   ;;  %s1136_s10 = smov %s1037_s18 }
 0x190   : > { %s1137_s11 = smov %s976_s12  ;;  %s1138_s12 = smov %s1140_s15 }
 0x191   :  { %12 = sbr.rel (!%p10_p11) target bundleno = 3 (0x3), region = 104 }
 0x198   :  { %655 = vsyncpa [#allocation5], 1 }
 0x199   :  { %657 = vsyncpa [#allocation5 + $0x1], 1 }

</bundles_post_ra>
